<compile_context>
chip_gen: v6e
topology: v6e:2x2x1
jax: 0.10.0
libtpu: 0.0.40
codegen_flags: <defaults>
</compile_context>

<pallas_src>
import functools
import math

import jax
import jax.numpy as jnp
from jax.experimental import pallas as pl
from jax.experimental.pallas import tpu as pltpu


# ----------------------------------------------------------------------------
# Pallas kernel
# ----------------------------------------------------------------------------
def _conv3x3(src, w_ref, b_ref, *, H, W, act):
    """3x3 / stride-1 / pad-1 conv of an un-haloed (H, W, Cin) bf16 value.

    The three kw taps are folded into the contraction dim (K = 3*Cin) and the
    zero padding (== nn.Conv2d(padding=1)) is folded into the concats, so the
    conv is 3 MXU matmuls of (H*W, 3*Cin) @ (3*Cin, Cout), f32 accumulation.
    Returns an f32 (H*W, Cout) result with bias + activation applied.
    """
    c_in = src.shape[-1]
    c_out = w_ref.shape[-1]

    zrow = jnp.zeros((1, W, c_in), src.dtype)
    rows = jnp.concatenate([zrow, src, zrow], axis=0)            # (H+2, W, Cin)
    zcol = jnp.zeros((H + 2, 1, c_in), src.dtype)
    cat = jnp.concatenate(
        [jnp.concatenate([zcol, rows[:, :W - 1, :]], axis=1),    # dx = 0 tap
         rows,                                                   # dx = 1 tap
         jnp.concatenate([rows[:, 1:, :], zcol], axis=1)],       # dx = 2 tap
        axis=-1)                                                 # (H+2, W, 3Cin)

    def tap(dy):
        lhs = cat[dy:dy + H].reshape(H * W, 3 * c_in)            # bf16
        rhs = w_ref[dy].reshape(3 * c_in, c_out)                 # bf16, per-tap
        return jnp.dot(lhs, rhs, preferred_element_type=jnp.float32)

    acc = tap(0)                 # accumulator initialised by the dy=0 matmul
    acc = acc + tap(1)
    acc = acc + tap(2)
    acc = acc + b_ref[...]       # (1, Cout) f32, broadcast over rows
    if act == "relu":
        acc = jnp.maximum(acc, 0.0)
    return acc                                                   # (H*W, Cout)


def _regression_head_kernel(x_ref, w1, b1, w2, b2, w3, b3, w4, b4, wo, bo,
                            o_ref, *, H, W):
    conv = functools.partial(_conv3x3, H=H, W=W)
    to_slab = lambda y: y.reshape(H, W, -1).astype(jnp.bfloat16)

    # conv1..conv4 (+ReLU) then output conv; activations stay in VMEM values.
    y = conv(x_ref[0], w1, b1, act="relu")
    y = conv(to_slab(y), w2, b2, act="relu")
    y = conv(to_slab(y), w3, b3, act="relu")
    y = conv(to_slab(y), w4, b4, act="relu")
    y = conv(to_slab(y), wo, bo, act=None)

    # (H*W, 128-padded cout) f32 lane-dense slab.
    o_ref[...] = y.reshape(1, H * W, y.shape[-1])


# ----------------------------------------------------------------------------
# Wrapper (= RegressionModel.forward)
# ----------------------------------------------------------------------------
def regression_forward(params, x_nchw):
    """RegressionModel.forward: x (B, Cin, H, W) f32 -> (B, H*W*A, 4) f32."""
    x = jnp.transpose(x_nchw, (0, 2, 3, 1)).astype(jnp.bfloat16)   # NHWC bf16
    B, H, W, cin = x.shape
    F = params["w2"].shape[-1]
    cout = params["wo"].shape[-1]
    num_anchors = cout // 4

    # Pad the output conv channels to a full 128-lane block: unmasked output
    # stores + wide MXU N; the pad columns are zero weight/zero bias and are
    # sliced off after the call.
    LANE = 128
    cout_p = ((cout + LANE - 1) // LANE) * LANE
    wo_p = jnp.zeros((3, 3, F, cout_p), params["wo"].dtype)
    wo_p = wo_p.at[..., :cout].set(params["wo"])
    bo_p = jnp.zeros((1, cout_p), params["bo"].dtype)
    bo_p = bo_p.at[:, :cout].set(params["bo"])

    # Weights/biases are constant across the grid: whole-operand VMEM residency,
    # single copy, no per-step pipelining buffers.
    wspec = pl.BlockSpec(memory_space=pltpu.MemorySpace.VMEM)

    kern = functools.partial(_regression_head_kernel, H=H, W=W)
    # TODO(synk): for realistic FPN sizes (F=256, H,W >= 64) add an H-strip grid
    # axis (with a 1-row read halo) so the working set fits v7x's 64 MiB VMEM
    # and stack 2 images/strips per step to lengthen matmul M on v6e/v7x.
    out = pl.pallas_call(
        kern,
        out_shape=jax.ShapeDtypeStruct((B, H * W, cout_p), jnp.float32),
        grid=(B,),
        in_specs=[pl.BlockSpec((1, H, W, cin), lambda b: (b, 0, 0, 0))]
                 + [wspec] * 10,
        out_specs=pl.BlockSpec((1, H * W, cout_p), lambda b: (b, 0, 0)),
        compiler_params=pltpu.CompilerParams(
            dimension_semantics=("parallel",),
            vmem_limit_bytes=64 * 1024 * 1024),
    )(x, params["w1"], params["b1"], params["w2"], params["b2"],
      params["w3"], params["b3"], params["w4"], params["b4"], wo_p, bo_p)

    # torch: permute(0,2,3,1).contiguous().view(B, -1, 4); NHWC => drop the
    # channel pad, then a pure reshape.
    return out[:, :, :cout].reshape(B, H * W * num_anchors, 4)


# ----------------------------------------------------------------------------
# Deterministic parameter construction (HWIO layout, bf16 weights / f32 bias)
# ----------------------------------------------------------------------------
def init_params(key, num_features_in, feature_size=256, num_anchors=9):
    ks = jax.random.split(key, 10)

    def conv_p(kw_key, kb_key, c_in, c_out):
        n = 3 * 3 * c_out
        w = math.sqrt(2.0 / n) * jax.random.normal(
            kw_key, (3, 3, c_in, c_out), jnp.float32)
        b = 0.1 * jax.random.normal(kb_key, (1, c_out), jnp.float32)
        return w.astype(jnp.bfloat16), b

    p = {}
    p["w1"], p["b1"] = conv_p(ks[0], ks[1], num_features_in, feature_size)
    p["w2"], p["b2"] = conv_p(ks[2], ks[3], feature_size, feature_size)
    p["w3"], p["b3"] = conv_p(ks[4], ks[5], feature_size, feature_size)
    p["w4"], p["b4"] = conv_p(ks[6], ks[7], feature_size, feature_size)
    p["wo"], p["bo"] = conv_p(ks[8], ks[9], feature_size, num_anchors * 4)
    return p


# ----------------------------------------------------------------------------
# Pure-JAX reference (same bf16-rounded weights/input, f32 conv math)
# ----------------------------------------------------------------------------
def regression_reference(params, x_nchw):
    x = jnp.transpose(x_nchw, (0, 2, 3, 1)).astype(jnp.bfloat16)
    x = x.astype(jnp.float32)

    def conv(y, w, b, act=None):
        y = jax.lax.conv_general_dilated(
            y, w.astype(jnp.float32), window_strides=(1, 1),
            padding=((1, 1), (1, 1)),
            dimension_numbers=("NHWC", "HWIO", "NHWC"),
            precision=jax.lax.Precision.HIGHEST)
        y = y + b.reshape(1, 1, 1, -1)
        if act == "relu":
            y = jnp.maximum(y, 0.0)
        return y

    y = conv(x, params["w1"], params["b1"], "relu")
    y = conv(y, params["w2"], params["b2"], "relu")
    y = conv(y, params["w3"], params["b3"], "relu")
    y = conv(y, params["w4"], params["b4"], "relu")
    y = conv(y, params["wo"], params["bo"])
    B, H, W, cout = y.shape
    return y.reshape(B, H * W * (cout // 4), 4)


# ----------------------------------------------------------------------------
if __name__ == "__main__":
    key = jax.random.PRNGKey(0)
    kp, kx = jax.random.split(key)

    # Small shapes consistent with the module (feature_size kept lane-friendly).
    B, cin, H, W = 2, 64, 16, 16
    feature_size, num_anchors = 128, 9

    params = init_params(kp, cin, feature_size, num_anchors)
    x = jax.random.normal(kx, (B, cin, H, W), jnp.float32)   # PyTorch NCHW

    fwd = jax.jit(regression_forward)
    out = fwd(params, x)
    jax.block_until_ready(out)

    assert out.shape == (B, H * W * num_anchors, 4), out.shape

    ref = regression_reference(params, x)
    err = float(jnp.max(jnp.abs(out - ref)) / (jnp.max(jnp.abs(ref)) + 1e-6))
    assert err < 5e-2, f"max relative error {err}"

    print("KERNEL_OK")
</pallas_src>

<mosaic_0001>
module attributes {stable_mosaic.version = 11 : i64} {
  func.func @_regression_head_kernel(%arg0: i32, %arg1: memref<1x16x16x64xbf16, #tpu.memory_space<vmem>>, %arg2: memref<3x3x64x128xbf16, #tpu.memory_space<vmem>>, %arg3: memref<1x128xf32, #tpu.memory_space<vmem>>, %arg4: memref<3x3x128x128xbf16, #tpu.memory_space<vmem>>, %arg5: memref<1x128xf32, #tpu.memory_space<vmem>>, %arg6: memref<3x3x128x128xbf16, #tpu.memory_space<vmem>>, %arg7: memref<1x128xf32, #tpu.memory_space<vmem>>, %arg8: memref<3x3x128x128xbf16, #tpu.memory_space<vmem>>, %arg9: memref<1x128xf32, #tpu.memory_space<vmem>>, %arg10: memref<3x3x128x128xbf16, #tpu.memory_space<vmem>>, %arg11: memref<1x128xf32, #tpu.memory_space<vmem>>, %arg12: memref<1x256x128xf32, #tpu.memory_space<vmem>>) attributes {dimension_semantics = [#tpu.dimension_semantics<parallel>], iteration_bounds = array<i64: 2>, scalar_prefetch = 0 : i64, scratch_operands = 0 : i64, tpu.core_type = #tpu.core_type<tc>, window_params = [{transform_indices = @transform_0, window_bounds = array<i64: 1, 16, 16, 64>}, {pipeline_mode = #tpu.pipeline_mode<synchronous>, transform_indices = @transform_1, window_bounds = array<i64: 3, 3, 64, 128>}, {pipeline_mode = #tpu.pipeline_mode<synchronous>, transform_indices = @transform_2, window_bounds = array<i64: 1, 128>}, {pipeline_mode = #tpu.pipeline_mode<synchronous>, transform_indices = @transform_3, window_bounds = array<i64: 3, 3, 128, 128>}, {pipeline_mode = #tpu.pipeline_mode<synchronous>, transform_indices = @transform_4, window_bounds = array<i64: 1, 128>}, {pipeline_mode = #tpu.pipeline_mode<synchronous>, transform_indices = @transform_5, window_bounds = array<i64: 3, 3, 128, 128>}, {pipeline_mode = #tpu.pipeline_mode<synchronous>, transform_indices = @transform_6, window_bounds = array<i64: 1, 128>}, {pipeline_mode = #tpu.pipeline_mode<synchronous>, transform_indices = @transform_7, window_bounds = array<i64: 3, 3, 128, 128>}, {pipeline_mode = #tpu.pipeline_mode<synchronous>, transform_indices = @transform_8, window_bounds = array<i64: 1, 128>}, {pipeline_mode = #tpu.pipeline_mode<synchronous>, transform_indices = @transform_9, window_bounds = array<i64: 3, 3, 128, 128>}, {pipeline_mode = #tpu.pipeline_mode<synchronous>, transform_indices = @transform_10, window_bounds = array<i64: 1, 128>}, {transform_indices = @transform_11, window_bounds = array<i64: 1, 256, 128>}]} {
    %c0 = arith.constant 0 : index
    %c0_0 = arith.constant 0 : index
    %c0_1 = arith.constant 0 : index
    %c0_2 = arith.constant 0 : index
    %0 = vector.load %arg1[%c0, %c0_0, %c0_1, %c0_2] : memref<1x16x16x64xbf16, #tpu.memory_space<vmem>>, vector<1x16x16x64xbf16>
    %1 = vector.shape_cast %0 : vector<1x16x16x64xbf16> to vector<16x16x64xbf16>
    %cst = arith.constant 0.000000e+00 : bf16
    %2 = vector.broadcast %cst : bf16 to vector<1x16x64xbf16>
    %3 = tpu.concatenate %2, %1, %2 in 0 : vector<1x16x64xbf16>, vector<16x16x64xbf16>, vector<1x16x64xbf16> -> vector<18x16x64xbf16>
    %cst_3 = arith.constant 0.000000e+00 : bf16
    %4 = vector.broadcast %cst_3 : bf16 to vector<18x1x64xbf16>
    %5 = vector.extract_strided_slice %3 {offsets = [0, 0, 0], sizes = [18, 15, 64], strides = [1, 1, 1]} : vector<18x16x64xbf16> to vector<18x15x64xbf16>
    %6 = tpu.concatenate %4, %5 in 1 : vector<18x1x64xbf16>, vector<18x15x64xbf16> -> vector<18x16x64xbf16>
    %7 = vector.extract_strided_slice %3 {offsets = [0, 1, 0], sizes = [18, 15, 64], strides = [1, 1, 1]} : vector<18x16x64xbf16> to vector<18x15x64xbf16>
    %8 = tpu.concatenate %7, %4 in 1 : vector<18x15x64xbf16>, vector<18x1x64xbf16> -> vector<18x16x64xbf16>
    %9 = tpu.concatenate %6, %3, %8 in 2 : vector<18x16x64xbf16>, vector<18x16x64xbf16>, vector<18x16x64xbf16> -> vector<18x16x192xbf16>
    %10 = vector.extract_strided_slice %9 {offsets = [0, 0, 0], sizes = [16, 16, 192], strides = [1, 1, 1]} : vector<18x16x192xbf16> to vector<16x16x192xbf16>
    %11 = vector.shape_cast %10 : vector<16x16x192xbf16> to vector<256x192xbf16>
    %c0_4 = arith.constant 0 : index
    %c0_5 = arith.constant 0 : index
    %c0_6 = arith.constant 0 : index
    %c0_7 = arith.constant 0 : index
    %12 = vector.load %arg2[%c0_4, %c0_5, %c0_6, %c0_7] : memref<3x3x64x128xbf16, #tpu.memory_space<vmem>>, vector<1x3x64x128xbf16>
    %13 = vector.shape_cast %12 : vector<1x3x64x128xbf16> to vector<3x64x128xbf16>
    %14 = vector.shape_cast %13 : vector<3x64x128xbf16> to vector<192x128xbf16>
    %cst_8 = arith.constant dense<0.000000e+00> : vector<256x128xf32>
    %15 = tpu.matmul %11, %14, %cst_8 {dimension_numbers = #tpu.dot_dimension_numbers<[1], [0], [0], [1], [0, 0, 1, 1], [], []>} : vector<256x192xbf16>, vector<192x128xbf16>, vector<256x128xf32> -> vector<256x128xf32>
    %16 = vector.extract_strided_slice %9 {offsets = [1, 0, 0], sizes = [16, 16, 192], strides = [1, 1, 1]} : vector<18x16x192xbf16> to vector<16x16x192xbf16>
    %17 = vector.shape_cast %16 : vector<16x16x192xbf16> to vector<256x192xbf16>
    %c1 = arith.constant 1 : index
    %c0_9 = arith.constant 0 : index
    %c0_10 = arith.constant 0 : index
    %c0_11 = arith.constant 0 : index
    %18 = vector.load %arg2[%c1, %c0_9, %c0_10, %c0_11] : memref<3x3x64x128xbf16, #tpu.memory_space<vmem>>, vector<1x3x64x128xbf16>
    %19 = vector.shape_cast %18 : vector<1x3x64x128xbf16> to vector<3x64x128xbf16>
    %20 = vector.shape_cast %19 : vector<3x64x128xbf16> to vector<192x128xbf16>
    %cst_12 = arith.constant dense<0.000000e+00> : vector<256x128xf32>
    %21 = tpu.matmul %17, %20, %cst_12 {dimension_numbers = #tpu.dot_dimension_numbers<[1], [0], [0], [1], [0, 0, 1, 1], [], []>} : vector<256x192xbf16>, vector<192x128xbf16>, vector<256x128xf32> -> vector<256x128xf32>
    %22 = arith.addf %15, %21 : vector<256x128xf32>
    %23 = vector.extract_strided_slice %9 {offsets = [2, 0, 0], sizes = [16, 16, 192], strides = [1, 1, 1]} : vector<18x16x192xbf16> to vector<16x16x192xbf16>
    %24 = vector.shape_cast %23 : vector<16x16x192xbf16> to vector<256x192xbf16>
    %c2 = arith.constant 2 : index
    %c0_13 = arith.constant 0 : index
    %c0_14 = arith.constant 0 : index
    %c0_15 = arith.constant 0 : index
    %25 = vector.load %arg2[%c2, %c0_13, %c0_14, %c0_15] : memref<3x3x64x128xbf16, #tpu.memory_space<vmem>>, vector<1x3x64x128xbf16>
    %26 = vector.shape_cast %25 : vector<1x3x64x128xbf16> to vector<3x64x128xbf16>
    %27 = vector.shape_cast %26 : vector<3x64x128xbf16> to vector<192x128xbf16>
    %cst_16 = arith.constant dense<0.000000e+00> : vector<256x128xf32>
    %28 = tpu.matmul %24, %27, %cst_16 {dimension_numbers = #tpu.dot_dimension_numbers<[1], [0], [0], [1], [0, 0, 1, 1], [], []>} : vector<256x192xbf16>, vector<192x128xbf16>, vector<256x128xf32> -> vector<256x128xf32>
    %29 = arith.addf %22, %28 : vector<256x128xf32>
    %c0_17 = arith.constant 0 : index
    %c0_18 = arith.constant 0 : index
    %30 = vector.load %arg3[%c0_17, %c0_18] : memref<1x128xf32, #tpu.memory_space<vmem>>, vector<1x128xf32>
    %31 = vector.broadcast %30 : vector<1x128xf32> to vector<256x128xf32>
    %32 = arith.addf %29, %31 : vector<256x128xf32>
    %cst_19 = arith.constant 0.000000e+00 : f32
    %33 = vector.broadcast %cst_19 : f32 to vector<256x128xf32>
    %34 = arith.maximumf %32, %33 : vector<256x128xf32>
    %35 = vector.shape_cast %34 : vector<256x128xf32> to vector<16x16x128xf32>
    %36 = arith.truncf %35 : vector<16x16x128xf32> to vector<16x16x128xbf16>
    %cst_20 = arith.constant 0.000000e+00 : bf16
    %37 = vector.broadcast %cst_20 : bf16 to vector<1x16x128xbf16>
    %38 = tpu.concatenate %37, %36, %37 in 0 : vector<1x16x128xbf16>, vector<16x16x128xbf16>, vector<1x16x128xbf16> -> vector<18x16x128xbf16>
    %cst_21 = arith.constant 0.000000e+00 : bf16
    %39 = vector.broadcast %cst_21 : bf16 to vector<18x1x128xbf16>
    %40 = vector.extract_strided_slice %38 {offsets = [0, 0, 0], sizes = [18, 15, 128], strides = [1, 1, 1]} : vector<18x16x128xbf16> to vector<18x15x128xbf16>
    %41 = tpu.concatenate %39, %40 in 1 : vector<18x1x128xbf16>, vector<18x15x128xbf16> -> vector<18x16x128xbf16>
    %42 = vector.extract_strided_slice %38 {offsets = [0, 1, 0], sizes = [18, 15, 128], strides = [1, 1, 1]} : vector<18x16x128xbf16> to vector<18x15x128xbf16>
    %43 = tpu.concatenate %42, %39 in 1 : vector<18x15x128xbf16>, vector<18x1x128xbf16> -> vector<18x16x128xbf16>
    %44 = tpu.concatenate %41, %38, %43 in 2 : vector<18x16x128xbf16>, vector<18x16x128xbf16>, vector<18x16x128xbf16> -> vector<18x16x384xbf16>
    %45 = vector.extract_strided_slice %44 {offsets = [0, 0, 0], sizes = [16, 16, 384], strides = [1, 1, 1]} : vector<18x16x384xbf16> to vector<16x16x384xbf16>
    %46 = vector.shape_cast %45 : vector<16x16x384xbf16> to vector<256x384xbf16>
    %c0_22 = arith.constant 0 : index
    %c0_23 = arith.constant 0 : index
    %c0_24 = arith.constant 0 : index
    %c0_25 = arith.constant 0 : index
    %47 = vector.load %arg4[%c0_22, %c0_23, %c0_24, %c0_25] : memref<3x3x128x128xbf16, #tpu.memory_space<vmem>>, vector<1x3x128x128xbf16>
    %48 = vector.shape_cast %47 : vector<1x3x128x128xbf16> to vector<3x128x128xbf16>
    %49 = vector.shape_cast %48 : vector<3x128x128xbf16> to vector<384x128xbf16>
    %cst_26 = arith.constant dense<0.000000e+00> : vector<256x128xf32>
    %50 = tpu.matmul %46, %49, %cst_26 {dimension_numbers = #tpu.dot_dimension_numbers<[1], [0], [0], [1], [0, 0, 1, 1], [], []>} : vector<256x384xbf16>, vector<384x128xbf16>, vector<256x128xf32> -> vector<256x128xf32>
    %51 = vector.extract_strided_slice %44 {offsets = [1, 0, 0], sizes = [16, 16, 384], strides = [1, 1, 1]} : vector<18x16x384xbf16> to vector<16x16x384xbf16>
    %52 = vector.shape_cast %51 : vector<16x16x384xbf16> to vector<256x384xbf16>
    %c1_27 = arith.constant 1 : index
    %c0_28 = arith.constant 0 : index
    %c0_29 = arith.constant 0 : index
    %c0_30 = arith.constant 0 : index
    %53 = vector.load %arg4[%c1_27, %c0_28, %c0_29, %c0_30] : memref<3x3x128x128xbf16, #tpu.memory_space<vmem>>, vector<1x3x128x128xbf16>
    %54 = vector.shape_cast %53 : vector<1x3x128x128xbf16> to vector<3x128x128xbf16>
    %55 = vector.shape_cast %54 : vector<3x128x128xbf16> to vector<384x128xbf16>
    %cst_31 = arith.constant dense<0.000000e+00> : vector<256x128xf32>
    %56 = tpu.matmul %52, %55, %cst_31 {dimension_numbers = #tpu.dot_dimension_numbers<[1], [0], [0], [1], [0, 0, 1, 1], [], []>} : vector<256x384xbf16>, vector<384x128xbf16>, vector<256x128xf32> -> vector<256x128xf32>
    %57 = arith.addf %50, %56 : vector<256x128xf32>
    %58 = vector.extract_strided_slice %44 {offsets = [2, 0, 0], sizes = [16, 16, 384], strides = [1, 1, 1]} : vector<18x16x384xbf16> to vector<16x16x384xbf16>
    %59 = vector.shape_cast %58 : vector<16x16x384xbf16> to vector<256x384xbf16>
    %c2_32 = arith.constant 2 : index
    %c0_33 = arith.constant 0 : index
    %c0_34 = arith.constant 0 : index
    %c0_35 = arith.constant 0 : index
    %60 = vector.load %arg4[%c2_32, %c0_33, %c0_34, %c0_35] : memref<3x3x128x128xbf16, #tpu.memory_space<vmem>>, vector<1x3x128x128xbf16>
    %61 = vector.shape_cast %60 : vector<1x3x128x128xbf16> to vector<3x128x128xbf16>
    %62 = vector.shape_cast %61 : vector<3x128x128xbf16> to vector<384x128xbf16>
    %cst_36 = arith.constant dense<0.000000e+00> : vector<256x128xf32>
    %63 = tpu.matmul %59, %62, %cst_36 {dimension_numbers = #tpu.dot_dimension_numbers<[1], [0], [0], [1], [0, 0, 1, 1], [], []>} : vector<256x384xbf16>, vector<384x128xbf16>, vector<256x128xf32> -> vector<256x128xf32>
    %64 = arith.addf %57, %63 : vector<256x128xf32>
    %c0_37 = arith.constant 0 : index
    %c0_38 = arith.constant 0 : index
    %65 = vector.load %arg5[%c0_37, %c0_38] : memref<1x128xf32, #tpu.memory_space<vmem>>, vector<1x128xf32>
    %66 = vector.broadcast %65 : vector<1x128xf32> to vector<256x128xf32>
    %67 = arith.addf %64, %66 : vector<256x128xf32>
    %cst_39 = arith.constant 0.000000e+00 : f32
    %68 = vector.broadcast %cst_39 : f32 to vector<256x128xf32>
    %69 = arith.maximumf %67, %68 : vector<256x128xf32>
    %70 = vector.shape_cast %69 : vector<256x128xf32> to vector<16x16x128xf32>
    %71 = arith.truncf %70 : vector<16x16x128xf32> to vector<16x16x128xbf16>
    %cst_40 = arith.constant 0.000000e+00 : bf16
    %72 = vector.broadcast %cst_40 : bf16 to vector<1x16x128xbf16>
    %73 = tpu.concatenate %72, %71, %72 in 0 : vector<1x16x128xbf16>, vector<16x16x128xbf16>, vector<1x16x128xbf16> -> vector<18x16x128xbf16>
    %cst_41 = arith.constant 0.000000e+00 : bf16
    %74 = vector.broadcast %cst_41 : bf16 to vector<18x1x128xbf16>
    %75 = vector.extract_strided_slice %73 {offsets = [0, 0, 0], sizes = [18, 15, 128], strides = [1, 1, 1]} : vector<18x16x128xbf16> to vector<18x15x128xbf16>
    %76 = tpu.concatenate %74, %75 in 1 : vector<18x1x128xbf16>, vector<18x15x128xbf16> -> vector<18x16x128xbf16>
    %77 = vector.extract_strided_slice %73 {offsets = [0, 1, 0], sizes = [18, 15, 128], strides = [1, 1, 1]} : vector<18x16x128xbf16> to vector<18x15x128xbf16>
    %78 = tpu.concatenate %77, %74 in 1 : vector<18x15x128xbf16>, vector<18x1x128xbf16> -> vector<18x16x128xbf16>
    %79 = tpu.concatenate %76, %73, %78 in 2 : vector<18x16x128xbf16>, vector<18x16x128xbf16>, vector<18x16x128xbf16> -> vector<18x16x384xbf16>
    %80 = vector.extract_strided_slice %79 {offsets = [0, 0, 0], sizes = [16, 16, 384], strides = [1, 1, 1]} : vector<18x16x384xbf16> to vector<16x16x384xbf16>
    %81 = vector.shape_cast %80 : vector<16x16x384xbf16> to vector<256x384xbf16>
    %c0_42 = arith.constant 0 : index
    %c0_43 = arith.constant 0 : index
    %c0_44 = arith.constant 0 : index
    %c0_45 = arith.constant 0 : index
    %82 = vector.load %arg6[%c0_42, %c0_43, %c0_44, %c0_45] : memref<3x3x128x128xbf16, #tpu.memory_space<vmem>>, vector<1x3x128x128xbf16>
    %83 = vector.shape_cast %82 : vector<1x3x128x128xbf16> to vector<3x128x128xbf16>
    %84 = vector.shape_cast %83 : vector<3x128x128xbf16> to vector<384x128xbf16>
    %cst_46 = arith.constant dense<0.000000e+00> : vector<256x128xf32>
    %85 = tpu.matmul %81, %84, %cst_46 {dimension_numbers = #tpu.dot_dimension_numbers<[1], [0], [0], [1], [0, 0, 1, 1], [], []>} : vector<256x384xbf16>, vector<384x128xbf16>, vector<256x128xf32> -> vector<256x128xf32>
    %86 = vector.extract_strided_slice %79 {offsets = [1, 0, 0], sizes = [16, 16, 384], strides = [1, 1, 1]} : vector<18x16x384xbf16> to vector<16x16x384xbf16>
    %87 = vector.shape_cast %86 : vector<16x16x384xbf16> to vector<256x384xbf16>
    %c1_47 = arith.constant 1 : index
    %c0_48 = arith.constant 0 : index
    %c0_49 = arith.constant 0 : index
    %c0_50 = arith.constant 0 : index
    %88 = vector.load %arg6[%c1_47, %c0_48, %c0_49, %c0_50] : memref<3x3x128x128xbf16, #tpu.memory_space<vmem>>, vector<1x3x128x128xbf16>
    %89 = vector.shape_cast %88 : vector<1x3x128x128xbf16> to vector<3x128x128xbf16>
    %90 = vector.shape_cast %89 : vector<3x128x128xbf16> to vector<384x128xbf16>
    %cst_51 = arith.constant dense<0.000000e+00> : vector<256x128xf32>
    %91 = tpu.matmul %87, %90, %cst_51 {dimension_numbers = #tpu.dot_dimension_numbers<[1], [0], [0], [1], [0, 0, 1, 1], [], []>} : vector<256x384xbf16>, vector<384x128xbf16>, vector<256x128xf32> -> vector<256x128xf32>
    %92 = arith.addf %85, %91 : vector<256x128xf32>
    %93 = vector.extract_strided_slice %79 {offsets = [2, 0, 0], sizes = [16, 16, 384], strides = [1, 1, 1]} : vector<18x16x384xbf16> to vector<16x16x384xbf16>
    %94 = vector.shape_cast %93 : vector<16x16x384xbf16> to vector<256x384xbf16>
    %c2_52 = arith.constant 2 : index
    %c0_53 = arith.constant 0 : index
    %c0_54 = arith.constant 0 : index
    %c0_55 = arith.constant 0 : index
    %95 = vector.load %arg6[%c2_52, %c0_53, %c0_54, %c0_55] : memref<3x3x128x128xbf16, #tpu.memory_space<vmem>>, vector<1x3x128x128xbf16>
    %96 = vector.shape_cast %95 : vector<1x3x128x128xbf16> to vector<3x128x128xbf16>
    %97 = vector.shape_cast %96 : vector<3x128x128xbf16> to vector<384x128xbf16>
    %cst_56 = arith.constant dense<0.000000e+00> : vector<256x128xf32>
    %98 = tpu.matmul %94, %97, %cst_56 {dimension_numbers = #tpu.dot_dimension_numbers<[1], [0], [0], [1], [0, 0, 1, 1], [], []>} : vector<256x384xbf16>, vector<384x128xbf16>, vector<256x128xf32> -> vector<256x128xf32>
    %99 = arith.addf %92, %98 : vector<256x128xf32>
    %c0_57 = arith.constant 0 : index
    %c0_58 = arith.constant 0 : index
    %100 = vector.load %arg7[%c0_57, %c0_58] : memref<1x128xf32, #tpu.memory_space<vmem>>, vector<1x128xf32>
    %101 = vector.broadcast %100 : vector<1x128xf32> to vector<256x128xf32>
    %102 = arith.addf %99, %101 : vector<256x128xf32>
    %cst_59 = arith.constant 0.000000e+00 : f32
    %103 = vector.broadcast %cst_59 : f32 to vector<256x128xf32>
    %104 = arith.maximumf %102, %103 : vector<256x128xf32>
    %105 = vector.shape_cast %104 : vector<256x128xf32> to vector<16x16x128xf32>
    %106 = arith.truncf %105 : vector<16x16x128xf32> to vector<16x16x128xbf16>
    %cst_60 = arith.constant 0.000000e+00 : bf16
    %107 = vector.broadcast %cst_60 : bf16 to vector<1x16x128xbf16>
    %108 = tpu.concatenate %107, %106, %107 in 0 : vector<1x16x128xbf16>, vector<16x16x128xbf16>, vector<1x16x128xbf16> -> vector<18x16x128xbf16>
    %cst_61 = arith.constant 0.000000e+00 : bf16
    %109 = vector.broadcast %cst_61 : bf16 to vector<18x1x128xbf16>
    %110 = vector.extract_strided_slice %108 {offsets = [0, 0, 0], sizes = [18, 15, 128], strides = [1, 1, 1]} : vector<18x16x128xbf16> to vector<18x15x128xbf16>
    %111 = tpu.concatenate %109, %110 in 1 : vector<18x1x128xbf16>, vector<18x15x128xbf16> -> vector<18x16x128xbf16>
    %112 = vector.extract_strided_slice %108 {offsets = [0, 1, 0], sizes = [18, 15, 128], strides = [1, 1, 1]} : vector<18x16x128xbf16> to vector<18x15x128xbf16>
    %113 = tpu.concatenate %112, %109 in 1 : vector<18x15x128xbf16>, vector<18x1x128xbf16> -> vector<18x16x128xbf16>
    %114 = tpu.concatenate %111, %108, %113 in 2 : vector<18x16x128xbf16>, vector<18x16x128xbf16>, vector<18x16x128xbf16> -> vector<18x16x384xbf16>
    %115 = vector.extract_strided_slice %114 {offsets = [0, 0, 0], sizes = [16, 16, 384], strides = [1, 1, 1]} : vector<18x16x384xbf16> to vector<16x16x384xbf16>
    %116 = vector.shape_cast %115 : vector<16x16x384xbf16> to vector<256x384xbf16>
    %c0_62 = arith.constant 0 : index
    %c0_63 = arith.constant 0 : index
    %c0_64 = arith.constant 0 : index
    %c0_65 = arith.constant 0 : index
    %117 = vector.load %arg8[%c0_62, %c0_63, %c0_64, %c0_65] : memref<3x3x128x128xbf16, #tpu.memory_space<vmem>>, vector<1x3x128x128xbf16>
    %118 = vector.shape_cast %117 : vector<1x3x128x128xbf16> to vector<3x128x128xbf16>
    %119 = vector.shape_cast %118 : vector<3x128x128xbf16> to vector<384x128xbf16>
    %cst_66 = arith.constant dense<0.000000e+00> : vector<256x128xf32>
    %120 = tpu.matmul %116, %119, %cst_66 {dimension_numbers = #tpu.dot_dimension_numbers<[1], [0], [0], [1], [0, 0, 1, 1], [], []>} : vector<256x384xbf16>, vector<384x128xbf16>, vector<256x128xf32> -> vector<256x128xf32>
    %121 = vector.extract_strided_slice %114 {offsets = [1, 0, 0], sizes = [16, 16, 384], strides = [1, 1, 1]} : vector<18x16x384xbf16> to vector<16x16x384xbf16>
    %122 = vector.shape_cast %121 : vector<16x16x384xbf16> to vector<256x384xbf16>
    %c1_67 = arith.constant 1 : index
    %c0_68 = arith.constant 0 : index
    %c0_69 = arith.constant 0 : index
    %c0_70 = arith.constant 0 : index
    %123 = vector.load %arg8[%c1_67, %c0_68, %c0_69, %c0_70] : memref<3x3x128x128xbf16, #tpu.memory_space<vmem>>, vector<1x3x128x128xbf16>
    %124 = vector.shape_cast %123 : vector<1x3x128x128xbf16> to vector<3x128x128xbf16>
    %125 = vector.shape_cast %124 : vector<3x128x128xbf16> to vector<384x128xbf16>
    %cst_71 = arith.constant dense<0.000000e+00> : vector<256x128xf32>
    %126 = tpu.matmul %122, %125, %cst_71 {dimension_numbers = #tpu.dot_dimension_numbers<[1], [0], [0], [1], [0, 0, 1, 1], [], []>} : vector<256x384xbf16>, vector<384x128xbf16>, vector<256x128xf32> -> vector<256x128xf32>
    %127 = arith.addf %120, %126 : vector<256x128xf32>
    %128 = vector.extract_strided_slice %114 {offsets = [2, 0, 0], sizes = [16, 16, 384], strides = [1, 1, 1]} : vector<18x16x384xbf16> to vector<16x16x384xbf16>
    %129 = vector.shape_cast %128 : vector<16x16x384xbf16> to vector<256x384xbf16>
    %c2_72 = arith.constant 2 : index
    %c0_73 = arith.constant 0 : index
    %c0_74 = arith.constant 0 : index
    %c0_75 = arith.constant 0 : index
    %130 = vector.load %arg8[%c2_72, %c0_73, %c0_74, %c0_75] : memref<3x3x128x128xbf16, #tpu.memory_space<vmem>>, vector<1x3x128x128xbf16>
    %131 = vector.shape_cast %130 : vector<1x3x128x128xbf16> to vector<3x128x128xbf16>
    %132 = vector.shape_cast %131 : vector<3x128x128xbf16> to vector<384x128xbf16>
    %cst_76 = arith.constant dense<0.000000e+00> : vector<256x128xf32>
    %133 = tpu.matmul %129, %132, %cst_76 {dimension_numbers = #tpu.dot_dimension_numbers<[1], [0], [0], [1], [0, 0, 1, 1], [], []>} : vector<256x384xbf16>, vector<384x128xbf16>, vector<256x128xf32> -> vector<256x128xf32>
    %134 = arith.addf %127, %133 : vector<256x128xf32>
    %c0_77 = arith.constant 0 : index
    %c0_78 = arith.constant 0 : index
    %135 = vector.load %arg9[%c0_77, %c0_78] : memref<1x128xf32, #tpu.memory_space<vmem>>, vector<1x128xf32>
    %136 = vector.broadcast %135 : vector<1x128xf32> to vector<256x128xf32>
    %137 = arith.addf %134, %136 : vector<256x128xf32>
    %cst_79 = arith.constant 0.000000e+00 : f32
    %138 = vector.broadcast %cst_79 : f32 to vector<256x128xf32>
    %139 = arith.maximumf %137, %138 : vector<256x128xf32>
    %140 = vector.shape_cast %139 : vector<256x128xf32> to vector<16x16x128xf32>
    %141 = arith.truncf %140 : vector<16x16x128xf32> to vector<16x16x128xbf16>
    %cst_80 = arith.constant 0.000000e+00 : bf16
    %142 = vector.broadcast %cst_80 : bf16 to vector<1x16x128xbf16>
    %143 = tpu.concatenate %142, %141, %142 in 0 : vector<1x16x128xbf16>, vector<16x16x128xbf16>, vector<1x16x128xbf16> -> vector<18x16x128xbf16>
    %cst_81 = arith.constant 0.000000e+00 : bf16
    %144 = vector.broadcast %cst_81 : bf16 to vector<18x1x128xbf16>
    %145 = vector.extract_strided_slice %143 {offsets = [0, 0, 0], sizes = [18, 15, 128], strides = [1, 1, 1]} : vector<18x16x128xbf16> to vector<18x15x128xbf16>
    %146 = tpu.concatenate %144, %145 in 1 : vector<18x1x128xbf16>, vector<18x15x128xbf16> -> vector<18x16x128xbf16>
    %147 = vector.extract_strided_slice %143 {offsets = [0, 1, 0], sizes = [18, 15, 128], strides = [1, 1, 1]} : vector<18x16x128xbf16> to vector<18x15x128xbf16>
    %148 = tpu.concatenate %147, %144 in 1 : vector<18x15x128xbf16>, vector<18x1x128xbf16> -> vector<18x16x128xbf16>
    %149 = tpu.concatenate %146, %143, %148 in 2 : vector<18x16x128xbf16>, vector<18x16x128xbf16>, vector<18x16x128xbf16> -> vector<18x16x384xbf16>
    %150 = vector.extract_strided_slice %149 {offsets = [0, 0, 0], sizes = [16, 16, 384], strides = [1, 1, 1]} : vector<18x16x384xbf16> to vector<16x16x384xbf16>
    %151 = vector.shape_cast %150 : vector<16x16x384xbf16> to vector<256x384xbf16>
    %c0_82 = arith.constant 0 : index
    %c0_83 = arith.constant 0 : index
    %c0_84 = arith.constant 0 : index
    %c0_85 = arith.constant 0 : index
    %152 = vector.load %arg10[%c0_82, %c0_83, %c0_84, %c0_85] : memref<3x3x128x128xbf16, #tpu.memory_space<vmem>>, vector<1x3x128x128xbf16>
    %153 = vector.shape_cast %152 : vector<1x3x128x128xbf16> to vector<3x128x128xbf16>
    %154 = vector.shape_cast %153 : vector<3x128x128xbf16> to vector<384x128xbf16>
    %cst_86 = arith.constant dense<0.000000e+00> : vector<256x128xf32>
    %155 = tpu.matmul %151, %154, %cst_86 {dimension_numbers = #tpu.dot_dimension_numbers<[1], [0], [0], [1], [0, 0, 1, 1], [], []>} : vector<256x384xbf16>, vector<384x128xbf16>, vector<256x128xf32> -> vector<256x128xf32>
    %156 = vector.extract_strided_slice %149 {offsets = [1, 0, 0], sizes = [16, 16, 384], strides = [1, 1, 1]} : vector<18x16x384xbf16> to vector<16x16x384xbf16>
    %157 = vector.shape_cast %156 : vector<16x16x384xbf16> to vector<256x384xbf16>
    %c1_87 = arith.constant 1 : index
    %c0_88 = arith.constant 0 : index
    %c0_89 = arith.constant 0 : index
    %c0_90 = arith.constant 0 : index
    %158 = vector.load %arg10[%c1_87, %c0_88, %c0_89, %c0_90] : memref<3x3x128x128xbf16, #tpu.memory_space<vmem>>, vector<1x3x128x128xbf16>
    %159 = vector.shape_cast %158 : vector<1x3x128x128xbf16> to vector<3x128x128xbf16>
    %160 = vector.shape_cast %159 : vector<3x128x128xbf16> to vector<384x128xbf16>
    %cst_91 = arith.constant dense<0.000000e+00> : vector<256x128xf32>
    %161 = tpu.matmul %157, %160, %cst_91 {dimension_numbers = #tpu.dot_dimension_numbers<[1], [0], [0], [1], [0, 0, 1, 1], [], []>} : vector<256x384xbf16>, vector<384x128xbf16>, vector<256x128xf32> -> vector<256x128xf32>
    %162 = arith.addf %155, %161 : vector<256x128xf32>
    %163 = vector.extract_strided_slice %149 {offsets = [2, 0, 0], sizes = [16, 16, 384], strides = [1, 1, 1]} : vector<18x16x384xbf16> to vector<16x16x384xbf16>
    %164 = vector.shape_cast %163 : vector<16x16x384xbf16> to vector<256x384xbf16>
    %c2_92 = arith.constant 2 : index
    %c0_93 = arith.constant 0 : index
    %c0_94 = arith.constant 0 : index
    %c0_95 = arith.constant 0 : index
    %165 = vector.load %arg10[%c2_92, %c0_93, %c0_94, %c0_95] : memref<3x3x128x128xbf16, #tpu.memory_space<vmem>>, vector<1x3x128x128xbf16>
    %166 = vector.shape_cast %165 : vector<1x3x128x128xbf16> to vector<3x128x128xbf16>
    %167 = vector.shape_cast %166 : vector<3x128x128xbf16> to vector<384x128xbf16>
    %cst_96 = arith.constant dense<0.000000e+00> : vector<256x128xf32>
    %168 = tpu.matmul %164, %167, %cst_96 {dimension_numbers = #tpu.dot_dimension_numbers<[1], [0], [0], [1], [0, 0, 1, 1], [], []>} : vector<256x384xbf16>, vector<384x128xbf16>, vector<256x128xf32> -> vector<256x128xf32>
    %169 = arith.addf %162, %168 : vector<256x128xf32>
    %c0_97 = arith.constant 0 : index
    %c0_98 = arith.constant 0 : index
    %170 = vector.load %arg11[%c0_97, %c0_98] : memref<1x128xf32, #tpu.memory_space<vmem>>, vector<1x128xf32>
    %171 = vector.broadcast %170 : vector<1x128xf32> to vector<256x128xf32>
    %172 = arith.addf %169, %171 : vector<256x128xf32>
    %173 = vector.shape_cast %172 : vector<256x128xf32> to vector<1x256x128xf32>
    %c0_99 = arith.constant 0 : index
    %c0_100 = arith.constant 0 : index
    %c0_101 = arith.constant 0 : index
    %174 = vector.load %arg12[%c0_99, %c0_100, %c0_101] : memref<1x256x128xf32, #tpu.memory_space<vmem>>, vector<1x256x128xf32>
    tpu.vector_store %arg12[%c0_99, %c0_100, %c0_101], %173 {strides = array<i32>} : memref<1x256x128xf32, #tpu.memory_space<vmem>>, vector<1x256x128xf32>,
    return
  }
  func.func @transform_0(%arg0: i32) -> (i32, i32, i32, i32) {
    %c0_i32 = arith.constant 0 : i32
    %c0_i32_0 = arith.constant 0 : i32
    %c0_i32_1 = arith.constant 0 : i32
    %c0_i32_2 = arith.constant 0 : i32
    return %arg0, %c0_i32, %c0_i32_0, %c0_i32_1 : i32, i32, i32, i32
  }
  func.func @transform_1(%arg0: i32) -> (i32, i32, i32, i32) {
    %c0_i32 = arith.constant 0 : i32
    %c0_i32_0 = arith.constant 0 : i32
    %c0_i32_1 = arith.constant 0 : i32
    %c0_i32_2 = arith.constant 0 : i32
    %c0_i32_3 = arith.constant 0 : i32
    return %c0_i32, %c0_i32_0, %c0_i32_1, %c0_i32_2 : i32, i32, i32, i32
  }
  func.func @transform_2(%arg0: i32) -> (i32, i32) {
    %c0_i32 = arith.constant 0 : i32
    %c0_i32_0 = arith.constant 0 : i32
    %c0_i32_1 = arith.constant 0 : i32
    return %c0_i32, %c0_i32_0 : i32, i32
  }
  func.func @transform_3(%arg0: i32) -> (i32, i32, i32, i32) {
    %c0_i32 = arith.constant 0 : i32
    %c0_i32_0 = arith.constant 0 : i32
    %c0_i32_1 = arith.constant 0 : i32
    %c0_i32_2 = arith.constant 0 : i32
    %c0_i32_3 = arith.constant 0 : i32
    return %c0_i32, %c0_i32_0, %c0_i32_1, %c0_i32_2 : i32, i32, i32, i32
  }
  func.func @transform_4(%arg0: i32) -> (i32, i32) {
    %c0_i32 = arith.constant 0 : i32
    %c0_i32_0 = arith.constant 0 : i32
    %c0_i32_1 = arith.constant 0 : i32
    return %c0_i32, %c0_i32_0 : i32, i32
  }
  func.func @transform_5(%arg0: i32) -> (i32, i32, i32, i32) {
    %c0_i32 = arith.constant 0 : i32
    %c0_i32_0 = arith.constant 0 : i32
    %c0_i32_1 = arith.constant 0 : i32
    %c0_i32_2 = arith.constant 0 : i32
    %c0_i32_3 = arith.constant 0 : i32
    return %c0_i32, %c0_i32_0, %c0_i32_1, %c0_i32_2 : i32, i32, i32, i32
  }
  func.func @transform_6(%arg0: i32) -> (i32, i32) {
    %c0_i32 = arith.constant 0 : i32
    %c0_i32_0 = arith.constant 0 : i32
    %c0_i32_1 = arith.constant 0 : i32
    return %c0_i32, %c0_i32_0 : i32, i32
  }
  func.func @transform_7(%arg0: i32) -> (i32, i32, i32, i32) {
    %c0_i32 = arith.constant 0 : i32
    %c0_i32_0 = arith.constant 0 : i32
    %c0_i32_1 = arith.constant 0 : i32
    %c0_i32_2 = arith.constant 0 : i32
    %c0_i32_3 = arith.constant 0 : i32
    return %c0_i32, %c0_i32_0, %c0_i32_1, %c0_i32_2 : i32, i32, i32, i32
  }
  func.func @transform_8(%arg0: i32) -> (i32, i32) {
    %c0_i32 = arith.constant 0 : i32
    %c0_i32_0 = arith.constant 0 : i32
    %c0_i32_1 = arith.constant 0 : i32
    return %c0_i32, %c0_i32_0 : i32, i32
  }
  func.func @transform_9(%arg0: i32) -> (i32, i32, i32, i32) {
    %c0_i32 = arith.constant 0 : i32
    %c0_i32_0 = arith.constant 0 : i32
    %c0_i32_1 = arith.constant 0 : i32
    %c0_i32_2 = arith.constant 0 : i32
    %c0_i32_3 = arith.constant 0 : i32
    return %c0_i32, %c0_i32_0, %c0_i32_1, %c0_i32_2 : i32, i32, i32, i32
  }
  func.func @transform_10(%arg0: i32) -> (i32, i32) {
    %c0_i32 = arith.constant 0 : i32
    %c0_i32_0 = arith.constant 0 : i32
    %c0_i32_1 = arith.constant 0 : i32
    return %c0_i32, %c0_i32_0 : i32, i32
  }
  func.func @transform_11(%arg0: i32) -> (i32, i32, i32) {
    %c0_i32 = arith.constant 0 : i32
    %c0_i32_0 = arith.constant 0 : i32
    %c0_i32_1 = arith.constant 0 : i32
    return %arg0, %c0_i32, %c0_i32_0 : i32, i32, i32
  }
}

</mosaic_0001>

<bundles_post_ra>
// kernel: regression_forward.1
= control target key start
LH: loop header
LB: loop body
LE: loop exit
PB: predicated region body
PF: predicated region fallthrough
CT: control target
= control target key end

     0   :  { %16 = vsyncpa [#allocation3], 0  ;;  %s17306_s0 = inlined_call_operand.vmem [shape: bf16[2,16,16,64], index: 0, kind: input, shape index: {}]   ;;  %s17307_s1 = inlined_call_operand.hbm [shape: bf16[3,3,64,128], index: 1, kind: input, shape index: {}]   ;;  %s17308_s2 = inlined_call_operand.hbm [shape: f32[1,128], index: 2, kind: input, shape index: {}]   ;;  %s17309_s3 = inlined_call_operand.hbm [shape: bf16[3,3,128,128], index: 3, kind: input, shape index: {}]   ;;  %s17310_s4 = inlined_call_operand.hbm [shape: f32[1,128], index: 4, kind: input, shape index: {}]   ;;  %s17311_s5 = inlined_call_operand.hbm [shape: bf16[3,3,128,128], index: 5, kind: input, shape index: {}]   ;;  %s17312_s6 = inlined_call_operand.hbm [shape: f32[1,128], index: 6, kind: input, shape index: {}]   ;;  %s17313_s7 = inlined_call_operand.hbm [shape: bf16[3,3,128,128], index: 7, kind: input, shape index: {}]   ;;  %s17314_s8 = inlined_call_operand.hbm [shape: f32[1,128], index: 8, kind: input, shape index: {}]   ;;  %s17315_s9 = inlined_call_operand.vmem [shape: bf16[3,3,128,128], index: 9, kind: input, shape index: {}]   ;;  %s17316_s10 = inlined_call_operand.vmem [shape: f32[1,128], index: 10, kind: input, shape index: {}]   ;;  %s17317_s11 = inlined_call_operand.vmem [shape: f32[2,256,128], index: 11, kind: output, shape index: {}]  }
   0x1   :  { %17 = vsyncpa [#allocation5], 0 }
   0x2   :  { %18 = vsyncpa [#allocation8], 0 }
   0x3   :  { %19 = vsyncpa [#allocation11], 0 }
   0x4   :  { %20 = vsyncpa [#allocation14], 0  ;;  %s12953_s17 = smov 0  }
   0x5 LB: > { %s12881_s18 = smov [#allocation4]   ;;  %s12959_s20 = sadd.s32 4294967295, %s12879_s17   ;;  %s12879_s17 = sphi %s12953_s17, %s26_s17  }
   0x6   : > { %s319_s19 = sshll.u32 %s12881_s18, 4  ;;  %p9487_p0 = scmp.ge.s32.totalorder %s12879_s17, 1  ;;  %s320_s19 = int_to_ptr.vmem [resolvable:$true] %s319_s19 }
   0x7   : > { %p293_p1 = scmp.lt.s32.totalorder %s12879_s17, 3  ;;  %p12268_p2 = scmp.eq.s32.totalorder %s12959_s20, 0 }
   0x8   : > { %s12882_s22 = smov [#allocation7]   ;;  %s12883_s24 = smov [#allocation10]  }
   0x9   : > { %p12964_p3 = pnand %p9487_p0, %p293_p1  ;;  %s343_s23 = sshll.u32 %s12882_s22, 4  ;;  %s12970_s23 = int_to_ptr.vmem [resolvable:$true] %s343_s23 }
   0xa   : > { %s367_s25 = sshll.u32 %s12883_s24, 4  ;;  %s12884_s27 = smov [#allocation2]   ;;  %s12978_s25 = int_to_ptr.vmem [resolvable:$true] %s367_s25 }
   0xb   : > { %p12243_p4 = pneg %p12964_p3  ;;  %s305_s28 = sshll.u32 %s12884_s27, 4  ;;  %s12980_s28 = int_to_ptr.vmem [resolvable:$true] %s305_s28 }
   0xc   : > { %s12656_s30 = scalar_lea.vmem %s320_s19, 16  ;;  %s12663_s12 = scalar_lea.vmem %s320_s19, 32 }
   0xd   : > { %p12974_p5 = pnand %p12268_p2, %p12243_p4  ;;  %p12657_p7 = scmp.ne.s32.totalorder %s320_s19, %s12656_s30 }
   0xe   : > { %p12664_p10 = scmp.lt.s32.totalorder %s320_s19, %s320_s19  ;;  %p12665_p11 = scmp.lt.s32.totalorder %s12663_s12, %s12656_s30 }
   0xf   : > { %p12984_p6 = pneg %p12974_p5 }
  0x10   : > { %p12666_p12 = por %p12665_p11, %p12664_p10 }
  0x11   : > { %p12659_p8 = pnand %p12657_p7, %p12984_p6 }
  0x13   : > { %p12660_p9 = pneg %p12659_p8 }
  0x15   : > { %p12667_p13 = pnand %p12666_p12, %p12660_p9 }
  0x17   : > { %12670 = shalt.err (!%p12667_p13)
}
  0x18   : > { %12249 = dma.hbm_to_vmem [thread:$0]  (!%p12974_p5), %s17308_s2, 16, %s320_s19, [#allocation5]  }
  0x19   : > { %s12682_s15 = scalar_lea.vmem %s12970_s23, 16  ;;  %s12689_s16 = scalar_lea.vmem %s12970_s23, 32 }
  0x1a   : > { %p12683_p0 = scmp.ne.s32.totalorder %s12970_s23, %s12682_s15  ;;  %p12690_p7 = scmp.lt.s32.totalorder %s12970_s23, %s12970_s23 }
  0x1b   : > { %p12691_p8 = scmp.lt.s32.totalorder %s12689_s16, %s12682_s15 }
  0x1c   : > { %p12685_p1 = pnand %p12683_p0, %p12984_p6 }
  0x1d   : > { %p12692_p9 = por %p12691_p8, %p12690_p7 }
  0x1e   : > { %p12686_p4 = pneg %p12685_p1 }
  0x20   : > { %p12693_p10 = pnand %p12692_p9, %p12686_p4 }
  0x22   : > { %12696 = shalt.err (!%p12693_p10)
}
  0x23   : > { %12255 = dma.hbm_to_vmem [thread:$0]  (!%p12974_p5), %s17310_s4, 16, %s12970_s23, [#allocation8]  }
  0x24   : > { %s12708_s19 = scalar_lea.vmem %s12978_s25, 16  ;;  %s12715_s24 = scalar_lea.vmem %s12978_s25, 32 }
  0x25   : > { %p12709_p11 = scmp.ne.s32.totalorder %s12978_s25, %s12708_s19  ;;  %p12716_p0 = scmp.lt.s32.totalorder %s12978_s25, %s12978_s25 }
  0x26   : > { %p12717_p1 = scmp.lt.s32.totalorder %s12715_s24, %s12708_s19 }
  0x27   : > { %p12711_p12 = pnand %p12709_p11, %p12984_p6 }
  0x28   : > { %p12718_p4 = por %p12717_p1, %p12716_p0 }
  0x29   : > { %p12712_p13 = pneg %p12711_p12 }
  0x2b   : > { %p12719_p7 = pnand %p12718_p4, %p12712_p13 }
  0x2d   : > { %12722 = shalt.err (!%p12719_p7)
}
  0x2e   : > { %12261 = dma.hbm_to_vmem [thread:$0]  (!%p12974_p5), %s17312_s6, 16, %s12978_s25, [#allocation11]  }
  0x2f   : > { %s12734_s23 = scalar_lea.vmem %s12980_s28, 4608  ;;  %p12742_p11 = scmp.lt.s32.totalorder %s12980_s28, %s12980_s28 }
  0x30   : > { %p12735_p8 = scmp.ne.s32.totalorder %s12980_s28, %s12734_s23  ;;  %p12743_p12 = scmp.lt.s32.totalorder %s12734_s23, %s12734_s23 }
  0x32   : > { %p12737_p9 = pnand %p12735_p8, %p12984_p6  ;;  %p12744_p13 = por %p12743_p12, %p12742_p11 }
  0x34   : > { %p12738_p10 = pneg %p12737_p9 }
  0x36   : > { %p12745_p0 = pnand %p12744_p13, %p12738_p10 }
  0x38   : > { %12748 = shalt.err (!%p12745_p0)
}
  0x39   : > { %s12885_s12 = smov 64   ;;  %s12886_s13 = smov 4  }
  0x3a   : > { %12246 = dma.hbm_to_vmem [thread:$0]  (!%p12974_p5), %s17307_s1, 4608, %s12980_s28, [#allocation3], %s12885_s12, %s12885_s12, %s12886_s13  }
  0x3b   : > { %s12887_s15 = smov [#allocation6]   ;;  %s12888_s18 = smov [#allocation9]  }
  0x3c   : > { %s329_s16 = sshll.u32 %s12887_s15, 4  ;;  %s353_s22 = sshll.u32 %s12888_s18, 4  ;;  %s330_s16 = int_to_ptr.vmem [resolvable:$true] %s329_s16  ;;  %s354_s22 = int_to_ptr.vmem [resolvable:$true] %s353_s22 }
  0x3d   : > { %s12760_s19 = scalar_lea.vmem %s330_s16, 9216  ;;  %p12768_p8 = scmp.lt.s32.totalorder %s330_s16, %s330_s16 }
  0x3e   : > { %p12761_p1 = scmp.ne.s32.totalorder %s330_s16, %s12760_s19  ;;  %p12769_p9 = scmp.lt.s32.totalorder %s12760_s19, %s12760_s19 }
  0x40   : > { %p12763_p4 = pnand %p12761_p1, %p12984_p6  ;;  %p12770_p10 = por %p12769_p9, %p12768_p8 }
  0x42   : > { %p12764_p7 = pneg %p12763_p4 }
  0x44   : > { %p12771_p11 = pnand %p12770_p10, %p12764_p7 }
  0x46   : > { %12774 = shalt.err (!%p12771_p11)
}
  0x47   : > { %12252 = dma.hbm_to_vmem [thread:$0]  (!%p12974_p5), %s17309_s3, 9216, %s330_s16, [#allocation5], %s12885_s12, %s12885_s12, %s12886_s13  }
  0x48   : > { %s12786_s27 = scalar_lea.vmem %s354_s22, 9216  ;;  %p12794_p1 = scmp.lt.s32.totalorder %s354_s22, %s354_s22 }
  0x49   : > { %p12787_p12 = scmp.ne.s32.totalorder %s354_s22, %s12786_s27  ;;  %p12795_p4 = scmp.lt.s32.totalorder %s12786_s27, %s12786_s27 }
  0x4b   : > { %p12789_p13 = pnand %p12787_p12, %p12984_p6  ;;  %p12796_p7 = por %p12795_p4, %p12794_p1 }
  0x4d   : > { %p12790_p0 = pneg %p12789_p13 }
  0x4f   : > { %p12797_p8 = pnand %p12796_p7, %p12790_p0 }
  0x51   : > { %12800 = shalt.err (!%p12797_p8)
}
  0x52   : > { %12258 = dma.hbm_to_vmem [thread:$0]  (!%p12974_p5), %s17311_s5, 9216, %s354_s22, [#allocation8], %s12885_s12, %s12885_s12, %s12886_s13  }
  0x53   : > { %s12889_s25 = smov [#allocation12]   ;;  %s12890_s15 = smov [#allocation13]  }
  0x54   : > { %s377_s14 = sshll.u32 %s12889_s25, 4  ;;  %s391_s16 = sshll.u32 %s12890_s15, 4  ;;  %s378_s14 = int_to_ptr.vmem [resolvable:$true] %s377_s14  ;;  %s392_s16 = int_to_ptr.vmem [resolvable:$true] %s391_s16 }
  0x55   : > { %s12812_s18 = scalar_lea.vmem %s378_s14, 9216  ;;  %p12820_p12 = scmp.lt.s32.totalorder %s378_s14, %s378_s14 }
  0x56   : > { %p12813_p9 = scmp.ne.s32.totalorder %s378_s14, %s12812_s18  ;;  %p12821_p13 = scmp.lt.s32.totalorder %s12812_s18, %s12812_s18 }
  0x58   : > { %p12815_p10 = pnand %p12813_p9, %p12984_p6  ;;  %p12822_p0 = por %p12821_p13, %p12820_p12 }
  0x5a   : > { %p12816_p11 = pneg %p12815_p10 }
  0x5c   : > { %p12823_p1 = pnand %p12822_p0, %p12816_p11 }
  0x5e   : > { %12826 = shalt.err (!%p12823_p1)
}
  0x5f   : > { %12264 = dma.hbm_to_vmem [thread:$0]  (!%p12974_p5), %s17313_s7, 9216, %s378_s14, [#allocation11], %s12885_s12, %s12885_s12, %s12886_s13  }
  0x60   : > { %s12838_s28 = scalar_lea.vmem %s392_s16, 16  ;;  %s12845_s24 = scalar_lea.vmem %s392_s16, 32 }
  0x61   : > { %p12839_p4 = scmp.ne.s32.totalorder %s392_s16, %s12838_s28  ;;  %p12846_p9 = scmp.lt.s32.totalorder %s392_s16, %s392_s16 }
  0x62   : > { %p12847_p10 = scmp.lt.s32.totalorder %s12845_s24, %s12838_s28 }
  0x63   : > { %p12841_p7 = pnand %p12839_p4, %p12984_p6 }
  0x64   : > { %p12848_p11 = por %p12847_p10, %p12846_p9 }
  0x65   : > { %p12842_p8 = pneg %p12841_p7 }
  0x67   : > { %p12849_p12 = pnand %p12848_p11, %p12842_p8 }
  0x69   : > { %12852 = shalt.err (!%p12849_p12)
}
  0x6a   : > { %12267 = dma.hbm_to_vmem [thread:$0]  (!%p12974_p5), %s17314_s8, 16, %s392_s16, [#allocation14]  }
  0x6b   : > { %418 = sbr.rel (%p12964_p3) target bundleno = 2459 (0x99b), region = 64 }
  0x70   : > { %12858 = dma.done.wait (%p12268_p2), [#allocation3], 4608  }
  0x71   : > { %12860 = vsyncadd (%p12268_p2), [#allocation3], 4294962688 }
  0x72   : > { %12862 = dma.done.wait (%p12268_p2), [#allocation5], 9232  }
  0x73   : > { %12864 = vsyncadd (%p12268_p2), [#allocation5], 4294958064 }
  0x74   : > { %12866 = dma.done.wait (%p12268_p2), [#allocation8], 9232  }
  0x75   : > { %12868 = vsyncadd (%p12268_p2), [#allocation8], 4294958064 }
  0x76   : > { %12870 = dma.done.wait (%p12268_p2), [#allocation11], 9232  }
  0x77   : > { %12872 = vsyncadd (%p12268_p2), [#allocation11], 4294958064 }
  0x78   : > { %12874 = dma.done.wait (%p12268_p2), [#allocation14], 16  }
  0x79   : > { %12876 = vsyncadd (%p12268_p2), [#allocation14], 4294967280  ;;  %p486_p3 = scmp.lt.s32.totalorder %s12959_s20, 1  ;;  %v17318_v0 = vmov 0   ;;  %s12892_s13 = smov 64   ;;  %v12316_v5 = vld [vmem:[#allocation2 + $0x98] sm:$0xff]  }
  0x7a   : > { %1109 = vmatprep.subr.bf16.mxu0 %v17318_v0  ;;  %1345 = vmatprep.subr.bf16.mxu1 %v17318_v0  ;;  %vm817_vm0 = vsmask.f32 7424  ;;  %vm816_vm1 = vcmask 1047552   ;;  %v12317_v12 = vld [vmem:[#allocation2 + $0x90] sm:$0xff]   ;;  %v12319_v14 = vld [vmem:[#allocation2 + $0x88] sm:$0xff]   ;;  %v17365_v16 = vmov 0 }
  0x7b   : > { %s17509_s20 = smov (!%p486_p3, %s12959_s20), 1  ;;  %1110 = vmatpush1.bf16.msra.mxu0 %v12316_v5  ;;  %vm13148_vm2 = vmand %vm816_vm1, %vm817_vm0  ;;  %v12320_v21 = vld [vmem:[#allocation2 + $0x80] sm:$0xff]   ;;  %vm871_vm3 = vcmask 523264   ;;  %v12321_v24 = vld [vmem:[#allocation2 + $0x78] sm:$0xff]   ;;  %vm745_vm4 = vcmask 1040384   ;;  %v765_v42 = vrot.slane %v17318_v0, 1 }
  0x7c   : > { %s10001_s21 = sshll.u32 %s17509_s20, 7  ;;  %1111 = vmatprep.subr.bf16.mxu0 %v17318_v0  ;;  %v17366_v16 = vsel %vm13148_vm2, 4294967295, %v17365_v16  ;;  %v12327_v27 = vld [vmem:[#allocation2 + $0x38] sm:$0xff]   ;;  %v12330_v30 = vld [vmem:[#allocation2 + $0x30] sm:$0xff]   ;;  %v12332_v32 = vld [vmem:[#allocation2 + $0x28] sm:$0xff]   ;;  %v17369_v54 = vmov 0 }
  0x7d   : > { %s13105_s12 = scalar_lea.vmem %s17306_s0, %s10001_s21  ;;  %17367 = vst [vmem:[#allocation20_spill] sm:$0xff] %v17366_v16  ;;  %1346 = vmatpush1.bf16.msra.mxu1 %v12327_v27  ;;  %v12322_v31 = vld [vmem:[#allocation2 + $0x70] sm:$0xff]   ;;  %v12324_v33 = vld [vmem:[#allocation2 + $0x68] sm:$0xff]   ;;  %v12334_v34 = vld [vmem:[#allocation2 + $0x20] sm:$0xff]   ;;  %vm746_vm5 = vsmask.f32 256 }
  0x7e   : > { %v12304_v1 = vld [vmem:[%s13105_s12] sm:$0xff]   ;;  %v13110_v2 = vld [vmem:[%s13105_s12 + $0x8] sm:$0xff]   ;;  %v13113_v3 = vld [vmem:[%s13105_s12 + $0x10] sm:$0xff]   ;;  %1347 = vmatprep.subr.bf16.mxu1 %v17318_v0  ;;  %v13219_v46 = vsel %vm13148_vm2, %v765_v42, 0  ;;  %s10002_s28 = sshll.u32 %s17509_s20, 8 }
  0x7f   : > { %839 = vrot.lane.b32.xlu0 %v12304_v1, %s12892_s13  ;;  %v13116_v4 = vld [vmem:[%s13105_s12 + $0x20] sm:$0xff]   ;;  %843 = vrot.lane.b32.xlu1 %v13113_v3, %s12892_s13  ;;  %v13123_v6 = vld [vmem:[%s13105_s12 + $0x18] sm:$0xff]   ;;  %v617_v7 = vshrl.u32 %v12304_v1, 16  ;;  %v620_v15 = vshll.u32 %v12304_v1, 16  ;;  %v627_v37 = vshll.u32 %v13110_v2, 16  ;;  %v634_v39 = vshll.u32 %v13113_v3, 16  ;;  %vm13231_vm6 = vmand %vm745_vm4, %vm746_vm5  ;;  %s17206_s26 = scalar_lea.vmem %s17317_s11, %s10002_s28 }
  0x80   : > { %v13129_v8 = vld [vmem:[%s13105_s12 + $0x30] sm:$0xff]   ;;  %v13134_v9 = vld [vmem:[%s13105_s12 + $0x28] sm:$0xff]   ;;  %v13137_v10 = vld [vmem:[%s13105_s12 + $0x40] sm:$0xff]   ;;  %1112 = vmatpush1.bf16.msra.mxu0 %v12317_v12  ;;  %v624_v41 = vshrl.u32 %v13110_v2, 16  ;;  %v631_v45 = vshrl.u32 %v13113_v3, 16  ;;  %17368 = vst [vmem:[#allocation21_spill] sm:$0xff] %v13219_v46  ;;  %9566 = vmatprep.mubr.msk.bf16.mxu1 %vm871_vm3, %v13219_v46 }
  0x81   : > { %v13140_v11 = vld [vmem:[%s13105_s12 + $0x38] sm:$0xff]   ;;  %v619_v13 = vrot.slane %v617_v7, 7  ;;  %1113 = vmatprep.subr.bf16.mxu0 %v17318_v0  ;;  %v13153_v17 = vld [vmem:[%s13105_s12 + $0x50] sm:$0xff]   ;;  %v13162_v19 = vld [vmem:[%s13105_s12 + $0x48] sm:$0xff]   ;;  %v767_v20 = vrot.slane %v620_v15, 1  ;;  %1348 = vmatpush1.bf16.msra.mxu1 %v12330_v30  ;;  %v769_v44 = vrot.slane %v627_v37, 1 }
  0x82   : > { %v13165_v22 = vld [vmem:[%s13105_s12 + $0x60] sm:$0xff]   ;;  %v13173_v25 = vld [vmem:[%s13105_s12 + $0x58] sm:$0xff]   ;;  %v13182_v28 = vld [vmem:[%s13105_s12 + $0x70] sm:$0xff]   ;;  %1349 = vmatprep.subr.bf16.mxu1 %v17318_v0  ;;  %v648_v48 = vshll.u32 %v13116_v4, 16  ;;  %v662_v49 = vshll.u32 %v13129_v8, 16  ;;  %v676_v50 = vshll.u32 %v13137_v10, 16 }
  0x83   : > { %841 = vrot.lane.b32.xlu0 %v13110_v2, %s12892_s13  ;;  %845 = vrot.lane.b32.xlu1 %v13123_v6, %s12892_s13  ;;  %v13155_v18 = vor.u32 %v620_v15, %v619_v13  ;;  %v768_v23 = vor.u32 %v767_v20, %v617_v7  ;;  %v13186_v29 = vld [vmem:[%s13105_s12 + $0x68] sm:$0xff]   ;;  %v13201_v35 = vld [vmem:[%s13105_s12 + $0x78] sm:$0xff]   ;;  %v12325_v36 = vld [vmem:[#allocation2 + $0x60] sm:$0xff]   ;;  %v626_v51 = vrot.slane %v624_v41, 7  ;;  %v690_v52 = vshll.u32 %v13153_v17, 16 }
  0x84   : > { %1114 = vmatpush1.bf16.msra.mxu0 %v12319_v14  ;;  %v12336_v38 = vld [vmem:[#allocation2 + $0x18] sm:$0xff]   ;;  %v12338_v43 = vld [vmem:[#allocation2 + $0x10] sm:$0xff]   ;;  %v641_v53 = vshll.u32 %v13123_v6, 16  ;;  %v17370_v54 = vsel %vm13231_vm6, 4294967295, %v17369_v54  ;;  %v12339_v55 = vld [vmem:[#allocation2 + $0x8] sm:$0xff]   ;;  %v771_v56 = vrot.slane %v634_v39, 1  ;;  %v770_v58 = vor.u32 %v769_v44, %v624_v41 }
  0x85   : > { %1115 = vmatprep.subr.bf16.mxu0 %v17318_v0  ;;  %v13177_v26 = vsel %vm13148_vm2, %v768_v23, 0  ;;  %1350 = vmatpush1.bf16.msra.mxu1 %v12332_v32  ;;  %v12326_v40 = vld [vmem:[#allocation2 + $0xb8] sm:$0xff]   ;;  %v12328_v47 = vld [vmem:[#allocation2 + $0xb0] sm:$0xff]   ;;  %17371 = vst [vmem:[#allocation22_spill] sm:$0xff] %v17370_v54  ;;  %v704_v57 = vshll.u32 %v13165_v22, 16  ;;  %v633_v59 = vrot.slane %v631_v45, 7  ;;  %v13245_v3 = vor.u32 %v627_v37, %v626_v51 }
  0x86   : > { %9538 = vmatprep.mubr.msk.bf16.mxu0 %vm871_vm3, %v13177_v26  ;;  %1351 = vmatprep.subr.bf16.mxu1 %v17318_v0  ;;  %v718_v60 = vshll.u32 %v13182_v28, 16  ;;  %v655_v61 = vshll.u32 %v13134_v9, 16  ;;  %v669_v62 = vshll.u32 %v13140_v11, 16  ;;  %v12331_v63 = vld [vmem:[#allocation2 + $0xa8] sm:$0xff]   ;;  %v683_v1 = vshll.u32 %v13162_v19, 16  ;;  %v12341_v12 = vld [vmem:[#allocation2] sm:$0xff]  }
  0x87   : > { %847 = vrot.lane.b32.xlu0 %v13116_v4, %s12892_s13  ;;  %849 = vrot.lane.b32.xlu1 %v13134_v9, %s12892_s13  ;;  %v749_v2 = vsel %vm13231_vm6, 0, %v13155_v18  ;;  %v638_v5 = vshrl.u32 %v13123_v6, 16  ;;  %v697_v7 = vshll.u32 %v13173_v25, 16  ;;  %v772_v13 = vor.u32 %v771_v56, %v631_v45  ;;  %v12333_v23 = vld [vmem:[#allocation2 + $0xa0] sm:$0xff]   ;;  %v12342_v30 = vld [vmem:[#allocation2 + $0x58] sm:$0xff]   ;;  %v12343_v37 = vld [vmem:[#allocation2 + $0x50] sm:$0xff]  }
  0x88   : > { %1116 = vmatpush1.bf16.msra.mxu0 %v12320_v21  ;;  %v13251_v14 = vsel %vm13148_vm2, %v770_v58, 0  ;;  %v13254_v15 = vor.u32 %v634_v39, %v633_v59  ;;  %v773_v20 = vrot.slane %v641_v53, 1  ;;  %v711_v21 = vshll.u32 %v13186_v29, 16  ;;  %v12345_v42 = vld [vmem:[#allocation2 + $0x48] sm:$0xff]   ;;  %v12346_v51 = vld [vmem:[#allocation2 + $0x40] sm:$0xff]  }
  0x89   : > { %1117 = vmatprep.subr.bf16.mxu0 %v17318_v0  ;;  %1352 = vmatpush1.bf16.msra.mxu1 %v12334_v34  ;;  %v750_v6 = vsel %vm13231_vm6, 0, %v13245_v3  ;;  %v13263_v27 = vsel %vm13148_vm2, %v772_v13, 0  ;;  %v775_v34 = vrot.slane %v648_v48, 1  ;;  %v612_v45 = vrot.slane %v17318_v0, 7 }
  0x8a   : > { %1353 = vmatprep.subr.bf16.mxu1 %v17318_v0  ;;  %v774_v32 = vor.u32 %v773_v20, %v638_v5  ;;  %v659_v58 = vshrl.u32 %v13129_v8, 16  ;;  %v666_v20 = vshrl.u32 %v13140_v11, 16 }
  0x8b   : > { %851 = vrot.lane.b32.xlu0 %v13129_v8, %s12892_s13  ;;  %853 = vrot.lane.b32.xlu1 %v13140_v11, %s12892_s13  ;;  %v13302_v59 = vsel %vm13231_vm6, 0, %v612_v45 }
  0x8c   : > { %1118 = vmatpush1.bf16.msra.mxu0 %v12321_v24  ;;  %v640_v24 = vrot.slane %v638_v5, 7  ;;  %v13277_v39 = vsel %vm13148_vm2, %v774_v32, 0  ;;  %17372 = vst [vmem:[#allocation23_spill] sm:$0xff] %v13302_v59  ;;  %v661_v13 = vrot.slane %v659_v58, 7  ;;  %v783_v32 = vrot.slane %v676_v50, 1 }
  0x8d   : > { %1119 = vmatprep.subr.bf16.mxu0 %v17318_v0  ;;  %1354 = vmatpush1.bf16.msra.mxu1 %v12336_v38 }
  0x8e   : > { %1355 = vmatprep.subr.bf16.mxu1 %v17318_v0  ;;  %v13272_v38 = vor.u32 %v641_v53, %v640_v24  ;;  %v652_v53 = vshrl.u32 %v13134_v9, 16  ;;  %v13328_v9 = vor.u32 %v662_v49, %v661_v13 }
  0x8f   : > { %855 = vrot.lane.b32.xlu0 %v13137_v10, %s12892_s13  ;;  %857 = vrot.lane.b32.xlu1 %v13162_v19, %s12892_s13 }
  0x90   : > { %1120 = vmatpush1.bf16.msra.mxu0 %v12322_v31  ;;  %v751_v31 = vsel %vm13231_vm6, 0, %v13254_v15  ;;  %v12350_v15 = vld [vmem:[#allocation2 + $0xc8] sm:$0xff]  }
  0x91   : > { %1121 = vmatprep.subr.bf16.mxu0 %v17318_v0  ;;  %1356 = vmatpush1.bf16.msra.mxu1 %v12338_v43 }
  0x92   : > { %1357 = vmatprep.subr.bf16.mxu1 %v17318_v0 }
  0x93   : > { %859 = vrot.lane.b32.xlu0 %v13153_v17, %s12892_s13  ;;  %861 = vrot.lane.b32.xlu1 %v13173_v25, %s12892_s13 }
  0x94   : > { %1122 = vmatpush1.bf16.msra.mxu0 %v12324_v33  ;;  %v645_v33 = vshrl.u32 %v13116_v4, 16  ;;  %v752_v4 = vsel %vm13231_vm6, 0, %v13272_v38  ;;  %v12352_v38 = vld [vmem:[#allocation2 + $0x118] sm:$0xff]  }
  0x95   : > { %1123 = vmatprep.subr.bf16.mxu0 %v17318_v0  ;;  %1358 = vmatpush1.bf16.msra.mxu1 %v12339_v55  ;;  %v779_v55 = vrot.slane %v662_v49, 1  ;;  %v787_v49 = vrot.slane %v690_v52, 1 }
  0x96   : > { %1359 = vmatprep.subr.bf16.mxu1 %v17318_v0  ;;  %v647_v41 = vrot.slane %v645_v33, 7 }
  0x97   : > { %863 = vrot.lane.b32.xlu0 %v13165_v22, %s12892_s13  ;;  %865 = vrot.lane.b32.xlu1 %v13186_v29, %s12892_s13  ;;  %v780_v5 = vor.u32 %v779_v55, %v659_v58 }
  0x98   : > { %1124 = vmatpush1.bf16.msra.mxu0 %v12325_v36  ;;  %v725_v36 = vshll.u32 %v13201_v35, 16  ;;  %v13287_v44 = vor.u32 %v648_v48, %v647_v41  ;;  %v785_v41 = vrot.slane %v683_v1, 1 }
  0x99   : > { %1133 = vmatprep.subr.bf16.mxu0 %v17318_v0  ;;  %1360 = vmatpush1.bf16.msra.mxu1 %v12341_v12 }
  0x9a   : > { %1369 = vmatprep.subr.bf16.mxu1 %v17318_v0  ;;  %v753_v56 = vsel %vm13231_vm6, 0, %v13287_v44 }
  0x9b   : > { %867 = vrot.lane.b32.xlu0 %v13182_v28, %s12892_s13  ;;  %869 = vrot.lane.b32.xlu1 %v13201_v35, %s12892_s13  ;;  %v12361_v35 = vld [vmem:[#allocation6 + $0xe8] sm:$0xff]  }
  0x9c   : > { %1134 = vmatpush2.bf16.msra.mxu0 %v12326_v40  ;;  %v776_v40 = vor.u32 %v775_v34, %v645_v33  ;;  %v13320_v33 = vsel %vm13148_vm2, %v780_v5, 0  ;;  %v668_v34 = vrot.slane %v666_v20, 7 }
  0x9d   : > { %1135 = vmatprep.subr.bf16.mxu0 %v17318_v0  ;;  %1370 = vmatpush2.bf16.msra.mxu1 %v12342_v30  ;;  %v673_v30 = vshrl.u32 %v13137_v10, 16 }
  0x9e   : > { %1371 = vmatprep.subr.bf16.mxu1 %v17318_v0  ;;  %v13285_v43 = vsel %vm13148_vm2, %v776_v40, 0  ;;  %v680_v40 = vshrl.u32 %v13162_v19, 16  ;;  %v13338_v55 = vor.u32 %v669_v62, %v668_v34  ;;  %v789_v34 = vrot.slane %v697_v7, 1 }
  0x9f   : > { %837 = vrot.lane.b32.xlu0 %v17318_v0, %s12892_s13 }
  0xa0   : > { %1136 = vmatpush2.bf16.msra.mxu0 %v12328_v47  ;;  %v777_v47 = vrot.slane %v655_v61, 1  ;;  %v682_v45 = vrot.slane %v680_v40, 7  ;;  %v786_v58 = vor.u32 %v785_v41, %v680_v40  ;;  %v756_v11 = vsel %vm13231_vm6, 0, %v13338_v55 }
  0xa1   : > { %1137 = vmatprep.subr.bf16.mxu0 %v17318_v0  ;;  %1372 = vmatpush2.bf16.msra.mxu1 %v12343_v37  ;;  %v715_v41 = vshrl.u32 %v13182_v28, 16 }
  0xa2   : > { %1373 = vmatprep.subr.bf16.mxu1 %v17318_v0  ;;  %v778_v48 = vor.u32 %v777_v47, %v652_v53  ;;  %v687_v47 = vshrl.u32 %v13153_v17, 16  ;;  %v13366_v13 = vsel %vm13148_vm2, %v786_v58, 0  ;;  %v791_v17 = vrot.slane %v704_v57, 1 }
  0xa4   : > { %1138 = vmatpush2.bf16.msra.mxu0 %v12331_v63  ;;  %v654_v63 = vrot.slane %v652_v53, 7  ;;  %v13306_v12 = vsel %vm13148_vm2, %v778_v48, 0  ;;  %v755_v53 = vsel %vm13231_vm6, 0, %v13328_v9  ;;  %v689_v5 = vrot.slane %v687_v47, 7 }
  0xa5   : > { %1139 = vmatprep.subr.bf16.mxu0 %v17318_v0  ;;  %1374 = vmatpush2.bf16.msra.mxu1 %v12345_v42 }
  0xa6   : > { %1375 = vmatprep.subr.bf16.mxu1 %v17318_v0  ;;  %v13313_v24 = vor.u32 %v655_v61, %v654_v63  ;;  %v675_v61 = vrot.slane %v673_v30, 7  ;;  %v13352_v63 = vor.u32 %v683_v1, %v682_v45  ;;  %v13373_v1 = vor.u32 %v690_v52, %v689_v5 }
  0xa7   : > { %v708_v52 = vshrl.u32 %v13186_v29, 16  ;;  %v795_v5 = vrot.slane %v718_v60, 1 }
  0xa8   : > { %1140 = vmatpush2.bf16.msra.mxu0 %v12333_v23  ;;  %v781_v23 = vrot.slane %v669_v62, 1  ;;  %v754_v37 = vsel %vm13231_vm6, 0, %v13313_v24  ;;  %v13342_v8 = vor.u32 %v676_v50, %v675_v61  ;;  %v788_v62 = vor.u32 %v787_v49, %v687_v47 }
  0xa9   : > { %1603 = vmatprep.subr.bf16.mxu0 %v17318_v0  ;;  %1376 = vmatpush2.bf16.msra.mxu1 %v12346_v51  ;;  %v784_v51 = vor.u32 %v783_v32, %v673_v30  ;;  %v758_v19 = vsel %vm13231_vm6, 0, %v13352_v63  ;;  %v759_v30 = vsel %vm13231_vm6, 0, %v13373_v1  ;;  %v701_v32 = vshrl.u32 %v13165_v22, 16 }
  0xaa   : > { %v782_v42 = vor.u32 %v781_v23, %v666_v20  ;;  %v757_v50 = vsel %vm13231_vm6, 0, %v13342_v8  ;;  %v13377_v20 = vsel %vm13148_vm2, %v788_v62, 0  ;;  %v694_v23 = vshrl.u32 %v13173_v25, 16 }
  0xab   : > { %v13359_v10 = vsel %vm13148_vm2, %v784_v51, 0  ;;  %v703_v61 = vrot.slane %v701_v32, 7  ;;  %v793_v47 = vrot.slane %v711_v21, 1  ;;  %v710_v51 = vrot.slane %v708_v52, 7 }
  0xac   : > { %v13348_v48 = vsel %vm13148_vm2, %v782_v42, 0  ;;  %v696_v40 = vrot.slane %v694_v23, 7  ;;  %v790_v42 = vor.u32 %v789_v34, %v694_v23  ;;  %v792_v49 = vor.u32 %v791_v17, %v701_v32 }
  0xad   : > { %v13398_v58 = vor.u32 %v704_v57, %v703_v61  ;;  %v717_v62 = vrot.slane %v715_v41, 7  ;;  %v13411_v32 = vor.u32 %v711_v21, %v710_v51  ;;  %v796_v34 = vor.u32 %v795_v5, %v715_v41  ;;  %v12335_v61 = vld [vmem:[#allocation2 + $0xf8] sm:$0xff]   ;;  %v12340_v41 = vld [vmem:[#allocation2 + $0xf0] sm:$0xff]  }
  0xae   : > { %v13392_v45 = vor.u32 %v697_v7, %v696_v40  ;;  %v13404_v23 = vsel %vm13148_vm2, %v790_v42, 0  ;;  %v794_v7 = vor.u32 %v793_v47, %v708_v52  ;;  %v13415_v22 = vsel %vm13148_vm2, %v792_v49, 0  ;;  %v12344_v47 = vld [vmem:[#allocation2 + $0xe8] sm:$0xff]  }
  0xaf   : > { %v761_v57 = vsel %vm13231_vm6, 0, %v13398_v58  ;;  %v13422_v40 = vor.u32 %v718_v60, %v717_v62  ;;  %v762_v29 = vsel %vm13231_vm6, 0, %v13411_v32  ;;  %v13433_v21 = vsel %vm13148_vm2, %v796_v34, 0  ;;  %v12348_v62 = vld [vmem:[#allocation2 + $0xd8] sm:$0xff]  }
  0xb0   : > { %v760_v25 = vsel %vm13231_vm6, 0, %v13392_v45  ;;  %v13426_v17 = vsel %vm13148_vm2, %v794_v7, 0  ;;  %v12349_v7 = vld [vmem:[#allocation2 + $0xd0] sm:$0xff]   ;;  %v797_v1 = vrot.slane %v725_v36, 1 }
  0xb1   : > { %v763_v52 = vsel %vm13231_vm6, 0, %v13422_v40 }
  0xf1   : > { %v840_v28 = vpop.permute.xlu0 %839  ;;  %v844_v5 = vpop.permute.xlu1 %843 }
  0xf2   : > { %v878_v60 = vsel %vm871_vm3, %v749_v2, %v840_v28  ;;  %v12347_v2 = vld [vmem:[#allocation2 + $0xe0] sm:$0xff]   ;;  %v13463_v3 = vsel %vm871_vm3, %v751_v31, %v844_v5  ;;  %v12353_v5 = vld [vmem:[#allocation2 + $0x110] sm:$0xff]  }
  0xf3   : > { %1142 = vmatmul.mubr.bf16.vlgmr.msra.gmra.mxu0 %v878_v60 }
  0xf4   : > { %1604 = vmatpush1.bf16.msra.mxu0 %v12335_v61  ;;  %9539 = vmatprep.mubr.msk.bf16.mxu0 %vm871_vm3, %v13251_v14 }
  0xf5   : > { %v842_v42 = vpop.permute.xlu0 %841  ;;  %1605 = vmatprep.subr.bf16.mxu0 %v17318_v0  ;;  %v846_v61 = vpop.permute.xlu1 %845 }
  0xf6   : > { %v13451_v51 = vsel %vm871_vm3, %v750_v6, %v842_v42  ;;  %v13477_v31 = vsel %vm871_vm3, %v752_v4, %v846_v61 }
  0xf8   : > { %1606 = vmatpush1.bf16.msra.mxu0 %v12340_v41  ;;  %v12351_v41 = vld [vmem:[#allocation2 + $0xc0] sm:$0xff]  }
  0xf9   : > { %v848_v18 = vpop.permute.xlu0 %847  ;;  %1607 = vmatprep.subr.bf16.mxu0 %v17318_v0  ;;  %v850_v44 = vpop.permute.xlu1 %849 }
  0xfa   : > { %v13493_v4 = vsel %vm871_vm3, %v753_v56, %v848_v18  ;;  %v12354_v56 = vld [vmem:[#allocation2 + $0x108] sm:$0xff]   ;;  %v13512_v18 = vsel %vm871_vm3, %v754_v37, %v850_v44 }
  0xfb   : > { %1150 = vmatmul.mubr.bf16.gmra.mxu0 %v13451_v51 }
  0xfc   : > { %9540 = vmatprep.mubr.msk.bf16.mxu0 %vm871_vm3, %v13263_v27  ;;  %1608 = vmatpush1.bf16.msra.mxu0 %v12344_v47 }
  0xfd   : > { %v852_v49 = vpop.permute.xlu0 %851  ;;  %1609 = vmatprep.subr.bf16.mxu0 %v17318_v0  ;;  %v854_v24 = vpop.permute.xlu1 %853 }
  0xfe   : > { %v13539_v37 = vsel %vm871_vm3, %v756_v11, %v854_v24  ;;  %v12644_v11 = vld [vmem:[%s13105_s12 + $0x78] sm:$0xff]  }
 0x100   : > { %1610 = vmatpush1.bf16.msra.mxu0 %v12347_v2 }
 0x101   : > { %v856_v6 = vpop.permute.xlu0 %855  ;;  %1611 = vmatprep.subr.bf16.mxu0 %v17318_v0 }
 0x102   : > { %v13552_v9 = vsel %vm871_vm3, %v757_v50, %v856_v6  ;;  %v722_v50 = vshrl.u32 %v12644_v11, 16 }
 0x103   : > { %1158 = vmatmul.mubr.bf16.gmra.mxu0 %v13463_v3 }
 0x104   : > { %9541 = vmatprep.mubr.msk.bf16.mxu0 %vm871_vm3, %v13277_v39  ;;  %1612 = vmatpush1.bf16.msra.mxu0 %v12348_v62  ;;  %v12355_v62 = vld [vmem:[#allocation2 + $0x100] sm:$0xff]   ;;  %v724_v6 = vrot.slane %v722_v50, 7 }
 0x105   : > { %v13469_v34 = vpop.permute.xlu0 %859  ;;  %1613 = vmatprep.subr.bf16.mxu0 %v17318_v0 }
 0x106   : > { %v13579_v8 = vsel %vm871_vm3, %v759_v30, %v13469_v34  ;;  %v12357_v30 = vld [vmem:[#allocation6 + $0xf8] sm:$0xff]   ;;  %v12359_v34 = vld [vmem:[#allocation6 + $0xf0] sm:$0xff]  }
 0x108   : > { %1614 = vmatpush1.bf16.msra.mxu0 %v12349_v7  ;;  %v12358_v7 = vld [vmem:[#allocation6 + $0x130] sm:$0xff]  }
 0x109   : > { %v13479_v28 = vpop.permute.xlu0 %863  ;;  %1615 = vmatprep.subr.bf16.mxu0 %v17318_v0 }
 0x10a   : > { %v13609_v45 = vsel %vm871_vm3, %v761_v57, %v13479_v28  ;;  %v12363_v28 = vld [vmem:[#allocation6 + $0xe0] sm:$0xff]  }
 0x10b   : > { %1166 = vmatmul.mubr.bf16.gmra.mxu0 %v13477_v31 }
 0x10c   : > { %9542 = vmatprep.mubr.msk.bf16.mxu0 %vm871_vm3, %v13285_v43  ;;  %1616 = vmatpush1.bf16.msra.mxu0 %v12350_v15  ;;  %v12360_v15 = vld [vmem:[#allocation6 + $0x128] sm:$0xff]  }
 0x10d   : > { %v13485_v42 = vpop.permute.xlu0 %867  ;;  %1617 = vmatprep.subr.bf16.mxu0 %v17318_v0 }
 0x10e   : > { %v13640_v32 = vsel %vm871_vm3, %v763_v52, %v13485_v42  ;;  %v12372_v42 = vld [vmem:[#allocation6 + $0x100] sm:$0xff]  }
 0x110   : > { %1618 = vmatpush1.bf16.msra.mxu0 %v12351_v41 }
 0x111   : > { %v838_v47 = vpop.permute.xlu0 %837  ;;  %1627 = vmatprep.subr.bf16.mxu0 %v17318_v0 }
 0x112   : > { %v13498_v2 = vsel %vm871_vm3, %v13302_v59, %v838_v47 }
 0x113   : > { %1174 = vmatmul.mubr.bf16.gmra.mxu0 %v13493_v4  ;;  %1378 = vmatmul.mubr.bf16.vlgmr.msra.gmra.mxu1 %v13498_v2 }
 0x114   : > { %9543 = vmatprep.mubr.msk.bf16.mxu0 %vm871_vm3, %v13306_v12  ;;  %9567 = vmatprep.mubr.msk.bf16.mxu1 %vm871_vm3, %v13177_v26  ;;  %v13526_v26 = vsel %vm871_vm3, %v755_v53, %v852_v49  ;;  %v858_v53 = vpop.permute.xlu1 %857 }
 0x115   : > { %1628 = vmatpush2.bf16.msra.mxu0 %v12352_v38  ;;  %v13565_v55 = vsel %vm871_vm3, %v758_v19, %v858_v53  ;;  %v12356_v19 = vld [vmem:[#allocation6 + $0x138] sm:$0xff]   ;;  %v12381_v53 = vld [vmem:[#allocation6 + $0x140] sm:$0xff]  }
 0x116   : > { %1629 = vmatprep.subr.bf16.mxu0 %v17318_v0  ;;  %10003 = vmatprep.subr.bf16.mxu1 %v12356_v19 }
 0x117   : > { %10004 = vmatpush3.bf16.msra.mxu1 %v12357_v30 }
 0x118   : > { %v862_v63 = vpop.permute.xlu1 %861  ;;  %10005 = vmatprep.subr.bf16.mxu1 %v12358_v7 }
 0x119   : > { %1630 = vmatpush2.bf16.msra.mxu0 %v12353_v5  ;;  %v12373_v5 = vld [vmem:[#allocation6 + $0xc0] sm:$0xff]  }
 0x11a   : > { %1631 = vmatprep.subr.bf16.mxu0 %v17318_v0 }
 0x11b   : > { %1182 = vmatmul.mubr.bf16.gmra.mxu0 %v13512_v18  ;;  %1386 = vmatmul.mubr.bf16.gmra.mxu1 %v878_v60  ;;  %v13595_v60 = vsel %vm871_vm3, %v760_v25, %v862_v63  ;;  %v798_v25 = vor.u32 %v797_v1, %v722_v50 }
 0x11c   : > { %9544 = vmatprep.mubr.msk.bf16.mxu0 %vm871_vm3, %v13320_v33  ;;  %9568 = vmatprep.mubr.msk.bf16.mxu1 %vm871_vm3, %v13251_v14  ;;  %v866_v49 = vpop.permute.xlu1 %865 }
 0x11d   : > { %1632 = vmatpush2.bf16.msra.mxu0 %v12354_v56  ;;  %v13622_v58 = vsel %vm871_vm3, %v762_v29, %v866_v49  ;;  %v13626_v57 = vsel %vm13148_vm2, %v798_v25, 0  ;;  %10006 = vmatpush3.bf16.msra.mxu1 %v12359_v34  ;;  %v727_v29 = vor.u32 %v725_v36, %v724_v6  ;;  %v12362_v36 = vld [vmem:[#allocation6 + $0x120] sm:$0xff]  }
 0x11e   : > { %1633 = vmatprep.subr.bf16.mxu0 %v17318_v0  ;;  %10007 = vmatprep.subr.bf16.mxu1 %v12360_v15 }
 0x11f   : > { %v764_v40 = vsel %vm13231_vm6, 0, %v727_v29 }
 0x120   : > { %v870_v61 = vpop.permute.xlu1 %869 }
 0x121   : > { %1634 = vmatpush2.bf16.msra.mxu0 %v12355_v62  ;;  %v13653_v52 = vsel %vm871_vm3, %v764_v40, %v870_v61  ;;  %10008 = vmatpush3.bf16.msra.mxu1 %v12361_v35 }
 0x122   : > { %10009 = vmatprep.subr.bf16.mxu1 %v12362_v36 }
 0x123   : > { %1190 = vmatmul.mubr.bf16.gmra.mxu0 %v13526_v26  ;;  %1394 = vmatmul.mubr.bf16.gmra.mxu1 %v13451_v51 }
 0x124   : > { %9545 = vmatprep.mubr.msk.bf16.mxu0 %vm871_vm3, %v13348_v48  ;;  %9569 = vmatprep.mubr.msk.bf16.mxu1 %vm871_vm3, %v13263_v27 }
 0x125   : > { %10010 = vmatpush3.bf16.msra.mxu1 %v12363_v28 }
 0x12b   : > { %1198 = vmatmul.mubr.bf16.gmra.mxu0 %v13539_v37  ;;  %1402 = vmatmul.mubr.bf16.gmra.mxu1 %v13463_v3 }
 0x12c   : > { %9546 = vmatprep.mubr.msk.bf16.mxu0 %vm871_vm3, %v13359_v10  ;;  %9570 = vmatprep.mubr.msk.bf16.mxu1 %vm871_vm3, %v13277_v39 }
 0x133   : > { %1206 = vmatmul.mubr.bf16.gmra.mxu0 %v13552_v9  ;;  %1410 = vmatmul.mubr.bf16.gmra.mxu1 %v13477_v31 }
 0x134   : > { %9547 = vmatprep.mubr.msk.bf16.mxu0 %vm871_vm3, %v13366_v13  ;;  %9571 = vmatprep.mubr.msk.bf16.mxu1 %vm871_vm3, %v13285_v43 }
 0x13b   : > { %1214 = vmatmul.mubr.bf16.gmra.mxu0 %v13565_v55  ;;  %1418 = vmatmul.mubr.bf16.gmra.mxu1 %v13493_v4 }
 0x13c   : > { %9548 = vmatprep.mubr.msk.bf16.mxu0 %vm871_vm3, %v13377_v20  ;;  %9572 = vmatprep.mubr.msk.bf16.mxu1 %vm871_vm3, %v13306_v12 }
 0x143   : > { %1222 = vmatmul.mubr.bf16.gmra.mxu0 %v13579_v8  ;;  %1426 = vmatmul.mubr.bf16.gmra.mxu1 %v13512_v18 }
 0x144   : > { %9549 = vmatprep.mubr.msk.bf16.mxu0 %vm871_vm3, %v13404_v23  ;;  %9573 = vmatprep.mubr.msk.bf16.mxu1 %vm871_vm3, %v13320_v33 }
 0x14b   : > { %1230 = vmatmul.mubr.bf16.gmra.mxu0 %v13595_v60  ;;  %1434 = vmatmul.mubr.bf16.gmra.mxu1 %v13526_v26 }
 0x14c   : > { %9550 = vmatprep.mubr.msk.bf16.mxu0 %vm871_vm3, %v13415_v22  ;;  %9574 = vmatprep.mubr.msk.bf16.mxu1 %vm871_vm3, %v13348_v48 }
 0x153   : > { %1238 = vmatmul.mubr.bf16.gmra.mxu0 %v13609_v45  ;;  %1442 = vmatmul.mubr.bf16.gmra.mxu1 %v13539_v37 }
 0x154   : > { %9551 = vmatprep.mubr.msk.bf16.mxu0 %vm871_vm3, %v13426_v17  ;;  %9575 = vmatprep.mubr.msk.bf16.mxu1 %vm871_vm3, %v13359_v10 }
 0x15b   : > { %1246 = vmatmul.mubr.bf16.gmra.mxu0 %v13622_v58  ;;  %1450 = vmatmul.mubr.bf16.gmra.mxu1 %v13552_v9 }
 0x15c   : > { %9552 = vmatprep.mubr.msk.bf16.mxu0 %vm871_vm3, %v13433_v21  ;;  %9576 = vmatprep.mubr.msk.bf16.mxu1 %vm871_vm3, %v13366_v13 }
 0x163   : > { %1254 = vmatmul.mubr.bf16.gmra.mxu0 %v13640_v32  ;;  %1458 = vmatmul.mubr.bf16.gmra.mxu1 %v13565_v55 }
 0x164   : > { %9553 = vmatprep.mubr.msk.bf16.mxu0 %vm871_vm3, %v13626_v57  ;;  %9577 = vmatprep.mubr.msk.bf16.mxu1 %vm871_vm3, %v13377_v20 }
 0x16b   : > { %1262 = vmatmul.mubr.bf16.gmra.mxu0 %v13653_v52  ;;  %1466 = vmatmul.mubr.bf16.gmra.mxu1 %v13579_v8 }
 0x16c   : > { %9578 = vmatprep.mubr.msk.bf16.mxu1 %vm871_vm3, %v13404_v23  ;;  %9594 = vmatprep.mubr.msk.bf16.mxu0 %vm871_vm3, %v13251_v14  ;;  %v12364_v14 = vld [vmem:[#allocation6 + $0x118] sm:$0xff]  }
 0x16d   : > { %10011 = vmatprep.subr.bf16.mxu1 %v12364_v14 }
 0x173   : > { %1474 = vmatmul.mubr.bf16.gmra.mxu1 %v13595_v60  ;;  %1636 = vmatmul.mubr.bf16.vlgmr.msra.gmra.mxu0 %v13451_v51  ;;  %v12367_v51 = vld [vmem:[#allocation6 + $0xd0] sm:$0xff]  }
 0x174   : > { %9579 = vmatprep.mubr.msk.bf16.mxu1 %vm871_vm3, %v13415_v22  ;;  %9595 = vmatprep.mubr.msk.bf16.mxu0 %vm871_vm3, %v13263_v27  ;;  %v12365_v27 = vld [vmem:[#allocation6 + $0xd8] sm:$0xff]  }
 0x175   : > { %10012 = vmatpush3.bf16.msra.mxu1 %v12365_v27 }
 0x17b   : > { %1482 = vmatmul.mubr.bf16.gmra.mxu1 %v13609_v45  ;;  %1644 = vmatmul.mubr.bf16.gmra.mxu0 %v13463_v3  ;;  %v12371_v3 = vld [vmem:[#allocation6 + $0x170] sm:$0xff]  }
 0x17c   : > { %9580 = vmatprep.mubr.msk.bf16.mxu1 %vm871_vm3, %v13426_v17  ;;  %9596 = vmatprep.mubr.msk.bf16.mxu0 %vm871_vm3, %v13277_v39  ;;  %v12366_v39 = vld [vmem:[#allocation6 + $0x110] sm:$0xff]  }
 0x17d   : > { %10013 = vmatprep.subr.bf16.mxu1 %v12366_v39 }
 0x17e   : > { %10014 = vmatpush3.bf16.msra.mxu1 %v12367_v51 }
 0x183   : > { %1490 = vmatmul.mubr.bf16.gmra.mxu1 %v13622_v58  ;;  %1652 = vmatmul.mubr.bf16.gmra.mxu0 %v13477_v31 }
 0x184   : > { %9581 = vmatprep.mubr.msk.bf16.mxu1 %vm871_vm3, %v13433_v21  ;;  %9597 = vmatprep.mubr.msk.bf16.mxu0 %vm871_vm3, %v13285_v43  ;;  %v12368_v43 = vld [vmem:[#allocation6 + $0x108] sm:$0xff]  }
 0x185   : > { %10015 = vmatprep.subr.bf16.mxu1 %v12368_v43 }
 0x18b   : > { %1498 = vmatmul.mubr.bf16.gmra.mxu1 %v13640_v32  ;;  %1660 = vmatmul.mubr.bf16.gmra.mxu0 %v13493_v4 }
 0x18c   : > { %9598 = vmatprep.mubr.msk.bf16.mxu0 %vm871_vm3, %v13306_v12  ;;  %v12369_v12 = vld [vmem:[#allocation6 + $0xc8] sm:$0xff]  }
 0x18d   : > { %10016 = vmatpush3.bf16.msra.mxu1 %v12369_v12 }
 0x18e   : > { %10017 = vmatprep.subr.bf16.mxu1 %v12372_v42 }
 0x191   : > { %10018 = vmatpush3.bf16.msra.mxu1 %v12373_v5 }
 0x193   : > { %1668 = vmatmul.mubr.bf16.gmra.mxu0 %v13512_v18  ;;  %v12377_v18 = vld [vmem:[#allocation6 + $0x150] sm:$0xff]  }
 0x194   : > { %9599 = vmatprep.mubr.msk.bf16.mxu0 %vm871_vm3, %v13320_v33  ;;  %v12370_v33 = vld [vmem:[#allocation6 + $0x178] sm:$0xff]  }
 0x195   : > { %11635 = vmatprep.subr.bf16.mxu0 %v12370_v33 }
 0x196   : > { %11636 = vmatpush3.bf16.msra.mxu0 %v12370_v33 }
 0x197   : > { %11637 = vmatprep.subr.bf16.mxu0 %v12371_v3 }
 0x19a   : > { %11638 = vmatpush3.bf16.msra.mxu0 %v12371_v3 }
 0x19b   : > { %1676 = vmatmul.mubr.bf16.gmra.mxu0 %v13526_v26 }
 0x19c   : > { %9600 = vmatprep.mubr.msk.bf16.mxu0 %vm871_vm3, %v13348_v48 }
 0x1a3   : > { %1684 = vmatmul.mubr.bf16.gmra.mxu0 %v13539_v37  ;;  %v12378_v37 = vld [vmem:[#allocation6 + $0x78] sm:$0xff]  }
 0x1a4   : > { %9601 = vmatprep.mubr.msk.bf16.mxu0 %vm871_vm3, %v13359_v10  ;;  %v12374_v10 = vld [vmem:[#allocation6 + $0x168] sm:$0xff]   ;;  %10139 = vmatprep.subr.bf16.mxu1 %v12378_v37 }
 0x1a5   : > { %11639 = vmatprep.subr.bf16.mxu0 %v12374_v10 }
 0x1a6   : > { %11640 = vmatpush3.bf16.msra.mxu0 %v12374_v10 }
 0x1ab   : > { %1692 = vmatmul.mubr.bf16.gmra.mxu0 %v13552_v9 }
 0x1ac   : > { %9602 = vmatprep.mubr.msk.bf16.mxu0 %vm871_vm3, %v13366_v13  ;;  %v12375_v13 = vld [vmem:[#allocation6 + $0x160] sm:$0xff]  }
 0x1ad   : > { %11641 = vmatprep.subr.bf16.mxu0 %v12375_v13 }
 0x1ae   : > { %11642 = vmatpush3.bf16.msra.mxu0 %v12375_v13 }
 0x1b3   : > { %v1143_v31 = vpop.f32.mrf.mxu0  ;;  %1700 = vmatmul.mubr.bf16.gmra.mxu0 %v13565_v55 }
 0x1b4   : > { %9603 = vmatprep.mubr.msk.bf16.mxu0 %vm871_vm3, %v13377_v20  ;;  %v12376_v20 = vld [vmem:[#allocation6 + $0x158] sm:$0xff]  }
 0x1b5   : > { %v1145_v48 = vpop.f32.mrf.mxu0  ;;  %11643 = vmatprep.subr.bf16.mxu0 %v12376_v20 }
 0x1b6   : > { %11644 = vmatpush3.bf16.msra.mxu0 %v12376_v20 }
 0x1b7   : > { %v1146_v41 = vpop.f32.mrf.mxu0  ;;  %11645 = vmatprep.subr.bf16.mxu0 %v12377_v18 }
 0x1b9   : > { %v1148_v38 = vpop.f32.mrf.mxu0 }
 0x1ba   : > { %11646 = vmatpush3.bf16.msra.mxu0 %v12377_v18 }
 0x1bb   : > { %v1151_v4 = vpop.f32.mrf.mxu0  ;;  %1708 = vmatmul.mubr.bf16.gmra.mxu0 %v13579_v8 }
 0x1bc   : > { %9604 = vmatprep.mubr.msk.bf16.mxu0 %vm871_vm3, %v13404_v23  ;;  %v12379_v23 = vld [vmem:[#allocation6 + $0x148] sm:$0xff]  }
 0x1bd   : > { %v1153_v47 = vpop.f32.mrf.mxu0  ;;  %11647 = vmatprep.subr.bf16.mxu0 %v12379_v23 }
 0x1be   : > { %11648 = vmatpush3.bf16.msra.mxu0 %v12379_v23 }
 0x1bf   : > { %v1154_v44 = vpop.f32.mrf.mxu0  ;;  %11649 = vmatprep.subr.bf16.mxu0 %v12381_v53 }
 0x1c1   : > { %v1156_v56 = vpop.f32.mrf.mxu0 }
 0x1c2   : > { %11650 = vmatpush3.bf16.msra.mxu0 %v12381_v53 }
 0x1c3   : > { %v1159_v62 = vpop.f32.mrf.mxu0  ;;  %1716 = vmatmul.mubr.bf16.gmra.mxu0 %v13595_v60 }
 0x1c4   : > { %9605 = vmatprep.mubr.msk.bf16.mxu0 %vm871_vm3, %v13415_v22 }
 0x1c5   : > { %v1161_v26 = vpop.f32.mrf.mxu0 }
 0x1c7   : > { %v1162_v24 = vpop.f32.mrf.mxu0 }
 0x1c9   : > { %v1164_v9 = vpop.f32.mrf.mxu0 }
 0x1cb   : > { %v1167_v55 = vpop.f32.mrf.mxu0  ;;  %1724 = vmatmul.mubr.bf16.gmra.mxu0 %v13609_v45 }
 0x1cc   : > { %9606 = vmatprep.mubr.msk.bf16.mxu0 %vm871_vm3, %v13426_v17 }
 0x1cd   : > { %v1169_v8 = vpop.f32.mrf.mxu0 }
 0x1cf   : > { %v1170_v22 = vpop.f32.mrf.mxu0 }
 0x1d1   : > { %v1172_v63 = vpop.f32.mrf.mxu0 }
 0x1d3   : > { %v1175_v11 = vpop.f32.mrf.mxu0  ;;  %v1379_v50 = vpop.f32.mrf.mxu1  ;;  %1732 = vmatmul.mubr.bf16.gmra.mxu0 %v13622_v58 }
 0x1d4   : > { %v13708_v19 = vadd.f32 %v1379_v50, %v1143_v31  ;;  %9607 = vmatprep.mubr.msk.bf16.mxu0 %vm871_vm3, %v13433_v21 }
 0x1d5   : > { %v1177_v1 = vpop.f32.mrf.mxu0  ;;  %v1381_v30 = vpop.f32.mrf.mxu1 }
 0x1d7   : > { %v1178_v60 = vpop.f32.mrf.mxu0  ;;  %v1382_v45 = vpop.f32.mrf.mxu1 }
 0x1d8   : > { %v13712_v25 = vadd.f32 %v1382_v45, %v1146_v41 }
 0x1d9   : > { %v1180_v17 = vpop.f32.mrf.mxu0  ;;  %v1384_v49 = vpop.f32.mrf.mxu1 }
 0x1db   : > { %v1183_v6 = vpop.f32.mrf.mxu0  ;;  %v1387_v7 = vpop.f32.mrf.mxu1  ;;  %1740 = vmatmul.mubr.bf16.gmra.mxu0 %v13640_v32 }
 0x1dc   : > { %v13715_v34 = vadd.f32 %v1387_v7, %v1151_v4  ;;  %9608 = vmatprep.mubr.msk.bf16.mxu0 %vm871_vm3, %v13626_v57 }
 0x1dd   : > { %v1185_v58 = vpop.f32.mrf.mxu0  ;;  %v1389_v29 = vpop.f32.mrf.mxu1 }
 0x1df   : > { %v1186_v21 = vpop.f32.mrf.mxu0  ;;  %v1390_v61 = vpop.f32.mrf.mxu1 }
 0x1e0   : > { %v13719_v40 = vadd.f32 %v1390_v61, %v1154_v44 }
 0x1e1   : > { %v1188_v15 = vpop.f32.mrf.mxu0  ;;  %v1392_v35 = vpop.f32.mrf.mxu1 }
 0x1e3   : > { %v1191_v36 = vpop.f32.mrf.mxu0  ;;  %v1395_v28 = vpop.f32.mrf.mxu1  ;;  %1748 = vmatmul.mubr.bf16.gmra.mxu0 %v13653_v52 }
 0x1e4   : > { %v13722_v14 = vadd.f32 %v1395_v28, %v1159_v62  ;;  %9609 = vmatprep.mubr.msk.bf16.mxu0 %vm871_vm3, %v13219_v46 }
 0x1e5   : > { %v1193_v32 = vpop.f32.mrf.mxu0  ;;  %v1397_v27 = vpop.f32.mrf.mxu1 }
 0x1e7   : > { %v1194_v57 = vpop.f32.mrf.mxu0  ;;  %v1398_v39 = vpop.f32.mrf.mxu1 }
 0x1e8   : > { %v13726_v51 = vadd.f32 %v1398_v39, %v1162_v24 }
 0x1e9   : > { %v1196_v43 = vpop.f32.mrf.mxu0  ;;  %v1400_v12 = vpop.f32.mrf.mxu1 }
 0x1eb   : > { %v1199_v33 = vpop.f32.mrf.mxu0  ;;  %v1403_v3 = vpop.f32.mrf.mxu1  ;;  %1756 = vmatmul.mubr.bf16.gmra.mxu0 %v13498_v2 }
 0x1ec   : > { %v13729_v31 = vadd.f32 %v1403_v3, %v1167_v55 }
 0x1ed   : > { %v1201_v52 = vpop.f32.mrf.mxu0  ;;  %v1405_v48 = vpop.f32.mrf.mxu1 }
 0x1ef   : > { %v1202_v10 = vpop.f32.mrf.mxu0  ;;  %v1406_v41 = vpop.f32.mrf.mxu1 }
 0x1f0   : > { %v13731_v42 = vadd.f32 %v1406_v41, %v1170_v22 }
 0x1f1   : > { %v1204_v38 = vpop.f32.mrf.mxu0  ;;  %v1408_v13 = vpop.f32.mrf.mxu1 }
 0x1f3   : > { %v1207_v4 = vpop.f32.mrf.mxu0  ;;  %v1411_v47 = vpop.f32.mrf.mxu1 }
 0x1f4   : > { %v13733_v20 = vadd.f32 %v1411_v47, %v1175_v11 }
 0x1f5   : > { %v1209_v5 = vpop.f32.mrf.mxu0  ;;  %v1413_v44 = vpop.f32.mrf.mxu1 }
 0x1f7   : > { %v1210_v56 = vpop.f32.mrf.mxu0  ;;  %v1414_v18 = vpop.f32.mrf.mxu1 }
 0x1f8   : > { %v13735_v62 = vadd.f32 %v1414_v18, %v1178_v60 }
 0x1f9   : > { %v1212_v2 = vpop.f32.mrf.mxu0  ;;  %v1416_v26 = vpop.f32.mrf.mxu1 }
 0x1fb   : > { %v1215_v23 = vpop.f32.mrf.mxu0  ;;  %v1419_v24 = vpop.f32.mrf.mxu1 }
 0x1fc   : > { %v13737_v37 = vadd.f32 %v1419_v24, %v1183_v6 }
 0x1fd   : > { %v1217_v9 = vpop.f32.mrf.mxu0  ;;  %v1421_v53 = vpop.f32.mrf.mxu1 }
 0x1ff   : > { %v1218_v55 = vpop.f32.mrf.mxu0  ;;  %v1422_v8 = vpop.f32.mrf.mxu1 }
 0x200   : > { %v13739_v22 = vadd.f32 %v1422_v8, %v1186_v21 }
 0x201   : > { %v1220_v63 = vpop.f32.mrf.mxu0  ;;  %v1424_v11 = vpop.f32.mrf.mxu1 }
 0x203   : > { %v1223_v50 = vpop.f32.mrf.mxu0  ;;  %v1427_v1 = vpop.f32.mrf.mxu1 }
 0x204   : > { %v13741_v30 = vadd.f32 %v1427_v1, %v1191_v36  ;;  %v13761_v1 = vld [vmem:[#allocation6 + $0xb8] sm:$0xff]  }
 0x205   : > { %v1225_v60 = vpop.f32.mrf.mxu0  ;;  %v1429_v45 = vpop.f32.mrf.mxu1  ;;  %11683 = vmatprep.subr.bf16.mxu0 %v13761_v1 }
 0x207   : > { %v1226_v17 = vpop.f32.mrf.mxu0  ;;  %v1430_v49 = vpop.f32.mrf.mxu1 }
 0x208   : > { %v13743_v7 = vadd.f32 %v1430_v49, %v1194_v57 }
 0x209   : > { %v1228_v6 = vpop.f32.mrf.mxu0  ;;  %v1432_v58 = vpop.f32.mrf.mxu1 }
 0x20b   : > { %v1231_v29 = vpop.f32.mrf.mxu0  ;;  %v1435_v61 = vpop.f32.mrf.mxu1 }
 0x20c   : > { %v13745_v15 = vadd.f32 %v1435_v61, %v1199_v33 }
 0x20d   : > { %v1233_v21 = vpop.f32.mrf.mxu0  ;;  %v1437_v35 = vpop.f32.mrf.mxu1 }
 0x20f   : > { %v1234_v28 = vpop.f32.mrf.mxu0  ;;  %v1438_v32 = vpop.f32.mrf.mxu1 }
 0x210   : > { %v13747_v27 = vadd.f32 %v1438_v32, %v1202_v10 }
 0x211   : > { %v1236_v36 = vpop.f32.mrf.mxu0  ;;  %v1440_v39 = vpop.f32.mrf.mxu1 }
 0x213   : > { %v1239_v43 = vpop.f32.mrf.mxu0  ;;  %v1443_v12 = vpop.f32.mrf.mxu1 }
 0x214   : > { %v13749_v3 = vadd.f32 %v1443_v12, %v1207_v4 }
 0x215   : > { %v1241_v57 = vpop.f32.mrf.mxu0  ;;  %v1445_v52 = vpop.f32.mrf.mxu1 }
 0x217   : > { %v1242_v48 = vpop.f32.mrf.mxu0  ;;  %v1446_v41 = vpop.f32.mrf.mxu1 }
 0x218   : > { %v13751_v38 = vadd.f32 %v1446_v41, %v1210_v56 }
 0x219   : > { %v1244_v33 = vpop.f32.mrf.mxu0  ;;  %v1448_v13 = vpop.f32.mrf.mxu1 }
 0x21a   : > { %v13779_v33 = vld [vmem:[#allocation4] ss:$0 sm:$0xff] }
 0x21b   : > { %v1247_v47 = vpop.f32.mrf.mxu0  ;;  %v1451_v5 = vpop.f32.mrf.mxu1 }
 0x21c   : > { %v13753_v44 = vadd.f32 %v1451_v5, %v1215_v23 }
 0x21d   : > { %v1249_v10 = vpop.f32.mrf.mxu0  ;;  %v1453_v18 = vpop.f32.mrf.mxu1 }
 0x21f   : > { %v1250_v2 = vpop.f32.mrf.mxu0  ;;  %v1454_v26 = vpop.f32.mrf.mxu1 }
 0x220   : > { %v13755_v24 = vadd.f32 %v1454_v26, %v1218_v55 }
 0x221   : > { %v1252_v4 = vpop.f32.mrf.mxu0  ;;  %v1456_v9 = vpop.f32.mrf.mxu1 }
 0x223   : > { %v13757_v53 = vpop.f32.mrf.mxu0  ;;  %v1459_v8 = vpop.f32.mrf.mxu1 }
 0x224   : > { %v13759_v63 = vadd.f32 %v1459_v8, %v1223_v50 }
 0x225   : > { %v1257_v56 = vpop.f32.mrf.mxu0  ;;  %v1461_v11 = vpop.f32.mrf.mxu1 }
 0x227   : > { %v13763_v60 = vpop.f32.mrf.mxu0  ;;  %v1462_v23 = vpop.f32.mrf.mxu1 }
 0x228   : > { %v13765_v45 = vadd.f32 %v1462_v23, %v1226_v17 }
 0x229   : > { %v1260_v55 = vpop.f32.mrf.mxu0  ;;  %v1464_v49 = vpop.f32.mrf.mxu1 }
 0x22b   : > { %v13768_v6 = vpop.f32.mrf.mxu0  ;;  %v1467_v58 = vpop.f32.mrf.mxu1 }
 0x22c   : > { %v13770_v61 = vadd.f32 %v1467_v58, %v1231_v29 }
 0x22d   : > { %v1265_v50 = vpop.f32.mrf.mxu0  ;;  %v1469_v21 = vpop.f32.mrf.mxu1 }
 0x22f   : > { %v13772_v35 = vpop.f32.mrf.mxu0  ;;  %v1470_v32 = vpop.f32.mrf.mxu1 }
 0x230   : > { %v13774_v36 = vadd.f32 %v1470_v32, %v1234_v28 }
 0x231   : > { %v1268_v39 = vpop.f32.mrf.mxu0  ;;  %v1472_v12 = vpop.f32.mrf.mxu1 }
 0x233   : > { %v1475_v17 = vpop.f32.mrf.mxu1  ;;  %v1637_v57 = vpop.f32.mrf.mxu0 }
 0x234   : > { %v13776_v52 = vadd.f32 %v1475_v17, %v1239_v43  ;;  %v1764_v41 = vadd.f32 %v1637_v57, %v13708_v19 }
 0x235   : > { %v1477_v13 = vpop.f32.mrf.mxu1  ;;  %v1639_v29 = vpop.f32.mrf.mxu0 }
 0x236   : > { %v1803_v18 = vadd.f32 %v13779_v33, %v1764_v41 }
 0x237   : > { %v1478_v5 = vpop.f32.mrf.mxu1  ;;  %v1640_v10 = vpop.f32.mrf.mxu0 }
 0x238   : > { %v13782_v26 = vadd.f32 %v1478_v5, %v1242_v48  ;;  %v1765_v28 = vadd.f32 %v1640_v10, %v13712_v25  ;;  %v1835_v11 = vmax.f32 %v1803_v18, 0.0 }
 0x239   : > { %v1480_v4 = vpop.f32.mrf.mxu1  ;;  %v1642_v9 = vpop.f32.mrf.mxu0 }
 0x23a   : > { %v1804_v8 = vadd.f32 %v13779_v33, %v1765_v28  ;;  %v12380_v4 = vld [vmem:[#allocation6 + $0x38] sm:$0xff]  }
 0x23b   : > { %v1483_v43 = vpop.f32.mrf.mxu1  ;;  %v1645_v56 = vpop.f32.mrf.mxu0 }
 0x23c   : > { %v1836_v19 = vmax.f32 %v1804_v8, 0.0  ;;  %v13786_v23 = vadd.f32 %v1483_v43, %v1247_v47  ;;  %v1766_v55 = vadd.f32 %v1645_v56, %v13715_v34  ;;  %v12382_v56 = vld [vmem:[#allocation6 + $0x70] sm:$0xff]  }
 0x23d   : > { %v1485_v49 = vpop.f32.mrf.mxu1  ;;  %v1647_v58 = vpop.f32.mrf.mxu0 }
 0x23e   : > { %v13789_v50 = vpack.c.bf16 %v1836_v19, %v1835_v11  ;;  %v1805_v48 = vadd.f32 %v13779_v33, %v1766_v55 }
 0x23f   : > { %v1486_v21 = vpop.f32.mrf.mxu1  ;;  %v1648_v25 = vpop.f32.mrf.mxu0 }
 0x240   : > { %v13792_v32 = vadd.f32 %v1486_v21, %v1250_v2  ;;  %v1767_v39 = vadd.f32 %v1648_v25, %v13719_v40  ;;  %2364 = vmatprep.mubr.bf16.mxu1 %v13789_v50  ;;  %v1884_v12 = vshrl.u32 %v13789_v50, 16  ;;  %v1887_v34 = vshll.u32 %v13789_v50, 16  ;;  %v12383_v25 = vld [vmem:[#allocation6 + $0x30] sm:$0xff]  }
 0x241   : > { %v1488_v47 = vpop.f32.mrf.mxu1  ;;  %v1650_v17 = vpop.f32.mrf.mxu0  ;;  %v1837_v13 = vmax.f32 %v1805_v48, 0.0 }
 0x242   : > { %v1806_v57 = vadd.f32 %v13779_v33, %v1767_v39  ;;  %v1886_v41 = vrot.slane %v1884_v12, 7  ;;  %v2027_v10 = vrot.slane %v1887_v34, 1  ;;  %v12384_v17 = vld [vmem:[#allocation6 + $0x68] sm:$0xff]  }
 0x243   : > { %v1491_v29 = vpop.f32.mrf.mxu1  ;;  %v1653_v5 = vpop.f32.mrf.mxu0 }
 0x244   : > { %v1838_v18 = vmax.f32 %v1806_v57, 0.0  ;;  %v13800_v2 = vadd.f32 %v1491_v29, %v13757_v53  ;;  %v1768_v40 = vadd.f32 %v1653_v5, %v13722_v14  ;;  %v1889_v28 = vor.u32 %v1887_v34, %v1886_v41 }
 0x245   : > { %v1493_v9 = vpop.f32.mrf.mxu1  ;;  %v1655_v8 = vpop.f32.mrf.mxu0  ;;  %v2028_v43 = vor.u32 %v2027_v10, %v1884_v12 }
 0x246   : > { %v13803_v11 = vpack.c.bf16 %v1838_v18, %v1837_v13  ;;  %v13807_v19 = vsel %vm13231_vm6, 0, %v1889_v28  ;;  %v1807_v55 = vadd.f32 %v13779_v33, %v1768_v40  ;;  %v12385_v9 = vld [vmem:[#allocation6 + $0x28] sm:$0xff]  }
 0x247   : > { %v1494_v49 = vpop.f32.mrf.mxu1  ;;  %v1656_v58 = vpop.f32.mrf.mxu0  ;;  %2365 = vmatmul.mubr.bf16.vlgmr.msra.gmra.mxu1 %v13807_v19  ;;  %v13813_v14 = vsel %vm13148_vm2, %v2028_v43, 0 }
 0x248   : > { %v13816_v53 = vadd.f32 %v1494_v49, %v13763_v60  ;;  %v1769_v48 = vadd.f32 %v1656_v58, %v13726_v51  ;;  %11651 = vmatprep.mubr.bf16.mxu0 %v13813_v14  ;;  %10140 = vmatpush3.bf16.msra.mxu1 %v12380_v4  ;;  %v1891_v21 = vshrl.u32 %v13803_v11, 16  ;;  %v1894_v47 = vshll.u32 %v13803_v11, 16 }
 0x249   : > { %2372 = vmatprep.mubr.bf16.mxu1 %v13803_v11  ;;  %v1496_v39 = vpop.f32.mrf.mxu1  ;;  %v1658_v12 = vpop.f32.mrf.mxu0  ;;  %10141 = vmatprep.subr.bf16.mxu1 %v12382_v56  ;;  %v1839_v57 = vmax.f32 %v1807_v55, 0.0  ;;  %v12386_v56 = vld [vmem:[#allocation6 + $0x60] sm:$0xff]   ;;  %v12395_v55 = vld [vmem:[#allocation6 + $0xb0] sm:$0xff]  }
 0x24a   : > { %v1808_v34 = vadd.f32 %v13779_v33, %v1769_v48  ;;  %v1893_v60 = vrot.slane %v1891_v21, 7  ;;  %v2029_v13 = vrot.slane %v1894_v47, 1 }
 0x24b   : > { %v1499_v41 = vpop.f32.mrf.mxu1  ;;  %v1661_v51 = vpop.f32.mrf.mxu0 }
 0x24c   : > { %v1840_v29 = vmax.f32 %v1808_v34, 0.0  ;;  %v13825_v5 = vadd.f32 %v1499_v41, %v13768_v6  ;;  %v1770_v10 = vadd.f32 %v1661_v51, %v13729_v31  ;;  %v1896_v18 = vor.u32 %v1894_v47, %v1893_v60  ;;  %10142 = vmatpush3.bf16.msra.mxu1 %v12383_v25  ;;  %v12388_v60 = vld [vmem:[#allocation6 + $0x58] sm:$0xff]  }
 0x24d   : > { %v1501_v40 = vpop.f32.mrf.mxu1  ;;  %v1663_v28 = vpop.f32.mrf.mxu0  ;;  %v2030_v4 = vor.u32 %v2029_v13, %v1891_v21  ;;  %10143 = vmatprep.subr.bf16.mxu1 %v12384_v17  ;;  %v12387_v17 = vld [vmem:[#allocation6 + $0x20] sm:$0xff]  }
 0x24e   : > { %v13828_v8 = vpack.c.bf16 %v1840_v29, %v1839_v57  ;;  %v13832_v43 = vsel %vm13231_vm6, 0, %v1896_v18  ;;  %v1809_v58 = vadd.f32 %v13779_v33, %v1770_v10  ;;  %v12389_v28 = vld [vmem:[#allocation6 + $0x18] sm:$0xff]  }
 0x24f   : > { %v1502_v49 = vpop.f32.mrf.mxu1  ;;  %v1664_v6 = vpop.f32.mrf.mxu0  ;;  %2373 = vmatmul.mubr.bf16.gmra.mxu1 %v13832_v43  ;;  %v13837_v31 = vsel %vm13148_vm2, %v2030_v4, 0 }
 0x250   : > { %v13841_v48 = vadd.f32 %v1502_v49, %v13772_v35  ;;  %v1771_v21 = vadd.f32 %v1664_v6, %v13731_v42  ;;  %11652 = vmatmul.mubr.bf16.vlgmr.msra.gmra.mxu0 %v13837_v31  ;;  %2380 = vmatprep.mubr.bf16.mxu1 %v13828_v8  ;;  %v1898_v25 = vshrl.u32 %v13828_v8, 16  ;;  %v1901_v47 = vshll.u32 %v13828_v8, 16  ;;  %v12396_v42 = vld [vmem:[#allocation6 + $0xa8] sm:$0xff]  }
 0x251   : > { %v1504_v39 = vpop.f32.mrf.mxu1  ;;  %v1666_v12 = vpop.f32.mrf.mxu0  ;;  %10144 = vmatpush3.bf16.msra.mxu1 %v12385_v9  ;;  %11684 = vmatpush3.bf16.msra.mxu0 %v13761_v1  ;;  %v1841_v51 = vmax.f32 %v1809_v58, 0.0  ;;  %v12390_v9 = vld [vmem:[#allocation6 + $0x50] sm:$0xff]  }
 0x252   : > { %v1810_v34 = vadd.f32 %v13779_v33, %v1771_v21  ;;  %v1900_v35 = vrot.slane %v1898_v25, 7  ;;  %10145 = vmatprep.subr.bf16.mxu1 %v12386_v56  ;;  %11685 = vmatprep.subr.bf16.mxu0 %v12395_v55  ;;  %v2031_v41 = vrot.slane %v1901_v47, 1  ;;  %v12397_v56 = vld [vmem:[#allocation6 + $0xa0] sm:$0xff]   ;;  %v12391_v39 = vld [vmem:[#allocation6 + $0x10] sm:$0xff]  }
 0x253   : > { %v1669_v57 = vpop.f32.mrf.mxu0 }
 0x254   : > { %v1842_v13 = vmax.f32 %v1810_v34, 0.0  ;;  %v1772_v29 = vadd.f32 %v1669_v57, %v13733_v20  ;;  %v1903_v10 = vor.u32 %v1901_v47, %v1900_v35  ;;  %v2032_v40 = vor.u32 %v2031_v41, %v1898_v25  ;;  %v12392_v34 = vld [vmem:[#allocation6 + $0x48] sm:$0xff]  }
 0x255   : > { %v1671_v18 = vpop.f32.mrf.mxu0  ;;  %10146 = vmatpush3.bf16.msra.mxu1 %v12387_v17  ;;  %11686 = vmatpush3.bf16.msra.mxu0 %v12395_v55 }
 0x256   : > { %v13851_v1 = vpack.c.bf16 %v1842_v13, %v1841_v51  ;;  %v13855_v4 = vsel %vm13231_vm6, 0, %v1903_v10  ;;  %10147 = vmatprep.subr.bf16.mxu1 %v12388_v60  ;;  %11687 = vmatprep.subr.bf16.mxu0 %v12396_v42  ;;  %v1811_v49 = vadd.f32 %v13779_v33, %v1772_v29  ;;  %v13861_v20 = vsel %vm13148_vm2, %v2032_v40, 0  ;;  %v12393_v10 = vld [vmem:[#allocation6 + $0x8] sm:$0xff]  }
 0x257   : > { %v1672_v6 = vpop.f32.mrf.mxu0  ;;  %2381 = vmatmul.mubr.bf16.gmra.mxu1 %v13855_v4  ;;  %11655 = vmatprep.mubr.bf16.mxu0 %v13861_v20 }
 0x258   : > { %v1773_v55 = vadd.f32 %v1672_v6, %v13735_v62  ;;  %2388 = vmatprep.mubr.bf16.mxu1 %v13851_v1  ;;  %v1905_v58 = vshrl.u32 %v13851_v1, 16  ;;  %v1908_v21 = vshll.u32 %v13851_v1, 16  ;;  %v12400_v62 = vld [vmem:[#allocation6 + $0x98] sm:$0xff]   ;;  %v1843_v35 = vmax.f32 %v1811_v49, 0.0 }
 0x259   : > { %v1674_v25 = vpop.f32.mrf.mxu0  ;;  %10148 = vmatpush3.bf16.msra.mxu1 %v12389_v28  ;;  %11688 = vmatpush3.bf16.msra.mxu0 %v12396_v42  ;;  %v12398_v28 = vld [vmem:[#allocation6 + $0x40] sm:$0xff]  }
 0x25a   : > { %v1812_v12 = vadd.f32 %v13779_v33, %v1773_v55  ;;  %v1907_v47 = vrot.slane %v1905_v58, 7  ;;  %v2033_v17 = vrot.slane %v1908_v21, 1  ;;  %10149 = vmatprep.subr.bf16.mxu1 %v12390_v9  ;;  %11689 = vmatprep.subr.bf16.mxu0 %v12397_v56 }
 0x25b   : > { %v1677_v60 = vpop.f32.mrf.mxu0 }
 0x25c   : > { %v1844_v57 = vmax.f32 %v1812_v12, 0.0  ;;  %v1774_v41 = vadd.f32 %v1677_v60, %v13737_v37  ;;  %v1910_v51 = vor.u32 %v1908_v21, %v1907_v47  ;;  %v2034_v13 = vor.u32 %v2033_v17, %v1905_v58  ;;  %v12401_v37 = vld [vmem:[#allocation6 + $0x90] sm:$0xff]   ;;  %v12399_v21 = vld [vmem:[#allocation6] sm:$0xff]   ;;  %v12402_v47 = vld [vmem:[#allocation6 + $0x88] sm:$0xff]  }
 0x25d   : > { %v1679_v29 = vpop.f32.mrf.mxu0  ;;  %10150 = vmatpush3.bf16.msra.mxu1 %v12391_v39  ;;  %11690 = vmatpush3.bf16.msra.mxu0 %v12397_v56  ;;  %v13888_v17 = vld [vmem:[#allocation6 + $0x238] sm:$0xff]  }
 0x25e   : > { %v13870_v42 = vpack.c.bf16 %v1844_v57, %v1843_v35  ;;  %v13874_v18 = vsel %vm13231_vm6, 0, %v1910_v51  ;;  %v13878_v40 = vsel %vm13148_vm2, %v2034_v13, 0  ;;  %10151 = vmatprep.subr.bf16.mxu1 %v12392_v34  ;;  %11691 = vmatprep.subr.bf16.mxu0 %v12400_v62  ;;  %v1813_v9 = vadd.f32 %v13779_v33, %v1774_v41 }
 0x25f   : > { %v1680_v49 = vpop.f32.mrf.mxu0  ;;  %2389 = vmatmul.mubr.bf16.gmra.mxu1 %v13874_v18  ;;  %11656 = vmatmul.mubr.bf16.gmra.mxu0 %v13878_v40 }
 0x260   : > { %v1775_v56 = vadd.f32 %v1680_v49, %v13739_v22  ;;  %2396 = vmatprep.mubr.bf16.mxu1 %v13870_v42  ;;  %v1912_v6 = vshrl.u32 %v13870_v42, 16  ;;  %v1915_v55 = vshll.u32 %v13870_v42, 16  ;;  %v1845_v22 = vmax.f32 %v1813_v9, 0.0 }
 0x261   : > { %v1682_v58 = vpop.f32.mrf.mxu0  ;;  %10152 = vmatpush3.bf16.msra.mxu1 %v12393_v10  ;;  %11692 = vmatpush3.bf16.msra.mxu0 %v12400_v62  ;;  %v12403_v10 = vld [vmem:[#allocation6 + $0x80] sm:$0xff]  }
 0x262   : > { %v1814_v25 = vadd.f32 %v13779_v33, %v1775_v56  ;;  %v1914_v39 = vrot.slane %v1912_v6, 7  ;;  %v2035_v12 = vrot.slane %v1915_v55, 1  ;;  %10153 = vmatprep.subr.bf16.mxu1 %v12398_v28  ;;  %11693 = vmatprep.subr.bf16.mxu0 %v12401_v37 }
 0x263   : > { %v1685_v34 = vpop.f32.mrf.mxu0 }
 0x264   : > { %v1846_v35 = vmax.f32 %v1814_v25, 0.0  ;;  %v1776_v60 = vadd.f32 %v1685_v34, %v13741_v30  ;;  %v1917_v57 = vor.u32 %v1915_v55, %v1914_v39  ;;  %v2036_v41 = vor.u32 %v2035_v12, %v1912_v6 }
 0x265   : > { %v1687_v51 = vpop.f32.mrf.mxu0  ;;  %10154 = vmatpush3.bf16.msra.mxu1 %v12399_v21  ;;  %11694 = vmatpush3.bf16.msra.mxu0 %v12401_v37  ;;  %v12407_v21 = vld [vmem:[#allocation6 + $0x1f8] sm:$0xff]  }
 0x266   : > { %v13891_v62 = vpack.c.bf16 %v1846_v35, %v1845_v22  ;;  %v13895_v13 = vsel %vm13231_vm6, 0, %v1917_v57  ;;  %v13899_v29 = vsel %vm13148_vm2, %v2036_v41, 0  ;;  %11695 = vmatprep.subr.bf16.mxu0 %v12402_v47  ;;  %11731 = vmatprep.subr.bf16.mxu1 %v13888_v17  ;;  %v1815_v30 = vadd.f32 %v13779_v33, %v1776_v60 }
 0x267   : > { %v1688_v28 = vpop.f32.mrf.mxu0  ;;  %2397 = vmatmul.mubr.bf16.gmra.mxu1 %v13895_v13  ;;  %11659 = vmatprep.mubr.bf16.mxu0 %v13899_v29 }
 0x268   : > { %v1777_v37 = vadd.f32 %v1688_v28, %v13743_v7  ;;  %2404 = vmatprep.mubr.bf16.mxu1 %v13891_v62  ;;  %v1919_v9 = vshrl.u32 %v13891_v62, 16  ;;  %v1922_v49 = vshll.u32 %v13891_v62, 16  ;;  %v1847_v25 = vmax.f32 %v1815_v30, 0.0 }
 0x269   : > { %v1690_v56 = vpop.f32.mrf.mxu0  ;;  %11696 = vmatpush3.bf16.msra.mxu0 %v12402_v47 }
 0x26a   : > { %v1816_v6 = vadd.f32 %v13779_v33, %v1777_v37  ;;  %v1921_v55 = vrot.slane %v1919_v9, 7  ;;  %v2037_v58 = vrot.slane %v1922_v49, 1  ;;  %11697 = vmatprep.subr.bf16.mxu0 %v12403_v10 }
 0x26b   : > { %v1693_v39 = vpop.f32.mrf.mxu0 }
 0x26c   : > { %v1848_v12 = vmax.f32 %v1816_v6, 0.0  ;;  %v1778_v22 = vadd.f32 %v1693_v39, %v13745_v15  ;;  %v1924_v7 = vor.u32 %v1922_v49, %v1921_v55  ;;  %v2038_v34 = vor.u32 %v2037_v58, %v1919_v9 }
 0x26d   : > { %v1695_v35 = vpop.f32.mrf.mxu0  ;;  %11698 = vmatpush3.bf16.msra.mxu0 %v12403_v10 }
 0x26e   : > { %v13911_v60 = vpack.c.bf16 %v1848_v12, %v1847_v25  ;;  %v13915_v47 = vsel %vm13231_vm6, 0, %v1924_v7  ;;  %v13919_v57 = vsel %vm13148_vm2, %v2038_v34, 0  ;;  %10275 = vmatprep.subr.bf16.mxu0 %v12407_v21  ;;  %v1817_v41 = vadd.f32 %v13779_v33, %v1778_v22 }
 0x26f   : > { %v1696_v51 = vpop.f32.mrf.mxu0  ;;  %2405 = vmatmul.mubr.bf16.gmra.mxu1 %v13915_v47  ;;  %11660 = vmatmul.mubr.bf16.gmra.mxu0 %v13919_v57 }
 0x270   : > { %v1779_v15 = vadd.f32 %v1696_v51, %v13747_v27  ;;  %2412 = vmatprep.mubr.bf16.mxu1 %v13911_v60  ;;  %v1926_v10 = vshrl.u32 %v13911_v60, 16  ;;  %v1929_v30 = vshll.u32 %v13911_v60, 16  ;;  %v1849_v56 = vmax.f32 %v1817_v41, 0.0 }
 0x271   : > { %v1698_v28 = vpop.f32.mrf.mxu0 }
 0x272   : > { %v1818_v37 = vadd.f32 %v13779_v33, %v1779_v15  ;;  %v1928_v9 = vrot.slane %v1926_v10, 7  ;;  %v2039_v49 = vrot.slane %v1929_v30, 1 }
 0x273   : > { %v1701_v6 = vpop.f32.mrf.mxu0 }
 0x274   : > { %v1850_v55 = vmax.f32 %v1818_v37, 0.0  ;;  %v1780_v58 = vadd.f32 %v1701_v6, %v13749_v3  ;;  %v1931_v21 = vor.u32 %v1929_v30, %v1928_v9  ;;  %v2040_v25 = vor.u32 %v2039_v49, %v1926_v10 }
 0x275   : > { %v1703_v39 = vpop.f32.mrf.mxu0 }
 0x276   : > { %v13930_v27 = vpack.c.bf16 %v1850_v55, %v1849_v56  ;;  %v13934_v12 = vsel %vm13231_vm6, 0, %v1931_v21  ;;  %v13938_v22 = vsel %vm13148_vm2, %v2040_v25, 0  ;;  %v1819_v7 = vadd.f32 %v13779_v33, %v1780_v58 }
 0x277   : > { %v1704_v34 = vpop.f32.mrf.mxu0  ;;  %2413 = vmatmul.mubr.bf16.gmra.mxu1 %v13934_v12  ;;  %11663 = vmatprep.mubr.bf16.mxu0 %v13938_v22 }
 0x278   : > { %v1781_v3 = vadd.f32 %v1704_v34, %v13751_v38  ;;  %2420 = vmatprep.mubr.bf16.mxu1 %v13930_v27  ;;  %v1933_v35 = vshrl.u32 %v13930_v27, 16  ;;  %v1936_v41 = vshll.u32 %v13930_v27, 16  ;;  %v1851_v28 = vmax.f32 %v1819_v7, 0.0 }
 0x279   : > { %v1706_v51 = vpop.f32.mrf.mxu0 }
 0x27a   : > { %v1820_v15 = vadd.f32 %v13779_v33, %v1781_v3  ;;  %v1935_v10 = vrot.slane %v1933_v35, 7  ;;  %v2041_v30 = vrot.slane %v1936_v41, 1 }
 0x27b   : > { %v1709_v37 = vpop.f32.mrf.mxu0 }
 0x27c   : > { %v1852_v9 = vmax.f32 %v1820_v15, 0.0  ;;  %v1782_v49 = vadd.f32 %v1709_v37, %v13753_v44  ;;  %v1938_v56 = vor.u32 %v1936_v41, %v1935_v10  ;;  %v2042_v6 = vor.u32 %v2041_v30, %v1933_v35 }
 0x27d   : > { %v1711_v55 = vpop.f32.mrf.mxu0 }
 0x27e   : > { %v13949_v38 = vpack.c.bf16 %v1852_v9, %v1851_v28  ;;  %v13953_v58 = vsel %vm13231_vm6, 0, %v1938_v56  ;;  %v13957_v21 = vsel %vm13148_vm2, %v2042_v6, 0  ;;  %v1821_v25 = vadd.f32 %v13779_v33, %v1782_v49 }
 0x27f   : > { %v1712_v39 = vpop.f32.mrf.mxu0  ;;  %2421 = vmatmul.mubr.bf16.gmra.mxu1 %v13953_v58  ;;  %11664 = vmatmul.mubr.bf16.gmra.mxu0 %v13957_v21 }
 0x280   : > { %v1783_v44 = vadd.f32 %v1712_v39, %v13755_v24  ;;  %2428 = vmatprep.mubr.bf16.mxu1 %v13949_v38  ;;  %v1940_v7 = vshrl.u32 %v13949_v38, 16  ;;  %v1943_v34 = vshll.u32 %v13949_v38, 16  ;;  %v1853_v15 = vmax.f32 %v1821_v25, 0.0 }
 0x281   : > { %v1714_v3 = vpop.f32.mrf.mxu0 }
 0x282   : > { %v1822_v35 = vadd.f32 %v13779_v33, %v1783_v44  ;;  %v1942_v41 = vrot.slane %v1940_v7, 7  ;;  %v2043_v51 = vrot.slane %v1943_v34, 1 }
 0x283   : > { %v1717_v10 = vpop.f32.mrf.mxu0 }
 0x284   : > { %v1854_v30 = vmax.f32 %v1822_v35, 0.0  ;;  %v1784_v28 = vadd.f32 %v1717_v10, %v13759_v63  ;;  %v1945_v37 = vor.u32 %v1943_v34, %v1942_v41  ;;  %v2044_v9 = vor.u32 %v2043_v51, %v1940_v7 }
 0x285   : > { %v1719_v49 = vpop.f32.mrf.mxu0 }
 0x286   : > { %v13968_v24 = vpack.c.bf16 %v1854_v30, %v1853_v15  ;;  %v13972_v56 = vsel %vm13231_vm6, 0, %v1945_v37  ;;  %v13976_v6 = vsel %vm13148_vm2, %v2044_v9, 0  ;;  %v1823_v55 = vadd.f32 %v13779_v33, %v1784_v28 }
 0x287   : > { %v1720_v25 = vpop.f32.mrf.mxu0  ;;  %2429 = vmatmul.mubr.bf16.gmra.mxu1 %v13972_v56  ;;  %11667 = vmatprep.mubr.bf16.mxu0 %v13976_v6 }
 0x288   : > { %v1785_v63 = vadd.f32 %v1720_v25, %v13765_v45  ;;  %2436 = vmatprep.mubr.bf16.mxu1 %v13968_v24  ;;  %v1947_v39 = vshrl.u32 %v13968_v24, 16  ;;  %v1950_v44 = vshll.u32 %v13968_v24, 16  ;;  %v1855_v41 = vmax.f32 %v1823_v55, 0.0 }
 0x289   : > { %v1722_v7 = vpop.f32.mrf.mxu0 }
 0x28a   : > { %v1824_v34 = vadd.f32 %v13779_v33, %v1785_v63  ;;  %v1949_v3 = vrot.slane %v1947_v39, 7  ;;  %v2045_v35 = vrot.slane %v1950_v44, 1 }
 0x28b   : > { %v1725_v51 = vpop.f32.mrf.mxu0 }
 0x28c   : > { %v1856_v15 = vmax.f32 %v1824_v34, 0.0  ;;  %v1786_v10 = vadd.f32 %v1725_v51, %v13770_v61  ;;  %v1952_v30 = vor.u32 %v1950_v44, %v1949_v3  ;;  %v2046_v28 = vor.u32 %v2045_v35, %v1947_v39 }
 0x28d   : > { %v1727_v37 = vpop.f32.mrf.mxu0 }
 0x28e   : > { %v13987_v45 = vpack.c.bf16 %v1856_v15, %v1855_v41  ;;  %v13991_v9 = vsel %vm13231_vm6, 0, %v1952_v30  ;;  %v13995_v49 = vsel %vm13148_vm2, %v2046_v28, 0  ;;  %v1825_v25 = vadd.f32 %v13779_v33, %v1786_v10 }
 0x28f   : > { %v1728_v55 = vpop.f32.mrf.mxu0  ;;  %2437 = vmatmul.mubr.bf16.gmra.mxu1 %v13991_v9  ;;  %11668 = vmatmul.mubr.bf16.gmra.mxu0 %v13995_v49 }
 0x290   : > { %v1787_v61 = vadd.f32 %v1728_v55, %v13774_v36  ;;  %2444 = vmatprep.mubr.bf16.mxu1 %v13987_v45  ;;  %v1954_v63 = vshrl.u32 %v13987_v45, 16  ;;  %v1957_v39 = vshll.u32 %v13987_v45, 16  ;;  %v1857_v35 = vmax.f32 %v1825_v25, 0.0 }
 0x291   : > { %v1730_v44 = vpop.f32.mrf.mxu0 }
 0x292   : > { %v1826_v7 = vadd.f32 %v13779_v33, %v1787_v61  ;;  %v1956_v34 = vrot.slane %v1954_v63, 7  ;;  %v2047_v3 = vrot.slane %v1957_v39, 1 }
 0x293   : > { %v1733_v41 = vpop.f32.mrf.mxu0 }
 0x294   : > { %v1858_v51 = vmax.f32 %v1826_v7, 0.0  ;;  %v1788_v15 = vadd.f32 %v1733_v41, %v13776_v52  ;;  %v1959_v10 = vor.u32 %v1957_v39, %v1956_v34  ;;  %v2048_v30 = vor.u32 %v2047_v3, %v1954_v63 }
 0x295   : > { %v1735_v28 = vpop.f32.mrf.mxu0 }
 0x296   : > { %v14006_v36 = vpack.c.bf16 %v1858_v51, %v1857_v35  ;;  %v14010_v37 = vsel %vm13231_vm6, 0, %v1959_v10  ;;  %v14014_v55 = vsel %vm13148_vm2, %v2048_v30, 0  ;;  %v1827_v61 = vadd.f32 %v13779_v33, %v1788_v15 }
 0x297   : > { %v1736_v25 = vpop.f32.mrf.mxu0  ;;  %2445 = vmatmul.mubr.bf16.gmra.mxu1 %v14010_v37  ;;  %11671 = vmatprep.mubr.bf16.mxu0 %v14014_v55 }
 0x298   : > { %v1789_v52 = vadd.f32 %v1736_v25, %v13782_v26  ;;  %2452 = vmatprep.mubr.bf16.mxu1 %v14006_v36  ;;  %v1961_v63 = vshrl.u32 %v14006_v36, 16  ;;  %v1964_v39 = vshll.u32 %v14006_v36, 16  ;;  %v1859_v35 = vmax.f32 %v1827_v61, 0.0 }
 0x299   : > { %v1738_v44 = vpop.f32.mrf.mxu0 }
 0x29a   : > { %v1828_v7 = vadd.f32 %v13779_v33, %v1789_v52  ;;  %v1963_v34 = vrot.slane %v1961_v63, 7  ;;  %v2049_v3 = vrot.slane %v1964_v39, 1 }
 0x29b   : > { %v1741_v41 = vpop.f32.mrf.mxu0 }
 0x29c   : > { %v1860_v51 = vmax.f32 %v1828_v7, 0.0  ;;  %v1790_v15 = vadd.f32 %v1741_v41, %v13786_v23  ;;  %v1966_v10 = vor.u32 %v1964_v39, %v1963_v34  ;;  %v2050_v30 = vor.u32 %v2049_v3, %v1961_v63 }
 0x29d   : > { %v1743_v28 = vpop.f32.mrf.mxu0 }
 0x29e   : > { %v14025_v26 = vpack.c.bf16 %v1860_v51, %v1859_v35  ;;  %v14029_v25 = vsel %vm13231_vm6, 0, %v1966_v10  ;;  %v14033_v44 = vsel %vm13148_vm2, %v2050_v30, 0  ;;  %v1829_v52 = vadd.f32 %v13779_v33, %v1790_v15 }
 0x29f   : > { %v1744_v61 = vpop.f32.mrf.mxu0  ;;  %2453 = vmatmul.mubr.bf16.gmra.mxu1 %v14029_v25  ;;  %11672 = vmatmul.mubr.bf16.gmra.mxu0 %v14033_v44 }
 0x2a0   : > { %v1791_v23 = vadd.f32 %v1744_v61, %v13792_v32  ;;  %2460 = vmatprep.mubr.bf16.mxu1 %v14025_v26  ;;  %v1968_v63 = vshrl.u32 %v14025_v26, 16  ;;  %v1971_v39 = vshll.u32 %v14025_v26, 16  ;;  %v1861_v41 = vmax.f32 %v1829_v52, 0.0 }
 0x2a1   : > { %v1746_v7 = vpop.f32.mrf.mxu0 }
 0x2a2   : > { %v1830_v34 = vadd.f32 %v13779_v33, %v1791_v23  ;;  %v1970_v3 = vrot.slane %v1968_v63, 7  ;;  %v2051_v35 = vrot.slane %v1971_v39, 1 }
 0x2a3   : > { %v1749_v51 = vpop.f32.mrf.mxu0 }
 0x2a4   : > { %v1862_v15 = vmax.f32 %v1830_v34, 0.0  ;;  %v1792_v10 = vadd.f32 %v1749_v51, %v13800_v2  ;;  %v1973_v30 = vor.u32 %v1971_v39, %v1970_v3  ;;  %v2052_v28 = vor.u32 %v2051_v35, %v1968_v63 }
 0x2a5   : > { %v1751_v0 = vpop.f32.mrf.mxu0 }
 0x2a6   : > { %v14044_v32 = vpack.c.bf16 %v1862_v15, %v1861_v41  ;;  %v14048_v61 = vsel %vm13231_vm6, 0, %v1973_v30  ;;  %v14052_v7 = vsel %vm13148_vm2, %v2052_v28, 0  ;;  %v1831_v23 = vadd.f32 %v13779_v33, %v1792_v10 }
 0x2a7   : > { %17373 = vst [vmem:[#allocation24_spill] sm:$0xff] %v14048_v61  ;;  %v1752_v52 = vpop.f32.mrf.mxu0  ;;  %2461 = vmatmul.mubr.bf16.gmra.mxu1 %v14048_v61  ;;  %11675 = vmatprep.mubr.bf16.mxu0 %v14052_v7 }
 0x2a8   : > { %v1793_v2 = vadd.f32 %v1752_v52, %v13816_v53  ;;  %2468 = vmatprep.mubr.bf16.mxu1 %v14044_v32  ;;  %v1975_v0 = vshrl.u32 %v14044_v32, 16  ;;  %v1978_v63 = vshll.u32 %v14044_v32, 16  ;;  %v1863_v41 = vmax.f32 %v1831_v23, 0.0 }
 0x2a9   : > { %v1754_v39 = vpop.f32.mrf.mxu0 }
 0x2aa   : > { %v1832_v34 = vadd.f32 %v13779_v33, %v1793_v2  ;;  %v1977_v3 = vrot.slane %v1975_v0, 7  ;;  %v2053_v35 = vrot.slane %v1978_v63, 1 }
 0x2ab   : > { %v1757_v51 = vpop.f32.mrf.mxu0 }
 0x2ac   : > { %v1864_v15 = vmax.f32 %v1832_v34, 0.0  ;;  %v1794_v10 = vadd.f32 %v1757_v51, %v13825_v5  ;;  %v1980_v30 = vor.u32 %v1978_v63, %v1977_v3  ;;  %v2054_v28 = vor.u32 %v2053_v35, %v1975_v0 }
 0x2ad   : > { %v1759_v61 = vpop.f32.mrf.mxu0 }
 0x2ae   : > { %v14063_v53 = vpack.c.bf16 %v1864_v15, %v1863_v41  ;;  %v14067_v52 = vsel %vm13231_vm6, 0, %v1980_v30  ;;  %v14071_v39 = vsel %vm13148_vm2, %v2054_v28, 0  ;;  %v1833_v5 = vadd.f32 %v13779_v33, %v1794_v10 }
 0x2af   : > { %v1760_v2 = vpop.f32.mrf.mxu0  ;;  %2469 = vmatmul.mubr.bf16.gmra.mxu1 %v14067_v52  ;;  %11676 = vmatmul.mubr.bf16.gmra.mxu0 %v14071_v39 }
 0x2b0   : > { %v1795_v23 = vadd.f32 %v1760_v2, %v13841_v48  ;;  %2476 = vmatprep.mubr.bf16.mxu1 %v14063_v53  ;;  %v1982_v61 = vshrl.u32 %v14063_v53, 16  ;;  %v1985_v0 = vshll.u32 %v14063_v53, 16  ;;  %v1865_v41 = vmax.f32 %v1833_v5, 0.0 }
 0x2b1   : > { %v1762_v63 = vpop.f32.mrf.mxu0 }
 0x2b2   : > { %v1834_v34 = vadd.f32 %v13779_v33, %v1795_v23  ;;  %v1984_v3 = vrot.slane %v1982_v61, 7  ;;  %v2055_v35 = vrot.slane %v1985_v0, 1 }
 0x2b4   : > { %v1866_v51 = vmax.f32 %v1834_v34, 0.0  ;;  %v1987_v15 = vor.u32 %v1985_v0, %v1984_v3  ;;  %v2056_v30 = vor.u32 %v2055_v35, %v1982_v61  ;;  %v17374_v3 = vmov 0   ;;  %v12405_v35 = vld [vmem:[#allocation6 + $0x230] sm:$0xff]  }
 0x2b6   : > { %v14081_v28 = vpack.c.bf16 %v1866_v51, %v1865_v41  ;;  %v14085_v48 = vsel %vm13231_vm6, 0, %v1987_v15  ;;  %v14089_v10 = vsel %vm13148_vm2, %v2056_v30, 0  ;;  %v12408_v41 = vld [vmem:[#allocation6 + $0x1b8] sm:$0xff]   ;;  %v12409_v51 = vld [vmem:[#allocation6 + $0x1f0] sm:$0xff]   ;;  %v12406_v15 = vld [vmem:[#allocation6 + $0x228] sm:$0xff]  }
 0x2b7   : > { %2477 = vmatmul.mubr.bf16.gmra.mxu1 %v14085_v48  ;;  %11679 = vmatprep.mubr.bf16.mxu0 %v14089_v10  ;;  %v12410_v30 = vld [vmem:[#allocation6 + $0x1b0] sm:$0xff]  }
 0x2b8   : > { %2484 = vmatprep.mubr.bf16.mxu1 %v14081_v28  ;;  %v1989_v33 = vshrl.u32 %v14081_v28, 16  ;;  %v1992_v2 = vshll.u32 %v14081_v28, 16 }
 0x2ba   : > { %v1991_v5 = vrot.slane %v1989_v33, 7  ;;  %v2057_v23 = vrot.slane %v1992_v2, 1 }
 0x2bc   : > { %v1994_v61 = vor.u32 %v1992_v2, %v1991_v5  ;;  %v2058_v0 = vor.u32 %v2057_v23, %v1989_v33  ;;  %v12411_v33 = vld [vmem:[#allocation6 + $0x1e8] sm:$0xff]   ;;  %v12415_v5 = vld [vmem:[#allocation6 + $0x220] sm:$0xff]   ;;  %v12416_v23 = vld [vmem:[#allocation6 + $0x1d8] sm:$0xff]  }
 0x2bd   : > { %v12412_v2 = vld [vmem:[#allocation6 + $0x1a8] sm:$0xff]  }
 0x2be   : > { %v14098_v63 = vsel %vm13231_vm6, 0, %v1994_v61  ;;  %v14102_v34 = vsel %vm13148_vm2, %v2058_v0, 0  ;;  %v12417_v61 = vld [vmem:[#allocation6 + $0x198] sm:$0xff]   ;;  %v12418_v0 = vld [vmem:[#allocation6 + $0x1d0] sm:$0xff]  }
 0x2bf   : > { %2485 = vmatmul.mubr.bf16.gmra.mxu1 %v14098_v63  ;;  %11680 = vmatmul.mubr.bf16.gmra.mxu0 %v14102_v34 }
 0x2c0   : > { %2830 = vmatprep.mubr.bf16.mxu1 %v17374_v3  ;;  %11699 = vmatprep.mubr.bf16.mxu0 %v13219_v46 }
 0x2c7   : > { %2831 = vmatmul.mubr.bf16.vlgmr.msra.gmra.mxu1 %v13302_v59  ;;  %11700 = vmatmul.mubr.bf16.vlgmr.msra.gmra.mxu0 %v13813_v14  ;;  %v12413_v14 = vld [vmem:[#allocation6 + $0x1e0] sm:$0xff]  }
 0x2c8   : > { %11732 = vmatpush3.bf16.msra.mxu1 %v13888_v17  ;;  %2838 = vmatprep.mubr.bf16.mxu1 %v13789_v50  ;;  %v12414_v50 = vld [vmem:[#allocation6 + $0x1a0] sm:$0xff]   ;;  %v12424_v17 = vld [vmem:[#allocation6 + $0x218] sm:$0xff]  }
 0x2c9   : > { %11703 = vmatprep.mubr.bf16.mxu0 %v13837_v31  ;;  %11733 = vmatprep.subr.bf16.mxu1 %v12405_v35 }
 0x2ca   : > { %10276 = vmatpush3.bf16.msra.mxu0 %v12408_v41  ;;  %v12426_v41 = vld [vmem:[#allocation6 + $0x208] sm:$0xff]  }
 0x2cb   : > { %10277 = vmatprep.subr.bf16.mxu0 %v12409_v51  ;;  %v12420_v51 = vld [vmem:[#allocation6 + $0x1c8] sm:$0xff]  }
 0x2cc   : > { %11734 = vmatpush3.bf16.msra.mxu1 %v12405_v35  ;;  %v12419_v35 = vld [vmem:[#allocation6 + $0x190] sm:$0xff]  }
 0x2cd   : > { %11735 = vmatprep.subr.bf16.mxu1 %v12406_v15 }
 0x2ce   : > { %10278 = vmatpush3.bf16.msra.mxu0 %v12410_v30  ;;  %v12427_v30 = vld [vmem:[#allocation6 + $0x200] sm:$0xff]  }
 0x2cf   : > { %2839 = vmatmul.mubr.bf16.gmra.mxu1 %v13807_v19  ;;  %11704 = vmatmul.mubr.bf16.gmra.mxu0 %v13861_v20  ;;  %v12425_v19 = vld [vmem:[#allocation6 + $0x210] sm:$0xff]  }
 0x2d0   : > { %2846 = vmatprep.mubr.bf16.mxu1 %v13803_v11  ;;  %11707 = vmatprep.mubr.bf16.mxu0 %v13878_v40 }
 0x2d1   : > { %11736 = vmatpush3.bf16.msra.mxu1 %v12406_v15  ;;  %10279 = vmatprep.subr.bf16.mxu0 %v12411_v33  ;;  %v12421_v15 = vld [vmem:[#allocation6 + $0x188] sm:$0xff]   ;;  %v12422_v33 = vld [vmem:[#allocation6 + $0x1c0] sm:$0xff]  }
 0x2d2   : > { %10280 = vmatpush3.bf16.msra.mxu0 %v12412_v2  ;;  %11737 = vmatprep.subr.bf16.mxu1 %v12415_v5  ;;  %v12423_v2 = vld [vmem:[#allocation6 + $0x180] sm:$0xff]  }
 0x2d3   : > { %10281 = vmatprep.subr.bf16.mxu0 %v12413_v14 }
 0x2d5   : > { %11738 = vmatpush3.bf16.msra.mxu1 %v12415_v5 }
 0x2d6   : > { %10282 = vmatpush3.bf16.msra.mxu0 %v12414_v50  ;;  %11739 = vmatprep.subr.bf16.mxu1 %v12424_v17 }
 0x2d7   : > { %2847 = vmatmul.mubr.bf16.gmra.mxu1 %v13832_v43  ;;  %11708 = vmatmul.mubr.bf16.gmra.mxu0 %v13899_v29 }
 0x2d8   : > { %2854 = vmatprep.mubr.bf16.mxu1 %v13828_v8  ;;  %11711 = vmatprep.mubr.bf16.mxu0 %v13919_v57 }
 0x2d9   : > { %10283 = vmatprep.subr.bf16.mxu0 %v12416_v23  ;;  %11740 = vmatpush3.bf16.msra.mxu1 %v12424_v17 }
 0x2da   : > { %10284 = vmatpush3.bf16.msra.mxu0 %v12417_v61  ;;  %11741 = vmatprep.subr.bf16.mxu1 %v12425_v19 }
 0x2db   : > { %10285 = vmatprep.subr.bf16.mxu0 %v12418_v0 }
 0x2dd   : > { %11742 = vmatpush3.bf16.msra.mxu1 %v12425_v19 }
 0x2de   : > { %10286 = vmatpush3.bf16.msra.mxu0 %v12419_v35  ;;  %11743 = vmatprep.subr.bf16.mxu1 %v12426_v41 }
 0x2df   : > { %2855 = vmatmul.mubr.bf16.gmra.mxu1 %v13855_v4  ;;  %11712 = vmatmul.mubr.bf16.gmra.mxu0 %v13938_v22 }
 0x2e0   : > { %2862 = vmatprep.mubr.bf16.mxu1 %v13851_v1  ;;  %11715 = vmatprep.mubr.bf16.mxu0 %v13957_v21 }
 0x2e1   : > { %10287 = vmatprep.subr.bf16.mxu0 %v12420_v51  ;;  %11744 = vmatpush3.bf16.msra.mxu1 %v12426_v41 }
 0x2e2   : > { %10288 = vmatpush3.bf16.msra.mxu0 %v12421_v15  ;;  %11745 = vmatprep.subr.bf16.mxu1 %v12427_v30 }
 0x2e3   : > { %10289 = vmatprep.subr.bf16.mxu0 %v12422_v33 }
 0x2e5   : > { %11746 = vmatpush3.bf16.msra.mxu1 %v12427_v30 }
 0x2e6   : > { %10290 = vmatpush3.bf16.msra.mxu0 %v12423_v2 }
 0x2e7   : > { %2863 = vmatmul.mubr.bf16.gmra.mxu1 %v13874_v18  ;;  %11716 = vmatmul.mubr.bf16.gmra.mxu0 %v13976_v6 }
 0x2e8   : > { %2870 = vmatprep.mubr.bf16.mxu1 %v13870_v42  ;;  %11719 = vmatprep.mubr.bf16.mxu0 %v13995_v49 }
 0x2ef   : > { %2871 = vmatmul.mubr.bf16.gmra.mxu1 %v13895_v13  ;;  %11720 = vmatmul.mubr.bf16.gmra.mxu0 %v14014_v55 }
 0x2f0   : > { %2878 = vmatprep.mubr.bf16.mxu1 %v13891_v62  ;;  %11723 = vmatprep.mubr.bf16.mxu0 %v14033_v44 }
 0x2f7   : > { %2879 = vmatmul.mubr.bf16.gmra.mxu1 %v13915_v47  ;;  %11724 = vmatmul.mubr.bf16.gmra.mxu0 %v14052_v7 }
 0x2f8   : > { %2886 = vmatprep.mubr.bf16.mxu1 %v13911_v60  ;;  %11727 = vmatprep.mubr.bf16.mxu0 %v14071_v39 }
 0x2ff   : > { %2887 = vmatmul.mubr.bf16.gmra.mxu1 %v13934_v12  ;;  %11728 = vmatmul.mubr.bf16.gmra.mxu0 %v14089_v10 }
 0x300   : > { %2894 = vmatprep.mubr.bf16.mxu1 %v13930_v27  ;;  %3345 = vmatprep.mubr.bf16.mxu0 %v13803_v11 }
 0x307   : > { %v10019_v5 = vpop.f32.mrf.mxu1  ;;  %2895 = vmatmul.mubr.bf16.gmra.mxu1 %v13953_v58  ;;  %3346 = vmatmul.mubr.bf16.vlgmr.msra.gmra.mxu0 %v13832_v43 }
 0x308   : > { %2902 = vmatprep.mubr.bf16.mxu1 %v13949_v38  ;;  %3353 = vmatprep.mubr.bf16.mxu0 %v13828_v8 }
 0x309   : > { %v10020_v14 = vpop.f32.mrf.mxu1 }
 0x30a   : > { %v10021_v50 = vadd.f32 %v10020_v14, %v10019_v5 }
 0x30b   : > { %v10022_v17 = vpop.f32.mrf.mxu1 }
 0x30d   : > { %v10023_v23 = vpop.f32.mrf.mxu1 }
 0x30e   : > { %v14145_v61 = vadd.f32 %v10023_v23, %v10022_v17 }
 0x30f   : > { %v10025_v19 = vpop.f32.mrf.mxu1  ;;  %2903 = vmatmul.mubr.bf16.gmra.mxu1 %v13972_v56  ;;  %3354 = vmatmul.mubr.bf16.gmra.mxu0 %v13855_v4 }
 0x310   : > { %v11653_v11 = vpop.f32.mrf.mxu0  ;;  %2910 = vmatprep.mubr.bf16.mxu1 %v13968_v24  ;;  %3361 = vmatprep.mubr.bf16.mxu0 %v13851_v1 }
 0x311   : > { %v10026_v43 = vpop.f32.mrf.mxu1 }
 0x312   : > { %v10027_v0 = vadd.f32 %v10026_v43, %v10025_v19  ;;  %v2527_v35 = vpop.f32.mrf.mxu0 }
 0x313   : > { %v14151_v8 = vadd.f32 %v10021_v50, %v2527_v35  ;;  %v10028_v41 = vpop.f32.mrf.mxu1 }
 0x314   : > { %v14153_v51 = vadd.f32 %v11653_v11, %v10027_v0  ;;  %v11654_v33 = vpop.f32.mrf.mxu0 }
 0x315   : > { %v10029_v15 = vpop.f32.mrf.mxu1 }
 0x316   : > { %v10030_v30 = vadd.f32 %v10029_v15, %v10028_v41  ;;  %v14161_v50 = vpop.f32.mrf.mxu0 }
 0x317   : > { %v10031_v2 = vpop.f32.mrf.mxu1  ;;  %2911 = vmatmul.mubr.bf16.gmra.mxu1 %v13991_v9  ;;  %3362 = vmatmul.mubr.bf16.gmra.mxu0 %v13874_v18 }
 0x318   : > { %v14157_v4 = vadd.f32 %v11654_v33, %v10030_v30  ;;  %2918 = vmatprep.mubr.bf16.mxu1 %v13987_v45  ;;  %3369 = vmatprep.mubr.bf16.mxu0 %v13870_v42 }
 0x319   : > { %v10032_v1 = vpop.f32.mrf.mxu1 }
 0x31a   : > { %v10033_v5 = vadd.f32 %v10032_v1, %v10031_v2 }
 0x31b   : > { %v10034_v14 = vpop.f32.mrf.mxu1 }
 0x31d   : > { %v10035_v17 = vpop.f32.mrf.mxu1 }
 0x31e   : > { %v14163_v23 = vadd.f32 %v10035_v17, %v10034_v14 }
 0x31f   : > { %v10037_v19 = vpop.f32.mrf.mxu1  ;;  %v11657_v11 = vpop.f32.mrf.mxu0  ;;  %2919 = vmatmul.mubr.bf16.gmra.mxu1 %v14010_v37  ;;  %3370 = vmatmul.mubr.bf16.gmra.mxu0 %v13895_v13 }
 0x320   : > { %2926 = vmatprep.mubr.bf16.mxu1 %v14006_v36  ;;  %3377 = vmatprep.mubr.bf16.mxu0 %v13891_v62 }
 0x321   : > { %v10038_v18 = vpop.f32.mrf.mxu1  ;;  %v2543_v42 = vpop.f32.mrf.mxu0 }
 0x322   : > { %v10039_v43 = vadd.f32 %v10038_v18, %v10037_v19  ;;  %v14169_v0 = vadd.f32 %v10033_v5, %v2543_v42  ;;  %v17375_v42 = vld [vmem:[#allocation24_spill] sm:$0xff] }
 0x323   : > { %v10040_v35 = vpop.f32.mrf.mxu1  ;;  %v11658_v33 = vpop.f32.mrf.mxu0 }
 0x324   : > { %v14171_v41 = vadd.f32 %v11657_v11, %v10039_v43 }
 0x325   : > { %v10041_v15 = vpop.f32.mrf.mxu1  ;;  %v14179_v14 = vpop.f32.mrf.mxu0 }
 0x326   : > { %v10042_v30 = vadd.f32 %v10041_v15, %v10040_v35 }
 0x327   : > { %v10043_v2 = vpop.f32.mrf.mxu1  ;;  %2927 = vmatmul.mubr.bf16.gmra.mxu1 %v14029_v25  ;;  %3378 = vmatmul.mubr.bf16.gmra.mxu0 %v13915_v47 }
 0x328   : > { %v14175_v13 = vadd.f32 %v11658_v33, %v10042_v30  ;;  %2934 = vmatprep.mubr.bf16.mxu1 %v14025_v26  ;;  %3385 = vmatprep.mubr.bf16.mxu0 %v13911_v60 }
 0x329   : > { %v10044_v62 = vpop.f32.mrf.mxu1 }
 0x32a   : > { %v10045_v1 = vadd.f32 %v10044_v62, %v10043_v2 }
 0x32b   : > { %v10046_v5 = vpop.f32.mrf.mxu1 }
 0x32d   : > { %v10047_v17 = vpop.f32.mrf.mxu1 }
 0x32e   : > { %v14181_v19 = vadd.f32 %v10047_v17, %v10046_v5 }
 0x32f   : > { %v10049_v11 = vpop.f32.mrf.mxu1  ;;  %v11661_v18 = vpop.f32.mrf.mxu0  ;;  %2935 = vmatmul.mubr.bf16.gmra.mxu1 %v17375_v42  ;;  %3386 = vmatmul.mubr.bf16.gmra.mxu0 %v13934_v12 }
 0x330   : > { %2942 = vmatprep.mubr.bf16.mxu1 %v14044_v32  ;;  %3393 = vmatprep.mubr.bf16.mxu0 %v13930_v27 }
 0x331   : > { %v10050_v47 = vpop.f32.mrf.mxu1  ;;  %v2559_v60 = vpop.f32.mrf.mxu0 }
 0x332   : > { %v10051_v43 = vadd.f32 %v10050_v47, %v10049_v11  ;;  %v14187_v35 = vadd.f32 %v10045_v1, %v2559_v60 }
 0x333   : > { %v10052_v15 = vpop.f32.mrf.mxu1  ;;  %v11662_v62 = vpop.f32.mrf.mxu0 }
 0x334   : > { %v14189_v30 = vadd.f32 %v11661_v18, %v10051_v43 }
 0x335   : > { %v10053_v33 = vpop.f32.mrf.mxu1  ;;  %v14197_v11 = vpop.f32.mrf.mxu0 }
 0x336   : > { %v10054_v2 = vadd.f32 %v10053_v33, %v10052_v15 }
 0x337   : > { %v10055_v5 = vpop.f32.mrf.mxu1  ;;  %2943 = vmatmul.mubr.bf16.gmra.mxu1 %v14067_v52  ;;  %3394 = vmatmul.mubr.bf16.gmra.mxu0 %v13953_v58 }
 0x338   : > { %v14193_v12 = vadd.f32 %v11662_v62, %v10054_v2  ;;  %2950 = vmatprep.mubr.bf16.mxu1 %v14063_v53  ;;  %3401 = vmatprep.mubr.bf16.mxu0 %v13949_v38 }
 0x339   : > { %v10056_v27 = vpop.f32.mrf.mxu1 }
 0x33a   : > { %v10057_v1 = vadd.f32 %v10056_v27, %v10055_v5 }
 0x33b   : > { %v10058_v17 = vpop.f32.mrf.mxu1 }
 0x33d   : > { %v10059_v18 = vpop.f32.mrf.mxu1 }
 0x33e   : > { %v10060_v47 = vadd.f32 %v10059_v18, %v10058_v17 }
 0x33f   : > { %v10061_v60 = vpop.f32.mrf.mxu1  ;;  %v11665_v43 = vpop.f32.mrf.mxu0  ;;  %2951 = vmatmul.mubr.bf16.gmra.mxu1 %v14085_v48  ;;  %3402 = vmatmul.mubr.bf16.gmra.mxu0 %v13972_v56 }
 0x340   : > { %3409 = vmatprep.mubr.bf16.mxu0 %v13968_v24  ;;  %11747 = vmatprep.mubr.bf16.mxu1 %v13837_v31 }
 0x341   : > { %v10062_v58 = vpop.f32.mrf.mxu1  ;;  %v2575_v15 = vpop.f32.mrf.mxu0 }
 0x342   : > { %v10063_v38 = vadd.f32 %v10062_v58, %v10061_v60  ;;  %v14203_v33 = vadd.f32 %v10057_v1, %v2575_v15 }
 0x343   : > { %v10064_v2 = vpop.f32.mrf.mxu1  ;;  %v11666_v62 = vpop.f32.mrf.mxu0 }
 0x344   : > { %v14205_v5 = vadd.f32 %v11665_v43, %v10063_v38 }
 0x345   : > { %v10065_v27 = vpop.f32.mrf.mxu1  ;;  %v2578_v17 = vpop.f32.mrf.mxu0 }
 0x346   : > { %v10066_v18 = vadd.f32 %v10065_v27, %v10064_v2  ;;  %v14207_v54 = vadd.f32 %v10060_v47, %v2578_v17 }
 0x347   : > { %v10067_v16 = vpop.f32.mrf.mxu1  ;;  %3410 = vmatmul.mubr.bf16.gmra.mxu0 %v13991_v9  ;;  %11748 = vmatmul.mubr.bf16.vlgmr.msra.gmra.mxu1 %v13861_v20 }
 0x348   : > { %v14211_v31 = vadd.f32 %v11666_v62, %v10066_v18  ;;  %3417 = vmatprep.mubr.bf16.mxu0 %v13987_v45  ;;  %11751 = vmatprep.mubr.bf16.mxu1 %v13878_v40 }
 0x349   : > { %v10068_v24 = vpop.f32.mrf.mxu1 }
 0x34a   : > { %v10069_v56 = vadd.f32 %v10068_v24, %v10067_v16 }
 0x34b   : > { %v10070_v1 = vpop.f32.mrf.mxu1 }
 0x34d   : > { %v10071_v60 = vpop.f32.mrf.mxu1 }
 0x34e   : > { %v14215_v43 = vadd.f32 %v10071_v60, %v10070_v1 }
 0x34f   : > { %v10073_v58 = vpop.f32.mrf.mxu1  ;;  %v11669_v47 = vpop.f32.mrf.mxu0  ;;  %3418 = vmatmul.mubr.bf16.gmra.mxu0 %v14010_v37  ;;  %11752 = vmatmul.mubr.bf16.gmra.mxu1 %v13899_v29 }
 0x350   : > { %3425 = vmatprep.mubr.bf16.mxu0 %v14006_v36  ;;  %11755 = vmatprep.mubr.bf16.mxu1 %v13919_v57 }
 0x351   : > { %v10074_v20 = vpop.f32.mrf.mxu1  ;;  %v2591_v45 = vpop.f32.mrf.mxu0 }
 0x352   : > { %v10075_v9 = vadd.f32 %v10074_v20, %v10073_v58  ;;  %v14221_v40 = vadd.f32 %v10069_v56, %v2591_v45 }
 0x353   : > { %v10076_v16 = vpop.f32.mrf.mxu1  ;;  %v11670_v62 = vpop.f32.mrf.mxu0 }
 0x354   : > { %v14223_v15 = vadd.f32 %v11669_v47, %v10075_v9 }
 0x355   : > { %v10077_v38 = vpop.f32.mrf.mxu1  ;;  %v14231_v17 = vpop.f32.mrf.mxu0 }
 0x356   : > { %v10078_v2 = vadd.f32 %v10077_v38, %v10076_v16  ;;  %v12431_v16 = vld [vmem:[#allocation9 + $0x130] sm:$0xff]  }
 0x357   : > { %v10079_v27 = vpop.f32.mrf.mxu1  ;;  %3426 = vmatmul.mubr.bf16.gmra.mxu0 %v14029_v25  ;;  %11756 = vmatmul.mubr.bf16.gmra.mxu1 %v13938_v22  ;;  %v12428_v22 = vld [vmem:[#allocation9 + $0x138] sm:$0xff]   ;;  %v12432_v38 = vld [vmem:[#allocation9 + $0xf0] sm:$0xff]  }
 0x358   : > { %v14227_v29 = vadd.f32 %v11670_v62, %v10078_v2  ;;  %3433 = vmatprep.mubr.bf16.mxu0 %v14025_v26  ;;  %11759 = vmatprep.mubr.bf16.mxu1 %v13957_v21  ;;  %v12429_v21 = vld [vmem:[#allocation9 + $0x178] sm:$0xff]  }
 0x359   : > { %v10080_v57 = vpop.f32.mrf.mxu1  ;;  %v12430_v26 = vld [vmem:[#allocation9 + $0xf8] sm:$0xff]   ;;  %10411 = vmatprep.subr.bf16.mxu1 %v12428_v22  ;;  %11779 = vmatprep.subr.bf16.mxu0 %v12429_v21 }
 0x35a   : > { %v10081_v36 = vadd.f32 %v10080_v57, %v10079_v27  ;;  %10412 = vmatpush3.bf16.msra.mxu1 %v12430_v26  ;;  %11780 = vmatpush3.bf16.msra.mxu0 %v12429_v21 }
 0x35b   : > { %v10082_v37 = vpop.f32.mrf.mxu1  ;;  %10413 = vmatprep.subr.bf16.mxu1 %v12431_v16  ;;  %v12439_v16 = vld [vmem:[#allocation9 + $0x168] sm:$0xff]  }
 0x35d   : > { %v10083_v18 = vpop.f32.mrf.mxu1 }
 0x35e   : > { %v14233_v24 = vadd.f32 %v10083_v18, %v10082_v37  ;;  %10414 = vmatpush3.bf16.msra.mxu1 %v12432_v38  ;;  %v12435_v37 = vld [vmem:[#allocation9 + $0xe8] sm:$0xff]   ;;  %v12440_v38 = vld [vmem:[#allocation9 + $0xd8] sm:$0xff]  }
 0x35f   : > { %v10085_v56 = vpop.f32.mrf.mxu1  ;;  %v11673_v1 = vpop.f32.mrf.mxu0  ;;  %3434 = vmatmul.mubr.bf16.gmra.mxu0 %v17375_v42  ;;  %11760 = vmatmul.mubr.bf16.gmra.mxu1 %v13976_v6 }
 0x360   : > { %3441 = vmatprep.mubr.bf16.mxu0 %v14044_v32  ;;  %11763 = vmatprep.mubr.bf16.mxu1 %v13995_v49 }
 0x361   : > { %v10086_v25 = vpop.f32.mrf.mxu1  ;;  %v2607_v60 = vpop.f32.mrf.mxu0 }
 0x362   : > { %v10087_v58 = vadd.f32 %v10086_v25, %v10085_v56  ;;  %v14239_v47 = vadd.f32 %v10081_v36, %v2607_v60  ;;  %v12436_v60 = vld [vmem:[#allocation9 + $0x120] sm:$0xff]  }
 0x363   : > { %v10088_v20 = vpop.f32.mrf.mxu1  ;;  %v11674_v32 = vpop.f32.mrf.mxu0 }
 0x364   : > { %v14241_v42 = vadd.f32 %v11673_v1, %v10087_v58  ;;  %v12437_v58 = vld [vmem:[#allocation9 + $0xe0] sm:$0xff]  }
 0x365   : > { %v10089_v6 = vpop.f32.mrf.mxu1  ;;  %v14251_v57 = vpop.f32.mrf.mxu0 }
 0x366   : > { %v10090_v45 = vadd.f32 %v10089_v6, %v10088_v20 }
 0x367   : > { %v10091_v9 = vpop.f32.mrf.mxu1  ;;  %3442 = vmatmul.mubr.bf16.gmra.mxu0 %v14067_v52  ;;  %11764 = vmatmul.mubr.bf16.gmra.mxu1 %v14014_v55 }
 0x368   : > { %v14245_v49 = vadd.f32 %v11674_v32, %v10090_v45  ;;  %3449 = vmatprep.mubr.bf16.mxu0 %v14063_v53  ;;  %11767 = vmatprep.mubr.bf16.mxu1 %v14033_v44  ;;  %v12433_v44 = vld [vmem:[#allocation9 + $0x128] sm:$0xff]   ;;  %v12434_v53 = vld [vmem:[#allocation9 + $0x170] sm:$0xff]  }
 0x369   : > { %v10092_v2 = vpop.f32.mrf.mxu1  ;;  %10415 = vmatprep.subr.bf16.mxu1 %v12433_v44  ;;  %11781 = vmatprep.subr.bf16.mxu0 %v12434_v53 }
 0x36a   : > { %v10093_v62 = vadd.f32 %v10092_v2, %v10091_v9  ;;  %10416 = vmatpush3.bf16.msra.mxu1 %v12435_v37  ;;  %11782 = vmatpush3.bf16.msra.mxu0 %v12434_v53 }
 0x36b   : > { %v14249_v27 = vpop.f32.mrf.mxu1  ;;  %10417 = vmatprep.subr.bf16.mxu1 %v12436_v60  ;;  %11783 = vmatprep.subr.bf16.mxu0 %v12439_v16 }
 0x36d   : > { %v14253_v36 = vpop.f32.mrf.mxu1 }
 0x36e   : > { %10418 = vmatpush3.bf16.msra.mxu1 %v12437_v58  ;;  %11784 = vmatpush3.bf16.msra.mxu0 %v12439_v16  ;;  %v12441_v58 = vld [vmem:[#allocation9 + $0x110] sm:$0xff]  }
 0x36f   : > { %v10097_v52 = vpop.f32.mrf.mxu1  ;;  %v11677_v55 = vpop.f32.mrf.mxu0  ;;  %3450 = vmatmul.mubr.bf16.gmra.mxu0 %v14085_v48  ;;  %11768 = vmatmul.mubr.bf16.gmra.mxu1 %v14052_v7 }
 0x370   : > { %3457 = vmatprep.mubr.bf16.mxu0 %v14081_v28  ;;  %11771 = vmatprep.mubr.bf16.mxu1 %v14071_v39 }
 0x371   : > { %v10098_v18 = vpop.f32.mrf.mxu1  ;;  %v2623_v56 = vpop.f32.mrf.mxu0 }
 0x372   : > { %v10099_v1 = vadd.f32 %v10098_v18, %v10097_v52  ;;  %v14259_v22 = vadd.f32 %v10093_v62, %v2623_v56 }
 0x373   : > { %v10100_v21 = vpop.f32.mrf.mxu1  ;;  %v11678_v28 = vpop.f32.mrf.mxu0 }
 0x374   : > { %v14261_v48 = vadd.f32 %v11677_v55, %v10099_v1 }
 0x375   : > { %v10101_v7 = vpop.f32.mrf.mxu1  ;;  %v14271_v32 = vpop.f32.mrf.mxu0 }
 0x376   : > { %v10102_v26 = vadd.f32 %v10101_v7, %v10100_v21 }
 0x377   : > { %v10103_v25 = vpop.f32.mrf.mxu1  ;;  %3458 = vmatmul.mubr.bf16.gmra.mxu0 %v14098_v63  ;;  %11772 = vmatmul.mubr.bf16.gmra.mxu1 %v14089_v10 }
 0x378   : > { %v14265_v39 = vadd.f32 %v11678_v28, %v10102_v26  ;;  %11775 = vmatprep.mubr.bf16.mxu1 %v14102_v34  ;;  %3465 = vmatprep.mubr.bf16.mxu0 %v17374_v3  ;;  %v12438_v34 = vld [vmem:[#allocation9 + $0x118] sm:$0xff]  }
 0x379   : > { %v10104_v20 = vpop.f32.mrf.mxu1  ;;  %10419 = vmatprep.subr.bf16.mxu1 %v12438_v34 }
 0x37a   : > { %v10105_v6 = vadd.f32 %v10104_v20, %v10103_v25  ;;  %10420 = vmatpush3.bf16.msra.mxu1 %v12440_v38  ;;  %v2531_v38 = vadd.f32 %v14145_v61, %v14161_v50 }
 0x37b   : > { %v14269_v45 = vpop.f32.mrf.mxu1  ;;  %10421 = vmatprep.subr.bf16.mxu1 %v12441_v58 }
 0x37d   : > { %v14273_v9 = vpop.f32.mrf.mxu1 }
 0x37f   : > { %v10109_v63 = vpop.f32.mrf.mxu1  ;;  %v11681_v10 = vpop.f32.mrf.mxu0  ;;  %3466 = vmatmul.mubr.bf16.gmra.mxu0 %v13302_v59  ;;  %11776 = vmatmul.mubr.bf16.gmra.mxu1 %v13219_v46  ;;  %v12447_v46 = vld [vmem:[#allocation9 + $0x150] sm:$0xff]   ;;  %v12448_v59 = vld [vmem:[#allocation9 + $0x100] sm:$0xff]  }
 0x381   : > { %v10110_v2 = vpop.f32.mrf.mxu1  ;;  %v2639_v62 = vpop.f32.mrf.mxu0 }
 0x382   : > { %v10111_v52 = vadd.f32 %v10110_v2, %v10109_v63  ;;  %v14277_v55 = vadd.f32 %v10105_v6, %v2639_v62  ;;  %v12443_v63 = vld [vmem:[#allocation9 + $0x160] sm:$0xff]  }
 0x383   : > { %v10112_v44 = vpop.f32.mrf.mxu1  ;;  %v11682_v53 = vpop.f32.mrf.mxu0  ;;  %11785 = vmatprep.subr.bf16.mxu0 %v12443_v63 }
 0x384   : > { %v14279_v37 = vadd.f32 %v11681_v10, %v10111_v52  ;;  %v12442_v52 = vld [vmem:[#allocation9 + $0xd0] sm:$0xff]   ;;  %11786 = vmatpush3.bf16.msra.mxu0 %v12443_v63 }
 0x385   : > { %v10113_v18 = vpop.f32.mrf.mxu1  ;;  %v14281_v56 = vpop.f32.mrf.mxu0  ;;  %10422 = vmatpush3.bf16.msra.mxu1 %v12442_v52  ;;  %v12450_v52 = vld [vmem:[#allocation9 + $0x148] sm:$0xff]  }
 0x386   : > { %v10114_v1 = vadd.f32 %v10113_v18, %v10112_v44  ;;  %v12446_v18 = vld [vmem:[#allocation9 + $0x158] sm:$0xff]  }
 0x387   : > { %v10155_v21 = vpop.f32.mrf.mxu1  ;;  %v11701_v7 = vpop.f32.mrf.mxu0  ;;  %11787 = vmatprep.subr.bf16.mxu0 %v12446_v18 }
 0x388   : > { %v14283_v26 = vadd.f32 %v11682_v53, %v10114_v1  ;;  %11788 = vmatpush3.bf16.msra.mxu0 %v12446_v18 }
 0x389   : > { %v10156_v28 = vpop.f32.mrf.mxu1  ;;  %v2993_v25 = vpop.f32.mrf.mxu0  ;;  %11789 = vmatprep.subr.bf16.mxu0 %v12447_v46 }
 0x38a   : > { %v10157_v60 = vadd.f32 %v10156_v28, %v10155_v21 }
 0x38b   : > { %v10158_v20 = vpop.f32.mrf.mxu1  ;;  %v11702_v6 = vpop.f32.mrf.mxu0 }
 0x38c   : > { %v2833_v34 = vadd.f32 %v10157_v60, %v14151_v8  ;;  %11790 = vmatpush3.bf16.msra.mxu0 %v12447_v46  ;;  %v12451_v46 = vld [vmem:[#allocation9 + $0x140] sm:$0xff]  }
 0x38d   : > { %v10159_v10 = vpop.f32.mrf.mxu1  ;;  %v14286_v16 = vpop.f32.mrf.mxu0  ;;  %11791 = vmatprep.subr.bf16.mxu0 %v12450_v52 }
 0x38e   : > { %v14290_v2 = vadd.f32 %v2993_v25, %v2833_v34  ;;  %v10160_v62 = vadd.f32 %v10159_v10, %v10158_v20  ;;  %v12444_v20 = vld [vmem:[#allocation9 + $0x108] sm:$0xff]  }
 0x38f   : > { %v10161_v44 = vpop.f32.mrf.mxu1  ;;  %v11705_v53 = vpop.f32.mrf.mxu0  ;;  %v12445_v10 = vld [vmem:[#allocation9 + $0xc8] sm:$0xff]   ;;  %10423 = vmatprep.subr.bf16.mxu1 %v12444_v20 }
 0x390   : > { %17376 = vst [vmem:[#allocation24_spill] sm:$0xff] %v14290_v2  ;;  %v14292_v1 = vadd.f32 %v10160_v62, %v2531_v38  ;;  %10424 = vmatpush3.bf16.msra.mxu1 %v12445_v10  ;;  %11792 = vmatpush3.bf16.msra.mxu0 %v12450_v52 }
 0x391   : > { %v10162_v8 = vpop.f32.mrf.mxu1  ;;  %v3009_v21 = vpop.f32.mrf.mxu0  ;;  %10425 = vmatprep.subr.bf16.mxu1 %v12448_v59  ;;  %11793 = vmatprep.subr.bf16.mxu0 %v12451_v46 }
 0x392   : > { %v10163_v28 = vadd.f32 %v10162_v8, %v10161_v44 }
 0x393   : > { %v10164_v60 = vpop.f32.mrf.mxu1  ;;  %v11706_v58 = vpop.f32.mrf.mxu0 }
 0x394   : > { %v2841_v61 = vadd.f32 %v10163_v28, %v14153_v51  ;;  %11794 = vmatpush3.bf16.msra.mxu0 %v12451_v46  ;;  %v14324_v46 = vld [vmem:[#allocation9 + $0xb8] sm:$0xff]  }
 0x395   : > { %v10165_v50 = vpop.f32.mrf.mxu1  ;;  %v14295_v25 = vpop.f32.mrf.mxu0  ;;  %17380 = vst [vmem:[#allocation28_spill] sm:$0xff] %v14324_v46 }
 0x396   : > { %v10166_v63 = vadd.f32 %v10165_v50, %v10164_v60  ;;  %v14297_v34 = vadd.f32 %v11701_v7, %v2841_v61  ;;  %v12449_v61 = vld [vmem:[#allocation9 + $0xc0] sm:$0xff]  }
 0x397   : > { %v10167_v38 = vpop.f32.mrf.mxu1  ;;  %v14299_v62 = vpop.f32.mrf.mxu0  ;;  %10426 = vmatpush3.bf16.msra.mxu1 %v12449_v61 }
 0x398   : > { %v2844_v44 = vadd.f32 %v10166_v63, %v14157_v4  ;;  %v2547_v4 = vadd.f32 %v14163_v23, %v14179_v14  ;;  %11827 = vmatprep.subr.bf16.mxu1 %v14324_v46 }
 0x399   : > { %v10168_v18 = vpop.f32.mrf.mxu1  ;;  %v3025_v51 = vpop.f32.mrf.mxu0 }
 0x39a   : > { %v10169_v8 = vadd.f32 %v10168_v18, %v10167_v38  ;;  %v14302_v28 = vadd.f32 %v11702_v6, %v2844_v44 }
 0x39b   : > { %v10170_v7 = vpop.f32.mrf.mxu1  ;;  %v11710_v60 = vpop.f32.mrf.mxu0 }
 0x39c   : > { %17377 = vst [vmem:[#allocation25_spill] sm:$0xff] %v14302_v28  ;;  %v2849_v50 = vadd.f32 %v10169_v8, %v14169_v0 }
 0x39d   : > { %v10171_v20 = vpop.f32.mrf.mxu1  ;;  %v14305_v3 = vpop.f32.mrf.mxu0 }
 0x39e   : > { %v10172_v63 = vadd.f32 %v10171_v20, %v10170_v7  ;;  %v14309_v6 = vadd.f32 %v3009_v21, %v2849_v50 }
 0x39f   : > { %v10173_v10 = vpop.f32.mrf.mxu1  ;;  %v14311_v38 = vpop.f32.mrf.mxu0 }
 0x3a0   : > { %17378 = vst [vmem:[#allocation26_spill] sm:$0xff] %v14309_v6  ;;  %v14313_v52 = vadd.f32 %v10172_v63, %v2547_v4 }
 0x3a1   : > { %v10174_v44 = vpop.f32.mrf.mxu1  ;;  %v3041_v0 = vpop.f32.mrf.mxu0 }
 0x3a2   : > { %v10175_v59 = vadd.f32 %v10174_v44, %v10173_v10 }
 0x3a3   : > { %v10176_v18 = vpop.f32.mrf.mxu1  ;;  %v14315_v8 = vpop.f32.mrf.mxu0 }
 0x3a4   : > { %v2857_v61 = vadd.f32 %v10175_v59, %v14171_v41 }
 0x3a5   : > { %v10177_v28 = vpop.f32.mrf.mxu1  ;;  %v14318_v2 = vpop.f32.mrf.mxu0 }
 0x3a6   : > { %v10178_v23 = vadd.f32 %v10177_v28, %v10176_v18  ;;  %v14320_v14 = vadd.f32 %v11705_v53, %v2857_v61  ;;  %v2563_v18 = vadd.f32 %v14181_v19, %v14197_v11 }
 0x3a7   : > { %v10179_v21 = vpop.f32.mrf.mxu1  ;;  %v14322_v7 = vpop.f32.mrf.mxu0 }
 0x3a8   : > { %17379 = vst [vmem:[#allocation27_spill] sm:$0xff] %v14320_v14  ;;  %v2860_v50 = vadd.f32 %v10178_v23, %v14175_v13 }
 0x3a9   : > { %v10180_v20 = vpop.f32.mrf.mxu1  ;;  %v14327_v4 = vpop.f32.mrf.mxu0 }
 0x3aa   : > { %v10181_v63 = vadd.f32 %v10180_v20, %v10179_v21  ;;  %v14330_v41 = vadd.f32 %v11706_v58, %v2860_v50 }
 0x3ab   : > { %v10182_v10 = vpop.f32.mrf.mxu1  ;;  %v14332_v44 = vpop.f32.mrf.mxu0 }
 0x3ac   : > { %17381 = vst [vmem:[#allocation29_spill] sm:$0xff] %v14330_v41  ;;  %v2865_v53 = vadd.f32 %v10181_v63, %v14187_v35 }
 0x3ad   : > { %v10183_v28 = vpop.f32.mrf.mxu1  ;;  %v14335_v59 = vpop.f32.mrf.mxu0 }
 0x3ae   : > { %v10184_v13 = vadd.f32 %v10183_v28, %v10182_v10  ;;  %v14339_v61 = vadd.f32 %v3025_v51, %v2865_v53 }
 0x3af   : > { %v10185_v23 = vpop.f32.mrf.mxu1  ;;  %v14341_v6 = vpop.f32.mrf.mxu0 }
 0x3b0   : > { %17382 = vst [vmem:[#allocation30_spill] sm:$0xff] %v14339_v61  ;;  %v14343_v21 = vadd.f32 %v10184_v13, %v2563_v18 }
 0x3b1   : > { %v10186_v58 = vpop.f32.mrf.mxu1  ;;  %v14345_v50 = vpop.f32.mrf.mxu0 }
 0x3b2   : > { %v10187_v20 = vadd.f32 %v10186_v58, %v10185_v23 }
 0x3b3   : > { %v10188_v46 = vpop.f32.mrf.mxu1  ;;  %v14347_v35 = vpop.f32.mrf.mxu0 }
 0x3b4   : > { %v2873_v63 = vadd.f32 %v10187_v20, %v14189_v30 }
 0x3b5   : > { %v10189_v41 = vpop.f32.mrf.mxu1  ;;  %v14350_v14 = vpop.f32.mrf.mxu0 }
 0x3b6   : > { %v10190_v19 = vadd.f32 %v10189_v41, %v10188_v46  ;;  %v14353_v11 = vadd.f32 %v14299_v62, %v2873_v63 }
 0x3b7   : > { %v10191_v51 = vpop.f32.mrf.mxu1  ;;  %v14355_v10 = vpop.f32.mrf.mxu0 }
 0x3b8   : > { %17383 = vst [vmem:[#allocation31_spill] sm:$0xff] %v14353_v11  ;;  %v2876_v53 = vadd.f32 %v10190_v19, %v14193_v12 }
 0x3b9   : > { %v10192_v28 = vpop.f32.mrf.mxu1  ;;  %v14358_v18 = vpop.f32.mrf.mxu0 }
 0x3ba   : > { %v10193_v13 = vadd.f32 %v10192_v28, %v10191_v51  ;;  %v14360_v23 = vadd.f32 %v11710_v60, %v2876_v53 }
 0x3bb   : > { %v10194_v58 = vpop.f32.mrf.mxu1  ;;  %v14362_v30 = vpop.f32.mrf.mxu0 }
 0x3bc   : > { %17384 = vst [vmem:[#allocation32_spill] sm:$0xff] %v14360_v23  ;;  %v2881_v20 = vadd.f32 %v10193_v13, %v14203_v33 }
 0x3bd   : > { %v10195_v46 = vpop.f32.mrf.mxu1  ;;  %v14365_v41 = vpop.f32.mrf.mxu0 }
 0x3be   : > { %v10196_v62 = vadd.f32 %v10195_v46, %v10194_v58  ;;  %v14367_v63 = vadd.f32 %v3041_v0, %v2881_v20 }
 0x3bf   : > { %v10197_v61 = vpop.f32.mrf.mxu1  ;;  %v14369_v11 = vpop.f32.mrf.mxu0 }
 0x3c0   : > { %17385 = vst [vmem:[#allocation33_spill] sm:$0xff] %v14367_v63  ;;  %17386 = vst [vmem:[#allocation34_spill] sm:$0xff] %v14369_v11  ;;  %v14372_v12 = vadd.f32 %v10196_v62, %v14207_v54 }
 0x3c1   : > { %v10198_v19 = vpop.f32.mrf.mxu1  ;;  %v14374_v60 = vpop.f32.mrf.mxu0 }
 0x3c2   : > { %v10199_v51 = vadd.f32 %v10198_v19, %v10197_v61 }
 0x3c3   : > { %v10200_v53 = vpop.f32.mrf.mxu1  ;;  %v14376_v28 = vpop.f32.mrf.mxu0 }
 0x3c4   : > { %17387 = vst [vmem:[#allocation35_spill] sm:$0xff] %v14376_v28  ;;  %v2889_v33 = vadd.f32 %v10199_v51, %v14205_v5  ;;  %v12455_v5 = vld [vmem:[#allocation9 + $0x78] sm:$0xff]  }
 0x3c5   : > { %v10201_v13 = vpop.f32.mrf.mxu1  ;;  %v14379_v23 = vpop.f32.mrf.mxu0  ;;  %10547 = vmatprep.subr.bf16.mxu0 %v12455_v5 }
 0x3c6   : > { %17388 = vst [vmem:[#allocation36_spill] sm:$0xff] %v14379_v23  ;;  %v10202_v0 = vadd.f32 %v10201_v13, %v10200_v53  ;;  %v14382_v58 = vadd.f32 %v14311_v38, %v2889_v33 }
 0x3c7   : > { %v10203_v20 = vpop.f32.mrf.mxu1  ;;  %v14384_v46 = vpop.f32.mrf.mxu0 }
 0x3c8   : > { %17389 = vst [vmem:[#allocation37_spill] sm:$0xff] %v14382_v58  ;;  %v2892_v54 = vadd.f32 %v10202_v0, %v14211_v31  ;;  %v2595_v31 = vadd.f32 %v14215_v43, %v14231_v17 }
 0x3c9   : > { %v10204_v62 = vpop.f32.mrf.mxu1  ;;  %v14387_v11 = vpop.f32.mrf.mxu0 }
 0x3ca   : > { %v10205_v61 = vadd.f32 %v10204_v62, %v10203_v20  ;;  %v14390_v19 = vadd.f32 %v14315_v8, %v2892_v54 }
 0x3cb   : > { %v10206_v51 = vpop.f32.mrf.mxu1  ;;  %v14392_v28 = vpop.f32.mrf.mxu0 }
 0x3cc   : > { %17390 = vst [vmem:[#allocation38_spill] sm:$0xff] %v14390_v19  ;;  %v2897_v53 = vadd.f32 %v10205_v61, %v14221_v40 }
 0x3cd   : > { %v10207_v38 = vpop.f32.mrf.mxu1  ;;  %v14395_v33 = vpop.f32.mrf.mxu0 }
 0x3ce   : > { %v10208_v13 = vadd.f32 %v10207_v38, %v10206_v51  ;;  %v14400_v0 = vadd.f32 %v14327_v4, %v2897_v53 }
 0x3cf   : > { %v10209_v20 = vpop.f32.mrf.mxu1  ;;  %v14402_v8 = vpop.f32.mrf.mxu0 }
 0x3d0   : > { %17391 = vst [vmem:[#allocation39_spill] sm:$0xff] %v14400_v0  ;;  %v14404_v54 = vadd.f32 %v10208_v13, %v2595_v31 }
 0x3d1   : > { %v10210_v62 = vpop.f32.mrf.mxu1  ;;  %v14406_v19 = vpop.f32.mrf.mxu0 }
 0x3d2   : > { %v10211_v40 = vadd.f32 %v10210_v62, %v10209_v20 }
 0x3d3   : > { %v10212_v61 = vpop.f32.mrf.mxu1  ;;  %v14408_v5 = vpop.f32.mrf.mxu0 }
 0x3d4   : > { %v2905_v63 = vadd.f32 %v10211_v40, %v14223_v15 }
 0x3d5   : > { %v10213_v58 = vpop.f32.mrf.mxu1  ;;  %v14411_v43 = vpop.f32.mrf.mxu0 }
 0x3d6   : > { %v10214_v17 = vadd.f32 %v10213_v58, %v10212_v61  ;;  %v14414_v4 = vadd.f32 %v14322_v7, %v2905_v63  ;;  %v2611_v63 = vadd.f32 %v14233_v24, %v14251_v57 }
 0x3d7   : > { %v10215_v51 = vpop.f32.mrf.mxu1  ;;  %v14416_v53 = vpop.f32.mrf.mxu0 }
 0x3d8   : > { %17392 = vst [vmem:[#allocation40_spill] sm:$0xff] %v14414_v4  ;;  %v2908_v38 = vadd.f32 %v10214_v17, %v14227_v29 }
 0x3d9   : > { %v10216_v31 = vpop.f32.mrf.mxu1  ;;  %v14419_v13 = vpop.f32.mrf.mxu0 }
 0x3da   : > { %v10217_v20 = vadd.f32 %v10216_v31, %v10215_v51  ;;  %v14422_v62 = vadd.f32 %v14332_v44, %v2908_v38 }
 0x3db   : > { %v10218_v15 = vpop.f32.mrf.mxu1  ;;  %v14424_v40 = vpop.f32.mrf.mxu0 }
 0x3dc   : > { %17393 = vst [vmem:[#allocation41_spill] sm:$0xff] %v14422_v62  ;;  %v2913_v58 = vadd.f32 %v10217_v20, %v14239_v47 }
 0x3dd   : > { %v10219_v61 = vpop.f32.mrf.mxu1  ;;  %v14427_v7 = vpop.f32.mrf.mxu0 }
 0x3de   : > { %v10220_v0 = vadd.f32 %v10219_v61, %v10218_v15  ;;  %v14432_v29 = vadd.f32 %v14345_v50, %v2913_v58 }
 0x3df   : > { %v10221_v17 = vpop.f32.mrf.mxu1  ;;  %v14434_v51 = vpop.f32.mrf.mxu0 }
 0x3e0   : > { %17394 = vst [vmem:[#allocation42_spill] sm:$0xff] %v14432_v29  ;;  %v14436_v44 = vadd.f32 %v10220_v0, %v2611_v63 }
 0x3e1   : > { %v10222_v38 = vpop.f32.mrf.mxu1  ;;  %v14438_v31 = vpop.f32.mrf.mxu0 }
 0x3e2   : > { %v10223_v62 = vadd.f32 %v10222_v38, %v10221_v17 }
 0x3e3   : > { %v10224_v47 = vpop.f32.mrf.mxu1  ;;  %v14440_v20 = vpop.f32.mrf.mxu0 }
 0x3e4   : > { %v2921_v4 = vadd.f32 %v10223_v62, %v14241_v42 }
 0x3e5   : > { %v10225_v23 = vpop.f32.mrf.mxu1  ;;  %v14443_v24 = vpop.f32.mrf.mxu0 }
 0x3e6   : > { %v10226_v57 = vadd.f32 %v10225_v23, %v10224_v47  ;;  %v14446_v50 = vadd.f32 %v14341_v6, %v2921_v4  ;;  %v10096_v23 = vadd.f32 %v14253_v36, %v14249_v27 }
 0x3e7   : > { %v10227_v15 = vpop.f32.mrf.mxu1  ;;  %v14448_v58 = vpop.f32.mrf.mxu0 }
 0x3e8   : > { %17395 = vst [vmem:[#allocation43_spill] sm:$0xff] %v14446_v50  ;;  %v2924_v0 = vadd.f32 %v10226_v57, %v14245_v49  ;;  %v2627_v49 = vadd.f32 %v10096_v23, %v14271_v32 }
 0x3e9   : > { %v10228_v61 = vpop.f32.mrf.mxu1  ;;  %v14451_v63 = vpop.f32.mrf.mxu0 }
 0x3ea   : > { %v10229_v17 = vadd.f32 %v10228_v61, %v10227_v15  ;;  %v14454_v38 = vadd.f32 %v14347_v35, %v2924_v0 }
 0x3eb   : > { %v10230_v42 = vpop.f32.mrf.mxu1  ;;  %v14456_v62 = vpop.f32.mrf.mxu0 }
 0x3ec   : > { %17396 = vst [vmem:[#allocation44_spill] sm:$0xff] %v14454_v38  ;;  %v2929_v6 = vadd.f32 %v10229_v17, %v14259_v22 }
 0x3ed   : > { %v10231_v4 = vpop.f32.mrf.mxu1  ;;  %v14461_v47 = vpop.f32.mrf.mxu0 }
 0x3ee   : > { %v10232_v57 = vadd.f32 %v10231_v4, %v10230_v42  ;;  %v14465_v29 = vadd.f32 %v14358_v18, %v2929_v6 }
 0x3ef   : > { %v10233_v15 = vpop.f32.mrf.mxu1  ;;  %v14467_v35 = vpop.f32.mrf.mxu0 }
 0x3f0   : > { %17397 = vst [vmem:[#allocation45_spill] sm:$0xff] %v14465_v29  ;;  %v14469_v0 = vadd.f32 %v10232_v57, %v2627_v49 }
 0x3f1   : > { %v10234_v61 = vpop.f32.mrf.mxu1  ;;  %v14471_v38 = vpop.f32.mrf.mxu0 }
 0x3f2   : > { %v10235_v27 = vadd.f32 %v10234_v61, %v10233_v15 }
 0x3f3   : > { %v10236_v36 = vpop.f32.mrf.mxu1  ;;  %v14473_v22 = vpop.f32.mrf.mxu0 }
 0x3f4   : > { %v2937_v17 = vadd.f32 %v10235_v27, %v14261_v48 }
 0x3f5   : > { %v10237_v50 = vpop.f32.mrf.mxu1  ;;  %v14476_v32 = vpop.f32.mrf.mxu0 }
 0x3f6   : > { %v10238_v42 = vadd.f32 %v10237_v50, %v10236_v36  ;;  %v14479_v18 = vadd.f32 %v14355_v10, %v2937_v17  ;;  %v10108_v50 = vadd.f32 %v14273_v9, %v14269_v45 }
 0x3f7   : > { %v10239_v23 = vpop.f32.mrf.mxu1  ;;  %v14481_v6 = vpop.f32.mrf.mxu0 }
 0x3f8   : > { %17398 = vst [vmem:[#allocation46_spill] sm:$0xff] %v14479_v18  ;;  %v2940_v4 = vadd.f32 %v10238_v42, %v14265_v39  ;;  %v2643_v39 = vadd.f32 %v10108_v50, %v14281_v56  ;;  %v10299_v56 = vadd.f32 %v14406_v19, %v14402_v8  ;;  %v2997_v19 = vadd.f32 %v14286_v16, %v14292_v1  ;;  %v14521_v8 = vld [vmem:[#allocation7] ss:$0 sm:$0xff] }
 0x3f9   : > { %v10240_v49 = vpop.f32.mrf.mxu1  ;;  %v14484_v57 = vpop.f32.mrf.mxu0  ;;  %v10296_v16 = vadd.f32 %v14395_v33, %v14392_v28  ;;  %v10305_v1 = vadd.f32 %v14419_v13, %v14416_v53  ;;  %v10314_v28 = vadd.f32 %v14443_v24, %v14440_v20  ;;  %v10317_v33 = vadd.f32 %v14451_v63, %v14448_v58 }
 0x3fa   : > { %v10241_v15 = vadd.f32 %v10240_v49, %v10239_v23  ;;  %v14487_v61 = vadd.f32 %v14362_v30, %v2940_v4  ;;  %v10326_v20 = vadd.f32 %v14476_v32, %v14473_v22 }
 0x3fb   : > { %v10242_v48 = vpop.f32.mrf.mxu1  ;;  %v14489_v27 = vpop.f32.mrf.mxu0 }
 0x3fc   : > { %17399 = vst [vmem:[#allocation47_spill] sm:$0xff] %v14487_v61  ;;  %17400 = vst [vmem:[#allocation48_spill] sm:$0xff] %v14489_v27  ;;  %v2945_v10 = vadd.f32 %v10241_v15, %v14277_v55 }
 0x3fd   : > { %v10243_v36 = vpop.f32.mrf.mxu1  ;;  %v14494_v17 = vpop.f32.mrf.mxu0 }
 0x3fe   : > { %v10244_v42 = vadd.f32 %v10243_v36, %v10242_v48  ;;  %v14498_v29 = vadd.f32 %v14374_v60, %v2945_v10  ;;  %v10293_v10 = vadd.f32 %v14387_v11, %v14384_v46  ;;  %v14529_v46 = vadd.f32 %v14305_v3, %v14343_v21  ;;  %v17402_v21 = vld [vmem:[#allocation25_spill] sm:$0xff] }
 0x3ff   : > { %v10245_v23 = vpop.f32.mrf.mxu1  ;;  %v10333_v30 = vpop.f32.mrf.mxu0  ;;  %v10308_v3 = vadd.f32 %v14427_v7, %v14424_v40  ;;  %v14560_v40 = vadd.f32 %v14461_v47, %v14456_v62  ;;  %v10323_v7 = vadd.f32 %v14471_v38, %v14467_v35  ;;  %v17403_v47 = vld [vmem:[#allocation27_spill] sm:$0xff]  ;;  %v14575_v35 = vadd.f32 %v14484_v57, %v14481_v6 }
 0x400   : > { %v14500_v4 = vadd.f32 %v10244_v42, %v2643_v39 }
 0x401   : > { %v10246_v49 = vpop.f32.mrf.mxu1  ;;  %v10334_v61 = vpop.f32.mrf.mxu0 }
 0x402   : > { %v10247_v18 = vadd.f32 %v10246_v49, %v10245_v23  ;;  %v14581_v32 = vadd.f32 %v10334_v61, %v10333_v30  ;;  %v17406_v61 = vld [vmem:[#allocation36_spill] sm:$0xff] }
 0x403   : > { %v10248_v27 = vpop.f32.mrf.mxu1  ;;  %v14502_v45 = vpop.f32.mrf.mxu0  ;;  %v14593_v30 = vadd.f32 %v17406_v61, %v14500_v4 }
 0x404   : > { %v14505_v9 = vadd.f32 %v10247_v18, %v14279_v37  ;;  %v10302_v37 = vadd.f32 %v14411_v43, %v14408_v5  ;;  %v17401_v5 = vld [vmem:[#allocation24_spill] sm:$0xff] }
 0x405   : > { %v10249_v55 = vpop.f32.mrf.mxu1  ;;  %v10337_v15 = vpop.f32.mrf.mxu0 }
 0x406   : > { %v10250_v60 = vadd.f32 %v10249_v55, %v10248_v27  ;;  %v14589_v6 = vadd.f32 %v10337_v15, %v14502_v45 }
 0x407   : > { %v14509_v48 = vpop.f32.mrf.mxu0  ;;  %v11749_v50 = vpop.f32.mrf.mxu1 }
 0x408   : > { %v14514_v36 = vadd.f32 %v10250_v60, %v14283_v26  ;;  %v3517_v39 = vadd.f32 %v11749_v50, %v10299_v56  ;;  %v14525_v26 = vadd.f32 %v14295_v25, %v14313_v52  ;;  %v14542_v25 = vadd.f32 %v14335_v59, %v14404_v54 }
 0x409   : > { %v10340_v42 = vpop.f32.mrf.mxu0  ;;  %v3508_v23 = vpop.f32.mrf.mxu1  ;;  %v14556_v54 = vadd.f32 %v14350_v14, %v14436_v44  ;;  %v14570_v14 = vadd.f32 %v14365_v41, %v14469_v0 }
 0x40a   : > { %v3637_v18 = vadd.f32 %v3517_v39, %v14297_v34  ;;  %v3509_v49 = vadd.f32 %v10293_v10, %v3508_v23  ;;  %v14533_v34 = vadd.f32 %v14318_v2, %v14372_v12  ;;  %v10311_v2 = vadd.f32 %v14438_v31, %v14434_v51  ;;  %v17404_v39 = vld [vmem:[#allocation48_spill] sm:$0xff] }
 0x40b   : > { %v10342_v27 = vpop.f32.mrf.mxu0  ;;  %v11750_v55 = vpop.f32.mrf.mxu1  ;;  %v14579_v22 = vadd.f32 %v14494_v17, %v17404_v39 }
 0x40c   : > { %v3520_v11 = vadd.f32 %v11750_v55, %v10302_v37  ;;  %v3635_v43 = vadd.f32 %v3509_v49, %v17401_v5  ;;  %v3676_v52 = vadd.f32 %v14521_v8, %v3637_v18  ;;  %v17405_v49 = vld [vmem:[#allocation26_spill] sm:$0xff] }
 0x40d   : > { %v10343_v56 = vpop.f32.mrf.mxu0  ;;  %v3511_v60 = vpop.f32.mrf.mxu1 }
 0x40e   : > { %v3638_v12 = vadd.f32 %v3520_v11, %v17402_v21  ;;  %v3512_v53 = vadd.f32 %v10296_v16, %v3511_v60  ;;  %v3674_v24 = vadd.f32 %v14521_v8, %v3635_v43  ;;  %v3708_v44 = vmax.f32 %v3676_v52, 0.0  ;;  %v17407_v60 = vld [vmem:[#allocation29_spill] sm:$0xff] }
 0x40f   : > { %v10345_v13 = vpop.f32.mrf.mxu0  ;;  %v11753_v59 = vpop.f32.mrf.mxu1  ;;  %v14598_v5 = vadd.f32 %v10343_v56, %v10342_v27 }
 0x410   : > { %v3677_v51 = vadd.f32 %v14521_v8, %v3638_v12  ;;  %v3533_v31 = vadd.f32 %v11753_v59, %v10311_v2  ;;  %v3636_v58 = vadd.f32 %v3512_v53, %v2997_v19  ;;  %v3706_v57 = vmax.f32 %v3674_v24, 0.0 }
 0x411   : > { %v10346_v63 = vpop.f32.mrf.mxu0  ;;  %v3524_v50 = vpop.f32.mrf.mxu1 }
 0x412   : > { %v3709_v62 = vmax.f32 %v3677_v51, 0.0  ;;  %v3641_v10 = vadd.f32 %v3533_v31, %v17403_v47  ;;  %v3525_v38 = vadd.f32 %v10305_v1, %v3524_v50  ;;  %v3675_v23 = vadd.f32 %v14521_v8, %v3636_v58  ;;  %v17408_v58 = vld [vmem:[#allocation31_spill] sm:$0xff] }
 0x413   : > { %v10348_v37 = vpop.f32.mrf.mxu0  ;;  %v11754_v41 = vpop.f32.mrf.mxu1  ;;  %v14596_v1 = vadd.f32 %v10340_v42, %v14509_v48  ;;  %v14600_v43 = vadd.f32 %v10346_v63, %v10345_v13 }
 0x414   : > { %v14584_v0 = vpack.c.bf16 %v3709_v62, %v3708_v44  ;;  %v3680_v18 = vadd.f32 %v14521_v8, %v3641_v10  ;;  %v3639_v19 = vadd.f32 %v3525_v38, %v17405_v49  ;;  %v3536_v55 = vadd.f32 %v11754_v41, %v10314_v28 }
 0x415   : > { %v3707_v11 = vmax.f32 %v3675_v23, 0.0  ;;  %v10349_v17 = vpop.f32.mrf.mxu0  ;;  %v3527_v16 = vpop.f32.mrf.mxu1  ;;  %v17409_v23 = vld [vmem:[#allocation30_spill] sm:$0xff] }
 0x416   : > { %v3642_v2 = vadd.f32 %v3536_v55, %v17407_v60  ;;  %v3712_v52 = vmax.f32 %v3680_v18, 0.0  ;;  %v3528_v45 = vadd.f32 %v10308_v3, %v3527_v16  ;;  %v3765_v28 = vshll.u32 %v14584_v0, 16  ;;  %v17410_v16 = vld [vmem:[#allocation32_spill] sm:$0xff] }
 0x417   : > { %v10351_v15 = vpop.f32.mrf.mxu0  ;;  %v11757_v21 = vpop.f32.mrf.mxu1  ;;  %v14603_v12 = vpack.c.bf16 %v3707_v11, %v3706_v57  ;;  %v3678_v4 = vadd.f32 %v14521_v8, %v3639_v19  ;;  %v3762_v42 = vshrl.u32 %v14584_v0, 16  ;;  %v14615_v24 = vadd.f32 %v10349_v17, %v10348_v37 }
 0x418   : > { %v3681_v53 = vadd.f32 %v14521_v8, %v3642_v2  ;;  %v3549_v48 = vadd.f32 %v11757_v21, %v10323_v7  ;;  %v3640_v27 = vadd.f32 %v3528_v45, %v14525_v26  ;;  %v3900_v51 = vrot.slane %v3765_v28, 1 }
 0x419   : > { %4235 = vmatprep.mubr.bf16.mxu1 %v14603_v12  ;;  %v10352_v56 = vpop.f32.mrf.mxu0  ;;  %v3540_v13 = vpop.f32.mrf.mxu1  ;;  %v3755_v3 = vshrl.u32 %v14603_v12, 16  ;;  %v3758_v59 = vshll.u32 %v14603_v12, 16  ;;  %v3710_v49 = vmax.f32 %v3678_v4, 0.0 }
 0x41a   : > { %v3713_v31 = vmax.f32 %v3681_v53, 0.0  ;;  %v3645_v7 = vadd.f32 %v3549_v48, %v17408_v58  ;;  %v3541_v63 = vadd.f32 %v10317_v33, %v3540_v13  ;;  %v3679_v50 = vadd.f32 %v14521_v8, %v3640_v27  ;;  %v12456_v27 = vld [vmem:[#allocation9 + $0x38] sm:$0xff]  }
 0x41b   : > { %v10354_v26 = vpop.f32.mrf.mxu0  ;;  %v11758_v44 = vpop.f32.mrf.mxu1  ;;  %v3757_v62 = vrot.slane %v3755_v3, 7  ;;  %v3898_v47 = vrot.slane %v3758_v59, 1  ;;  %v3901_v10 = vor.u32 %v3900_v51, %v3762_v42  ;;  %v14623_v11 = vadd.f32 %v10352_v56, %v10351_v15 }
 0x41c   : > { %v14619_v38 = vpack.c.bf16 %v3713_v31, %v3712_v52  ;;  %v3684_v39 = vadd.f32 %v14521_v8, %v3645_v7  ;;  %v3643_v41 = vadd.f32 %v3541_v63, %v17409_v23  ;;  %v3552_v18 = vadd.f32 %v11758_v44, %v10326_v20  ;;  %v12453_v52 = vld [vmem:[#allocation9 + $0xb0] sm:$0xff]   ;;  %v17413_v7 = vld [vmem:[#allocation28_spill] sm:$0xff] }
 0x41d   : > { %v3711_v37 = vmax.f32 %v3679_v50, 0.0  ;;  %v10355_v19 = vpop.f32.mrf.mxu0  ;;  %v3543_v55 = vpop.f32.mrf.mxu1  ;;  %v3760_v57 = vor.u32 %v3758_v59, %v3757_v62  ;;  %v3899_v33 = vor.u32 %v3898_v47, %v3755_v3  ;;  %v14629_v2 = vsel %vm13148_vm2, %v3901_v10, 0  ;;  %v12457_v59 = vld [vmem:[#allocation9 + $0x70] sm:$0xff]   ;;  %v12454_v10 = vld [vmem:[#allocation9 + $0xa8] sm:$0xff]  }
 0x41e   : > { %v3682_v17 = vadd.f32 %v14521_v8, %v3643_v41  ;;  %v3646_v61 = vadd.f32 %v3552_v18, %v17410_v16  ;;  %v3544_v20 = vadd.f32 %v14560_v40, %v3543_v55  ;;  %v3716_v56 = vmax.f32 %v3684_v39, 0.0  ;;  %v17414_v62 = vld [vmem:[#allocation37_spill] sm:$0xff] }
 0x41f   : > { %v14631_v45 = vpack.c.bf16 %v3711_v37, %v3710_v49  ;;  %v10357_v21 = vpop.f32.mrf.mxu0  ;;  %v11761_v4 = vpop.f32.mrf.mxu1  ;;  %v14636_v48 = vsel %vm13231_vm6, 0, %v3760_v57  ;;  %v14640_v15 = vsel %vm13148_vm2, %v3899_v33, 0  ;;  %v3764_v40 = vrot.slane %v3762_v42, 7  ;;  %v12458_v37 = vld [vmem:[#allocation9 + $0x30] sm:$0xff]  }
 0x420   : > { %v3685_v13 = vadd.f32 %v14521_v8, %v3646_v61  ;;  %v3565_v3 = vadd.f32 %v11761_v4, %v14581_v32  ;;  %4236 = vmatmul.mubr.bf16.vlgmr.msra.gmra.mxu1 %v14636_v48  ;;  %11795 = vmatprep.mubr.bf16.mxu0 %v14640_v15  ;;  %v3714_v51 = vmax.f32 %v3682_v17, 0.0  ;;  %v14646_v31 = vadd.f32 %v10355_v19, %v10354_v26  ;;  %v17415_v55 = vld [vmem:[#allocation33_spill] sm:$0xff] }
 0x421   : > { %v3644_v58 = vadd.f32 %v3544_v20, %v14529_v46  ;;  %11828 = vmatpush3.bf16.msra.mxu1 %v17413_v7  ;;  %4243 = vmatprep.mubr.bf16.mxu1 %v14584_v0  ;;  %v10358_v63 = vpop.f32.mrf.mxu0  ;;  %v3556_v50 = vpop.f32.mrf.mxu1  ;;  %v3772_v44 = vshll.u32 %v14631_v45, 16  ;;  %v3769_v26 = vshrl.u32 %v14631_v45, 16  ;;  %v3767_v41 = vor.u32 %v3765_v28, %v3764_v40  ;;  %v12459_v40 = vld [vmem:[#allocation9 + $0x68] sm:$0xff]  }
 0x422   : > { %v3717_v32 = vmax.f32 %v3685_v13, 0.0  ;;  %v3649_v47 = vadd.f32 %v3565_v3, %v17414_v62  ;;  %11796 = vmatmul.mubr.bf16.vlgmr.msra.gmra.mxu0 %v14629_v2  ;;  %v3557_v42 = vadd.f32 %v14575_v35, %v3556_v50  ;;  %11829 = vmatprep.subr.bf16.mxu1 %v12453_v52  ;;  %v3779_v49 = vshll.u32 %v14619_v38, 16  ;;  %v17416_v13 = vld [vmem:[#allocation38_spill] sm:$0xff] }
 0x423   : > { %v3683_v46 = vadd.f32 %v14521_v8, %v3644_v58  ;;  %v10360_v39 = vpop.f32.mrf.mxu0  ;;  %v11762_v23 = vpop.f32.mrf.mxu1  ;;  %v3902_v18 = vrot.slane %v3772_v44, 1  ;;  %10548 = vmatpush3.bf16.msra.mxu0 %v12456_v27  ;;  %v3776_v20 = vshrl.u32 %v14619_v38, 16  ;;  %v14670_v27 = vadd.f32 %v10358_v63, %v10357_v21  ;;  %v12460_v63 = vld [vmem:[#allocation9 + $0x28] sm:$0xff]  }
 0x424   : > { %v14662_v19 = vpack.c.bf16 %v3717_v32, %v3716_v56  ;;  %v3688_v35 = vadd.f32 %v14521_v8, %v3649_v47  ;;  %v3647_v57 = vadd.f32 %v3557_v42, %v17415_v55  ;;  %v3568_v33 = vadd.f32 %v11762_v23, %v14589_v6  ;;  %10549 = vmatprep.subr.bf16.mxu0 %v12457_v59  ;;  %v12463_v32 = vld [vmem:[#allocation9 + $0xa0] sm:$0xff]  }
 0x425   : > { %v3715_v17 = vmax.f32 %v3683_v46, 0.0  ;;  %v10361_v16 = vpop.f32.mrf.mxu0  ;;  %v3559_v61 = vpop.f32.mrf.mxu1  ;;  %v3903_v28 = vor.u32 %v3902_v18, %v3769_v26  ;;  %v3904_v4 = vrot.slane %v3779_v49, 1  ;;  %11830 = vmatpush3.bf16.msra.mxu1 %v12453_v52  ;;  %v14678_v6 = vsel %vm13231_vm6, 0, %v3767_v41  ;;  %v12461_v42 = vld [vmem:[#allocation9 + $0x60] sm:$0xff]  }
 0x426   : > { %v14673_v56 = vadd.f32 %v14521_v8, %v3647_v57  ;;  %v3650_v3 = vadd.f32 %v3568_v33, %v17416_v13  ;;  %11831 = vmatprep.subr.bf16.mxu1 %v12454_v10  ;;  %v3560_v58 = vadd.f32 %v14579_v22, %v3559_v61  ;;  %v3720_v62 = vmax.f32 %v3688_v35, 0.0  ;;  %v17418_v13 = vld [vmem:[#allocation39_spill] sm:$0xff] }
 0x427   : > { %v14680_v59 = vpack.c.bf16 %v3715_v17, %v3714_v51  ;;  %v10363_v7 = vpop.f32.mrf.mxu0  ;;  %v11765_v50 = vpop.f32.mrf.mxu1  ;;  %v14685_v52 = vsel %vm13148_vm2, %v3903_v28, 0  ;;  %v3905_v21 = vor.u32 %v3904_v4, %v3776_v20  ;;  %10550 = vmatpush3.bf16.msra.mxu0 %v12458_v37  ;;  %v3771_v22 = vrot.slane %v3769_v26, 7  ;;  %v17417_v26 = vld [vmem:[#allocation40_spill] sm:$0xff] }
 0x428   : > { %v3689_v47 = vadd.f32 %v14521_v8, %v3650_v3  ;;  %v3581_v51 = vadd.f32 %v11765_v50, %v14600_v43  ;;  %4244 = vmatmul.mubr.bf16.gmra.mxu1 %v14678_v6  ;;  %11799 = vmatprep.mubr.bf16.mxu0 %v14685_v52  ;;  %v14693_v46 = vadd.f32 %v10361_v16, %v10360_v39  ;;  %v3718_v35 = vmax.f32 %v14673_v56, 0.0  ;;  %v12472_v39 = vld [vmem:[#allocation9 + $0x98] sm:$0xff]   ;;  %v12462_v4 = vld [vmem:[#allocation9 + $0x20] sm:$0xff]  }
 0x429   : > { %v3648_v23 = vadd.f32 %v3560_v58, %v14533_v34  ;;  %4251 = vmatprep.mubr.bf16.mxu1 %v14631_v45  ;;  %v14699_v41 = vsel %vm13148_vm2, %v3905_v21, 0  ;;  %v10364_v18 = vpop.f32.mrf.mxu0  ;;  %v3572_v37 = vpop.f32.mrf.mxu1  ;;  %v3786_v43 = vshll.u32 %v14680_v59, 16  ;;  %11832 = vmatpush3.bf16.msra.mxu1 %v12454_v10  ;;  %v3774_v61 = vor.u32 %v3772_v44, %v3771_v22  ;;  %v17419_v22 = vld [vmem:[#allocation41_spill] sm:$0xff] }
 0x42a   : > { %v3721_v55 = vmax.f32 %v3689_v47, 0.0  ;;  %v3653_v57 = vadd.f32 %v3581_v51, %v17417_v26  ;;  %11800 = vmatmul.mubr.bf16.gmra.mxu0 %v14699_v41  ;;  %v3573_v34 = vadd.f32 %v14596_v1, %v3572_v37  ;;  %10551 = vmatprep.subr.bf16.mxu0 %v12459_v40  ;;  %v3783_v10 = vshrl.u32 %v14680_v59, 16 }
 0x42b   : > { %v3687_v33 = vadd.f32 %v14521_v8, %v3648_v23  ;;  %v10366_v17 = vpop.f32.mrf.mxu0  ;;  %v11766_v16 = vpop.f32.mrf.mxu1  ;;  %v3906_v28 = vrot.slane %v3786_v43, 1  ;;  %10552 = vmatpush3.bf16.msra.mxu0 %v12460_v63  ;;  %11833 = vmatprep.subr.bf16.mxu1 %v12463_v32  ;;  %v14717_v50 = vadd.f32 %v10364_v18, %v10363_v7  ;;  %v3793_v63 = vshll.u32 %v14662_v19, 16 }
 0x42c   : > { %v14712_v56 = vpack.c.bf16 %v3721_v55, %v3720_v62  ;;  %v3692_v1 = vadd.f32 %v14521_v8, %v3653_v57  ;;  %v3651_v3 = vadd.f32 %v3573_v34, %v17418_v13  ;;  %v3584_v40 = vadd.f32 %v11766_v16, %v14615_v24  ;;  %10553 = vmatprep.subr.bf16.mxu0 %v12461_v42  ;;  %v12464_v62 = vld [vmem:[#allocation9 + $0x58] sm:$0xff]   ;;  %v12473_v34 = vld [vmem:[#allocation9 + $0x90] sm:$0xff]  }
 0x42d   : > { %v3719_v58 = vmax.f32 %v3687_v33, 0.0  ;;  %v10367_v44 = vpop.f32.mrf.mxu0  ;;  %v3575_v21 = vpop.f32.mrf.mxu1  ;;  %v3907_v47 = vor.u32 %v3906_v28, %v3783_v10  ;;  %11834 = vmatpush3.bf16.msra.mxu1 %v12463_v32  ;;  %v14725_v37 = vsel %vm13231_vm6, 0, %v3774_v61  ;;  %v3790_v24 = vshrl.u32 %v14662_v19, 16  ;;  %v12465_v57 = vld [vmem:[#allocation9 + $0x18] sm:$0xff]  }
 0x42e   : > { %v3724_v51 = vmax.f32 %v3692_v1, 0.0  ;;  %v3654_v23 = vadd.f32 %v3584_v40, %v17419_v22  ;;  %11835 = vmatprep.subr.bf16.mxu1 %v12472_v39  ;;  %v3576_v42 = vadd.f32 %v14598_v5, %v3575_v21  ;;  %v3908_v26 = vrot.slane %v3793_v63, 1 }
 0x42f   : > { %v14728_v7 = vpack.c.bf16 %v3719_v58, %v3718_v35  ;;  %v10369_v18 = vpop.f32.mrf.mxu0  ;;  %v11769_v55 = vpop.f32.mrf.mxu1  ;;  %v14733_v32 = vsel %vm13148_vm2, %v3907_v47, 0  ;;  %10554 = vmatpush3.bf16.msra.mxu0 %v12462_v4  ;;  %v3690_v33 = vadd.f32 %v14521_v8, %v3651_v3  ;;  %v3778_v5 = vrot.slane %v3776_v20, 7  ;;  %v12466_v3 = vld [vmem:[#allocation9 + $0x50] sm:$0xff]   ;;  %v17420_v58 = vld [vmem:[#allocation43_spill] sm:$0xff] }
 0x430   : > { %v3693_v16 = vadd.f32 %v14521_v8, %v3654_v23  ;;  %v3597_v35 = vadd.f32 %v11769_v55, %v14670_v27  ;;  %4252 = vmatmul.mubr.bf16.gmra.mxu1 %v14725_v37  ;;  %11803 = vmatprep.mubr.bf16.mxu0 %v14733_v32  ;;  %v14744_v61 = vadd.f32 %v10367_v44, %v10366_v17 }
 0x431   : > { %v3652_v28 = vadd.f32 %v3576_v42, %v14542_v25  ;;  %4259 = vmatprep.mubr.bf16.mxu1 %v14619_v38  ;;  %v3909_v4 = vor.u32 %v3908_v26, %v3790_v24  ;;  %v10370_v1 = vpop.f32.mrf.mxu0  ;;  %v3588_v13 = vpop.f32.mrf.mxu1  ;;  %v17332_v27 = vshll.u32 %v14728_v7, 16  ;;  %10555 = vmatprep.subr.bf16.mxu0 %v12464_v62  ;;  %v3797_v17 = vshrl.u32 %v14728_v7, 16  ;;  %v12467_v42 = vld [vmem:[#allocation9 + $0x10] sm:$0xff]  }
 0x432   : > { %v3725_v40 = vmax.f32 %v3693_v16, 0.0  ;;  %v3657_v21 = vadd.f32 %v3597_v35, %v17420_v58  ;;  %v3589_v20 = vadd.f32 %v14623_v11, %v3588_v13  ;;  %11836 = vmatpush3.bf16.msra.mxu1 %v12472_v39  ;;  %v3781_v62 = vor.u32 %v3779_v49, %v3778_v5  ;;  %v12474_v11 = vld [vmem:[#allocation9 + $0x88] sm:$0xff]   ;;  %v17421_v26 = vld [vmem:[#allocation42_spill] sm:$0xff] }
 0x433   : > { %v3691_v25 = vadd.f32 %v14521_v8, %v3652_v28  ;;  %v14757_v44 = vsel %vm13148_vm2, %v3909_v4, 0  ;;  %v10372_v47 = vpop.f32.mrf.mxu0  ;;  %v11770_v22 = vpop.f32.mrf.mxu1  ;;  %v3910_v23 = vrot.slane %v17332_v27, 1  ;;  %10556 = vmatpush3.bf16.msra.mxu0 %v12465_v57  ;;  %11837 = vmatprep.subr.bf16.mxu1 %v12473_v34  ;;  %v3722_v28 = vmax.f32 %v3690_v33, 0.0  ;;  %v12468_v58 = vld [vmem:[#allocation9 + $0x48] sm:$0xff]  }
 0x434   : > { %v14763_v55 = vpack.c.bf16 %v3725_v40, %v3724_v51  ;;  %v3696_v39 = vadd.f32 %v14521_v8, %v3657_v21  ;;  %11804 = vmatmul.mubr.bf16.gmra.mxu0 %v14757_v44  ;;  %v3655_v16 = vadd.f32 %v3589_v20, %v17421_v26  ;;  %v3600_v35 = vadd.f32 %v11770_v22, %v14693_v46  ;;  %v17422_v40 = vld [vmem:[#allocation44_spill] sm:$0xff] }
 0x435   : > { %v3723_v4 = vmax.f32 %v3691_v25, 0.0  ;;  %v10371_v49 = vadd.f32 %v10370_v1, %v10369_v18  ;;  %v10373_v5 = vpop.f32.mrf.mxu0  ;;  %v3591_v13 = vpop.f32.mrf.mxu1  ;;  %v3911_v57 = vor.u32 %v3910_v23, %v3797_v17  ;;  %10557 = vmatprep.subr.bf16.mxu0 %v12466_v3  ;;  %v14774_v21 = vsel %vm13231_vm6, 0, %v3781_v62  ;;  %v12469_v22 = vld [vmem:[#allocation9 + $0x8] sm:$0xff]   ;;  %v12475_v62 = vld [vmem:[#allocation9 + $0x80] sm:$0xff]  }
 0x436   : > { %v3728_v51 = vmax.f32 %v3696_v39, 0.0  ;;  %v3658_v27 = vadd.f32 %v3600_v35, %v17422_v40  ;;  %v17335_v20 = vshrl.u32 %v14712_v56, 16  ;;  %11838 = vmatpush3.bf16.msra.mxu1 %v12473_v34  ;;  %v3592_v18 = vadd.f32 %v14646_v31, %v3591_v13  ;;  %v12470_v26 = vld [vmem:[#allocation9 + $0x40] sm:$0xff]   ;;  %v17423_v13 = vld [vmem:[#allocation46_spill] sm:$0xff] }
 0x437   : > { %v14777_v46 = vpack.c.bf16 %v3723_v4, %v3722_v28  ;;  %v10375_v33 = vpop.f32.mrf.mxu0  ;;  %v11773_v1 = vpop.f32.mrf.mxu1  ;;  %v14782_v3 = vsel %vm13148_vm2, %v3911_v57, 0  ;;  %v17333_v25 = vshll.u32 %v14712_v56, 16  ;;  %10558 = vmatpush3.bf16.msra.mxu0 %v12467_v42  ;;  %11839 = vmatprep.subr.bf16.mxu1 %v12474_v11  ;;  %v3694_v23 = vadd.f32 %v14521_v8, %v3655_v16 }
 0x438   : > { %v3697_v34 = vadd.f32 %v14521_v8, %v3658_v27  ;;  %v3613_v39 = vadd.f32 %v11773_v1, %v10371_v49  ;;  %4260 = vmatmul.mubr.bf16.gmra.mxu1 %v14774_v21  ;;  %11807 = vmatprep.mubr.bf16.mxu0 %v14782_v3  ;;  %v3785_v31 = vrot.slane %v3783_v10, 7  ;;  %v10374_v35 = vadd.f32 %v10373_v5, %v10372_v47 }
 0x439   : > { %v3656_v28 = vadd.f32 %v3592_v18, %v14556_v54  ;;  %4267 = vmatprep.mubr.bf16.mxu1 %v14680_v59  ;;  %v3912_v42 = vrot.slane %v17333_v25, 1  ;;  %v10376_v16 = vpop.f32.mrf.mxu0  ;;  %v3604_v4 = vpop.f32.mrf.mxu1  ;;  %v17334_v27 = vshll.u32 %v14777_v46, 16  ;;  %10559 = vmatprep.subr.bf16.mxu0 %v12468_v58  ;;  %v17337_v10 = vshrl.u32 %v14777_v46, 16 }
 0x43a   : > { %v3729_v49 = vmax.f32 %v3697_v34, 0.0  ;;  %v3661_v57 = vadd.f32 %v3613_v39, %v17423_v13  ;;  %v3605_v40 = vadd.f32 %v14717_v50, %v3604_v4  ;;  %11840 = vmatpush3.bf16.msra.mxu1 %v12474_v11  ;;  %v3788_v1 = vor.u32 %v3786_v43, %v3785_v31  ;;  %v12471_v34 = vld [vmem:[#allocation9] sm:$0xff]   ;;  %v12476_v50 = vld [vmem:[#allocation9 + $0x1f8] sm:$0xff]  }
 0x43b   : > { %v3695_v54 = vadd.f32 %v14521_v8, %v3656_v28  ;;  %v3913_v47 = vor.u32 %v3912_v42, %v17335_v20  ;;  %v10378_v5 = vpop.f32.mrf.mxu0  ;;  %v11774_v18 = vpop.f32.mrf.mxu1  ;;  %v3914_v58 = vrot.slane %v17334_v27, 1  ;;  %10560 = vmatpush3.bf16.msra.mxu0 %v12469_v22  ;;  %11841 = vmatprep.subr.bf16.mxu1 %v12475_v62  ;;  %v17424_v28 = vld [vmem:[#allocation45_spill] sm:$0xff]  ;;  %v3726_v42 = vmax.f32 %v3694_v23, 0.0  ;;  %v14816_v20 = vld [vmem:[#allocation9 + $0x238] sm:$0xff]  }
 0x43c   : > { %v14806_v39 = vpack.c.bf16 %v3729_v49, %v3728_v51  ;;  %v3700_v11 = vadd.f32 %v14521_v8, %v3661_v57  ;;  %v3659_v4 = vadd.f32 %v3605_v40, %v17424_v28  ;;  %v3616_v13 = vadd.f32 %v11774_v18, %v10374_v35  ;;  %10561 = vmatprep.subr.bf16.mxu0 %v12470_v26  ;;  %v17425_v51 = vld [vmem:[#allocation34_spill] sm:$0xff]  ;;  %v17426_v26 = vld [vmem:[#allocation47_spill] sm:$0xff] }
 0x43d   : > { %v3727_v25 = vmax.f32 %v3695_v54, 0.0  ;;  %v14812_v43 = vsel %vm13148_vm2, %v3913_v47, 0  ;;  %v10379_v31 = vpop.f32.mrf.mxu0  ;;  %v3607_v27 = vpop.f32.mrf.mxu1  ;;  %v3915_v22 = vor.u32 %v3914_v58, %v17337_v10  ;;  %v3114_v49 = vadd.f32 %v17425_v51, %v14505_v9 }
 0x43e   : > { %11808 = vmatmul.mubr.bf16.gmra.mxu0 %v14812_v43  ;;  %v10377_v35 = vadd.f32 %v10376_v16, %v10375_v33  ;;  %v3662_v23 = vadd.f32 %v3616_v13, %v17426_v26  ;;  %v14824_v57 = vsel %vm13231_vm6, 0, %v3788_v1  ;;  %11842 = vmatpush3.bf16.msra.mxu1 %v12475_v62  ;;  %v3732_v54 = vmax.f32 %v3700_v11, 0.0 }
 0x43f   : > { %v14826_v40 = vpack.c.bf16 %v3727_v25, %v3726_v42  ;;  %v3608_v47 = vadd.f32 %v14744_v61, %v3607_v27  ;;  %v10381_v18 = vpop.f32.mrf.mxu0  ;;  %v11777_v58 = vpop.f32.mrf.mxu1  ;;  %v14831_v9 = vsel %vm13148_vm2, %v3915_v22, 0  ;;  %10562 = vmatpush3.bf16.msra.mxu0 %v12471_v34  ;;  %10683 = vmatprep.subr.bf16.mxu1 %v12476_v50  ;;  %v3698_v33 = vadd.f32 %v14521_v8, %v3659_v4 }
 0x440   : > { %v3701_v16 = vadd.f32 %v14521_v8, %v3662_v23  ;;  %4268 = vmatmul.mubr.bf16.gmra.mxu1 %v14824_v57  ;;  %11811 = vmatprep.mubr.bf16.mxu0 %v14831_v9  ;;  %v17336_v25 = vshll.u32 %v14763_v55, 16  ;;  %v3792_v61 = vrot.slane %v3790_v24, 7  ;;  %v3818_v27 = vshrl.u32 %v14763_v55, 16 }
 0x441   : > { %v3660_v62 = vadd.f32 %v3608_v47, %v14570_v14  ;;  %4275 = vmatprep.mubr.bf16.mxu1 %v14662_v19  ;;  %v10382_v1 = vpop.f32.mrf.mxu0  ;;  %v3620_v34 = vpop.f32.mrf.mxu1  ;;  %v3825_v50 = vshrl.u32 %v14826_v40, 16  ;;  %v3828_v11 = vshll.u32 %v14826_v40, 16  ;;  %11875 = vmatprep.subr.bf16.mxu0 %v14816_v20  ;;  %v3835_v23 = vshll.u32 %v14806_v39, 16 }
 0x442   : > { %v3733_v28 = vmax.f32 %v3701_v16, 0.0  ;;  %v3916_v4 = vrot.slane %v17336_v25, 1  ;;  %v10383_v13 = vadd.f32 %v10382_v1, %v10381_v18  ;;  %v3621_v24 = vadd.f32 %v10377_v35, %v3620_v34 }
 0x443   : > { %v3699_v14 = vadd.f32 %v14521_v8, %v3660_v62  ;;  %v10384_v42 = vpop.f32.mrf.mxu0  ;;  %v11778_v22 = vpop.f32.mrf.mxu1  ;;  %v3795_v51 = vor.u32 %v3793_v63, %v3792_v61  ;;  %v3918_v26 = vrot.slane %v3828_v11, 1  ;;  %v10380_v16 = vadd.f32 %v10379_v31, %v10378_v5 }
 0x444   : > { %v14854_v47 = vpack.c.bf16 %v3733_v28, %v3732_v54  ;;  %v3917_v25 = vor.u32 %v3916_v4, %v3818_v27  ;;  %v3629_v18 = vadd.f32 %v11777_v58, %v10383_v13  ;;  %v3730_v35 = vmax.f32 %v3698_v33, 0.0 }
 0x445   : > { %v3731_v1 = vmax.f32 %v3699_v14, 0.0  ;;  %v3663_v62 = vadd.f32 %v3621_v24, %v14498_v29  ;;  %v10385_v34 = vpop.f32.mrf.mxu0  ;;  %v3623_v10 = vpop.f32.mrf.mxu1  ;;  %v3919_v63 = vor.u32 %v3918_v26, %v3825_v50  ;;  %v3920_v5 = vrot.slane %v3835_v23, 1 }
 0x446   : > { %v14863_v61 = vsel %vm13148_vm2, %v3917_v25, 0  ;;  %v3665_v54 = vadd.f32 %v3629_v18, %v3114_v49  ;;  %v10386_v28 = vadd.f32 %v10385_v34, %v10384_v42  ;;  %v3624_v58 = vadd.f32 %v10380_v16, %v3623_v10  ;;  %v17427_v25 = vld [vmem:[#allocation35_spill] sm:$0xff] }
 0x447   : > { %v14867_v31 = vpack.c.bf16 %v3731_v1, %v3730_v35  ;;  %11812 = vmatmul.mubr.bf16.gmra.mxu0 %v14863_v61  ;;  %v14872_v29 = vsel %vm13231_vm6, 0, %v3795_v51  ;;  %v14876_v33 = vsel %vm13148_vm2, %v3919_v63, 0  ;;  %v3117_v49 = vadd.f32 %v17427_v25, %v14514_v36 }
 0x448   : > { %v3632_v4 = vadd.f32 %v11778_v22, %v10386_v28  ;;  %4276 = vmatmul.mubr.bf16.gmra.mxu1 %v14872_v29  ;;  %11815 = vmatprep.mubr.bf16.mxu0 %v14876_v33  ;;  %v3832_v13 = vshrl.u32 %v14806_v39, 16  ;;  %v3799_v10 = vrot.slane %v3797_v17, 7  ;;  %v3702_v24 = vadd.f32 %v14521_v8, %v3663_v62 }
 0x449   : > { %v3664_v14 = vadd.f32 %v3624_v58, %v14593_v30  ;;  %4283 = vmatprep.mubr.bf16.mxu1 %v14728_v7  ;;  %v3842_v42 = vshll.u32 %v14867_v31, 16  ;;  %v3704_v36 = vadd.f32 %v14521_v8, %v3665_v54  ;;  %v3839_v26 = vshrl.u32 %v14867_v31, 16 }
 0x44a   : > { %v3666_v22 = vadd.f32 %v3632_v4, %v3117_v49  ;;  %v3921_v51 = vor.u32 %v3920_v5, %v3832_v13  ;;  %v17428_v17 = vshll.u32 %v14728_v7, 16  ;;  %v3849_v35 = vshll.u32 %v14854_v47, 16 }
 0x44b   : > { %v3703_v16 = vadd.f32 %v14521_v8, %v3664_v14  ;;  %v3922_v30 = vrot.slane %v3842_v42, 1  ;;  %v3734_v62 = vmax.f32 %v3702_v24, 0.0  ;;  %v3736_v54 = vmax.f32 %v3704_v36, 0.0 }
 0x44c   : > { %v3802_v18 = vor.u32 %v17428_v17, %v3799_v10  ;;  %v3705_v1 = vadd.f32 %v14521_v8, %v3666_v22  ;;  %v14904_v5 = vsel %vm13148_vm2, %v3921_v51, 0  ;;  %v3924_v58 = vrot.slane %v3849_v35, 1 }
 0x44d   : > { %v3735_v34 = vmax.f32 %v3703_v16, 0.0  ;;  %v3923_v63 = vor.u32 %v3922_v30, %v3839_v26  ;;  %v17429_v4 = vshrl.u32 %v14712_v56, 16  ;;  %v3846_v14 = vshrl.u32 %v14854_v47, 16 }
 0x44e   : > { %v3737_v28 = vmax.f32 %v3705_v1, 0.0  ;;  %v14913_v8 = vsel %vm13231_vm6, 0, %v3802_v18  ;;  %v17430_v16 = vshll.u32 %v14712_v56, 16 }
 0x44f   : > { %v14908_v25 = vpack.c.bf16 %v3735_v34, %v3734_v62  ;;  %11816 = vmatmul.mubr.bf16.gmra.mxu0 %v14904_v5  ;;  %v14917_v49 = vsel %vm13148_vm2, %v3923_v63, 0  ;;  %v3806_v10 = vrot.slane %v17429_v4, 7  ;;  %v3925_v22 = vor.u32 %v3924_v58, %v3846_v14 }
 0x450   : > { %v14921_v24 = vpack.c.bf16 %v3737_v28, %v3736_v54  ;;  %4284 = vmatmul.mubr.bf16.gmra.mxu1 %v14913_v8  ;;  %11819 = vmatprep.mubr.bf16.mxu0 %v14917_v49  ;;  %v17431_v58 = vshrl.u32 %v14777_v46, 16 }
 0x451   : > { %4291 = vmatprep.mubr.bf16.mxu1 %v14712_v56  ;;  %v3856_v36 = vshll.u32 %v14908_v25, 16  ;;  %v3809_v17 = vor.u32 %v17430_v16, %v3806_v10  ;;  %v3853_v18 = vshrl.u32 %v14908_v25, 16  ;;  %v14942_v34 = vsel %vm13148_vm2, %v3925_v22, 0 }
 0x452   : > { %v17338_v51 = vshll.u32 %v14921_v24, 16  ;;  %v3860_v63 = vshrl.u32 %v14921_v24, 16  ;;  %v3813_v4 = vrot.slane %v17431_v58, 7  ;;  %v17432_v22 = vshll.u32 %v14777_v46, 16 }
 0x453   : > { %v3926_v30 = vrot.slane %v3856_v36, 1  ;;  %v14948_v54 = vsel %vm13231_vm6, 0, %v3809_v17  ;;  %v17434_v58 = vshll.u32 %v14763_v55, 16 }
 0x454   : > { %v3928_v1 = vrot.slane %v17338_v51, 1  ;;  %v3816_v16 = vor.u32 %v17432_v22, %v3813_v4  ;;  %v17435_v22 = vld [vmem:[#allocation23_spill] sm:$0xff] }
 0x455   : > { %v3927_v62 = vor.u32 %v3926_v30, %v3853_v18 }
 0x456   : > { %v3929_v10 = vor.u32 %v3928_v1, %v3860_v63  ;;  %v14970_v30 = vsel %vm13231_vm6, 0, %v3816_v16  ;;  %v17433_v1 = vmov 0   ;;  %v3827_v16 = vrot.slane %v3825_v50, 7 }
 0x457   : > { %11820 = vmatmul.mubr.bf16.gmra.mxu0 %v14942_v34  ;;  %v14952_v28 = vsel %vm13148_vm2, %v3927_v62, 0  ;;  %v3820_v62 = vrot.slane %v3818_v27, 7  ;;  %v12487_v27 = vld [vmem:[#allocation9 + $0x228] sm:$0xff]  }
 0x458   : > { %4292 = vmatmul.mubr.bf16.gmra.mxu1 %v14948_v54  ;;  %11823 = vmatprep.mubr.bf16.mxu0 %v14952_v28  ;;  %v14965_v17 = vsel %vm13148_vm2, %v3929_v10, 0  ;;  %v12482_v10 = vld [vmem:[#allocation9 + $0x230] sm:$0xff]  }
 0x459   : > { %4299 = vmatprep.mubr.bf16.mxu1 %v14777_v46  ;;  %v3823_v4 = vor.u32 %v17434_v58, %v3820_v62  ;;  %v3830_v62 = vor.u32 %v3828_v11, %v3827_v16  ;;  %v12491_v58 = vld [vmem:[#allocation9 + $0x220] sm:$0xff]  }
 0x45a   : > { %v12499_v16 = vld [vmem:[#allocation9 + $0x200] sm:$0xff]  }
 0x45b   : > { %v14982_v51 = vsel %vm13231_vm6, 0, %v3823_v4  ;;  %v14995_v50 = vsel %vm13231_vm6, 0, %v3830_v62  ;;  %v3841_v4 = vrot.slane %v3839_v26, 7 }
 0x45f   : > { %11824 = vmatmul.mubr.bf16.gmra.mxu0 %v14965_v17 }
 0x460   : > { %4300 = vmatmul.mubr.bf16.gmra.mxu1 %v14970_v30  ;;  %4701 = vmatprep.mubr.bf16.mxu0 %v17433_v1 }
 0x461   : > { %4307 = vmatprep.mubr.bf16.mxu1 %v14763_v55 }
 0x467   : > { %4702 = vmatmul.mubr.bf16.vlgmr.msra.gmra.mxu0 %v17435_v22 }
 0x468   : > { %4709 = vmatprep.mubr.bf16.mxu0 %v14603_v12  ;;  %4308 = vmatmul.mubr.bf16.gmra.mxu1 %v14982_v51  ;;  %v3834_v12 = vrot.slane %v3832_v13, 7 }
 0x469   : > { %4315 = vmatprep.mubr.bf16.mxu1 %v14826_v40  ;;  %11876 = vmatpush3.bf16.msra.mxu0 %v14816_v20  ;;  %v12494_v20 = vld [vmem:[#allocation9 + $0x218] sm:$0xff]  }
 0x46a   : > { %11877 = vmatprep.subr.bf16.mxu0 %v12482_v10  ;;  %v3837_v11 = vor.u32 %v3835_v23, %v3834_v12  ;;  %v12498_v23 = vld [vmem:[#allocation9 + $0x208] sm:$0xff]   ;;  %v3862_v12 = vrot.slane %v3860_v63, 7 }
 0x46b   : > { %v17437_v63 = vld [vmem:[#allocation21_spill] sm:$0xff] }
 0x46c   : > { %v15007_v13 = vsel %vm13231_vm6, 0, %v3837_v11  ;;  %v12478_v11 = vld [vmem:[#allocation9 + $0x1b8] sm:$0xff]  }
 0x46d   : > { %11878 = vmatpush3.bf16.msra.mxu0 %v12482_v10  ;;  %v3844_v10 = vor.u32 %v3842_v42, %v3841_v4  ;;  %v12480_v4 = vld [vmem:[#allocation9 + $0x1b0] sm:$0xff]  }
 0x46e   : > { %11879 = vmatprep.subr.bf16.mxu0 %v12487_v27 }
 0x46f   : > { %4710 = vmatmul.mubr.bf16.gmra.mxu0 %v14636_v48  ;;  %v12495_v48 = vld [vmem:[#allocation9 + $0x210] sm:$0xff]   ;;  %v15019_v26 = vsel %vm13231_vm6, 0, %v3844_v10  ;;  %v12483_v10 = vld [vmem:[#allocation9 + $0x1a8] sm:$0xff]  }
 0x470   : > { %4717 = vmatprep.mubr.bf16.mxu0 %v14584_v0  ;;  %4316 = vmatmul.mubr.bf16.gmra.mxu1 %v14995_v50 }
 0x471   : > { %4323 = vmatprep.mubr.bf16.mxu1 %v14806_v39  ;;  %11880 = vmatpush3.bf16.msra.mxu0 %v12487_v27  ;;  %v3848_v27 = vrot.slane %v3846_v14, 7  ;;  %v3855_v14 = vrot.slane %v3853_v18, 7  ;;  %v17436_v18 = vshll.u32 %v14921_v24, 16 }
 0x472   : > { %11881 = vmatprep.subr.bf16.mxu0 %v12491_v58 }
 0x473   : > { %v3851_v42 = vor.u32 %v3849_v35, %v3848_v27  ;;  %v12486_v27 = vld [vmem:[#allocation9 + $0x1d8] sm:$0xff]  }
 0x475   : > { %11882 = vmatpush3.bf16.msra.mxu0 %v12491_v58  ;;  %v15031_v62 = vsel %vm13231_vm6, 0, %v3851_v42  ;;  %v3858_v58 = vor.u32 %v3856_v36, %v3855_v14  ;;  %v12488_v42 = vld [vmem:[#allocation9 + $0x198] sm:$0xff]   ;;  %v12489_v14 = vld [vmem:[#allocation9 + $0x1d0] sm:$0xff]  }
 0x476   : > { %11883 = vmatprep.subr.bf16.mxu0 %v12494_v20 }
 0x477   : > { %4718 = vmatmul.mubr.bf16.gmra.mxu0 %v14678_v6  ;;  %v15043_v35 = vsel %vm13231_vm6, 0, %v3858_v58  ;;  %v12490_v58 = vld [vmem:[#allocation9 + $0x190] sm:$0xff]  }
 0x478   : > { %4725 = vmatprep.mubr.bf16.mxu0 %v14631_v45  ;;  %4324 = vmatmul.mubr.bf16.gmra.mxu1 %v15007_v13 }
 0x479   : > { %4331 = vmatprep.mubr.bf16.mxu1 %v14867_v31  ;;  %11884 = vmatpush3.bf16.msra.mxu0 %v12494_v20  ;;  %v3865_v20 = vor.u32 %v17436_v18, %v3862_v12  ;;  %v12492_v12 = vld [vmem:[#allocation9 + $0x1c8] sm:$0xff]  }
 0x47a   : > { %11885 = vmatprep.subr.bf16.mxu0 %v12495_v48  ;;  %v12493_v18 = vld [vmem:[#allocation9 + $0x188] sm:$0xff]  }
 0x47b   : > { %v15055_v36 = vsel %vm13231_vm6, 0, %v3865_v20  ;;  %v12496_v20 = vld [vmem:[#allocation9 + $0x1c0] sm:$0xff]  }
 0x47d   : > { %11886 = vmatpush3.bf16.msra.mxu0 %v12495_v48  ;;  %v12479_v48 = vld [vmem:[#allocation9 + $0x1f0] sm:$0xff]  }
 0x47e   : > { %11887 = vmatprep.subr.bf16.mxu0 %v12498_v23 }
 0x47f   : > { %4726 = vmatmul.mubr.bf16.gmra.mxu0 %v14725_v37 }
 0x480   : > { %4733 = vmatprep.mubr.bf16.mxu0 %v14619_v38  ;;  %4332 = vmatmul.mubr.bf16.gmra.mxu1 %v15019_v26 }
 0x481   : > { %4339 = vmatprep.mubr.bf16.mxu1 %v14854_v47  ;;  %11888 = vmatpush3.bf16.msra.mxu0 %v12498_v23  ;;  %v12481_v23 = vld [vmem:[#allocation9 + $0x1e8] sm:$0xff]  }
 0x482   : > { %11889 = vmatprep.subr.bf16.mxu0 %v12499_v16 }
 0x485   : > { %11890 = vmatpush3.bf16.msra.mxu0 %v12499_v16  ;;  %v12484_v16 = vld [vmem:[#allocation9 + $0x1e0] sm:$0xff]  }
 0x487   : > { %4734 = vmatmul.mubr.bf16.gmra.mxu0 %v14774_v21 }
 0x488   : > { %4741 = vmatprep.mubr.bf16.mxu0 %v14680_v59  ;;  %4340 = vmatmul.mubr.bf16.gmra.mxu1 %v15031_v62 }
 0x489   : > { %4347 = vmatprep.mubr.bf16.mxu1 %v14908_v25 }
 0x48f   : > { %4742 = vmatmul.mubr.bf16.gmra.mxu0 %v14824_v57 }
 0x490   : > { %4749 = vmatprep.mubr.bf16.mxu0 %v14662_v19  ;;  %4348 = vmatmul.mubr.bf16.gmra.mxu1 %v15043_v35 }
 0x491   : > { %4355 = vmatprep.mubr.bf16.mxu1 %v14921_v24 }
 0x497   : > { %4750 = vmatmul.mubr.bf16.gmra.mxu0 %v14872_v29 }
 0x498   : > { %4757 = vmatprep.mubr.bf16.mxu0 %v14728_v7  ;;  %4356 = vmatmul.mubr.bf16.gmra.mxu1 %v15055_v36 }
 0x499   : > { %11843 = vmatprep.mubr.bf16.mxu1 %v17437_v63 }
 0x49f   : > { %4758 = vmatmul.mubr.bf16.gmra.mxu0 %v14913_v8 }
 0x4a0   : > { %4765 = vmatprep.mubr.bf16.mxu0 %v14712_v56  ;;  %11844 = vmatmul.mubr.bf16.vlgmr.msra.gmra.mxu1 %v14640_v15  ;;  %v12485_v15 = vld [vmem:[#allocation9 + $0x1a0] sm:$0xff]  }
 0x4a1   : > { %10684 = vmatpush3.bf16.msra.mxu1 %v12478_v11  ;;  %11847 = vmatprep.mubr.bf16.mxu1 %v14629_v2  ;;  %v12497_v11 = vld [vmem:[#allocation9 + $0x180] sm:$0xff]  }
 0x4a2   : > { %10685 = vmatprep.subr.bf16.mxu1 %v12479_v48 }
 0x4a5   : > { %10686 = vmatpush3.bf16.msra.mxu1 %v12480_v4 }
 0x4a6   : > { %10687 = vmatprep.subr.bf16.mxu1 %v12481_v23 }
 0x4a7   : > { %4766 = vmatmul.mubr.bf16.gmra.mxu0 %v14948_v54 }
 0x4a8   : > { %4773 = vmatprep.mubr.bf16.mxu0 %v14777_v46  ;;  %11848 = vmatmul.mubr.bf16.gmra.mxu1 %v14685_v52 }
 0x4a9   : > { %11851 = vmatprep.mubr.bf16.mxu1 %v14699_v41  ;;  %10688 = vmatpush3.bf16.msra.mxu1 %v12483_v10 }
 0x4aa   : > { %10689 = vmatprep.subr.bf16.mxu1 %v12484_v16 }
 0x4ad   : > { %10690 = vmatpush3.bf16.msra.mxu1 %v12485_v15 }
 0x4ae   : > { %10691 = vmatprep.subr.bf16.mxu1 %v12486_v27 }
 0x4af   : > { %4774 = vmatmul.mubr.bf16.gmra.mxu0 %v14970_v30 }
 0x4b0   : > { %4781 = vmatprep.mubr.bf16.mxu0 %v14763_v55  ;;  %11852 = vmatmul.mubr.bf16.gmra.mxu1 %v14733_v32 }
 0x4b1   : > { %11855 = vmatprep.mubr.bf16.mxu1 %v14757_v44  ;;  %10692 = vmatpush3.bf16.msra.mxu1 %v12488_v42 }
 0x4b2   : > { %10693 = vmatprep.subr.bf16.mxu1 %v12489_v14 }
 0x4b5   : > { %10694 = vmatpush3.bf16.msra.mxu1 %v12490_v58 }
 0x4b6   : > { %10695 = vmatprep.subr.bf16.mxu1 %v12492_v12 }
 0x4b7   : > { %4782 = vmatmul.mubr.bf16.gmra.mxu0 %v14982_v51 }
 0x4b8   : > { %4789 = vmatprep.mubr.bf16.mxu0 %v14826_v40  ;;  %11856 = vmatmul.mubr.bf16.gmra.mxu1 %v14782_v3 }
 0x4b9   : > { %11859 = vmatprep.mubr.bf16.mxu1 %v14812_v43  ;;  %10696 = vmatpush3.bf16.msra.mxu1 %v12493_v18 }
 0x4ba   : > { %10697 = vmatprep.subr.bf16.mxu1 %v12496_v20 }
 0x4bd   : > { %10698 = vmatpush3.bf16.msra.mxu1 %v12497_v11 }
 0x4bf   : > { %4790 = vmatmul.mubr.bf16.gmra.mxu0 %v14995_v50 }
 0x4c0   : > { %4797 = vmatprep.mubr.bf16.mxu0 %v14806_v39  ;;  %11860 = vmatmul.mubr.bf16.gmra.mxu1 %v14831_v9 }
 0x4c1   : > { %11863 = vmatprep.mubr.bf16.mxu1 %v14863_v61 }
 0x4c7   : > { %4798 = vmatmul.mubr.bf16.gmra.mxu0 %v15007_v13 }
 0x4c8   : > { %4805 = vmatprep.mubr.bf16.mxu0 %v14867_v31  ;;  %11864 = vmatmul.mubr.bf16.gmra.mxu1 %v14876_v33 }
 0x4c9   : > { %11867 = vmatprep.mubr.bf16.mxu1 %v14904_v5 }
 0x4cf   : > { %4806 = vmatmul.mubr.bf16.gmra.mxu0 %v15019_v26 }
 0x4d0   : > { %4813 = vmatprep.mubr.bf16.mxu0 %v14854_v47  ;;  %11868 = vmatmul.mubr.bf16.gmra.mxu1 %v14917_v49 }
 0x4d1   : > { %11871 = vmatprep.mubr.bf16.mxu1 %v14942_v34 }
 0x4d7   : > { %4814 = vmatmul.mubr.bf16.gmra.mxu0 %v15031_v62 }
 0x4d8   : > { %4821 = vmatprep.mubr.bf16.mxu0 %v14908_v25  ;;  %11872 = vmatmul.mubr.bf16.gmra.mxu1 %v14952_v28 }
 0x4d9   : > { %5216 = vmatprep.mubr.bf16.mxu1 %v14584_v0 }
 0x4df   : > { %4822 = vmatmul.mubr.bf16.gmra.mxu0 %v15043_v35 }
 0x4e0   : > { %11891 = vmatprep.mubr.bf16.mxu0 %v14629_v2  ;;  %v10427_v48 = vpop.f32.mrf.mxu1  ;;  %5217 = vmatmul.mubr.bf16.vlgmr.msra.gmra.mxu1 %v14678_v6 }
 0x4e1   : > { %5224 = vmatprep.mubr.bf16.mxu1 %v14631_v45 }
 0x4e2   : > { %v11797_v4 = vpop.f32.mrf.mxu0  ;;  %v10428_v23 = vpop.f32.mrf.mxu1 }
 0x4e3   : > { %v10429_v10 = vadd.f32 %v10428_v23, %v10427_v48 }
 0x4e4   : > { %v4398_v16 = vpop.f32.mrf.mxu0  ;;  %v10430_v15 = vpop.f32.mrf.mxu1 }
 0x4e5   : > { %v15096_v27 = vadd.f32 %v10429_v10, %v4398_v16 }
 0x4e6   : > { %v11798_v42 = vpop.f32.mrf.mxu0  ;;  %v10431_v14 = vpop.f32.mrf.mxu1 }
 0x4e7   : > { %11892 = vmatmul.mubr.bf16.vlgmr.msra.gmra.mxu0 %v14685_v52  ;;  %v10432_v0 = vadd.f32 %v10431_v14, %v10430_v15 }
 0x4e8   : > { %11895 = vmatprep.mubr.bf16.mxu0 %v14699_v41  ;;  %v4401_v2 = vpop.f32.mrf.mxu0  ;;  %v10433_v58 = vpop.f32.mrf.mxu1  ;;  %5225 = vmatmul.mubr.bf16.gmra.mxu1 %v14725_v37 }
 0x4e9   : > { %v15101_v6 = vadd.f32 %v10432_v0, %v4401_v2  ;;  %5232 = vmatprep.mubr.bf16.mxu1 %v14619_v38 }
 0x4ea   : > { %v11801_v45 = vpop.f32.mrf.mxu0  ;;  %v10434_v12 = vpop.f32.mrf.mxu1 }
 0x4eb   : > { %v10435_v18 = vadd.f32 %v10434_v12, %v10433_v58 }
 0x4ec   : > { %v4414_v20 = vpop.f32.mrf.mxu0  ;;  %v10436_v11 = vpop.f32.mrf.mxu1 }
 0x4ed   : > { %v15104_v48 = vadd.f32 %v11797_v4, %v10435_v18 }
 0x4ee   : > { %v11802_v23 = vpop.f32.mrf.mxu0  ;;  %v10437_v52 = vpop.f32.mrf.mxu1 }
 0x4ef   : > { %11896 = vmatmul.mubr.bf16.gmra.mxu0 %v14733_v32  ;;  %v10438_v41 = vadd.f32 %v10437_v52, %v10436_v11 }
 0x4f0   : > { %11899 = vmatprep.mubr.bf16.mxu0 %v14757_v44  ;;  %v4417_v10 = vpop.f32.mrf.mxu0  ;;  %v10439_v37 = vpop.f32.mrf.mxu1  ;;  %5233 = vmatmul.mubr.bf16.gmra.mxu1 %v14774_v21 }
 0x4f1   : > { %v15109_v16 = vadd.f32 %v11798_v42, %v10438_v41  ;;  %5240 = vmatprep.mubr.bf16.mxu1 %v14680_v59  ;;  %v12500_v41 = vld [vmem:[#allocation12 + $0x178] sm:$0xff]  }
 0x4f2   : > { %v10440_v38 = vpop.f32.mrf.mxu1  ;;  %11923 = vmatprep.subr.bf16.mxu1 %v12500_v41 }
 0x4f3   : > { %v10441_v15 = vadd.f32 %v10440_v38, %v10439_v37  ;;  %11924 = vmatpush3.bf16.msra.mxu1 %v12500_v41 }
 0x4f4   : > { %v11805_v14 = vpop.f32.mrf.mxu0  ;;  %v10442_v4 = vpop.f32.mrf.mxu1 }
 0x4f5   : > { %v15112_v0 = vadd.f32 %v10441_v15, %v4414_v20 }
 0x4f6   : > { %v4430_v2 = vpop.f32.mrf.mxu0  ;;  %v10443_v58 = vpop.f32.mrf.mxu1 }
 0x4f7   : > { %11900 = vmatmul.mubr.bf16.gmra.mxu0 %v14782_v3  ;;  %v10444_v32 = vadd.f32 %v10443_v58, %v10442_v4 }
 0x4f8   : > { %11903 = vmatprep.mubr.bf16.mxu0 %v14812_v43  ;;  %v11806_v44 = vpop.f32.mrf.mxu0  ;;  %v10445_v12 = vpop.f32.mrf.mxu1  ;;  %5241 = vmatmul.mubr.bf16.gmra.mxu1 %v14824_v57 }
 0x4f9   : > { %v15117_v21 = vadd.f32 %v10444_v32, %v4417_v10  ;;  %5248 = vmatprep.mubr.bf16.mxu1 %v14662_v19 }
 0x4fa   : > { %v4433_v59 = vpop.f32.mrf.mxu0  ;;  %v10446_v42 = vpop.f32.mrf.mxu1 }
 0x4fb   : > { %v10447_v18 = vadd.f32 %v10446_v42, %v10445_v12 }
 0x4fc   : > { %v10448_v20 = vpop.f32.mrf.mxu1 }
 0x4fd   : > { %v15120_v11 = vadd.f32 %v11801_v45, %v10447_v18 }
 0x4fe   : > { %v15122_v52 = vpop.f32.mrf.mxu0  ;;  %v10449_v3 = vpop.f32.mrf.mxu1 }
 0x4ff   : > { %11904 = vmatmul.mubr.bf16.gmra.mxu0 %v14831_v9  ;;  %v10450_v43 = vadd.f32 %v10449_v3, %v10448_v20 }
 0x500   : > { %v4446_v37 = vpop.f32.mrf.mxu0  ;;  %11907 = vmatprep.mubr.bf16.mxu0 %v14863_v61  ;;  %v10451_v57 = vpop.f32.mrf.mxu1  ;;  %5249 = vmatmul.mubr.bf16.gmra.mxu1 %v14872_v29 }
 0x501   : > { %v15127_v19 = vadd.f32 %v11802_v23, %v10450_v43  ;;  %5256 = vmatprep.mubr.bf16.mxu1 %v14728_v7 }
 0x502   : > { %v15130_v45 = vpop.f32.mrf.mxu0  ;;  %v10452_v10 = vpop.f32.mrf.mxu1 }
 0x503   : > { %v10453_v38 = vadd.f32 %v10452_v10, %v10451_v57 }
 0x504   : > { %v4449_v15 = vpop.f32.mrf.mxu0  ;;  %v10454_v4 = vpop.f32.mrf.mxu1 }
 0x505   : > { %v15132_v9 = vadd.f32 %v10453_v38, %v4430_v2 }
 0x506   : > { %v10455_v58 = vpop.f32.mrf.mxu1 }
 0x507   : > { %v15134_v32 = vpop.f32.mrf.mxu0  ;;  %11908 = vmatmul.mubr.bf16.gmra.mxu0 %v14876_v33  ;;  %v10456_v61 = vadd.f32 %v10455_v58, %v10454_v4 }
 0x508   : > { %11911 = vmatprep.mubr.bf16.mxu0 %v14904_v5  ;;  %v10457_v29 = vpop.f32.mrf.mxu1  ;;  %5257 = vmatmul.mubr.bf16.gmra.mxu1 %v14913_v8  ;;  %v12501_v5 = vld [vmem:[#allocation12 + $0x170] sm:$0xff]  }
 0x509   : > { %v15139_v7 = vpop.f32.mrf.mxu0  ;;  %v15141_v23 = vadd.f32 %v10456_v61, %v4433_v59  ;;  %5264 = vmatprep.mubr.bf16.mxu1 %v14712_v56  ;;  %11925 = vmatprep.subr.bf16.mxu1 %v12501_v5 }
 0x50a   : > { %v10458_v12 = vpop.f32.mrf.mxu1  ;;  %11926 = vmatpush3.bf16.msra.mxu1 %v12501_v5 }
 0x50b   : > { %v15144_v2 = vpop.f32.mrf.mxu0  ;;  %v10459_v42 = vadd.f32 %v10458_v12, %v10457_v29 }
 0x50c   : > { %v10460_v18 = vpop.f32.mrf.mxu1 }
 0x50d   : > { %v15146_v20 = vpop.f32.mrf.mxu0  ;;  %v15148_v33 = vadd.f32 %v11805_v14, %v10459_v42 }
 0x50e   : > { %v10461_v3 = vpop.f32.mrf.mxu1 }
 0x50f   : > { %v15150_v41 = vpop.f32.mrf.mxu0  ;;  %11912 = vmatmul.mubr.bf16.gmra.mxu0 %v14917_v49  ;;  %v10462_v8 = vadd.f32 %v10461_v3, %v10460_v18  ;;  %v12502_v3 = vld [vmem:[#allocation12 + $0x168] sm:$0xff]  }
 0x510   : > { %11915 = vmatprep.mubr.bf16.mxu0 %v14942_v34  ;;  %v10463_v59 = vpop.f32.mrf.mxu1  ;;  %5265 = vmatmul.mubr.bf16.gmra.mxu1 %v14948_v54 }
 0x511   : > { %v15155_v56 = vpop.f32.mrf.mxu0  ;;  %v15157_v43 = vadd.f32 %v11806_v44, %v10462_v8  ;;  %5272 = vmatprep.mubr.bf16.mxu1 %v14777_v46  ;;  %v12504_v8 = vld [vmem:[#allocation12 + $0xf8] sm:$0xff]   ;;  %11927 = vmatprep.subr.bf16.mxu1 %v12502_v3 }
 0x512   : > { %v10464_v14 = vpop.f32.mrf.mxu1  ;;  %11928 = vmatpush3.bf16.msra.mxu1 %v12502_v3 }
 0x513   : > { %v15160_v57 = vpop.f32.mrf.mxu0  ;;  %v10465_v10 = vadd.f32 %v10464_v14, %v10463_v59 }
 0x514   : > { %v10466_v38 = vpop.f32.mrf.mxu1 }
 0x515   : > { %v15162_v49 = vpop.f32.mrf.mxu0  ;;  %v15164_v4 = vadd.f32 %v10465_v10, %v4446_v37 }
 0x516   : > { %v10467_v34 = vpop.f32.mrf.mxu1 }
 0x517   : > { %v15166_v58 = vpop.f32.mrf.mxu0  ;;  %11916 = vmatmul.mubr.bf16.gmra.mxu0 %v14952_v28  ;;  %v10468_v54 = vadd.f32 %v10467_v34, %v10466_v38 }
 0x518   : > { %11919 = vmatprep.mubr.bf16.mxu0 %v14965_v17  ;;  %v10469_v46 = vpop.f32.mrf.mxu1  ;;  %5273 = vmatmul.mubr.bf16.gmra.mxu1 %v14970_v30 }
 0x519   : > { %v15171_v44 = vpop.f32.mrf.mxu0  ;;  %v15173_v61 = vadd.f32 %v10468_v54, %v4449_v15  ;;  %5280 = vmatprep.mubr.bf16.mxu1 %v14763_v55  ;;  %v12503_v15 = vld [vmem:[#allocation12 + $0x138] sm:$0xff]  }
 0x51a   : > { %v10470_v29 = vpop.f32.mrf.mxu1  ;;  %10819 = vmatprep.subr.bf16.mxu0 %v12503_v15  ;;  %v12507_v15 = vld [vmem:[#allocation12 + $0x128] sm:$0xff]  }
 0x51b   : > { %v15176_v37 = vpop.f32.mrf.mxu0  ;;  %v10471_v12 = vadd.f32 %v10470_v29, %v10469_v46  ;;  %10820 = vmatpush3.bf16.msra.mxu0 %v12504_v8  ;;  %v12505_v29 = vld [vmem:[#allocation12 + $0x130] sm:$0xff]   ;;  %v12508_v8 = vld [vmem:[#allocation12 + $0xe8] sm:$0xff]  }
 0x51c   : > { %v10472_v42 = vpop.f32.mrf.mxu1  ;;  %10821 = vmatprep.subr.bf16.mxu0 %v12505_v29 }
 0x51d   : > { %v15178_v18 = vpop.f32.mrf.mxu0  ;;  %v15181_v28 = vadd.f32 %v15122_v52, %v10471_v12  ;;  %v12506_v12 = vld [vmem:[#allocation12 + $0xf0] sm:$0xff]  }
 0x51e   : > { %v10473_v17 = vpop.f32.mrf.mxu1 }
 0x51f   : > { %v15183_v5 = vpop.f32.mrf.mxu0  ;;  %v10474_v30 = vadd.f32 %v10473_v17, %v10472_v42  ;;  %11920 = vmatmul.mubr.bf16.gmra.mxu0 %v17437_v63 }
 0x520   : > { %v10475_v55 = vpop.f32.mrf.mxu1  ;;  %5281 = vmatmul.mubr.bf16.gmra.mxu1 %v14982_v51  ;;  %10822 = vmatpush3.bf16.msra.mxu0 %v12506_v12 }
 0x521   : > { %v15187_v59 = vpop.f32.mrf.mxu0  ;;  %v15190_v14 = vadd.f32 %v15130_v45, %v10474_v30  ;;  %5288 = vmatprep.mubr.bf16.mxu1 %v14826_v40  ;;  %10823 = vmatprep.subr.bf16.mxu0 %v12507_v15 }
 0x522   : > { %v10476_v52 = vpop.f32.mrf.mxu1 }
 0x523   : > { %v15193_v10 = vpop.f32.mrf.mxu0  ;;  %v10477_v38 = vadd.f32 %v10476_v52, %v10475_v55 }
 0x524   : > { %v10478_v34 = vpop.f32.mrf.mxu1  ;;  %10824 = vmatpush3.bf16.msra.mxu0 %v12508_v8 }
 0x525   : > { %v15195_v54 = vpop.f32.mrf.mxu0  ;;  %v15198_v51 = vadd.f32 %v10477_v38, %v15139_v7 }
 0x526   : > { %v10479_v46 = vpop.f32.mrf.mxu1 }
 0x527   : > { %v10563_v45 = vpop.f32.mrf.mxu0  ;;  %v15200_v42 = vadd.f32 %v10479_v46, %v10478_v34 }
 0x528   : > { %v10481_v40 = vpop.f32.mrf.mxu1  ;;  %5289 = vmatmul.mubr.bf16.gmra.mxu1 %v14995_v50 }
 0x529   : > { %v10564_v17 = vpop.f32.mrf.mxu0  ;;  %5296 = vmatprep.mubr.bf16.mxu1 %v14806_v39 }
 0x52a   : > { %v10565_v3 = vadd.f32 %v10564_v17, %v10563_v45  ;;  %v10482_v30 = vpop.f32.mrf.mxu1 }
 0x52b   : > { %v10566_v7 = vpop.f32.mrf.mxu0  ;;  %v10483_v55 = vadd.f32 %v10482_v30, %v10481_v40  ;;  %v12509_v40 = vld [vmem:[#allocation12 + $0x120] sm:$0xff]  }
 0x52c   : > { %v10484_v52 = vpop.f32.mrf.mxu1  ;;  %v15205_v38 = vadd.f32 %v10565_v3, %v15096_v27  ;;  %v12510_v30 = vld [vmem:[#allocation12 + $0xe0] sm:$0xff]   ;;  %10825 = vmatprep.subr.bf16.mxu0 %v12509_v40 }
 0x52d   : > { %v10567_v34 = vpop.f32.mrf.mxu0  ;;  %v15208_v46 = vadd.f32 %v15134_v32, %v10483_v55  ;;  %10826 = vmatpush3.bf16.msra.mxu0 %v12510_v30  ;;  %v12515_v30 = vld [vmem:[#allocation12 + $0xd0] sm:$0xff]  }
 0x52e   : > { %v10568_v50 = vadd.f32 %v10567_v34, %v10566_v7  ;;  %v10485_v29 = vpop.f32.mrf.mxu1  ;;  %v12513_v34 = vld [vmem:[#allocation12 + $0xd8] sm:$0xff]  }
 0x52f   : > { %v10569_v39 = vpop.f32.mrf.mxu0  ;;  %v10486_v12 = vadd.f32 %v10485_v29, %v10484_v52  ;;  %v12512_v52 = vld [vmem:[#allocation12 + $0x118] sm:$0xff]  }
 0x530   : > { %v10487_v45 = vpop.f32.mrf.mxu1  ;;  %5297 = vmatmul.mubr.bf16.gmra.mxu1 %v15007_v13  ;;  %v15212_v17 = vadd.f32 %v10568_v50, %v15101_v6  ;;  %v12511_v6 = vld [vmem:[#allocation12 + $0x160] sm:$0xff]   ;;  %10827 = vmatprep.subr.bf16.mxu0 %v12512_v52 }
 0x531   : > { %v10570_v27 = vpop.f32.mrf.mxu0  ;;  %v15215_v3 = vadd.f32 %v15144_v2, %v10486_v12  ;;  %5304 = vmatprep.mubr.bf16.mxu1 %v14867_v31  ;;  %11929 = vmatprep.subr.bf16.mxu1 %v12511_v6 }
 0x532   : > { %v10571_v32 = vadd.f32 %v10570_v27, %v10569_v39  ;;  %v10488_v15 = vpop.f32.mrf.mxu1  ;;  %11930 = vmatpush3.bf16.msra.mxu1 %v12511_v6  ;;  %10828 = vmatpush3.bf16.msra.mxu0 %v12513_v34 }
 0x533   : > { %v10572_v8 = vpop.f32.mrf.mxu0  ;;  %v10489_v7 = vadd.f32 %v10488_v15, %v10487_v45 }
 0x534   : > { %v10490_v55 = vpop.f32.mrf.mxu1  ;;  %v15219_v13 = vadd.f32 %v10571_v32, %v15104_v48 }
 0x535   : > { %v10573_v50 = vpop.f32.mrf.mxu0  ;;  %v15222_v29 = vadd.f32 %v10489_v7, %v15155_v56  ;;  %v12514_v56 = vld [vmem:[#allocation12 + $0x110] sm:$0xff]   ;;  %v12516_v7 = vld [vmem:[#allocation12 + $0x108] sm:$0xff]  }
 0x536   : > { %v10574_v2 = vadd.f32 %v10573_v50, %v10572_v8  ;;  %v10491_v12 = vpop.f32.mrf.mxu1  ;;  %10829 = vmatprep.subr.bf16.mxu0 %v12514_v56  ;;  %v12520_v56 = vld [vmem:[#allocation12 + $0x150] sm:$0xff]  }
 0x537   : > { %v10575_v31 = vpop.f32.mrf.mxu0  ;;  %v15224_v39 = vadd.f32 %v10491_v12, %v10490_v55  ;;  %v12517_v55 = vld [vmem:[#allocation12 + $0x158] sm:$0xff]   ;;  %10830 = vmatpush3.bf16.msra.mxu0 %v12515_v30  ;;  %v12521_v30 = vld [vmem:[#allocation12 + $0xc0] sm:$0xff]  }
 0x538   : > { %v10493_v45 = vpop.f32.mrf.mxu1  ;;  %5305 = vmatmul.mubr.bf16.gmra.mxu1 %v15019_v26  ;;  %v15228_v48 = vadd.f32 %v10574_v2, %v15109_v16  ;;  %v12518_v26 = vld [vmem:[#allocation12 + $0xc8] sm:$0xff]   ;;  %10831 = vmatprep.subr.bf16.mxu0 %v12516_v7 }
 0x539   : > { %v10576_v40 = vpop.f32.mrf.mxu0  ;;  %5312 = vmatprep.mubr.bf16.mxu1 %v14854_v47  ;;  %11931 = vmatprep.subr.bf16.mxu1 %v12517_v55 }
 0x53a   : > { %v10577_v27 = vadd.f32 %v10576_v40, %v10575_v31  ;;  %v10494_v32 = vpop.f32.mrf.mxu1  ;;  %11932 = vmatpush3.bf16.msra.mxu1 %v12517_v55 }
 0x53b   : > { %v10578_v15 = vpop.f32.mrf.mxu0  ;;  %v10495_v8 = vadd.f32 %v10494_v32, %v10493_v45  ;;  %10832 = vmatpush3.bf16.msra.mxu0 %v12518_v26  ;;  %11933 = vmatprep.subr.bf16.mxu1 %v12520_v56 }
 0x53c   : > { %v10496_v6 = vpop.f32.mrf.mxu1  ;;  %v15232_v52 = vadd.f32 %v10577_v27, %v15112_v0 }
 0x53d   : > { %v10579_v16 = vpop.f32.mrf.mxu0  ;;  %v15235_v34 = vadd.f32 %v15150_v41, %v10495_v8  ;;  %v12519_v41 = vld [vmem:[#allocation12 + $0x100] sm:$0xff]  }
 0x53e   : > { %v10580_v47 = vadd.f32 %v10579_v16, %v10578_v15  ;;  %v10497_v50 = vpop.f32.mrf.mxu1  ;;  %10833 = vmatprep.subr.bf16.mxu0 %v12519_v41  ;;  %11934 = vmatpush3.bf16.msra.mxu1 %v12520_v56 }
 0x53f   : > { %v10581_v2 = vpop.f32.mrf.mxu0  ;;  %v10498_v12 = vadd.f32 %v10497_v50, %v10496_v6  ;;  %10834 = vmatpush3.bf16.msra.mxu0 %v12521_v30 }
 0x540   : > { %v10499_v31 = vpop.f32.mrf.mxu1  ;;  %5313 = vmatmul.mubr.bf16.gmra.mxu1 %v15031_v62  ;;  %v15239_v45 = vadd.f32 %v10580_v47, %v15117_v21  ;;  %v12522_v62 = vld [vmem:[#allocation12 + $0x148] sm:$0xff]  }
 0x541   : > { %v10582_v0 = vpop.f32.mrf.mxu0  ;;  %v15242_v40 = vadd.f32 %v15160_v57, %v10498_v12  ;;  %5320 = vmatprep.mubr.bf16.mxu1 %v14908_v25  ;;  %11935 = vmatprep.subr.bf16.mxu1 %v12522_v62 }
 0x542   : > { %v10583_v27 = vadd.f32 %v10582_v0, %v10581_v2  ;;  %v10500_v32 = vpop.f32.mrf.mxu1  ;;  %11936 = vmatpush3.bf16.msra.mxu1 %v12522_v62 }
 0x543   : > { %v10584_v15 = vpop.f32.mrf.mxu0  ;;  %v10501_v8 = vadd.f32 %v10500_v32, %v10499_v31 }
 0x544   : > { %v15245_v7 = vpop.f32.mrf.mxu1  ;;  %v15248_v21 = vadd.f32 %v10583_v27, %v15120_v11  ;;  %v12523_v11 = vld [vmem:[#allocation12 + $0x140] sm:$0xff]  }
 0x545   : > { %v10585_v57 = vpop.f32.mrf.mxu0  ;;  %v15251_v25 = vadd.f32 %v10501_v8, %v15171_v44  ;;  %11937 = vmatprep.subr.bf16.mxu1 %v12523_v11 }
 0x546   : > { %v10586_v55 = vadd.f32 %v10585_v57, %v10584_v15  ;;  %v15253_v6 = vpop.f32.mrf.mxu1  ;;  %11938 = vmatpush3.bf16.msra.mxu1 %v12523_v11 }
 0x547   : > { %v10587_v26 = vpop.f32.mrf.mxu0 }
 0x548   : > { %v10505_v16 = vpop.f32.mrf.mxu1  ;;  %5321 = vmatmul.mubr.bf16.gmra.mxu1 %v15043_v35  ;;  %v15257_v47 = vadd.f32 %v10586_v55, %v15127_v19 }
 0x549   : > { %v10588_v50 = vpop.f32.mrf.mxu0  ;;  %5328 = vmatprep.mubr.bf16.mxu1 %v14921_v24 }
 0x54a   : > { %v10589_v2 = vadd.f32 %v10588_v50, %v10587_v26  ;;  %v10506_v12 = vpop.f32.mrf.mxu1 }
 0x54b   : > { %v10590_v44 = vpop.f32.mrf.mxu0  ;;  %v10507_v31 = vadd.f32 %v10506_v12, %v10505_v16 }
 0x54c   : > { %v10508_v0 = vpop.f32.mrf.mxu1  ;;  %v15261_v41 = vadd.f32 %v10589_v2, %v15132_v9 }
 0x54d   : > { %v10591_v56 = vpop.f32.mrf.mxu0  ;;  %v15264_v35 = vadd.f32 %v15166_v58, %v10507_v31 }
 0x54e   : > { %v10592_v19 = vadd.f32 %v10591_v56, %v10590_v44  ;;  %v10509_v30 = vpop.f32.mrf.mxu1 }
 0x54f   : > { %v10593_v27 = vpop.f32.mrf.mxu0  ;;  %v10510_v24 = vadd.f32 %v10509_v30, %v10508_v0 }
 0x550   : > { %v10511_v32 = vpop.f32.mrf.mxu1  ;;  %5329 = vmatmul.mubr.bf16.gmra.mxu1 %v15055_v36  ;;  %v15268_v15 = vadd.f32 %v10592_v19, %v15141_v23 }
 0x551   : > { %v10594_v8 = vpop.f32.mrf.mxu0  ;;  %v15271_v62 = vadd.f32 %v15176_v37, %v10510_v24  ;;  %5336 = vmatprep.mubr.bf16.mxu1 %v17433_v1 }
 0x552   : > { %v10595_v9 = vadd.f32 %v10594_v8, %v10593_v27  ;;  %v10512_v58 = vpop.f32.mrf.mxu1 }
 0x553   : > { %v10596_v57 = vpop.f32.mrf.mxu0  ;;  %v10513_v55 = vadd.f32 %v10512_v58, %v10511_v32 }
 0x554   : > { %v15274_v26 = vpop.f32.mrf.mxu1  ;;  %v4744_v16 = vadd.f32 %v10595_v9, %v15148_v33 }
 0x555   : > { %v10597_v50 = vpop.f32.mrf.mxu0  ;;  %v15278_v36 = vadd.f32 %v10513_v55, %v15187_v59 }
 0x556   : > { %v10598_v23 = vadd.f32 %v10597_v50, %v10596_v57  ;;  %v15280_v11 = vpop.f32.mrf.mxu1 }
 0x557   : > { %v10599_v2 = vpop.f32.mrf.mxu0 }
 0x558   : > { %v10517_v37 = vpop.f32.mrf.mxu1  ;;  %5337 = vmatmul.mubr.bf16.gmra.mxu1 %v17435_v22  ;;  %v4747_v12 = vadd.f32 %v10598_v23, %v15157_v43 }
 0x559   : > { %v10600_v44 = vpop.f32.mrf.mxu0 }
 0x55a   : > { %v10601_v31 = vadd.f32 %v10600_v44, %v10599_v2  ;;  %v10518_v0 = vpop.f32.mrf.mxu1 }
 0x55b   : > { %v10602_v56 = vpop.f32.mrf.mxu0  ;;  %v10519_v19 = vadd.f32 %v10518_v0, %v10517_v37 }
 0x55c   : > { %v10520_v30 = vpop.f32.mrf.mxu1  ;;  %v4752_v33 = vadd.f32 %v10601_v31, %v15164_v4 }
 0x55d   : > { %v10603_v27 = vpop.f32.mrf.mxu0  ;;  %v15286_v59 = vadd.f32 %v15183_v5, %v10519_v19 }
 0x55e   : > { %v10604_v24 = vadd.f32 %v10603_v27, %v10602_v56  ;;  %v10521_v32 = vpop.f32.mrf.mxu1 }
 0x55f   : > { %v10605_v8 = vpop.f32.mrf.mxu0  ;;  %v10522_v9 = vadd.f32 %v10521_v32, %v10520_v30 }
 0x560   : > { %v11845_v58 = vpop.f32.mrf.mxu1  ;;  %v15289_v57 = vadd.f32 %v10604_v24, %v15173_v61 }
 0x561   : > { %v10606_v43 = vpop.f32.mrf.mxu0  ;;  %v15292_v55 = vadd.f32 %v15193_v10, %v10522_v9  ;;  %v15295_v50 = vadd.f32 %v11845_v58, %v15219_v13 }
 0x562   : > { %v10607_v4 = vadd.f32 %v10606_v43, %v10605_v8  ;;  %v4864_v23 = vpop.f32.mrf.mxu1 }
 0x563   : > { %v10608_v2 = vpop.f32.mrf.mxu0  ;;  %v15298_v5 = vadd.f32 %v4864_v23, %v15205_v38 }
 0x564   : > { %v11846_v37 = vpop.f32.mrf.mxu1  ;;  %v4760_v44 = vadd.f32 %v10607_v4, %v15181_v28 }
 0x565   : > { %v10609_v31 = vpop.f32.mrf.mxu0  ;;  %v15302_v61 = vadd.f32 %v11846_v37, %v15228_v48 }
 0x566   : > { %v10610_v0 = vadd.f32 %v10609_v31, %v10608_v2  ;;  %v15304_v56 = vpop.f32.mrf.mxu1 }
 0x567   : > { %v10611_v10 = vpop.f32.mrf.mxu0 }
 0x568   : > { %v11849_v19 = vpop.f32.mrf.mxu1  ;;  %v4763_v13 = vadd.f32 %v10610_v0, %v15190_v14  ;;  %v4466_v14 = vadd.f32 %v15200_v42, %v15146_v20 }
 0x569   : > { %v10612_v30 = vpop.f32.mrf.mxu0  ;;  %v15308_v27 = vadd.f32 %v11849_v19, %v15248_v21 }
 0x56a   : > { %v10613_v38 = vadd.f32 %v10612_v30, %v10611_v10  ;;  %v4880_v24 = vpop.f32.mrf.mxu1 }
 0x56b   : > { %v10614_v32 = vpop.f32.mrf.mxu0  ;;  %v15311_v28 = vadd.f32 %v4880_v24, %v15232_v52 }
 0x56c   : > { %v11850_v8 = vpop.f32.mrf.mxu1  ;;  %v4768_v48 = vadd.f32 %v10613_v38, %v15198_v51 }
 0x56d   : > { %v10615_v9 = vpop.f32.mrf.mxu0  ;;  %v15315_v58 = vadd.f32 %v11850_v8, %v15257_v47 }
 0x56e   : > { %v10616_v43 = vadd.f32 %v10615_v9, %v10614_v32  ;;  %v15319_v4 = vpop.f32.mrf.mxu1 }
 0x56f   : > { %v10617_v21 = vpop.f32.mrf.mxu0 }
 0x570   : > { %v11853_v23 = vpop.f32.mrf.mxu1  ;;  %v15321_v2 = vadd.f32 %v10616_v43, %v4466_v14 }
 0x571   : > { %v10618_v37 = vpop.f32.mrf.mxu0  ;;  %v15323_v52 = vadd.f32 %v11853_v23, %v4744_v16 }
 0x572   : > { %v10619_v31 = vadd.f32 %v10618_v37, %v10617_v21  ;;  %v4896_v0 = vpop.f32.mrf.mxu1 }
 0x573   : > { %v10620_v51 = vpop.f32.mrf.mxu0  ;;  %v15326_v10 = vadd.f32 %v4896_v0, %v15261_v41 }
 0x574   : > { %v11854_v47 = vpop.f32.mrf.mxu1  ;;  %v4776_v19 = vadd.f32 %v10619_v31, %v15208_v46  ;;  %v4482_v31 = vadd.f32 %v15224_v39, %v15162_v49 }
 0x575   : > { %v10621_v20 = vpop.f32.mrf.mxu0  ;;  %v15329_v42 = vadd.f32 %v11854_v47, %v4747_v12 }
 0x576   : > { %v10622_v30 = vadd.f32 %v10621_v20, %v10620_v51  ;;  %v15331_v38 = vpop.f32.mrf.mxu1 }
 0x577   : > { %v10623_v24 = vpop.f32.mrf.mxu0 }
 0x578   : > { %v11857_v32 = vpop.f32.mrf.mxu1  ;;  %v4779_v16 = vadd.f32 %v10622_v30, %v15215_v3 }
 0x579   : > { %v10624_v8 = vpop.f32.mrf.mxu0  ;;  %v15334_v9 = vadd.f32 %v11857_v32, %v4760_v44 }
 0x57a   : > { %v10625_v14 = vadd.f32 %v10624_v8, %v10623_v24  ;;  %v4912_v43 = vpop.f32.mrf.mxu1  ;;  %v12525_v24 = vld [vmem:[#allocation12 + $0x78] sm:$0xff]  }
 0x57b   : > { %v10626_v41 = vpop.f32.mrf.mxu0  ;;  %v15336_v21 = vadd.f32 %v4912_v43, %v4752_v33  ;;  %v15349_v33 = vld [vmem:[#allocation12 + $0xb8] sm:$0xff]   ;;  %10955 = vmatprep.subr.bf16.mxu1 %v12525_v24 }
 0x57c   : > { %v11858_v23 = vpop.f32.mrf.mxu1  ;;  %v4784_v46 = vadd.f32 %v10625_v14, %v15222_v29  ;;  %11971 = vmatprep.subr.bf16.mxu0 %v15349_v33 }
 0x57d   : > { %v10627_v12 = vpop.f32.mrf.mxu0  ;;  %v15339_v37 = vadd.f32 %v11858_v23, %v4763_v13 }
 0x57e   : > { %v10628_v0 = vadd.f32 %v10627_v12, %v10626_v41  ;;  %v15343_v51 = vpop.f32.mrf.mxu1 }
 0x57f   : > { %v10629_v3 = vpop.f32.mrf.mxu0 }
 0x580   : > { %v11861_v44 = vpop.f32.mrf.mxu1  ;;  %v15345_v47 = vadd.f32 %v10628_v0, %v4482_v31 }
 0x581   : > { %v10630_v20 = vpop.f32.mrf.mxu0  ;;  %v15347_v30 = vadd.f32 %v11861_v44, %v4776_v19 }
 0x582   : > { %v10631_v29 = vadd.f32 %v10630_v20, %v10629_v3  ;;  %v4928_v32 = vpop.f32.mrf.mxu1 }
 0x583   : > { %v10632_v13 = vpop.f32.mrf.mxu0  ;;  %v15351_v8 = vadd.f32 %v4928_v32, %v4768_v48  ;;  %v10504_v48 = vadd.f32 %v15253_v6, %v15245_v7 }
 0x584   : > { %v11862_v49 = vpop.f32.mrf.mxu1  ;;  %v4792_v39 = vadd.f32 %v10631_v29, %v15235_v34 }
 0x585   : > { %v10633_v14 = vpop.f32.mrf.mxu0  ;;  %v15355_v43 = vadd.f32 %v11862_v49, %v4779_v16  ;;  %v4498_v49 = vadd.f32 %v10504_v48, %v15178_v18 }
 0x586   : > { %v10634_v41 = vadd.f32 %v10633_v14, %v10632_v13  ;;  %v15357_v19 = vpop.f32.mrf.mxu1 }
 0x587   : > { %v10635_v23 = vpop.f32.mrf.mxu0 }
 0x588   : > { %v11865_v12 = vpop.f32.mrf.mxu1  ;;  %v4795_v31 = vadd.f32 %v10634_v41, %v15242_v40 }
 0x589   : > { %v10636_v0 = vpop.f32.mrf.mxu0  ;;  %v15360_v3 = vadd.f32 %v11865_v12, %v4792_v39 }
 0x58a   : > { %v10637_v44 = vadd.f32 %v10636_v0, %v10635_v23  ;;  %v4944_v20 = vpop.f32.mrf.mxu1 }
 0x58b   : > { %v10638_v24 = vpop.f32.mrf.mxu0  ;;  %v15364_v34 = vadd.f32 %v4944_v20, %v4784_v46 }
 0x58c   : > { %v11866_v16 = vpop.f32.mrf.mxu1  ;;  %v4800_v29 = vadd.f32 %v10637_v44, %v15251_v25 }
 0x58d   : > { %v10639_v32 = vpop.f32.mrf.mxu0  ;;  %v15367_v13 = vadd.f32 %v11866_v16, %v4795_v31 }
 0x58e   : > { %v10640_v40 = vadd.f32 %v10639_v32, %v10638_v24  ;;  %v15370_v14 = vpop.f32.mrf.mxu1 }
 0x58f   : > { %v10641_v39 = vpop.f32.mrf.mxu0 }
 0x590   : > { %v11869_v41 = vpop.f32.mrf.mxu1  ;;  %v15372_v12 = vadd.f32 %v10640_v40, %v4498_v49  ;;  %v10516_v40 = vadd.f32 %v15280_v11, %v15274_v26 }
 0x591   : > { %v10642_v7 = vpop.f32.mrf.mxu0 }
 0x592   : > { %v10643_v6 = vadd.f32 %v10642_v7, %v10641_v39  ;;  %v4960_v23 = vpop.f32.mrf.mxu1 }
 0x593   : > { %v10644_v46 = vpop.f32.mrf.mxu0  ;;  %v15374_v0 = vadd.f32 %v4960_v23, %v4800_v29 }
 0x594   : > { %v4808_v25 = vadd.f32 %v10643_v6, %v15264_v35  ;;  %v11870_v44 = vpop.f32.mrf.mxu1 }
 0x595   : > { %v10645_v31 = vpop.f32.mrf.mxu0 }
 0x596   : > { %v10646_v20 = vadd.f32 %v10645_v31, %v10644_v46  ;;  %v15377_v16 = vadd.f32 %v11869_v41, %v4808_v25  ;;  %v15379_v18 = vpop.f32.mrf.mxu1  ;;  %v4514_v46 = vadd.f32 %v10516_v40, %v15195_v54 }
 0x597   : > { %v10647_v48 = vpop.f32.mrf.mxu0 }
 0x598   : > { %v4811_v24 = vadd.f32 %v10646_v20, %v15271_v62  ;;  %v11873_v32 = vpop.f32.mrf.mxu1 }
 0x599   : > { %v10648_v49 = vpop.f32.mrf.mxu0 }
 0x59a   : > { %v10649_v39 = vadd.f32 %v10648_v49, %v10647_v48  ;;  %v15384_v29 = vadd.f32 %v11870_v44, %v4811_v24  ;;  %v4976_v7 = vpop.f32.mrf.mxu1 }
 0x59b   : > { %v10650_v35 = vpop.f32.mrf.mxu0 }
 0x59c   : > { %v4816_v6 = vadd.f32 %v10649_v39, %v15278_v36  ;;  %v11874_v23 = vpop.f32.mrf.mxu1 }
 0x59d   : > { %v10651_v41 = vpop.f32.mrf.mxu0 }
 0x59e   : > { %v10652_v25 = vadd.f32 %v10651_v41, %v10650_v35  ;;  %v15388_v31 = vadd.f32 %v4976_v7, %v4816_v6  ;;  %v15390_v62 = vpop.f32.mrf.mxu1 }
 0x59f   : > { %17438 = vst [vmem:[#allocation24_spill] sm:$0xff] %v15390_v62  ;;  %v10653_v20 = vpop.f32.mrf.mxu0 }
 0x5a0   : > { %v15392_v22 = vadd.f32 %v10652_v25, %v4514_v46  ;;  %v10699_v26 = vpop.f32.mrf.mxu1 }
 0x5a1   : > { %v10654_v11 = vpop.f32.mrf.mxu0 }
 0x5a2   : > { %17439 = vst [vmem:[#allocation25_spill] sm:$0xff] %v15392_v22  ;;  %v10655_v44 = vadd.f32 %v10654_v11, %v10653_v20  ;;  %v10700_v48 = vpop.f32.mrf.mxu1 }
 0x5a3   : > { %v10656_v24 = vpop.f32.mrf.mxu0  ;;  %v10701_v40 = vadd.f32 %v10700_v48, %v10699_v26  ;;  %v4868_v48 = vadd.f32 %v15304_v56, %v15212_v17 }
 0x5a4   : > { %v4824_v49 = vadd.f32 %v10655_v44, %v15286_v59  ;;  %v10702_v36 = vpop.f32.mrf.mxu1 }
 0x5a5   : > { %v10657_v39 = vpop.f32.mrf.mxu0 }
 0x5a6   : > { %v15395_v63 = vadd.f32 %v11873_v32, %v4824_v49  ;;  %v10658_v54 = vadd.f32 %v10657_v39, %v10656_v24  ;;  %v10703_v7 = vpop.f32.mrf.mxu1  ;;  %v15401_v32 = vld [vmem:[#allocation10] ss:$0 sm:$0xff] }
 0x5a7   : > { %v11893_v35 = vpop.f32.mrf.mxu0  ;;  %v10704_v20 = vadd.f32 %v10703_v7, %v10702_v36 }
 0x5a8   : > { %v4827_v6 = vadd.f32 %v10658_v54, %v15292_v55  ;;  %v10705_v41 = vpop.f32.mrf.mxu1 }
 0x5a9   : > { %v5379_v46 = vpop.f32.mrf.mxu0 }
 0x5aa   : > { %v15398_v25 = vadd.f32 %v11874_v23, %v4827_v6  ;;  %v5380_v1 = vadd.f32 %v10701_v40, %v5379_v46  ;;  %v10706_v11 = vpop.f32.mrf.mxu1 }
 0x5ab   : > { %v11894_v62 = vpop.f32.mrf.mxu0  ;;  %v10707_v22 = vadd.f32 %v10706_v11, %v10705_v41 }
 0x5ac   : > { %v5506_v59 = vadd.f32 %v5380_v1, %v15298_v5  ;;  %v10708_v44 = vpop.f32.mrf.mxu1 }
 0x5ad   : > { %v5382_v24 = vpop.f32.mrf.mxu0  ;;  %v5388_v26 = vadd.f32 %v11893_v35, %v10707_v22 }
 0x5ae   : > { %v5383_v55 = vadd.f32 %v10704_v20, %v5382_v24  ;;  %v10709_v49 = vpop.f32.mrf.mxu1  ;;  %v5545_v36 = vadd.f32 %v15401_v32, %v5506_v59 }
 0x5af   : > { %v5508_v23 = vadd.f32 %v5388_v26, %v15295_v50  ;;  %v11897_v39 = vpop.f32.mrf.mxu0  ;;  %v10710_v54 = vadd.f32 %v10709_v49, %v10708_v44 }
 0x5b0   : > { %v5507_v40 = vadd.f32 %v5383_v55, %v4868_v48  ;;  %v10711_v7 = vpop.f32.mrf.mxu1  ;;  %v5577_v56 = vmax.f32 %v5545_v36, 0.0  ;;  %v4884_v36 = vadd.f32 %v15319_v4, %v15239_v45 }
 0x5b1   : > { %v5395_v6 = vpop.f32.mrf.mxu0  ;;  %v5391_v1 = vadd.f32 %v11894_v62, %v10710_v54  ;;  %v5547_v22 = vadd.f32 %v15401_v32, %v5508_v23 }
 0x5b2   : > { %v5546_v5 = vadd.f32 %v15401_v32, %v5507_v40  ;;  %v10712_v41 = vpop.f32.mrf.mxu1 }
 0x5b3   : > { %v5509_v35 = vadd.f32 %v5391_v1, %v15302_v61  ;;  %v10713_v17 = vadd.f32 %v10712_v41, %v10711_v7  ;;  %v11898_v20 = vpop.f32.mrf.mxu0  ;;  %v5579_v26 = vmax.f32 %v5547_v22, 0.0 }
 0x5b4   : > { %v5578_v46 = vmax.f32 %v5546_v5, 0.0  ;;  %v10714_v50 = vpop.f32.mrf.mxu1 }
 0x5b5   : > { %v5548_v11 = vadd.f32 %v15401_v32, %v5509_v35  ;;  %v5396_v44 = vadd.f32 %v10713_v17, %v5395_v6  ;;  %v5398_v49 = vpop.f32.mrf.mxu0 }
 0x5b6   : > { %v15411_v59 = vpack.c.bf16 %v5578_v46, %v5577_v56  ;;  %v10715_v24 = vpop.f32.mrf.mxu1 }
 0x5b7   : > { %v5580_v62 = vmax.f32 %v5548_v11, 0.0  ;;  %v5510_v48 = vadd.f32 %v5396_v44, %v15311_v28  ;;  %v10716_v55 = vadd.f32 %v10715_v24, %v10714_v50  ;;  %v15423_v17 = vpop.f32.mrf.mxu0  ;;  %v12529_v24 = vld [vmem:[#allocation12 + $0xb0] sm:$0xff]  }
 0x5b8   : > { %6106 = vmatprep.mubr.bf16.mxu0 %v15411_v59  ;;  %v10717_v61 = vpop.f32.mrf.mxu1  ;;  %v5626_v23 = vshrl.u32 %v15411_v59, 16  ;;  %v5629_v54 = vshll.u32 %v15411_v59, 16 }
 0x5b9   : > { %v15419_v40 = vpack.c.bf16 %v5580_v62, %v5579_v26  ;;  %v5399_v7 = vadd.f32 %v10716_v55, %v5398_v49  ;;  %v5549_v28 = vadd.f32 %v15401_v32, %v5510_v48 }
 0x5ba   : > { %v10718_v6 = vpop.f32.mrf.mxu1  ;;  %v5628_v1 = vrot.slane %v5626_v23, 7  ;;  %v5769_v5 = vrot.slane %v5629_v54, 1 }
 0x5bb   : > { %v5511_v41 = vadd.f32 %v5399_v7, %v4884_v36  ;;  %v10719_v22 = vadd.f32 %v10718_v6, %v10717_v61  ;;  %v5633_v35 = vshrl.u32 %v15419_v40, 16  ;;  %v5636_v11 = vshll.u32 %v15419_v40, 16 }
 0x5bc   : > { %v5631_v56 = vor.u32 %v5629_v54, %v5628_v1  ;;  %v5770_v46 = vor.u32 %v5769_v5, %v5626_v23  ;;  %v10720_v50 = vpop.f32.mrf.mxu1  ;;  %v5581_v49 = vmax.f32 %v5549_v28, 0.0  ;;  %v5411_v54 = vpop.f32.mrf.mxu0  ;;  %v12526_v1 = vld [vmem:[#allocation12 + $0x38] sm:$0xff]  }
 0x5bd   : > { %v5550_v45 = vadd.f32 %v15401_v32, %v5511_v41  ;;  %v5404_v4 = vadd.f32 %v11897_v39, %v10719_v22  ;;  %v5635_v44 = vrot.slane %v5633_v35, 7  ;;  %v5771_v55 = vrot.slane %v5636_v11, 1  ;;  %v12527_v41 = vld [vmem:[#allocation12 + $0x70] sm:$0xff]  }
 0x5be   : > { %v15429_v26 = vsel %vm13231_vm6, 0, %v5631_v56  ;;  %v15433_v62 = vsel %vm13148_vm2, %v5770_v46, 0  ;;  %v10721_v48 = vpop.f32.mrf.mxu1 }
 0x5bf   : > { %v5582_v61 = vmax.f32 %v5550_v45, 0.0  ;;  %v5512_v23 = vadd.f32 %v5404_v4, %v15308_v27  ;;  %6107 = vmatmul.mubr.bf16.vlgmr.msra.gmra.mxu0 %v15429_v26  ;;  %11939 = vmatprep.mubr.bf16.mxu1 %v15433_v62  ;;  %v10722_v39 = vadd.f32 %v10721_v48, %v10720_v50  ;;  %v5638_v7 = vor.u32 %v5636_v11, %v5635_v44  ;;  %v12534_v27 = vld [vmem:[#allocation12 + $0xa8] sm:$0xff]   ;;  %v12528_v44 = vld [vmem:[#allocation12 + $0x30] sm:$0xff]  }
 0x5c0   : > { %6114 = vmatprep.mubr.bf16.mxu0 %v15419_v40  ;;  %v10723_v36 = vpop.f32.mrf.mxu1  ;;  %v5772_v6 = vor.u32 %v5771_v55, %v5633_v35  ;;  %11972 = vmatpush3.bf16.msra.mxu0 %v15349_v33  ;;  %v15450_v35 = vpop.f32.mrf.mxu0 }
 0x5c1   : > { %v15440_v5 = vpack.c.bf16 %v5582_v61, %v5581_v49  ;;  %v5407_v28 = vadd.f32 %v11898_v20, %v10722_v39  ;;  %11973 = vmatprep.subr.bf16.mxu0 %v12529_v24  ;;  %v5551_v46 = vadd.f32 %v15401_v32, %v5512_v23  ;;  %v15454_v20 = vsel %vm13231_vm6, 0, %v5638_v7  ;;  %v12530_v49 = vld [vmem:[#allocation12 + $0x68] sm:$0xff]   ;;  %v12539_v39 = vld [vmem:[#allocation12 + $0xa0] sm:$0xff]  }
 0x5c2   : > { %v10724_v22 = vpop.f32.mrf.mxu1  ;;  %v15444_v56 = vsel %vm13148_vm2, %v5772_v6, 0 }
 0x5c3   : > { %v5513_v50 = vadd.f32 %v5407_v28, %v15315_v58  ;;  %v10725_v11 = vadd.f32 %v10724_v22, %v10723_v36  ;;  %11940 = vmatmul.mubr.bf16.vlgmr.msra.gmra.mxu1 %v15444_v56  ;;  %v5640_v33 = vshrl.u32 %v15440_v5, 16  ;;  %v5643_v4 = vshll.u32 %v15440_v5, 16 }
 0x5c4   : > { %v10726_v45 = vpop.f32.mrf.mxu1  ;;  %10956 = vmatpush3.bf16.msra.mxu1 %v12526_v1  ;;  %11974 = vmatpush3.bf16.msra.mxu0 %v12529_v24  ;;  %v5583_v36 = vmax.f32 %v5551_v46, 0.0  ;;  %v5414_v1 = vpop.f32.mrf.mxu0 }
 0x5c5   : > { %v5552_v48 = vadd.f32 %v15401_v32, %v5513_v50  ;;  %v5412_v58 = vadd.f32 %v10725_v11, %v5411_v54  ;;  %v5642_v55 = vrot.slane %v5640_v33, 7  ;;  %10957 = vmatprep.subr.bf16.mxu1 %v12527_v41  ;;  %11975 = vmatprep.subr.bf16.mxu0 %v12534_v27  ;;  %v5773_v23 = vrot.slane %v5643_v4, 1  ;;  %v12531_v41 = vld [vmem:[#allocation12 + $0x28] sm:$0xff]  }
 0x5c6   : > { %v10727_v61 = vpop.f32.mrf.mxu1  ;;  %v4900_v50 = vadd.f32 %v15331_v38, %v15268_v15  ;;  %v15472_v38 = vpop.f32.mrf.mxu0 }
 0x5c7   : > { %v5584_v6 = vmax.f32 %v5552_v48, 0.0  ;;  %v5514_v7 = vadd.f32 %v5412_v58, %v15326_v10  ;;  %6115 = vmatmul.mubr.bf16.gmra.mxu0 %v15454_v20  ;;  %v10728_v28 = vadd.f32 %v10727_v61, %v10726_v45  ;;  %v5645_v22 = vor.u32 %v5643_v4, %v5642_v55  ;;  %v12532_v48 = vld [vmem:[#allocation12 + $0x60] sm:$0xff]   ;;  %v12542_v58 = vld [vmem:[#allocation12 + $0x98] sm:$0xff]  }
 0x5c8   : > { %6122 = vmatprep.mubr.bf16.mxu0 %v15440_v5  ;;  %v10729_v24 = vpop.f32.mrf.mxu1  ;;  %v5774_v54 = vor.u32 %v5773_v23, %v5640_v33  ;;  %10958 = vmatpush3.bf16.msra.mxu1 %v12528_v44  ;;  %v12533_v61 = vld [vmem:[#allocation12 + $0x20] sm:$0xff]  }
 0x5c9   : > { %v15463_v11 = vpack.c.bf16 %v5584_v6, %v5583_v36  ;;  %v5415_v46 = vadd.f32 %v10728_v28, %v5414_v1  ;;  %10959 = vmatprep.subr.bf16.mxu1 %v12530_v49  ;;  %11976 = vmatpush3.bf16.msra.mxu0 %v12534_v27  ;;  %v5553_v33 = vadd.f32 %v15401_v32, %v5514_v7  ;;  %v15476_v27 = vsel %vm13231_vm6, 0, %v5645_v22  ;;  %v12535_v7 = vld [vmem:[#allocation12 + $0x58] sm:$0xff]  }
 0x5ca   : > { %v10730_v10 = vpop.f32.mrf.mxu1  ;;  %v15467_v45 = vsel %vm13148_vm2, %v5774_v54, 0  ;;  %11977 = vmatprep.subr.bf16.mxu0 %v12539_v39 }
 0x5cb   : > { %17440 = vst [vmem:[#allocation27_spill] sm:$0xff] %v15463_v11  ;;  %v5515_v4 = vadd.f32 %v5415_v46, %v4900_v50  ;;  %v10731_v44 = vadd.f32 %v10730_v10, %v10729_v24  ;;  %11943 = vmatprep.mubr.bf16.mxu1 %v15467_v45  ;;  %v5647_v15 = vshrl.u32 %v15463_v11, 16  ;;  %v5650_v49 = vshll.u32 %v15463_v11, 16  ;;  %v12543_v24 = vld [vmem:[#allocation12 + $0x90] sm:$0xff]   ;;  %v5427_v46 = vpop.f32.mrf.mxu0 }
 0x5cc   : > { %v10732_v55 = vpop.f32.mrf.mxu1  ;;  %10960 = vmatpush3.bf16.msra.mxu1 %v12531_v41  ;;  %v5585_v54 = vmax.f32 %v5553_v33, 0.0  ;;  %v12537_v33 = vld [vmem:[#allocation12 + $0x50] sm:$0xff]  }
 0x5cd   : > { %v5554_v23 = vadd.f32 %v15401_v32, %v5515_v4  ;;  %v5420_v36 = vadd.f32 %v15423_v17, %v10731_v44  ;;  %v5649_v6 = vrot.slane %v5647_v15, 7  ;;  %10961 = vmatprep.subr.bf16.mxu1 %v12532_v48  ;;  %11978 = vmatpush3.bf16.msra.mxu0 %v12539_v39  ;;  %v5775_v1 = vrot.slane %v5650_v49, 1  ;;  %v12536_v48 = vld [vmem:[#allocation12 + $0x18] sm:$0xff]  }
 0x5ce   : > { %v10733_v28 = vpop.f32.mrf.mxu1  ;;  %11979 = vmatprep.subr.bf16.mxu0 %v12542_v58 }
 0x5cf   : > { %v5586_v22 = vmax.f32 %v5554_v23, 0.0  ;;  %v5516_v50 = vadd.f32 %v5420_v36, %v15323_v52  ;;  %6123 = vmatmul.mubr.bf16.gmra.mxu0 %v15476_v27  ;;  %v10734_v41 = vadd.f32 %v10733_v28, %v10732_v55  ;;  %v5652_v17 = vor.u32 %v5650_v49, %v5649_v6  ;;  %v12546_v55 = vld [vmem:[#allocation12 + $0x88] sm:$0xff]   ;;  %v12538_v28 = vld [vmem:[#allocation12 + $0x10] sm:$0xff]  }
 0x5d0   : > { %6130 = vmatprep.mubr.bf16.mxu0 %v15463_v11  ;;  %v10735_v10 = vpop.f32.mrf.mxu1  ;;  %v5776_v4 = vor.u32 %v5775_v1, %v5647_v15  ;;  %10962 = vmatpush3.bf16.msra.mxu1 %v12533_v61 }
 0x5d1   : > { %v15484_v39 = vpack.c.bf16 %v5586_v22, %v5585_v54  ;;  %v5423_v44 = vadd.f32 %v15450_v35, %v10734_v41  ;;  %10963 = vmatprep.subr.bf16.mxu1 %v12535_v7  ;;  %11980 = vmatpush3.bf16.msra.mxu0 %v12542_v58  ;;  %v5555_v36 = vadd.f32 %v15401_v32, %v5516_v50  ;;  %v15495_v35 = vpop.f32.mrf.mxu0  ;;  %v15499_v58 = vsel %vm13231_vm6, 0, %v5652_v17  ;;  %v12540_v22 = vld [vmem:[#allocation12 + $0x48] sm:$0xff]  }
 0x5d2   : > { %v10736_v23 = vpop.f32.mrf.mxu1  ;;  %v15489_v52 = vsel %vm13148_vm2, %v5776_v4, 0  ;;  %11981 = vmatprep.subr.bf16.mxu0 %v12543_v24 }
 0x5d3   : > { %v5517_v15 = vadd.f32 %v5423_v44, %v15329_v42  ;;  %v10737_v49 = vadd.f32 %v10736_v23, %v10735_v10  ;;  %11944 = vmatmul.mubr.bf16.gmra.mxu1 %v15489_v52  ;;  %v5654_v61 = vshrl.u32 %v15484_v39, 16  ;;  %v5657_v7 = vshll.u32 %v15484_v39, 16  ;;  %v12547_v10 = vld [vmem:[#allocation12 + $0x80] sm:$0xff]  }
 0x5d4   : > { %v10738_v6 = vpop.f32.mrf.mxu1  ;;  %10964 = vmatpush3.bf16.msra.mxu1 %v12536_v48  ;;  %v5587_v4 = vmax.f32 %v5555_v36, 0.0  ;;  %v5430_v48 = vpop.f32.mrf.mxu0 }
 0x5d5   : > { %v5556_v1 = vadd.f32 %v15401_v32, %v5517_v15  ;;  %v5428_v54 = vadd.f32 %v10737_v49, %v5427_v46  ;;  %v5656_v42 = vrot.slane %v5654_v61, 7  ;;  %10965 = vmatprep.subr.bf16.mxu1 %v12537_v33  ;;  %11982 = vmatpush3.bf16.msra.mxu0 %v12543_v24  ;;  %v5777_v41 = vrot.slane %v5657_v7, 1  ;;  %v12541_v33 = vld [vmem:[#allocation12 + $0x8] sm:$0xff]  }
 0x5d6   : > { %v10739_v50 = vpop.f32.mrf.mxu1  ;;  %11983 = vmatprep.subr.bf16.mxu0 %v12546_v55  ;;  %v4916_v24 = vadd.f32 %v15343_v51, %v15289_v57  ;;  %v15517_v51 = vpop.f32.mrf.mxu0 }
 0x5d7   : > { %v5588_v44 = vmax.f32 %v5556_v1, 0.0  ;;  %v5518_v17 = vadd.f32 %v5428_v54, %v15336_v21  ;;  %6131 = vmatmul.mubr.bf16.gmra.mxu0 %v15499_v58  ;;  %v10740_v23 = vadd.f32 %v10739_v50, %v10738_v6  ;;  %v5659_v46 = vor.u32 %v5657_v7, %v5656_v42  ;;  %v12544_v1 = vld [vmem:[#allocation12 + $0x40] sm:$0xff]  }
 0x5d8   : > { %6138 = vmatprep.mubr.bf16.mxu0 %v15484_v39  ;;  %v10741_v15 = vpop.f32.mrf.mxu1  ;;  %v5778_v49 = vor.u32 %v5777_v41, %v5654_v61  ;;  %10966 = vmatpush3.bf16.msra.mxu1 %v12538_v28 }
 0x5d9   : > { %v15508_v11 = vpack.c.bf16 %v5588_v44, %v5587_v4  ;;  %v5431_v36 = vadd.f32 %v10740_v23, %v5430_v48  ;;  %10967 = vmatprep.subr.bf16.mxu1 %v12540_v22  ;;  %11984 = vmatpush3.bf16.msra.mxu0 %v12546_v55  ;;  %v5557_v7 = vadd.f32 %v15401_v32, %v5518_v17  ;;  %v15521_v54 = vsel %vm13231_vm6, 0, %v5659_v46  ;;  %v12545_v22 = vld [vmem:[#allocation12] sm:$0xff]   ;;  %v15526_v44 = vld [vmem:[#allocation12 + $0x238] sm:$0xff]  }
 0x5da   : > { %v10742_v21 = vpop.f32.mrf.mxu1  ;;  %v15512_v6 = vsel %vm13148_vm2, %v5778_v49, 0  ;;  %11985 = vmatprep.subr.bf16.mxu0 %v12547_v10 }
 0x5db   : > { %v5519_v61 = vadd.f32 %v5431_v36, %v4916_v24  ;;  %v10743_v28 = vadd.f32 %v10742_v21, %v10741_v15  ;;  %11947 = vmatprep.mubr.bf16.mxu1 %v15512_v6  ;;  %v5661_v57 = vshrl.u32 %v15508_v11, 16  ;;  %v5664_v42 = vshll.u32 %v15508_v11, 16  ;;  %v5443_v24 = vpop.f32.mrf.mxu0 }
 0x5dc   : > { %v10744_v55 = vpop.f32.mrf.mxu1  ;;  %10968 = vmatpush3.bf16.msra.mxu1 %v12541_v33  ;;  %v5589_v48 = vmax.f32 %v5557_v7, 0.0  ;;  %v12551_v33 = vld [vmem:[#allocation12 + $0x1f8] sm:$0xff]  }
 0x5dd   : > { %v5558_v50 = vadd.f32 %v15401_v32, %v5519_v61  ;;  %v5436_v41 = vadd.f32 %v15472_v38, %v10743_v28  ;;  %v5663_v4 = vrot.slane %v5661_v57, 7  ;;  %10969 = vmatprep.subr.bf16.mxu1 %v12544_v1  ;;  %11986 = vmatpush3.bf16.msra.mxu0 %v12547_v10  ;;  %v5779_v23 = vrot.slane %v5664_v42, 1 }
 0x5de   : > { %v10745_v17 = vpop.f32.mrf.mxu1  ;;  %11091 = vmatprep.subr.bf16.mxu0 %v12551_v33 }
 0x5df   : > { %v5590_v15 = vmax.f32 %v5558_v50, 0.0  ;;  %v5520_v46 = vadd.f32 %v5436_v41, %v15334_v9  ;;  %6139 = vmatmul.mubr.bf16.gmra.mxu0 %v15521_v54  ;;  %v10746_v49 = vadd.f32 %v10745_v17, %v10744_v55  ;;  %v5666_v38 = vor.u32 %v5664_v42, %v5663_v4  ;;  %v11910_v42 = vpop.f32.mrf.mxu0 }
 0x5e0   : > { %6146 = vmatprep.mubr.bf16.mxu0 %v15508_v11  ;;  %v10747_v36 = vpop.f32.mrf.mxu1  ;;  %v5780_v21 = vor.u32 %v5779_v23, %v5661_v57  ;;  %10970 = vmatpush3.bf16.msra.mxu1 %v12545_v22 }
 0x5e1   : > { %v15531_v10 = vpack.c.bf16 %v5590_v15, %v5589_v48  ;;  %v5439_v1 = vadd.f32 %v15495_v35, %v10746_v49  ;;  %12019 = vmatprep.subr.bf16.mxu1 %v15526_v44  ;;  %v5559_v61 = vadd.f32 %v15401_v32, %v5520_v46  ;;  %v15545_v35 = vsel %vm13231_vm6, 0, %v5666_v38  ;;  %v5446_v33 = vpop.f32.mrf.mxu0 }
 0x5e2   : > { %v10748_v7 = vpop.f32.mrf.mxu1  ;;  %v15537_v9 = vsel %vm13148_vm2, %v5780_v21, 0 }
 0x5e3   : > { %v5521_v28 = vadd.f32 %v5439_v1, %v15339_v37  ;;  %v10749_v55 = vadd.f32 %v10748_v7, %v10747_v36  ;;  %11948 = vmatmul.mubr.bf16.gmra.mxu1 %v15537_v9  ;;  %v5668_v57 = vshrl.u32 %v15531_v10, 16  ;;  %v5671_v50 = vshll.u32 %v15531_v10, 16 }
 0x5e4   : > { %v10750_v22 = vpop.f32.mrf.mxu1  ;;  %v5591_v37 = vmax.f32 %v5559_v61, 0.0  ;;  %v4932_v1 = vadd.f32 %v15357_v19, %v15321_v2 }
 0x5e5   : > { %v5560_v41 = vadd.f32 %v15401_v32, %v5521_v28  ;;  %v5444_v4 = vadd.f32 %v10749_v55, %v5443_v24  ;;  %v5670_v17 = vrot.slane %v5668_v57, 7  ;;  %v5781_v48 = vrot.slane %v5671_v50, 1 }
 0x5e6   : > { %v10751_v23 = vpop.f32.mrf.mxu1 }
 0x5e7   : > { %v5592_v15 = vmax.f32 %v5560_v41, 0.0  ;;  %v5522_v46 = vadd.f32 %v5444_v4, %v15351_v8  ;;  %6147 = vmatmul.mubr.bf16.gmra.mxu0 %v15545_v35  ;;  %v10752_v49 = vadd.f32 %v10751_v23, %v10750_v22  ;;  %v5673_v38 = vor.u32 %v5671_v50, %v5670_v17 }
 0x5e8   : > { %6154 = vmatprep.mubr.bf16.mxu0 %v15531_v10  ;;  %v10753_v36 = vpop.f32.mrf.mxu1  ;;  %v5782_v21 = vor.u32 %v5781_v48, %v5668_v57  ;;  %v11913_v57 = vpop.f32.mrf.mxu0 }
 0x5e9   : > { %v15554_v24 = vpack.c.bf16 %v5592_v15, %v5591_v37  ;;  %v5447_v7 = vadd.f32 %v10752_v49, %v5446_v33  ;;  %v5561_v8 = vadd.f32 %v15401_v32, %v5522_v46  ;;  %v15565_v2 = vsel %vm13231_vm6, 0, %v5673_v38 }
 0x5ea   : > { %v10754_v28 = vpop.f32.mrf.mxu1  ;;  %v15558_v61 = vsel %vm13148_vm2, %v5782_v21, 0 }
 0x5eb   : > { %v5523_v55 = vadd.f32 %v5447_v7, %v4932_v1  ;;  %v10755_v22 = vadd.f32 %v10754_v28, %v10753_v36  ;;  %11951 = vmatprep.mubr.bf16.mxu1 %v15558_v61  ;;  %v5675_v50 = vshrl.u32 %v15554_v24, 16  ;;  %v5678_v41 = vshll.u32 %v15554_v24, 16  ;;  %v5459_v36 = vpop.f32.mrf.mxu0 }
 0x5ec   : > { %v10756_v19 = vpop.f32.mrf.mxu1  ;;  %v5593_v15 = vmax.f32 %v5561_v8, 0.0 }
 0x5ed   : > { %v5562_v4 = vadd.f32 %v15401_v32, %v5523_v55  ;;  %v5452_v17 = vadd.f32 %v15517_v51, %v10755_v22  ;;  %v5677_v23 = vrot.slane %v5675_v50, 7  ;;  %v5783_v37 = vrot.slane %v5678_v41, 1 }
 0x5ee   : > { %v10757_v48 = vpop.f32.mrf.mxu1 }
 0x5ef   : > { %v5594_v46 = vmax.f32 %v5562_v4, 0.0  ;;  %v5524_v49 = vadd.f32 %v5452_v17, %v15347_v30  ;;  %6155 = vmatmul.mubr.bf16.gmra.mxu0 %v15565_v2  ;;  %v10758_v33 = vadd.f32 %v10757_v48, %v10756_v19  ;;  %v5680_v21 = vor.u32 %v5678_v41, %v5677_v23  ;;  %v11914_v4 = vpop.f32.mrf.mxu0 }
 0x5f0   : > { %6162 = vmatprep.mubr.bf16.mxu0 %v15554_v24  ;;  %v10759_v38 = vpop.f32.mrf.mxu1  ;;  %v5784_v1 = vor.u32 %v5783_v37, %v5675_v50 }
 0x5f1   : > { %v15573_v7 = vpack.c.bf16 %v5594_v46, %v5593_v15  ;;  %v5455_v28 = vadd.f32 %v11910_v42, %v10758_v33  ;;  %v5563_v8 = vadd.f32 %v15401_v32, %v5524_v49  ;;  %v15585_v50 = vsel %vm13231_vm6, 0, %v5680_v21 }
 0x5f2   : > { %v10760_v51 = vpop.f32.mrf.mxu1  ;;  %v15577_v55 = vsel %vm13148_vm2, %v5784_v1, 0 }
 0x5f3   : > { %v5525_v30 = vadd.f32 %v5455_v28, %v15355_v43  ;;  %v10761_v22 = vadd.f32 %v10760_v51, %v10759_v38  ;;  %11952 = vmatmul.mubr.bf16.gmra.mxu1 %v15577_v55  ;;  %v5682_v19 = vshrl.u32 %v15573_v7, 16  ;;  %v5685_v41 = vshll.u32 %v15573_v7, 16  ;;  %v5462_v38 = vpop.f32.mrf.mxu0 }
 0x5f4   : > { %v10762_v42 = vpop.f32.mrf.mxu1  ;;  %v5595_v43 = vmax.f32 %v5563_v8, 0.0  ;;  %v4948_v51 = vadd.f32 %v15370_v14, %v15345_v47 }
 0x5f5   : > { %v5564_v17 = vadd.f32 %v15401_v32, %v5525_v30  ;;  %v5460_v23 = vadd.f32 %v10761_v22, %v5459_v36  ;;  %v5684_v48 = vrot.slane %v5682_v19, 7  ;;  %v5785_v15 = vrot.slane %v5685_v41, 1 }
 0x5f6   : > { %v10763_v37 = vpop.f32.mrf.mxu1 }
 0x5f7   : > { %v5596_v46 = vmax.f32 %v5564_v17, 0.0  ;;  %v5526_v49 = vadd.f32 %v5460_v23, %v15364_v34  ;;  %6163 = vmatmul.mubr.bf16.gmra.mxu0 %v15585_v50  ;;  %v10764_v33 = vadd.f32 %v10763_v37, %v10762_v42  ;;  %v5687_v1 = vor.u32 %v5685_v41, %v5684_v48 }
 0x5f8   : > { %6170 = vmatprep.mubr.bf16.mxu0 %v15573_v7  ;;  %v10765_v21 = vpop.f32.mrf.mxu1  ;;  %v5786_v28 = vor.u32 %v5785_v15, %v5682_v19  ;;  %v11917_v19 = vpop.f32.mrf.mxu0 }
 0x5f9   : > { %v15594_v36 = vpack.c.bf16 %v5596_v46, %v5595_v43  ;;  %v5463_v30 = vadd.f32 %v10764_v33, %v5462_v38  ;;  %v5565_v34 = vadd.f32 %v15401_v32, %v5526_v49  ;;  %v15605_v47 = vsel %vm13231_vm6, 0, %v5687_v1 }
 0x5fa   : > { %v10766_v22 = vpop.f32.mrf.mxu1  ;;  %v15598_v8 = vsel %vm13148_vm2, %v5786_v28, 0  ;;  %v5475_v28 = vpop.f32.mrf.mxu0 }
 0x5fb   : > { %17441 = vst [vmem:[#allocation48_spill] sm:$0xff] %v15594_v36  ;;  %v5527_v42 = vadd.f32 %v5463_v30, %v4948_v51  ;;  %v10767_v17 = vadd.f32 %v10766_v22, %v10765_v21  ;;  %11955 = vmatprep.mubr.bf16.mxu1 %v15598_v8  ;;  %v5689_v41 = vshrl.u32 %v15594_v36, 16  ;;  %v5692_v23 = vshll.u32 %v15594_v36, 16 }
 0x5fc   : > { %v10768_v14 = vpop.f32.mrf.mxu1  ;;  %v5597_v49 = vmax.f32 %v5565_v34, 0.0 }
 0x5fd   : > { %v5566_v48 = vadd.f32 %v15401_v32, %v5527_v42  ;;  %v5468_v37 = vadd.f32 %v11913_v57, %v10767_v17  ;;  %v5691_v15 = vrot.slane %v5689_v41, 7  ;;  %v5787_v46 = vrot.slane %v5692_v23, 1 }
 0x5fe   : > { %v10769_v43 = vpop.f32.mrf.mxu1 }
 0x5ff   : > { %v5598_v33 = vmax.f32 %v5566_v48, 0.0  ;;  %v5528_v38 = vadd.f32 %v5468_v37, %v15360_v3  ;;  %6171 = vmatmul.mubr.bf16.gmra.mxu0 %v15605_v47  ;;  %v10770_v21 = vadd.f32 %v10769_v43, %v10768_v14  ;;  %v5694_v51 = vor.u32 %v5692_v23, %v5691_v15  ;;  %v11918_v37 = vpop.f32.mrf.mxu0 }
 0x600   : > { %6178 = vmatprep.mubr.bf16.mxu0 %v15594_v36  ;;  %v10771_v1 = vpop.f32.mrf.mxu1  ;;  %v5788_v30 = vor.u32 %v5787_v46, %v5689_v41 }
 0x601   : > { %v15612_v22 = vpack.c.bf16 %v5598_v33, %v5597_v49  ;;  %v5471_v42 = vadd.f32 %v11914_v4, %v10770_v21  ;;  %v5567_v34 = vadd.f32 %v15401_v32, %v5528_v38  ;;  %v15624_v41 = vsel %vm13231_vm6, 0, %v5694_v51 }
 0x602   : > { %v10772_v57 = vpop.f32.mrf.mxu1  ;;  %v15616_v17 = vsel %vm13148_vm2, %v5788_v30, 0  ;;  %v5478_v30 = vpop.f32.mrf.mxu0 }
 0x603   : > { %17442 = vst [vmem:[#allocation26_spill] sm:$0xff] %v15612_v22  ;;  %v5529_v3 = vadd.f32 %v5471_v42, %v15367_v13  ;;  %v10773_v48 = vadd.f32 %v10772_v57, %v10771_v1  ;;  %11956 = vmatmul.mubr.bf16.gmra.mxu1 %v15616_v17  ;;  %v5696_v14 = vshrl.u32 %v15612_v22, 16  ;;  %v5699_v23 = vshll.u32 %v15612_v22, 16 }
 0x604   : > { %v10774_v4 = vpop.f32.mrf.mxu1  ;;  %v5599_v13 = vmax.f32 %v5567_v34, 0.0 }
 0x605   : > { %v5568_v15 = vadd.f32 %v15401_v32, %v5529_v3  ;;  %v5476_v43 = vadd.f32 %v10773_v48, %v5475_v28  ;;  %v5698_v46 = vrot.slane %v5696_v14, 7  ;;  %v5789_v33 = vrot.slane %v5699_v23, 1 }
 0x606   : > { %v10775_v49 = vpop.f32.mrf.mxu1  ;;  %v4964_v3 = vadd.f32 %v15379_v18, %v15372_v12 }
 0x607   : > { %v5600_v38 = vmax.f32 %v5568_v15, 0.0  ;;  %v5530_v21 = vadd.f32 %v5476_v43, %v15374_v0  ;;  %6179 = vmatmul.mubr.bf16.gmra.mxu0 %v15624_v41  ;;  %v10776_v1 = vadd.f32 %v10775_v49, %v10774_v4  ;;  %v5701_v42 = vor.u32 %v5699_v23, %v5698_v46  ;;  %v15639_v0 = vpop.f32.mrf.mxu0 }
 0x608   : > { %6186 = vmatprep.mubr.bf16.mxu0 %v15612_v22  ;;  %v10777_v51 = vpop.f32.mrf.mxu1  ;;  %v5790_v57 = vor.u32 %v5789_v33, %v5696_v14 }
 0x609   : > { %v15633_v28 = vpack.c.bf16 %v5600_v38, %v5599_v13  ;;  %v5479_v48 = vadd.f32 %v10776_v1, %v5478_v30  ;;  %v5569_v4 = vadd.f32 %v15401_v32, %v5530_v21  ;;  %v15646_v12 = vsel %vm13231_vm6, 0, %v5701_v42  ;;  %v5491_v21 = vpop.f32.mrf.mxu0 }
 0x60a   : > { %v10778_v36 = vpop.f32.mrf.mxu1  ;;  %v15637_v34 = vsel %vm13148_vm2, %v5790_v57, 0  ;;  %17444 = vst [vmem:[#allocation29_spill] sm:$0xff] %v15646_v12 }
 0x60b   : > { %17443 = vst [vmem:[#allocation36_spill] sm:$0xff] %v15633_v28  ;;  %v5531_v15 = vadd.f32 %v5479_v48, %v4964_v3  ;;  %v10779_v43 = vadd.f32 %v10778_v36, %v10777_v51  ;;  %11959 = vmatprep.mubr.bf16.mxu1 %v15637_v34  ;;  %v5703_v14 = vshrl.u32 %v15633_v28, 16  ;;  %v5706_v23 = vshll.u32 %v15633_v28, 16 }
 0x60c   : > { %v10780_v18 = vpop.f32.mrf.mxu1  ;;  %v5601_v1 = vmax.f32 %v5569_v4, 0.0  ;;  %v11922_v4 = vpop.f32.mrf.mxu0 }
 0x60d   : > { %v5570_v46 = vadd.f32 %v15401_v32, %v5531_v15  ;;  %v5484_v49 = vadd.f32 %v11917_v19, %v10779_v43  ;;  %v5705_v33 = vrot.slane %v5703_v14, 7  ;;  %v5791_v38 = vrot.slane %v5706_v23, 1 }
 0x60e   : > { %v10781_v13 = vpop.f32.mrf.mxu1 }
 0x60f   : > { %v5602_v36 = vmax.f32 %v5570_v46, 0.0  ;;  %v5532_v30 = vadd.f32 %v5484_v49, %v15377_v16  ;;  %6187 = vmatmul.mubr.bf16.gmra.mxu0 %v15646_v12  ;;  %v10782_v51 = vadd.f32 %v10781_v13, %v10780_v18  ;;  %v5708_v57 = vor.u32 %v5706_v23, %v5705_v33  ;;  %v17446_v12 = vld [vmem:[#allocation24_spill] sm:$0xff] }
 0x610   : > { %6194 = vmatprep.mubr.bf16.mxu0 %v15633_v28  ;;  %v10783_v42 = vpop.f32.mrf.mxu1  ;;  %v5792_v3 = vor.u32 %v5791_v38, %v5703_v14  ;;  %v17445_v28 = vld [vmem:[#allocation25_spill] sm:$0xff] }
 0x611   : > { %v15653_v48 = vpack.c.bf16 %v5602_v36, %v5601_v1  ;;  %v5487_v15 = vadd.f32 %v11918_v37, %v10782_v51  ;;  %v5571_v46 = vadd.f32 %v15401_v32, %v5532_v30  ;;  %v15665_v14 = vsel %vm13231_vm6, 0, %v5708_v57  ;;  %v5494_v36 = vpop.f32.mrf.mxu0 }
 0x612   : > { %v10784_v19 = vpop.f32.mrf.mxu1  ;;  %v15657_v43 = vsel %vm13148_vm2, %v5792_v3, 0 }
 0x613   : > { %v5533_v16 = vadd.f32 %v5487_v15, %v15384_v29  ;;  %v10785_v49 = vadd.f32 %v10784_v19, %v10783_v42  ;;  %11960 = vmatmul.mubr.bf16.gmra.mxu1 %v15657_v43  ;;  %v5710_v18 = vshrl.u32 %v15653_v48, 16  ;;  %v5713_v23 = vshll.u32 %v15653_v48, 16 }
 0x614   : > { %v10786_v37 = vpop.f32.mrf.mxu1  ;;  %v5603_v29 = vmax.f32 %v5571_v46, 0.0 }
 0x615   : > { %v5572_v33 = vadd.f32 %v15401_v32, %v5533_v16  ;;  %v5492_v13 = vadd.f32 %v10785_v49, %v5491_v21  ;;  %v5712_v38 = vrot.slane %v5710_v18, 7  ;;  %v5793_v30 = vrot.slane %v5713_v23, 1 }
 0x616   : > { %v10787_v1 = vpop.f32.mrf.mxu1  ;;  %v4980_v16 = vadd.f32 %v17446_v12, %v17445_v28 }
 0x617   : > { %v5604_v51 = vmax.f32 %v5572_v33, 0.0  ;;  %6195 = vmatmul.mubr.bf16.gmra.mxu0 %v15665_v14  ;;  %v5534_v42 = vadd.f32 %v5492_v13, %v15388_v31  ;;  %v10788_v3 = vadd.f32 %v10787_v1, %v10786_v37  ;;  %v5715_v15 = vor.u32 %v5713_v23, %v5712_v38 }
 0x618   : > { %6202 = vmatprep.mubr.bf16.mxu0 %v15653_v48  ;;  %v10789_v57 = vpop.f32.mrf.mxu1  ;;  %v5794_v19 = vor.u32 %v5793_v30, %v5710_v18 }
 0x619   : > { %v15674_v21 = vpack.c.bf16 %v5604_v51, %v5603_v29  ;;  %v5495_v49 = vadd.f32 %v10788_v3, %v5494_v36  ;;  %v5573_v33 = vadd.f32 %v15401_v32, %v5534_v42  ;;  %v15685_v18 = vsel %vm13231_vm6, 0, %v5715_v15 }
 0x61a   : > { %v10790_v22 = vpop.f32.mrf.mxu1  ;;  %v15678_v46 = vsel %vm13148_vm2, %v5794_v19, 0 }
 0x61b   : > { %v5535_v31 = vadd.f32 %v5495_v49, %v4980_v16  ;;  %v10791_v37 = vadd.f32 %v10790_v22, %v10789_v57  ;;  %11963 = vmatprep.mubr.bf16.mxu1 %v15678_v46  ;;  %v5717_v23 = vshrl.u32 %v15674_v21, 16  ;;  %v5720_v12 = vshll.u32 %v15674_v21, 16 }
 0x61c   : > { %v10792_v28 = vpop.f32.mrf.mxu1  ;;  %v5605_v29 = vmax.f32 %v5573_v33, 0.0 }
 0x61d   : > { %v5574_v13 = vadd.f32 %v15401_v32, %v5535_v31  ;;  %v5500_v38 = vadd.f32 %v15639_v0, %v10791_v37  ;;  %v5719_v1 = vrot.slane %v5717_v23, 7  ;;  %v5795_v30 = vrot.slane %v5720_v12, 1 }
 0x61e   : > { %v10793_v36 = vpop.f32.mrf.mxu1 }
 0x61f   : > { %v5606_v22 = vmax.f32 %v5574_v13, 0.0  ;;  %v5536_v51 = vadd.f32 %v5500_v38, %v15395_v63  ;;  %6203 = vmatmul.mubr.bf16.gmra.mxu0 %v15685_v18  ;;  %v10794_v42 = vadd.f32 %v10793_v36, %v10792_v28  ;;  %v5722_v3 = vor.u32 %v5720_v12, %v5719_v1 }
 0x620   : > { %6210 = vmatprep.mubr.bf16.mxu0 %v15674_v21  ;;  %v5796_v57 = vor.u32 %v5795_v30, %v5717_v23 }
 0x621   : > { %v15693_v15 = vpack.c.bf16 %v5606_v22, %v5605_v29  ;;  %v5503_v19 = vadd.f32 %v11922_v4, %v10794_v42  ;;  %v5575_v16 = vadd.f32 %v15401_v32, %v5536_v51  ;;  %v15706_v31 = vsel %vm13231_vm6, 0, %v5722_v3 }
 0x622   : > { %v15697_v0 = vsel %vm13148_vm2, %v5796_v57, 0  ;;  %v17447_v57 = vmov 0  }
 0x623   : > { %v5537_v49 = vadd.f32 %v5503_v19, %v15398_v25  ;;  %11964 = vmatmul.mubr.bf16.gmra.mxu1 %v15697_v0  ;;  %v5724_v63 = vshrl.u32 %v15693_v15, 16  ;;  %v5727_v33 = vshll.u32 %v15693_v15, 16  ;;  %v5607_v28 = vmax.f32 %v5575_v16, 0.0  ;;  %v17448_v16 = vld [vmem:[#allocation21_spill] sm:$0xff] }
 0x625   : > { %v5576_v4 = vadd.f32 %v15401_v32, %v5537_v49  ;;  %v5726_v37 = vrot.slane %v5724_v63, 7  ;;  %v5797_v23 = vrot.slane %v5727_v33, 1  ;;  %v12549_v49 = vld [vmem:[#allocation12 + $0x230] sm:$0xff]  }
 0x627   : > { %v5608_v12 = vmax.f32 %v5576_v4, 0.0  ;;  %6211 = vmatmul.mubr.bf16.gmra.mxu0 %v15706_v31  ;;  %v5798_v13 = vor.u32 %v5797_v23, %v5724_v63  ;;  %v5729_v25 = vor.u32 %v5727_v33, %v5726_v37  ;;  %v17449_v63 = vld [vmem:[#allocation23_spill] sm:$0xff]  ;;  %v12550_v33 = vld [vmem:[#allocation12 + $0x228] sm:$0xff]   ;;  %v12553_v37 = vld [vmem:[#allocation12 + $0x1f0] sm:$0xff]  }
 0x628   : > { %6218 = vmatprep.mubr.bf16.mxu0 %v15693_v15  ;;  %v12552_v4 = vld [vmem:[#allocation12 + $0x1b8] sm:$0xff]   ;;  %v12559_v23 = vld [vmem:[#allocation12 + $0x220] sm:$0xff]  }
 0x629   : > { %v15713_v38 = vsel %vm13148_vm2, %v5798_v13, 0  ;;  %v15715_v1 = vpack.c.bf16 %v5608_v12, %v5607_v28  ;;  %v15722_v30 = vsel %vm13231_vm6, 0, %v5729_v25  ;;  %v12554_v28 = vld [vmem:[#allocation12 + $0x1b0] sm:$0xff]   ;;  %v12555_v12 = vld [vmem:[#allocation12 + $0x1e8] sm:$0xff]   ;;  %v12560_v25 = vld [vmem:[#allocation12 + $0x1d8] sm:$0xff]  }
 0x62a   : > { %11967 = vmatprep.mubr.bf16.mxu1 %v15713_v38  ;;  %v12569_v13 = vld [vmem:[#allocation12 + $0x210] sm:$0xff]  }
 0x62b   : > { %v5731_v32 = vshrl.u32 %v15715_v1, 16  ;;  %v5734_v36 = vshll.u32 %v15715_v1, 16 }
 0x62d   : > { %v5733_v29 = vrot.slane %v5731_v32, 7  ;;  %v5799_v22 = vrot.slane %v5734_v36, 1 }
 0x62f   : > { %6219 = vmatmul.mubr.bf16.gmra.mxu0 %v15722_v30  ;;  %v5800_v51 = vor.u32 %v5799_v22, %v5731_v32  ;;  %v5736_v42 = vor.u32 %v5734_v36, %v5733_v29  ;;  %v12570_v32 = vld [vmem:[#allocation12 + $0x208] sm:$0xff]   ;;  %v12561_v36 = vld [vmem:[#allocation12 + $0x198] sm:$0xff]   ;;  %v12562_v29 = vld [vmem:[#allocation12 + $0x1d0] sm:$0xff]  }
 0x630   : > { %6226 = vmatprep.mubr.bf16.mxu0 %v15715_v1  ;;  %v12571_v22 = vld [vmem:[#allocation12 + $0x200] sm:$0xff]  }
 0x631   : > { %v15728_v3 = vsel %vm13148_vm2, %v5800_v51, 0  ;;  %v15734_v19 = vsel %vm13231_vm6, 0, %v5736_v42  ;;  %v12563_v51 = vld [vmem:[#allocation12 + $0x190] sm:$0xff]   ;;  %v12564_v42 = vld [vmem:[#allocation12 + $0x1c8] sm:$0xff]  }
 0x632   : > { %11968 = vmatmul.mubr.bf16.gmra.mxu1 %v15728_v3 }
 0x633   : > { %6572 = vmatprep.mubr.bf16.mxu1 %v17447_v57 }
 0x637   : > { %6227 = vmatmul.mubr.bf16.gmra.mxu0 %v15734_v19 }
 0x638   : > { %11987 = vmatprep.mubr.bf16.mxu0 %v17448_v16 }
 0x63a   : > { %6573 = vmatmul.mubr.bf16.vlgmr.msra.gmra.mxu1 %v17449_v63 }
 0x63b   : > { %12020 = vmatpush3.bf16.msra.mxu1 %v15526_v44  ;;  %6580 = vmatprep.mubr.bf16.mxu1 %v15411_v59  ;;  %v12568_v59 = vld [vmem:[#allocation12 + $0x218] sm:$0xff]   ;;  %v12556_v44 = vld [vmem:[#allocation12 + $0x1a8] sm:$0xff]  }
 0x63c   : > { %12021 = vmatprep.subr.bf16.mxu1 %v12549_v49 }
 0x63f   : > { %11988 = vmatmul.mubr.bf16.vlgmr.msra.gmra.mxu0 %v15433_v62  ;;  %12022 = vmatpush3.bf16.msra.mxu1 %v12549_v49  ;;  %v12557_v62 = vld [vmem:[#allocation12 + $0x1e0] sm:$0xff]  }
 0x640   : > { %11991 = vmatprep.mubr.bf16.mxu0 %v15444_v56  ;;  %12023 = vmatprep.subr.bf16.mxu1 %v12550_v33  ;;  %v17450_v49 = vld [vmem:[#allocation27_spill] sm:$0xff] }
 0x641   : > { %11092 = vmatpush3.bf16.msra.mxu0 %v12552_v4  ;;  %v12566_v4 = vld [vmem:[#allocation12 + $0x1c0] sm:$0xff]  }
 0x642   : > { %6581 = vmatmul.mubr.bf16.gmra.mxu1 %v15429_v26  ;;  %11093 = vmatprep.subr.bf16.mxu0 %v12553_v37  ;;  %v12558_v26 = vld [vmem:[#allocation12 + $0x1a0] sm:$0xff]  }
 0x643   : > { %6588 = vmatprep.mubr.bf16.mxu1 %v15419_v40  ;;  %12024 = vmatpush3.bf16.msra.mxu1 %v12550_v33  ;;  %v12565_v33 = vld [vmem:[#allocation12 + $0x188] sm:$0xff]   ;;  %v12567_v37 = vld [vmem:[#allocation12 + $0x180] sm:$0xff]  }
 0x644   : > { %12025 = vmatprep.subr.bf16.mxu1 %v12559_v23 }
 0x645   : > { %11094 = vmatpush3.bf16.msra.mxu0 %v12554_v28 }
 0x646   : > { %11095 = vmatprep.subr.bf16.mxu0 %v12555_v12 }
 0x647   : > { %11992 = vmatmul.mubr.bf16.gmra.mxu0 %v15467_v45  ;;  %12026 = vmatpush3.bf16.msra.mxu1 %v12559_v23 }
 0x648   : > { %11995 = vmatprep.mubr.bf16.mxu0 %v15489_v52  ;;  %12027 = vmatprep.subr.bf16.mxu1 %v12568_v59 }
 0x649   : > { %11096 = vmatpush3.bf16.msra.mxu0 %v12556_v44 }
 0x64a   : > { %6589 = vmatmul.mubr.bf16.gmra.mxu1 %v15454_v20  ;;  %11097 = vmatprep.subr.bf16.mxu0 %v12557_v62  ;;  %v17451_v62 = vld [vmem:[#allocation48_spill] sm:$0xff] }
 0x64b   : > { %6596 = vmatprep.mubr.bf16.mxu1 %v15440_v5  ;;  %12028 = vmatpush3.bf16.msra.mxu1 %v12568_v59 }
 0x64c   : > { %12029 = vmatprep.subr.bf16.mxu1 %v12569_v13 }
 0x64d   : > { %11098 = vmatpush3.bf16.msra.mxu0 %v12558_v26 }
 0x64e   : > { %11099 = vmatprep.subr.bf16.mxu0 %v12560_v25 }
 0x64f   : > { %11996 = vmatmul.mubr.bf16.gmra.mxu0 %v15512_v6  ;;  %12030 = vmatpush3.bf16.msra.mxu1 %v12569_v13 }
 0x650   : > { %11999 = vmatprep.mubr.bf16.mxu0 %v15537_v9  ;;  %12031 = vmatprep.subr.bf16.mxu1 %v12570_v32 }
 0x651   : > { %11100 = vmatpush3.bf16.msra.mxu0 %v12561_v36 }
 0x652   : > { %6597 = vmatmul.mubr.bf16.gmra.mxu1 %v15476_v27  ;;  %11101 = vmatprep.subr.bf16.mxu0 %v12562_v29  ;;  %v17452_v29 = vld [vmem:[#allocation26_spill] sm:$0xff] }
 0x653   : > { %6604 = vmatprep.mubr.bf16.mxu1 %v17450_v49  ;;  %12032 = vmatpush3.bf16.msra.mxu1 %v12570_v32 }
 0x654   : > { %12033 = vmatprep.subr.bf16.mxu1 %v12571_v22 }
 0x655   : > { %11102 = vmatpush3.bf16.msra.mxu0 %v12563_v51 }
 0x656   : > { %11103 = vmatprep.subr.bf16.mxu0 %v12564_v42 }
 0x657   : > { %12000 = vmatmul.mubr.bf16.gmra.mxu0 %v15558_v61  ;;  %12034 = vmatpush3.bf16.msra.mxu1 %v12571_v22 }
 0x658   : > { %12003 = vmatprep.mubr.bf16.mxu0 %v15577_v55 }
 0x659   : > { %11104 = vmatpush3.bf16.msra.mxu0 %v12565_v33 }
 0x65a   : > { %6605 = vmatmul.mubr.bf16.gmra.mxu1 %v15499_v58  ;;  %11105 = vmatprep.subr.bf16.mxu0 %v12566_v4 }
 0x65b   : > { %6612 = vmatprep.mubr.bf16.mxu1 %v15484_v39 }
 0x65d   : > { %11106 = vmatpush3.bf16.msra.mxu0 %v12567_v37 }
 0x65f   : > { %12004 = vmatmul.mubr.bf16.gmra.mxu0 %v15598_v8 }
 0x660   : > { %12007 = vmatprep.mubr.bf16.mxu0 %v15616_v17 }
 0x662   : > { %6613 = vmatmul.mubr.bf16.gmra.mxu1 %v15521_v54 }
 0x663   : > { %6620 = vmatprep.mubr.bf16.mxu1 %v15508_v11 }
 0x667   : > { %12008 = vmatmul.mubr.bf16.gmra.mxu0 %v15637_v34 }
 0x668   : > { %12011 = vmatprep.mubr.bf16.mxu0 %v15657_v43 }
 0x66a   : > { %6621 = vmatmul.mubr.bf16.gmra.mxu1 %v15545_v35 }
 0x66b   : > { %6628 = vmatprep.mubr.bf16.mxu1 %v15531_v10 }
 0x66f   : > { %12012 = vmatmul.mubr.bf16.gmra.mxu0 %v15678_v46 }
 0x670   : > { %12015 = vmatprep.mubr.bf16.mxu0 %v15697_v0 }
 0x672   : > { %6629 = vmatmul.mubr.bf16.gmra.mxu1 %v15565_v2 }
 0x673   : > { %6636 = vmatprep.mubr.bf16.mxu1 %v15554_v24 }
 0x677   : > { %12016 = vmatmul.mubr.bf16.gmra.mxu0 %v15713_v38 }
 0x678   : > { %7087 = vmatprep.mubr.bf16.mxu0 %v15419_v40 }
 0x67a   : > { %6637 = vmatmul.mubr.bf16.gmra.mxu1 %v15585_v50 }
 0x67b   : > { %6644 = vmatprep.mubr.bf16.mxu1 %v15573_v7 }
 0x67f   : > { %v10835_v23 = vpop.f32.mrf.mxu0  ;;  %7088 = vmatmul.mubr.bf16.vlgmr.msra.gmra.mxu0 %v15454_v20 }
 0x680   : > { %7095 = vmatprep.mubr.bf16.mxu0 %v15440_v5 }
 0x681   : > { %v10836_v28 = vpop.f32.mrf.mxu0 }
 0x682   : > { %v10837_v12 = vadd.f32 %v10836_v28, %v10835_v23  ;;  %6645 = vmatmul.mubr.bf16.gmra.mxu1 %v15605_v47  ;;  %v17453_v28 = vld [vmem:[#allocation29_spill] sm:$0xff] }
 0x683   : > { %v10838_v59 = vpop.f32.mrf.mxu0  ;;  %v11941_v44 = vpop.f32.mrf.mxu1  ;;  %6652 = vmatprep.mubr.bf16.mxu1 %v17451_v62 }
 0x685   : > { %v10839_v13 = vpop.f32.mrf.mxu0  ;;  %v6269_v26 = vpop.f32.mrf.mxu1 }
 0x686   : > { %v15777_v40 = vadd.f32 %v10839_v13, %v10838_v59  ;;  %v15779_v25 = vadd.f32 %v10837_v12, %v6269_v26 }
 0x687   : > { %v10841_v32 = vpop.f32.mrf.mxu0  ;;  %7096 = vmatmul.mubr.bf16.gmra.mxu0 %v15476_v27  ;;  %v11942_v51 = vpop.f32.mrf.mxu1 }
 0x688   : > { %7103 = vmatprep.mubr.bf16.mxu0 %v17450_v49 }
 0x689   : > { %v10842_v5 = vpop.f32.mrf.mxu0  ;;  %v15791_v27 = vpop.f32.mrf.mxu1 }
 0x68a   : > { %v10843_v20 = vadd.f32 %v10842_v5, %v10841_v32  ;;  %6653 = vmatmul.mubr.bf16.gmra.mxu1 %v15624_v41 }
 0x68b   : > { %v10844_v36 = vpop.f32.mrf.mxu0  ;;  %6660 = vmatprep.mubr.bf16.mxu1 %v17452_v29 }
 0x68c   : > { %v15785_v22 = vadd.f32 %v11941_v44, %v10843_v20  ;;  %v17454_v44 = vld [vmem:[#allocation36_spill] sm:$0xff] }
 0x68d   : > { %v10845_v42 = vpop.f32.mrf.mxu0 }
 0x68e   : > { %v10846_v33 = vadd.f32 %v10845_v42, %v10844_v36 }
 0x68f   : > { %v10847_v4 = vpop.f32.mrf.mxu0  ;;  %7104 = vmatmul.mubr.bf16.gmra.mxu0 %v15499_v58 }
 0x690   : > { %v15788_v37 = vadd.f32 %v11942_v51, %v10846_v33  ;;  %7111 = vmatprep.mubr.bf16.mxu0 %v15484_v39 }
 0x691   : > { %v10848_v49 = vpop.f32.mrf.mxu0 }
 0x692   : > { %v10849_v23 = vadd.f32 %v10848_v49, %v10847_v4  ;;  %6661 = vmatmul.mubr.bf16.gmra.mxu1 %v17453_v28 }
 0x693   : > { %v10850_v12 = vpop.f32.mrf.mxu0  ;;  %v11945_v59 = vpop.f32.mrf.mxu1  ;;  %6668 = vmatprep.mubr.bf16.mxu1 %v17454_v44 }
 0x695   : > { %v10851_v13 = vpop.f32.mrf.mxu0  ;;  %v6285_v26 = vpop.f32.mrf.mxu1 }
 0x696   : > { %v15795_v32 = vadd.f32 %v10851_v13, %v10850_v12  ;;  %v15797_v5 = vadd.f32 %v10849_v23, %v6285_v26 }
 0x697   : > { %v10853_v58 = vpop.f32.mrf.mxu0  ;;  %7112 = vmatmul.mubr.bf16.gmra.mxu0 %v15521_v54  ;;  %v11946_v42 = vpop.f32.mrf.mxu1 }
 0x698   : > { %7119 = vmatprep.mubr.bf16.mxu0 %v15508_v11 }
 0x699   : > { %v10854_v39 = vpop.f32.mrf.mxu0  ;;  %v15809_v11 = vpop.f32.mrf.mxu1 }
 0x69a   : > { %v10855_v20 = vadd.f32 %v10854_v39, %v10853_v58  ;;  %6669 = vmatmul.mubr.bf16.gmra.mxu1 %v15665_v14 }
 0x69b   : > { %v10856_v36 = vpop.f32.mrf.mxu0  ;;  %6676 = vmatprep.mubr.bf16.mxu1 %v15653_v48 }
 0x69c   : > { %v15803_v51 = vadd.f32 %v11945_v59, %v10855_v20 }
 0x69d   : > { %v10857_v33 = vpop.f32.mrf.mxu0 }
 0x69e   : > { %v10858_v4 = vadd.f32 %v10857_v33, %v10856_v36 }
 0x69f   : > { %v10859_v49 = vpop.f32.mrf.mxu0  ;;  %7120 = vmatmul.mubr.bf16.gmra.mxu0 %v15545_v35 }
 0x6a0   : > { %v15806_v23 = vadd.f32 %v11946_v42, %v10858_v4  ;;  %7127 = vmatprep.mubr.bf16.mxu0 %v15531_v10 }
 0x6a1   : > { %v10860_v54 = vpop.f32.mrf.mxu0 }
 0x6a2   : > { %v10861_v12 = vadd.f32 %v10860_v54, %v10859_v49  ;;  %6677 = vmatmul.mubr.bf16.gmra.mxu1 %v15685_v18 }
 0x6a3   : > { %v10862_v13 = vpop.f32.mrf.mxu0  ;;  %v11949_v26 = vpop.f32.mrf.mxu1  ;;  %6684 = vmatprep.mubr.bf16.mxu1 %v15674_v21 }
 0x6a5   : > { %v10863_v59 = vpop.f32.mrf.mxu0  ;;  %v6301_v58 = vpop.f32.mrf.mxu1 }
 0x6a6   : > { %v10864_v39 = vadd.f32 %v10863_v59, %v10862_v13  ;;  %v15813_v20 = vadd.f32 %v10861_v12, %v6301_v58 }
 0x6a7   : > { %v10865_v35 = vpop.f32.mrf.mxu0  ;;  %7128 = vmatmul.mubr.bf16.gmra.mxu0 %v15565_v2  ;;  %v11950_v36 = vpop.f32.mrf.mxu1 }
 0x6a8   : > { %7135 = vmatprep.mubr.bf16.mxu0 %v15554_v24 }
 0x6a9   : > { %v10866_v10 = vpop.f32.mrf.mxu0  ;;  %v6304_v42 = vpop.f32.mrf.mxu1 }
 0x6aa   : > { %v10867_v33 = vadd.f32 %v10866_v10, %v10865_v35  ;;  %v15817_v4 = vadd.f32 %v10864_v39, %v6304_v42  ;;  %6685 = vmatmul.mubr.bf16.gmra.mxu1 %v15706_v31 }
 0x6ab   : > { %v10868_v49 = vpop.f32.mrf.mxu0  ;;  %6692 = vmatprep.mubr.bf16.mxu1 %v15693_v15 }
 0x6ac   : > { %v15821_v54 = vadd.f32 %v11949_v26, %v10867_v33 }
 0x6ad   : > { %v10869_v12 = vpop.f32.mrf.mxu0 }
 0x6ae   : > { %v10870_v13 = vadd.f32 %v10869_v12, %v10868_v49 }
 0x6af   : > { %v10871_v59 = vpop.f32.mrf.mxu0  ;;  %7136 = vmatmul.mubr.bf16.gmra.mxu0 %v15585_v50 }
 0x6b0   : > { %v15824_v2 = vadd.f32 %v11950_v36, %v10870_v13  ;;  %7143 = vmatprep.mubr.bf16.mxu0 %v15573_v7 }
 0x6b1   : > { %v10872_v24 = vpop.f32.mrf.mxu0 }
 0x6b2   : > { %v10873_v58 = vadd.f32 %v10872_v24, %v10871_v59  ;;  %6693 = vmatmul.mubr.bf16.gmra.mxu1 %v15722_v30 }
 0x6b3   : > { %v10874_v39 = vpop.f32.mrf.mxu0  ;;  %v11953_v35 = vpop.f32.mrf.mxu1  ;;  %12035 = vmatprep.mubr.bf16.mxu1 %v15444_v56 }
 0x6b5   : > { %v10875_v10 = vpop.f32.mrf.mxu0  ;;  %v6317_v26 = vpop.f32.mrf.mxu1 }
 0x6b6   : > { %v10876_v42 = vadd.f32 %v10875_v10, %v10874_v39  ;;  %v15829_v33 = vadd.f32 %v10873_v58, %v6317_v26 }
 0x6b7   : > { %v10877_v49 = vpop.f32.mrf.mxu0  ;;  %7144 = vmatmul.mubr.bf16.gmra.mxu0 %v15605_v47  ;;  %v11954_v50 = vpop.f32.mrf.mxu1 }
 0x6b8   : > { %7151 = vmatprep.mubr.bf16.mxu0 %v17451_v62 }
 0x6b9   : > { %v10878_v7 = vpop.f32.mrf.mxu0  ;;  %v6320_v36 = vpop.f32.mrf.mxu1 }
 0x6ba   : > { %v10879_v12 = vadd.f32 %v10878_v7, %v10877_v49  ;;  %v15833_v13 = vadd.f32 %v10876_v42, %v6320_v36  ;;  %12036 = vmatmul.mubr.bf16.vlgmr.msra.gmra.mxu1 %v15467_v45 }
 0x6bb   : > { %v10880_v59 = vpop.f32.mrf.mxu0  ;;  %12039 = vmatprep.mubr.bf16.mxu1 %v15489_v52 }
 0x6bc   : > { %v15837_v56 = vadd.f32 %v11953_v35, %v10879_v12 }
 0x6bd   : > { %v10881_v24 = vpop.f32.mrf.mxu0 }
 0x6be   : > { %v10882_v58 = vadd.f32 %v10881_v24, %v10880_v59 }
 0x6bf   : > { %v10883_v39 = vpop.f32.mrf.mxu0  ;;  %7152 = vmatmul.mubr.bf16.gmra.mxu0 %v15624_v41 }
 0x6c0   : > { %v15840_v47 = vadd.f32 %v11954_v50, %v10882_v58  ;;  %7159 = vmatprep.mubr.bf16.mxu0 %v17452_v29 }
 0x6c1   : > { %v10884_v62 = vpop.f32.mrf.mxu0 }
 0x6c2   : > { %v10885_v10 = vadd.f32 %v10884_v62, %v10883_v39  ;;  %12040 = vmatmul.mubr.bf16.gmra.mxu1 %v15512_v6 }
 0x6c3   : > { %v10886_v26 = vpop.f32.mrf.mxu0  ;;  %v11957_v45 = vpop.f32.mrf.mxu1  ;;  %12043 = vmatprep.mubr.bf16.mxu1 %v15537_v9 }
 0x6c5   : > { %v10887_v52 = vpop.f32.mrf.mxu0  ;;  %v6333_v35 = vpop.f32.mrf.mxu1 }
 0x6c6   : > { %v15845_v42 = vadd.f32 %v10887_v52, %v10886_v26  ;;  %v15847_v49 = vadd.f32 %v10885_v10, %v6333_v35 }
 0x6c7   : > { %v10889_v7 = vpop.f32.mrf.mxu0  ;;  %7160 = vmatmul.mubr.bf16.gmra.mxu0 %v17453_v28  ;;  %v11958_v9 = vpop.f32.mrf.mxu1 }
 0x6c8   : > { %7167 = vmatprep.mubr.bf16.mxu0 %v17454_v44 }
 0x6c9   : > { %v10890_v41 = vpop.f32.mrf.mxu0  ;;  %v15859_v28 = vpop.f32.mrf.mxu1 }
 0x6ca   : > { %v10891_v29 = vadd.f32 %v10890_v41, %v10889_v7  ;;  %12044 = vmatmul.mubr.bf16.gmra.mxu1 %v15558_v61 }
 0x6cb   : > { %v10892_v6 = vpop.f32.mrf.mxu0  ;;  %12047 = vmatprep.mubr.bf16.mxu1 %v15577_v55 }
 0x6cc   : > { %v15853_v50 = vadd.f32 %v11957_v45, %v10891_v29 }
 0x6cd   : > { %v10893_v36 = vpop.f32.mrf.mxu0 }
 0x6ce   : > { %v10894_v12 = vadd.f32 %v10893_v36, %v10892_v6 }
 0x6cf   : > { %v10895_v59 = vpop.f32.mrf.mxu0  ;;  %7168 = vmatmul.mubr.bf16.gmra.mxu0 %v15665_v14 }
 0x6d0   : > { %v15856_v24 = vadd.f32 %v11958_v9, %v10894_v12  ;;  %7175 = vmatprep.mubr.bf16.mxu0 %v15653_v48  ;;  %v12572_v48 = vld [vmem:[%s17315_s9 + $0x138] sm:$0xff]  }
 0x6d1   : > { %v10896_v44 = vpop.f32.mrf.mxu0  ;;  %11227 = vmatprep.subr.bf16.mxu1 %v12572_v48 }
 0x6d2   : > { %v10897_v58 = vadd.f32 %v10896_v44, %v10895_v59  ;;  %12048 = vmatmul.mubr.bf16.gmra.mxu1 %v15598_v8  ;;  %v12573_v8 = vld [vmem:[%s17315_s9 + $0xf8] sm:$0xff]  }
 0x6d3   : > { %v10898_v61 = vpop.f32.mrf.mxu0  ;;  %v11961_v55 = vpop.f32.mrf.mxu1  ;;  %12051 = vmatprep.mubr.bf16.mxu1 %v15616_v17  ;;  %v12574_v17 = vld [vmem:[%s17315_s9 + $0x178] sm:$0xff]   ;;  %11228 = vmatpush3.bf16.msra.mxu1 %v12573_v8 }
 0x6d4   : > { %12067 = vmatprep.subr.bf16.mxu0 %v12574_v17 }
 0x6d5   : > { %v10899_v39 = vpop.f32.mrf.mxu0  ;;  %v6349_v62 = vpop.f32.mrf.mxu1  ;;  %12068 = vmatpush3.bf16.msra.mxu0 %v12574_v17 }
 0x6d6   : > { %v15863_v10 = vadd.f32 %v10899_v39, %v10898_v61  ;;  %v15865_v26 = vadd.f32 %v10897_v58, %v6349_v62 }
 0x6d7   : > { %v10901_v14 = vpop.f32.mrf.mxu0  ;;  %7176 = vmatmul.mubr.bf16.gmra.mxu0 %v15685_v18  ;;  %v11962_v7 = vpop.f32.mrf.mxu1 }
 0x6d8   : > { %7183 = vmatprep.mubr.bf16.mxu0 %v15674_v21  ;;  %v12575_v21 = vld [vmem:[%s17315_s9 + $0x130] sm:$0xff]  }
 0x6d9   : > { %v10902_v45 = vpop.f32.mrf.mxu0  ;;  %11229 = vmatprep.subr.bf16.mxu1 %v12575_v21 }
 0x6da   : > { %v10903_v52 = vadd.f32 %v10902_v45, %v10901_v14  ;;  %12052 = vmatmul.mubr.bf16.gmra.mxu1 %v15637_v34  ;;  %v12576_v34 = vld [vmem:[%s17315_s9 + $0xf0] sm:$0xff]  }
 0x6db   : > { %v10904_v35 = vpop.f32.mrf.mxu0  ;;  %12055 = vmatprep.mubr.bf16.mxu1 %v15657_v43  ;;  %v15892_v43 = vpop.f32.mrf.mxu1  ;;  %11230 = vmatpush3.bf16.msra.mxu1 %v12576_v34 }
 0x6dc   : > { %v15880_v18 = vadd.f32 %v11961_v55, %v10903_v52 }
 0x6dd   : > { %v10905_v41 = vpop.f32.mrf.mxu0 }
 0x6de   : > { %v10906_v29 = vadd.f32 %v10905_v41, %v10904_v35 }
 0x6df   : > { %v10907_v6 = vpop.f32.mrf.mxu0  ;;  %7184 = vmatmul.mubr.bf16.gmra.mxu0 %v15706_v31 }
 0x6e0   : > { %v15889_v9 = vadd.f32 %v11962_v7, %v10906_v29  ;;  %7191 = vmatprep.mubr.bf16.mxu0 %v15693_v15  ;;  %v12577_v15 = vld [vmem:[%s17315_s9 + $0x128] sm:$0xff]  }
 0x6e1   : > { %v10908_v36 = vpop.f32.mrf.mxu0  ;;  %11231 = vmatprep.subr.bf16.mxu1 %v12577_v15 }
 0x6e2   : > { %v10909_v12 = vadd.f32 %v10908_v36, %v10907_v6  ;;  %12056 = vmatmul.mubr.bf16.gmra.mxu1 %v15678_v46  ;;  %v12578_v46 = vld [vmem:[%s17315_s9 + $0xe8] sm:$0xff]   ;;  %v12582_v36 = vld [vmem:[%s17315_s9 + $0x118] sm:$0xff]  }
 0x6e3   : > { %v15895_v59 = vpop.f32.mrf.mxu0  ;;  %v11965_v44 = vpop.f32.mrf.mxu1  ;;  %12059 = vmatprep.mubr.bf16.mxu1 %v15697_v0  ;;  %v12579_v0 = vld [vmem:[%s17315_s9 + $0x170] sm:$0xff]   ;;  %11232 = vmatpush3.bf16.msra.mxu1 %v12578_v46 }
 0x6e4   : > { %12069 = vmatprep.subr.bf16.mxu0 %v12579_v0 }
 0x6e5   : > { %v15898_v31 = vpop.f32.mrf.mxu0  ;;  %v6365_v58 = vpop.f32.mrf.mxu1  ;;  %12070 = vmatpush3.bf16.msra.mxu0 %v12579_v0 }
 0x6e6   : > { %v15900_v61 = vadd.f32 %v10909_v12, %v6365_v58  ;;  %v12584_v58 = vld [vmem:[%s17315_s9 + $0x168] sm:$0xff]  }
 0x6e7   : > { %v10913_v55 = vpop.f32.mrf.mxu0  ;;  %7192 = vmatmul.mubr.bf16.gmra.mxu0 %v15722_v30  ;;  %v11966_v14 = vpop.f32.mrf.mxu1  ;;  %12071 = vmatprep.subr.bf16.mxu0 %v12584_v58 }
 0x6e8   : > { %7199 = vmatprep.mubr.bf16.mxu0 %v15715_v1  ;;  %v12580_v1 = vld [vmem:[%s17315_s9 + $0x120] sm:$0xff]  }
 0x6e9   : > { %v10914_v39 = vpop.f32.mrf.mxu0  ;;  %v15926_v35 = vpop.f32.mrf.mxu1  ;;  %11233 = vmatprep.subr.bf16.mxu1 %v12580_v1  ;;  %12072 = vmatpush3.bf16.msra.mxu0 %v12584_v58 }
 0x6ea   : > { %v10915_v62 = vadd.f32 %v10914_v39, %v10913_v55  ;;  %12060 = vmatmul.mubr.bf16.gmra.mxu1 %v15713_v38  ;;  %v12581_v38 = vld [vmem:[%s17315_s9 + $0xe0] sm:$0xff]  }
 0x6eb   : > { %v10916_v48 = vpop.f32.mrf.mxu0  ;;  %12063 = vmatprep.mubr.bf16.mxu1 %v15728_v3  ;;  %11234 = vmatpush3.bf16.msra.mxu1 %v12581_v38 }
 0x6ec   : > { %v15915_v30 = vadd.f32 %v11965_v44, %v10915_v62  ;;  %v12583_v44 = vld [vmem:[%s17315_s9 + $0xd8] sm:$0xff]   ;;  %11235 = vmatprep.subr.bf16.mxu1 %v12582_v36 }
 0x6ed   : > { %v10917_v8 = vpop.f32.mrf.mxu0 }
 0x6ee   : > { %v10918_v17 = vadd.f32 %v10917_v8, %v10916_v48 }
 0x6ef   : > { %v10919_v45 = vpop.f32.mrf.mxu0  ;;  %7200 = vmatmul.mubr.bf16.gmra.mxu0 %v15734_v19  ;;  %11236 = vmatpush3.bf16.msra.mxu1 %v12583_v44  ;;  %v12586_v44 = vld [vmem:[%s17315_s9 + $0xd0] sm:$0xff]  }
 0x6f0   : > { %v15924_v52 = vadd.f32 %v11966_v14, %v10918_v17  ;;  %7207 = vmatprep.mubr.bf16.mxu0 %v17447_v57 }
 0x6f1   : > { %v10920_v3 = vpop.f32.mrf.mxu0 }
 0x6f2   : > { %v10921_v7 = vadd.f32 %v10920_v3, %v10919_v45  ;;  %v11969_v41 = vpop.f32.mrf.mxu1  ;;  %12064 = vmatmul.mubr.bf16.gmra.mxu1 %v17448_v16  ;;  %v12585_v45 = vld [vmem:[%s17315_s9 + $0x110] sm:$0xff]  }
 0x6f3   : > { %v15930_v29 = vpop.f32.mrf.mxu0  ;;  %11237 = vmatprep.subr.bf16.mxu1 %v12585_v45 }
 0x6f4   : > { %v6381_v19 = vpop.f32.mrf.mxu1  ;;  %11238 = vmatpush3.bf16.msra.mxu1 %v12586_v44 }
 0x6f5   : > { %v15932_v21 = vpop.f32.mrf.mxu0  ;;  %v15934_v6 = vadd.f32 %v10921_v7, %v6381_v19 }
 0x6f6   : > { %v11970_v34 = vpop.f32.mrf.mxu1 }
 0x6f7   : > { %v10925_v12 = vpop.f32.mrf.mxu0  ;;  %7208 = vmatmul.mubr.bf16.gmra.mxu0 %v17449_v63 }
 0x6f8   : > { %v15946_v15 = vpop.f32.mrf.mxu1 }
 0x6f9   : > { %v10926_v55 = vpop.f32.mrf.mxu0 }
 0x6fa   : > { %v10927_v46 = vadd.f32 %v10926_v55, %v10925_v12  ;;  %v10971_v0 = vpop.f32.mrf.mxu1 }
 0x6fb   : > { %v10928_v39 = vpop.f32.mrf.mxu0 }
 0x6fc   : > { %v15948_v62 = vadd.f32 %v11969_v41, %v10927_v46  ;;  %v10972_v48 = vpop.f32.mrf.mxu1  ;;  %v6273_v41 = vadd.f32 %v15777_v40, %v15791_v27  ;;  %v12587_v27 = vld [vmem:[%s17315_s9 + $0x160] sm:$0xff]  }
 0x6fd   : > { %v10929_v14 = vpop.f32.mrf.mxu0  ;;  %v10973_v8 = vadd.f32 %v10972_v48, %v10971_v0  ;;  %12073 = vmatprep.subr.bf16.mxu0 %v12587_v27 }
 0x6fe   : > { %v10930_v17 = vadd.f32 %v10929_v14, %v10928_v39  ;;  %v10974_v1 = vpop.f32.mrf.mxu1  ;;  %12074 = vmatpush3.bf16.msra.mxu0 %v12587_v27  ;;  %v12591_v27 = vld [vmem:[%s17315_s9 + $0x150] sm:$0xff]  }
 0x6ff   : > { %v11989_v38 = vpop.f32.mrf.mxu0  ;;  %v6575_v3 = vadd.f32 %v10973_v8, %v15779_v25  ;;  %v12588_v8 = vld [vmem:[%s17315_s9 + $0x108] sm:$0xff]  }
 0x700   : > { %v15954_v7 = vadd.f32 %v11970_v34, %v10930_v17  ;;  %v10975_v19 = vpop.f32.mrf.mxu1  ;;  %11239 = vmatprep.subr.bf16.mxu1 %v12588_v8 }
 0x701   : > { %v6735_v36 = vpop.f32.mrf.mxu0  ;;  %v10976_v12 = vadd.f32 %v10975_v19, %v10974_v1  ;;  %v12589_v19 = vld [vmem:[%s17315_s9 + $0xc8] sm:$0xff]  }
 0x702   : > { %v15961_v58 = vadd.f32 %v6735_v36, %v6575_v3  ;;  %v10977_v55 = vpop.f32.mrf.mxu1  ;;  %11240 = vmatpush3.bf16.msra.mxu1 %v12589_v19 }
 0x703   : > { %v11990_v46 = vpop.f32.mrf.mxu0  ;;  %v15963_v0 = vadd.f32 %v10976_v12, %v6273_v41 }
 0x704   : > { %v10978_v25 = vpop.f32.mrf.mxu1 }
 0x705   : > { %v15965_v34 = vpop.f32.mrf.mxu0  ;;  %v10979_v39 = vadd.f32 %v10978_v25, %v10977_v55 }
 0x706   : > { %v10980_v48 = vpop.f32.mrf.mxu1 }
 0x707   : > { %v11993_v14 = vpop.f32.mrf.mxu0  ;;  %v6583_v40 = vadd.f32 %v10979_v39, %v15785_v22  ;;  %v12590_v22 = vld [vmem:[%s17315_s9 + $0x158] sm:$0xff]  }
 0x708   : > { %v10981_v17 = vpop.f32.mrf.mxu1  ;;  %12075 = vmatprep.subr.bf16.mxu0 %v12590_v22 }
 0x709   : > { %v6751_v1 = vpop.f32.mrf.mxu0  ;;  %v10982_v45 = vadd.f32 %v10981_v17, %v10980_v48  ;;  %v15974_v3 = vadd.f32 %v11989_v38, %v6583_v40  ;;  %12076 = vmatpush3.bf16.msra.mxu0 %v12590_v22  ;;  %v12594_v22 = vld [vmem:[%s17315_s9 + $0x148] sm:$0xff]  }
 0x70a   : > { %v10983_v41 = vpop.f32.mrf.mxu1  ;;  %12077 = vmatprep.subr.bf16.mxu0 %v12591_v27 }
 0x70b   : > { %v11994_v36 = vpop.f32.mrf.mxu0  ;;  %v6586_v12 = vadd.f32 %v10982_v45, %v15788_v37  ;;  %v6289_v37 = vadd.f32 %v15795_v32, %v15809_v11 }
 0x70c   : > { %v10984_v44 = vpop.f32.mrf.mxu1 }
 0x70d   : > { %v15983_v38 = vpop.f32.mrf.mxu0  ;;  %v10985_v55 = vadd.f32 %v10984_v44, %v10983_v41  ;;  %v15985_v25 = vadd.f32 %v11990_v46, %v6586_v12  ;;  %v12592_v46 = vld [vmem:[%s17315_s9 + $0x100] sm:$0xff]   ;;  %12078 = vmatpush3.bf16.msra.mxu0 %v12591_v27 }
 0x70e   : > { %v10986_v39 = vpop.f32.mrf.mxu1  ;;  %11241 = vmatprep.subr.bf16.mxu1 %v12592_v46  ;;  %12079 = vmatprep.subr.bf16.mxu0 %v12594_v22 }
 0x70f   : > { %v11997_v48 = vpop.f32.mrf.mxu0  ;;  %v6591_v40 = vadd.f32 %v10985_v55, %v15797_v5  ;;  %v12593_v5 = vld [vmem:[%s17315_s9 + $0xc0] sm:$0xff]  }
 0x710   : > { %v10987_v8 = vpop.f32.mrf.mxu1  ;;  %11242 = vmatpush3.bf16.msra.mxu1 %v12593_v5 }
 0x711   : > { %v6767_v17 = vpop.f32.mrf.mxu0  ;;  %v10988_v45 = vadd.f32 %v10987_v8, %v10986_v39  ;;  %v15993_v19 = vadd.f32 %v6751_v1, %v6591_v40  ;;  %12080 = vmatpush3.bf16.msra.mxu0 %v12594_v22  ;;  %v12595_v8 = vld [vmem:[%s17315_s9 + $0x140] sm:$0xff]  }
 0x712   : > { %v10989_v41 = vpop.f32.mrf.mxu1  ;;  %12081 = vmatprep.subr.bf16.mxu0 %v12595_v8 }
 0x713   : > { %17455 = vst [vmem:[#allocation31_spill] sm:$0xff] %v15993_v19  ;;  %v11998_v12 = vpop.f32.mrf.mxu0  ;;  %v16004_v32 = vadd.f32 %v10988_v45, %v6289_v37 }
 0x714   : > { %v10990_v11 = vpop.f32.mrf.mxu1 }
 0x715   : > { %v16006_v1 = vpop.f32.mrf.mxu0  ;;  %v10991_v44 = vadd.f32 %v10990_v11, %v10989_v41  ;;  %v16019_v41 = vld [vmem:[%s17315_s9 + $0xb8] sm:$0xff]   ;;  %12082 = vmatpush3.bf16.msra.mxu0 %v12595_v8 }
 0x716   : > { %v10992_v55 = vpop.f32.mrf.mxu1  ;;  %17457 = vst [vmem:[#allocation32_spill] sm:$0xff] %v16019_v41  ;;  %12115 = vmatprep.subr.bf16.mxu1 %v16019_v41 }
 0x717   : > { %v16008_v39 = vpop.f32.mrf.mxu0  ;;  %v6599_v40 = vadd.f32 %v10991_v44, %v15803_v51 }
 0x718   : > { %v10993_v37 = vpop.f32.mrf.mxu1 }
 0x719   : > { %v6783_v45 = vpop.f32.mrf.mxu0  ;;  %v10994_v27 = vadd.f32 %v10993_v37, %v10992_v55  ;;  %v16014_v46 = vadd.f32 %v11993_v14, %v6599_v40 }
 0x71a   : > { %v10995_v5 = vpop.f32.mrf.mxu1 }
 0x71b   : > { %17456 = vst [vmem:[#allocation30_spill] sm:$0xff] %v16014_v46  ;;  %v12002_v11 = vpop.f32.mrf.mxu0  ;;  %v6602_v51 = vadd.f32 %v10994_v27, %v15806_v23 }
 0x71c   : > { %v10996_v22 = vpop.f32.mrf.mxu1 }
 0x71d   : > { %v16023_v44 = vpop.f32.mrf.mxu0  ;;  %v10997_v16 = vadd.f32 %v10996_v22, %v10995_v5  ;;  %v16025_v55 = vadd.f32 %v11994_v36, %v6602_v51 }
 0x71e   : > { %v10998_v14 = vpop.f32.mrf.mxu1 }
 0x71f   : > { %17458 = vst [vmem:[#allocation28_spill] sm:$0xff] %v16025_v55  ;;  %v16027_v40 = vpop.f32.mrf.mxu0  ;;  %v6607_v37 = vadd.f32 %v10997_v16, %v15813_v20 }
 0x720   : > { %v10999_v63 = vpop.f32.mrf.mxu1 }
 0x721   : > { %v6799_v57 = vpop.f32.mrf.mxu0  ;;  %v11000_v60 = vadd.f32 %v10999_v63, %v10998_v14  ;;  %v16030_v53 = vadd.f32 %v6767_v17, %v6607_v37 }
 0x722   : > { %v11001_v23 = vpop.f32.mrf.mxu1 }
 0x723   : > { %17459 = vst [vmem:[#allocation37_spill] sm:$0xff] %v16030_v53  ;;  %v16032_v8 = vpop.f32.mrf.mxu0  ;;  %v16035_v27 = vadd.f32 %v11000_v60, %v15817_v4 }
 0x724   : > { %v11002_v41 = vpop.f32.mrf.mxu1 }
 0x725   : > { %v16037_v5 = vpop.f32.mrf.mxu0  ;;  %v11003_v36 = vadd.f32 %v11002_v41, %v11001_v23 }
 0x726   : > { %v11004_v51 = vpop.f32.mrf.mxu1 }
 0x727   : > { %v16039_v22 = vpop.f32.mrf.mxu0  ;;  %v6615_v16 = vadd.f32 %v11003_v36, %v15821_v54 }
 0x728   : > { %v11005_v20 = vpop.f32.mrf.mxu1 }
 0x729   : > { %v16042_v55 = vpop.f32.mrf.mxu0  ;;  %v11006_v63 = vadd.f32 %v11005_v20, %v11004_v51  ;;  %v16044_v17 = vadd.f32 %v11997_v48, %v6615_v16 }
 0x72a   : > { %v11007_v14 = vpop.f32.mrf.mxu1 }
 0x72b   : > { %17460 = vst [vmem:[#allocation33_spill] sm:$0xff] %v16044_v17  ;;  %v16046_v37 = vpop.f32.mrf.mxu0  ;;  %v6618_v60 = vadd.f32 %v11006_v63, %v15824_v2 }
 0x72c   : > { %v11008_v4 = vpop.f32.mrf.mxu1 }
 0x72d   : > { %v16049_v53 = vpop.f32.mrf.mxu0  ;;  %v11009_v41 = vadd.f32 %v11008_v4, %v11007_v14  ;;  %v16051_v23 = vadd.f32 %v11998_v12, %v6618_v60 }
 0x72e   : > { %v11010_v19 = vpop.f32.mrf.mxu1 }
 0x72f   : > { %17461 = vst [vmem:[#allocation38_spill] sm:$0xff] %v16051_v23  ;;  %v16053_v46 = vpop.f32.mrf.mxu0  ;;  %v6623_v54 = vadd.f32 %v11009_v41, %v15829_v33 }
 0x730   : > { %v11011_v36 = vpop.f32.mrf.mxu1 }
 0x731   : > { %v16056_v51 = vpop.f32.mrf.mxu0  ;;  %v11012_v48 = vadd.f32 %v11011_v36, %v11010_v19  ;;  %v16058_v16 = vadd.f32 %v6783_v45, %v6623_v54 }
 0x732   : > { %v11013_v20 = vpop.f32.mrf.mxu1 }
 0x733   : > { %17462 = vst [vmem:[#allocation40_spill] sm:$0xff] %v16058_v16  ;;  %v16060_v17 = vpop.f32.mrf.mxu0  ;;  %v16063_v2 = vadd.f32 %v11012_v48, %v15833_v13 }
 0x734   : > { %v11014_v63 = vpop.f32.mrf.mxu1 }
 0x735   : > { %v16065_v12 = vpop.f32.mrf.mxu0  ;;  %v11015_v14 = vadd.f32 %v11014_v63, %v11013_v20 }
 0x736   : > { %17463 = vst [vmem:[#allocation39_spill] sm:$0xff] %v16065_v12  ;;  %v11016_v60 = vpop.f32.mrf.mxu1 }
 0x737   : > { %v16067_v4 = vpop.f32.mrf.mxu0  ;;  %v6631_v33 = vadd.f32 %v11015_v14, %v15837_v56 }
 0x738   : > { %v11017_v41 = vpop.f32.mrf.mxu1 }
 0x739   : > { %v16070_v23 = vpop.f32.mrf.mxu0  ;;  %v11018_v19 = vadd.f32 %v11017_v41, %v11016_v60  ;;  %v16073_v45 = vadd.f32 %v16008_v39, %v6631_v33  ;;  %v6337_v39 = vadd.f32 %v15845_v42, %v15859_v28 }
 0x73a   : > { %v11019_v54 = vpop.f32.mrf.mxu1 }
 0x73b   : > { %17464 = vst [vmem:[#allocation41_spill] sm:$0xff] %v16073_v45  ;;  %v16075_v36 = vpop.f32.mrf.mxu0  ;;  %v6634_v13 = vadd.f32 %v11018_v19, %v15840_v47 }
 0x73c   : > { %v11020_v48 = vpop.f32.mrf.mxu1 }
 0x73d   : > { %v16078_v16 = vpop.f32.mrf.mxu0  ;;  %v11021_v20 = vadd.f32 %v11020_v48, %v11019_v54  ;;  %v16080_v63 = vadd.f32 %v12002_v11, %v6634_v13  ;;  %v12599_v11 = vld [vmem:[%s17315_s9 + $0x78] sm:$0xff]  }
 0x73e   : > { %17465 = vst [vmem:[#allocation43_spill] sm:$0xff] %v16078_v16  ;;  %v11022_v12 = vpop.f32.mrf.mxu1  ;;  %11363 = vmatprep.subr.bf16.mxu0 %v12599_v11 }
 0x73f   : > { %17466 = vst [vmem:[#allocation42_spill] sm:$0xff] %v16080_v63  ;;  %v16082_v56 = vpop.f32.mrf.mxu0  ;;  %v6639_v14 = vadd.f32 %v11021_v20, %v15847_v49 }
 0x740   : > { %v11023_v60 = vpop.f32.mrf.mxu1 }
 0x741   : > { %v16087_v33 = vpop.f32.mrf.mxu0  ;;  %v11024_v41 = vadd.f32 %v11023_v60, %v11022_v12  ;;  %v16089_v45 = vadd.f32 %v6799_v57, %v6639_v14 }
 0x742   : > { %v11025_v47 = vpop.f32.mrf.mxu1 }
 0x743   : > { %17467 = vst [vmem:[#allocation44_spill] sm:$0xff] %v16089_v45  ;;  %v16094_v19 = vpop.f32.mrf.mxu0  ;;  %v16096_v54 = vadd.f32 %v11024_v41, %v6337_v39 }
 0x744   : > { %v11026_v13 = vpop.f32.mrf.mxu1 }
 0x745   : > { %v16098_v49 = vpop.f32.mrf.mxu0  ;;  %v11027_v48 = vadd.f32 %v11026_v13, %v11025_v47 }
 0x746   : > { %v11028_v42 = vpop.f32.mrf.mxu1 }
 0x747   : > { %v16100_v28 = vpop.f32.mrf.mxu0  ;;  %v6647_v57 = vadd.f32 %v11027_v48, %v15853_v50 }
 0x748   : > { %v11029_v12 = vpop.f32.mrf.mxu1 }
 0x749   : > { %v16103_v20 = vpop.f32.mrf.mxu0  ;;  %v11030_v14 = vadd.f32 %v11029_v12, %v11028_v42  ;;  %v16106_v60 = vadd.f32 %v16027_v40, %v6647_v57  ;;  %v6353_v40 = vadd.f32 %v15863_v10, %v15892_v43 }
 0x74a   : > { %v11031_v16 = vpop.f32.mrf.mxu1 }
 0x74b   : > { %17468 = vst [vmem:[#allocation46_spill] sm:$0xff] %v16106_v60  ;;  %v16108_v39 = vpop.f32.mrf.mxu0  ;;  %v6650_v41 = vadd.f32 %v11030_v14, %v15856_v24 }
 0x74c   : > { %v11032_v11 = vpop.f32.mrf.mxu1 }
 0x74d   : > { %v16111_v45 = vpop.f32.mrf.mxu0  ;;  %v11033_v47 = vadd.f32 %v11032_v11, %v11031_v16  ;;  %v16114_v13 = vadd.f32 %v16032_v8, %v6650_v41 }
 0x74e   : > { %v11034_v50 = vpop.f32.mrf.mxu1 }
 0x74f   : > { %17469 = vst [vmem:[#allocation45_spill] sm:$0xff] %v16114_v13  ;;  %v16116_v48 = vpop.f32.mrf.mxu0  ;;  %v6655_v42 = vadd.f32 %v11033_v47, %v15865_v26 }
 0x750   : > { %v11035_v12 = vpop.f32.mrf.mxu1 }
 0x751   : > { %v16121_v57 = vpop.f32.mrf.mxu0  ;;  %v11036_v60 = vadd.f32 %v11035_v12, %v11034_v50  ;;  %v16124_v24 = vadd.f32 %v16042_v55, %v6655_v42 }
 0x752   : > { %v11037_v14 = vpop.f32.mrf.mxu1 }
 0x753   : > { %17470 = vst [vmem:[#allocation34_spill] sm:$0xff] %v16124_v24  ;;  %v16126_v16 = vpop.f32.mrf.mxu0  ;;  %v16128_v8 = vadd.f32 %v11036_v60, %v6353_v40 }
 0x754   : > { %v11038_v41 = vpop.f32.mrf.mxu1 }
 0x755   : > { %v16130_v11 = vpop.f32.mrf.mxu0  ;;  %v11039_v13 = vadd.f32 %v11038_v41, %v11037_v14 }
 0x756   : > { %v11040_v26 = vpop.f32.mrf.mxu1 }
 0x757   : > { %v16132_v47 = vpop.f32.mrf.mxu0  ;;  %v6663_v10 = vadd.f32 %v11039_v13, %v15880_v18  ;;  %v10912_v13 = vadd.f32 %v15898_v31, %v15895_v59 }
 0x758   : > { %v11041_v43 = vpop.f32.mrf.mxu1 }
 0x759   : > { %v16135_v63 = vpop.f32.mrf.mxu0  ;;  %v11042_v50 = vadd.f32 %v11041_v43, %v11040_v26  ;;  %v16138_v55 = vadd.f32 %v16039_v22, %v6663_v10  ;;  %v6369_v43 = vadd.f32 %v10912_v13, %v15926_v35 }
 0x75a   : > { %v11043_v42 = vpop.f32.mrf.mxu1 }
 0x75b   : > { %17471 = vst [vmem:[#allocation47_spill] sm:$0xff] %v16138_v55  ;;  %v16140_v12 = vpop.f32.mrf.mxu0  ;;  %v6666_v60 = vadd.f32 %v11042_v50, %v15889_v9 }
 0x75c   : > { %v11044_v40 = vpop.f32.mrf.mxu1 }
 0x75d   : > { %v16143_v24 = vpop.f32.mrf.mxu0  ;;  %v11045_v14 = vadd.f32 %v11044_v40, %v11043_v42  ;;  %v16146_v41 = vadd.f32 %v16046_v37, %v6666_v60 }
 0x75e   : > { %v11046_v18 = vpop.f32.mrf.mxu1 }
 0x75f   : > { %17472 = vst [vmem:[#allocation35_spill] sm:$0xff] %v16146_v41  ;;  %v16150_v26 = vpop.f32.mrf.mxu0  ;;  %v6671_v22 = vadd.f32 %v11045_v14, %v15900_v61 }
 0x760   : > { %v11047_v10 = vpop.f32.mrf.mxu1 }
 0x761   : > { %v16154_v55 = vpop.f32.mrf.mxu0  ;;  %v11048_v9 = vadd.f32 %v11047_v10, %v11046_v18  ;;  %v16157_v50 = vadd.f32 %v16056_v51, %v6671_v22 }
 0x762   : > { %v11049_v42 = vpop.f32.mrf.mxu1 }
 0x763   : > { %17473 = vst [vmem:[#allocation25_spill] sm:$0xff] %v16157_v50  ;;  %v16159_v37 = vpop.f32.mrf.mxu0  ;;  %v16161_v60 = vadd.f32 %v11048_v9, %v6369_v43 }
 0x764   : > { %v11050_v40 = vpop.f32.mrf.mxu1 }
 0x765   : > { %v16163_v59 = vpop.f32.mrf.mxu0  ;;  %v11051_v31 = vadd.f32 %v11050_v40, %v11049_v42 }
 0x766   : > { %v11052_v41 = vpop.f32.mrf.mxu1 }
 0x767   : > { %v16165_v61 = vpop.f32.mrf.mxu0  ;;  %v6679_v35 = vadd.f32 %v11051_v31, %v15915_v30  ;;  %v10924_v31 = vadd.f32 %v15932_v21, %v15930_v29 }
 0x768   : > { %v11053_v14 = vpop.f32.mrf.mxu1 }
 0x769   : > { %v16168_v13 = vpop.f32.mrf.mxu0  ;;  %v11054_v18 = vadd.f32 %v11053_v14, %v11052_v41  ;;  %v16171_v51 = vadd.f32 %v16053_v46, %v6679_v35  ;;  %v6385_v14 = vadd.f32 %v10924_v31, %v15946_v15 }
 0x76a   : > { %v11055_v22 = vpop.f32.mrf.mxu1 }
 0x76b   : > { %17474 = vst [vmem:[#allocation24_spill] sm:$0xff] %v16171_v51  ;;  %v16173_v10 = vpop.f32.mrf.mxu0  ;;  %v6682_v43 = vadd.f32 %v11054_v18, %v15924_v52 }
 0x76c   : > { %v11056_v9 = vpop.f32.mrf.mxu1 }
 0x76d   : > { %v16176_v50 = vpop.f32.mrf.mxu0  ;;  %v11057_v42 = vadd.f32 %v11056_v9, %v11055_v22  ;;  %v16179_v40 = vadd.f32 %v16060_v17, %v6682_v43 }
 0x76e   : > { %v11058_v30 = vpop.f32.mrf.mxu1 }
 0x76f   : > { %17475 = vst [vmem:[#allocation27_spill] sm:$0xff] %v16179_v40  ;;  %v16183_v41 = vpop.f32.mrf.mxu0  ;;  %v6687_v46 = vadd.f32 %v11057_v42, %v15934_v6 }
 0x770   : > { %v11059_v35 = vpop.f32.mrf.mxu1 }
 0x771   : > { %v16187_v51 = vpop.f32.mrf.mxu0  ;;  %v11060_v52 = vadd.f32 %v11059_v35, %v11058_v30  ;;  %v16190_v18 = vadd.f32 %v16070_v23, %v6687_v46  ;;  %v11115_v30 = vadd.f32 %v16103_v20, %v16100_v28  ;;  %v16215_v20 = vld [vmem:[#allocation13] ss:$0 sm:$0xff] }
 0x772   : > { %v11061_v22 = vpop.f32.mrf.mxu1 }
 0x773   : > { %v16192_v17 = vpop.f32.mrf.mxu0  ;;  %v16194_v43 = vadd.f32 %v11060_v52, %v6385_v14  ;;  %v11109_v14 = vadd.f32 %v16087_v33, %v16082_v56  ;;  %v6739_v56 = vadd.f32 %v15965_v34, %v15963_v0  ;;  %v16231_v0 = vadd.f32 %v16023_v44, %v16063_v2 }
 0x774   : > { %v11062_v9 = vpop.f32.mrf.mxu1  ;;  %v11127_v34 = vadd.f32 %v16135_v63, %v16132_v47 }
 0x775   : > { %17476 = vst [vmem:[#allocation48_spill] sm:$0xff] %v16194_v43  ;;  %v16196_v29 = vpop.f32.mrf.mxu0  ;;  %v11063_v21 = vadd.f32 %v11062_v9, %v11061_v22 }
 0x776   : > { %v11064_v40 = vpop.f32.mrf.mxu1 }
 0x777   : > { %v16198_v6 = vpop.f32.mrf.mxu0  ;;  %v6695_v15 = vadd.f32 %v11063_v21, %v15948_v62  ;;  %v11118_v62 = vadd.f32 %v16111_v45, %v16108_v39 }
 0x778   : > { %v11065_v42 = vpop.f32.mrf.mxu1 }
 0x779   : > { %v16204_v23 = vadd.f32 %v16067_v4, %v6695_v15  ;;  %v11150_v31 = vpop.f32.mrf.mxu0  ;;  %v11066_v46 = vadd.f32 %v11065_v42, %v11064_v40 }
 0x77a   : > { %v12037_v35 = vpop.f32.mrf.mxu1 }
 0x77b   : > { %v11152_v52 = vpop.f32.mrf.mxu0  ;;  %v6698_v22 = vadd.f32 %v11066_v46, %v15954_v7  ;;  %v7259_v9 = vadd.f32 %v12037_v35, %v11115_v30  ;;  %v11112_v7 = vadd.f32 %v16098_v49, %v16094_v19  ;;  %v16238_v30 = vadd.f32 %v16037_v5, %v16096_v54  ;;  %v17478_v46 = vld [vmem:[#allocation30_spill] sm:$0xff] }
 0x77c   : > { %v7250_v43 = vpop.f32.mrf.mxu1 }
 0x77d   : > { %v16212_v21 = vadd.f32 %v16075_v36, %v6698_v22  ;;  %v11153_v28 = vpop.f32.mrf.mxu0  ;;  %v7379_v4 = vadd.f32 %v7259_v9, %v15974_v3  ;;  %v7251_v40 = vadd.f32 %v11109_v14, %v7250_v43  ;;  %v6755_v3 = vadd.f32 %v15983_v38, %v16004_v32 }
 0x77e   : > { %v12038_v15 = vpop.f32.mrf.mxu1  ;;  %v16227_v43 = vadd.f32 %v16006_v1, %v16035_v27  ;;  %v11121_v38 = vadd.f32 %v16121_v57, %v16116_v48  ;;  %v11124_v32 = vadd.f32 %v16130_v11, %v16126_v16  ;;  %v16247_v27 = vadd.f32 %v16049_v53, %v16128_v8  ;;  %v17477_v53 = vld [vmem:[#allocation39_spill] sm:$0xff] }
 0x77f   : > { %v11155_v33 = vpop.f32.mrf.mxu0  ;;  %v7377_v42 = vadd.f32 %v7251_v40, %v15961_v58  ;;  %v7262_v45 = vadd.f32 %v12038_v15, %v11118_v62  ;;  %v7418_v36 = vadd.f32 %v16215_v20, %v7379_v4  ;;  %v11133_v48 = vadd.f32 %v16154_v55, %v16150_v26  ;;  %v17479_v40 = vld [vmem:[#allocation31_spill] sm:$0xff] }
 0x780   : > { %v7253_v39 = vpop.f32.mrf.mxu1  ;;  %v16256_v57 = vadd.f32 %v16163_v59, %v16159_v37  ;;  %v16260_v8 = vadd.f32 %v17477_v53, %v16161_v60  ;;  %v11139_v55 = vadd.f32 %v16168_v13, %v16165_v61  ;;  %v11142_v26 = vadd.f32 %v16176_v50, %v16173_v10 }
 0x781   : > { %v11156_v19 = vpop.f32.mrf.mxu0  ;;  %v7380_v58 = vadd.f32 %v7262_v45, %v15985_v25  ;;  %v7254_v49 = vadd.f32 %v11112_v7, %v7253_v39  ;;  %v7416_v1 = vadd.f32 %v16215_v20, %v7377_v42  ;;  %v11130_v25 = vadd.f32 %v16143_v24, %v16140_v12 }
 0x782   : > { %v12041_v44 = vpop.f32.mrf.mxu1  ;;  %v7450_v16 = vmax.f32 %v7418_v36, 0.0  ;;  %v16270_v37 = vadd.f32 %v16187_v51, %v16183_v41  ;;  %v16278_v61 = vadd.f32 %v16196_v29, %v16192_v17  ;;  %v11151_v50 = vadd.f32 %v11150_v31, %v16198_v6 }
 0x783   : > { %v11158_v2 = vpop.f32.mrf.mxu0  ;;  %v7419_v5 = vadd.f32 %v16215_v20, %v7380_v58  ;;  %v7378_v63 = vadd.f32 %v7254_v49, %v6739_v56  ;;  %v7275_v54 = vadd.f32 %v12041_v44, %v11127_v34  ;;  %v7448_v59 = vmax.f32 %v7416_v1, 0.0  ;;  %v17480_v34 = vld [vmem:[#allocation28_spill] sm:$0xff] }
 0x784   : > { %v7266_v11 = vpop.f32.mrf.mxu1  ;;  %v16281_v13 = vadd.f32 %v11153_v28, %v11152_v52  ;;  %v16283_v41 = vadd.f32 %v11156_v19, %v11155_v33 }
 0x785   : > { %v7451_v47 = vmax.f32 %v7419_v5, 0.0  ;;  %v11159_v24 = vpop.f32.mrf.mxu0  ;;  %v7417_v12 = vadd.f32 %v16215_v20, %v7378_v63  ;;  %v7383_v35 = vadd.f32 %v7275_v54, %v17478_v46  ;;  %v7267_v14 = vadd.f32 %v11121_v38, %v7266_v11 }
 0x786   : > { %v12042_v60 = vpop.f32.mrf.mxu1  ;;  %v16285_v56 = vadd.f32 %v11159_v24, %v11158_v2  ;;  %v17481_v2 = vld [vmem:[#allocation33_spill] sm:$0xff] }
 0x787   : > { %v16272_v22 = vpack.c.bf16 %v7451_v47, %v7450_v16  ;;  %v7449_v9 = vmax.f32 %v7417_v12, 0.0  ;;  %v11161_v62 = vpop.f32.mrf.mxu0  ;;  %v7422_v4 = vadd.f32 %v16215_v20, %v7383_v35  ;;  %v7381_v15 = vadd.f32 %v7267_v14, %v17479_v40  ;;  %v17482_v35 = vld [vmem:[#allocation37_spill] sm:$0xff] }
 0x788   : > { %v7278_v51 = vadd.f32 %v12042_v60, %v11130_v25  ;;  %v7269_v10 = vpop.f32.mrf.mxu1 }
 0x789   : > { %v11162_v7 = vpop.f32.mrf.mxu0  ;;  %v7270_v42 = vadd.f32 %v11124_v32, %v7269_v10  ;;  %v16287_v45 = vpack.c.bf16 %v7449_v9, %v7448_v59  ;;  %v7454_v36 = vmax.f32 %v7422_v4, 0.0  ;;  %v7420_v39 = vadd.f32 %v16215_v20, %v7381_v15  ;;  %v17483_v10 = vld [vmem:[#allocation38_spill] sm:$0xff] }
 0x78a   : > { %v7384_v17 = vadd.f32 %v7278_v51, %v17480_v34  ;;  %v12045_v29 = vpop.f32.mrf.mxu1  ;;  %v7507_v6 = vshll.u32 %v16272_v22, 16  ;;  %v16292_v31 = vadd.f32 %v11162_v7, %v11161_v62  ;;  %v7504_v32 = vshrl.u32 %v16272_v22, 16 }
 0x78b   : > { %v11164_v52 = vpop.f32.mrf.mxu0  ;;  %v7382_v28 = vadd.f32 %v7270_v42, %v6755_v3  ;;  %v7291_v33 = vadd.f32 %v12045_v29, %v11139_v55  ;;  %7977 = vmatprep.mubr.bf16.mxu1 %v16287_v45  ;;  %v7497_v19 = vshrl.u32 %v16287_v45, 16  ;;  %v7500_v38 = vshll.u32 %v16287_v45, 16  ;;  %v12597_v42 = vld [vmem:[%s17315_s9 + $0xb0] sm:$0xff]  }
 0x78c   : > { %v7423_v58 = vadd.f32 %v16215_v20, %v7384_v17  ;;  %v7282_v49 = vpop.f32.mrf.mxu1  ;;  %v7642_v1 = vrot.slane %v7507_v6, 1  ;;  %v7452_v54 = vmax.f32 %v7420_v39, 0.0  ;;  %v7506_v4 = vrot.slane %v7504_v32, 7  ;;  %v12624_v39 = vld [vmem:[%s17315_s9 + $0x1b0] sm:$0xff]  }
 0x78d   : > { %v11165_v44 = vpop.f32.mrf.mxu0  ;;  %v7421_v25 = vadd.f32 %v16215_v20, %v7382_v28  ;;  %v7387_v3 = vadd.f32 %v7291_v33, %v17481_v2  ;;  %v7283_v5 = vadd.f32 %v11133_v48, %v7282_v49  ;;  %v7499_v63 = vrot.slane %v7497_v19, 7  ;;  %v12600_v28 = vld [vmem:[%s17315_s9 + $0x38] sm:$0xff]  }
 0x78e   : > { %v7455_v16 = vmax.f32 %v7423_v58, 0.0  ;;  %v12046_v11 = vpop.f32.mrf.mxu1  ;;  %v7640_v53 = vrot.slane %v7500_v38, 1  ;;  %v7643_v47 = vor.u32 %v7642_v1, %v7504_v32  ;;  %v16307_v48 = vadd.f32 %v11165_v44, %v11164_v52  ;;  %v17486_v44 = vld [vmem:[#allocation32_spill] sm:$0xff] }
 0x78f   : > { %v7453_v24 = vmax.f32 %v7421_v25, 0.0  ;;  %v11167_v12 = vpop.f32.mrf.mxu0  ;;  %v7426_v46 = vadd.f32 %v16215_v20, %v7387_v3  ;;  %v7385_v14 = vadd.f32 %v7283_v5, %v17482_v35  ;;  %v7294_v55 = vadd.f32 %v12046_v11, %v11142_v26  ;;  %v12598_v11 = vld [vmem:[%s17315_s9 + $0xa8] sm:$0xff]  }
 0x790   : > { %v16305_v59 = vpack.c.bf16 %v7455_v16, %v7454_v36  ;;  %v7285_v60 = vpop.f32.mrf.mxu1  ;;  %v7502_v9 = vor.u32 %v7500_v38, %v7499_v63  ;;  %v7641_v62 = vor.u32 %v7640_v53, %v7497_v19  ;;  %v16327_v52 = vsel %vm13148_vm2, %v7643_v47, 0  ;;  %v12601_v38 = vld [vmem:[%s17315_s9 + $0x70] sm:$0xff]  }
 0x791   : > { %v16309_v40 = vpack.c.bf16 %v7453_v24, %v7452_v54  ;;  %v11168_v15 = vpop.f32.mrf.mxu0  ;;  %v7424_v51 = vadd.f32 %v16215_v20, %v7385_v14  ;;  %v7388_v7 = vadd.f32 %v7294_v55, %v17483_v10  ;;  %v7286_v26 = vadd.f32 %v16256_v57, %v7285_v60  ;;  %v17487_v63 = vld [vmem:[#allocation41_spill] sm:$0xff]  ;;  %v17488_v55 = vld [vmem:[#allocation40_spill] sm:$0xff] }
 0x792   : > { %v12049_v36 = vpop.f32.mrf.mxu1  ;;  %v16319_v34 = vsel %vm13231_vm6, 0, %v7502_v9  ;;  %v16323_v29 = vsel %vm13148_vm2, %v7641_v62, 0  ;;  %v7458_v33 = vmax.f32 %v7426_v46, 0.0  ;;  %v16332_v19 = vadd.f32 %v11168_v15, %v11167_v12 }
 0x793   : > { %v11170_v57 = vpop.f32.mrf.mxu0  ;;  %v7427_v58 = vadd.f32 %v16215_v20, %v7388_v7  ;;  %v7307_v49 = vadd.f32 %v12049_v36, %v11151_v50  ;;  %7978 = vmatmul.mubr.bf16.vlgmr.msra.gmra.mxu1 %v16319_v34  ;;  %12083 = vmatprep.mubr.bf16.mxu0 %v16323_v29  ;;  %v7456_v32 = vmax.f32 %v7424_v51, 0.0  ;;  %v7386_v1 = vadd.f32 %v7286_v26, %v16227_v43  ;;  %v17489_v36 = vld [vmem:[#allocation42_spill] sm:$0xff] }
 0x794   : > { %12116 = vmatpush3.bf16.msra.mxu1 %v17486_v44  ;;  %7985 = vmatprep.mubr.bf16.mxu1 %v16272_v22  ;;  %v7298_v25 = vpop.f32.mrf.mxu1  ;;  %v7511_v2 = vshrl.u32 %v16309_v40, 16  ;;  %v7514_v50 = vshll.u32 %v16309_v40, 16  ;;  %v7509_v43 = vor.u32 %v7507_v6, %v7506_v4  ;;  %v7518_v12 = vshrl.u32 %v16305_v59, 16 }
 0x795   : > { %v7459_v3 = vmax.f32 %v7427_v58, 0.0  ;;  %v11171_v5 = vpop.f32.mrf.mxu0  ;;  %v7391_v54 = vadd.f32 %v7307_v49, %v17487_v63  ;;  %12084 = vmatmul.mubr.bf16.vlgmr.msra.gmra.mxu0 %v16327_v52  ;;  %v7299_v16 = vadd.f32 %v16270_v37, %v7298_v25  ;;  %12117 = vmatprep.subr.bf16.mxu1 %v12597_v42  ;;  %v7425_v53 = vadd.f32 %v16215_v20, %v7386_v1  ;;  %v12602_v37 = vld [vmem:[%s17315_s9 + $0x30] sm:$0xff]   ;;  %v12604_v1 = vld [vmem:[%s17315_s9 + $0x28] sm:$0xff]   ;;  %v12605_v63 = vld [vmem:[%s17315_s9 + $0x60] sm:$0xff]  }
 0x796   : > { %v12050_v47 = vpop.f32.mrf.mxu1  ;;  %v7644_v24 = vrot.slane %v7514_v50, 1  ;;  %v7521_v46 = vshll.u32 %v16305_v59, 16  ;;  %11364 = vmatpush3.bf16.msra.mxu0 %v12600_v28  ;;  %v7513_v10 = vrot.slane %v7511_v2, 7  ;;  %v16366_v7 = vadd.f32 %v11171_v5, %v11170_v57 }
 0x797   : > { %v16359_v35 = vpack.c.bf16 %v7459_v3, %v7458_v33  ;;  %v11173_v6 = vpop.f32.mrf.mxu0  ;;  %v7430_v14 = vadd.f32 %v16215_v20, %v7391_v54  ;;  %v7389_v60 = vadd.f32 %v7299_v16, %v17488_v55  ;;  %v7310_v9 = vadd.f32 %v12050_v47, %v16281_v13  ;;  %11365 = vmatprep.subr.bf16.mxu0 %v12601_v38  ;;  %v12603_v13 = vld [vmem:[%s17315_s9 + $0x68] sm:$0xff]   ;;  %v12616_v55 = vld [vmem:[%s17315_s9 + $0x98] sm:$0xff]  }
 0x798   : > { %v7457_v62 = vmax.f32 %v7425_v53, 0.0  ;;  %v7301_v4 = vpop.f32.mrf.mxu1  ;;  %v7645_v15 = vor.u32 %v7644_v24, %v7511_v2  ;;  %v7646_v51 = vrot.slane %v7521_v46, 1  ;;  %12118 = vmatpush3.bf16.msra.mxu1 %v12597_v42  ;;  %v16372_v58 = vsel %vm13231_vm6, 0, %v7509_v43 }
 0x799   : > { %v11174_v26 = vpop.f32.mrf.mxu0  ;;  %v7392_v28 = vadd.f32 %v7310_v9, %v17489_v36  ;;  %v7302_v33 = vadd.f32 %v16278_v61, %v7301_v4  ;;  %12119 = vmatprep.subr.bf16.mxu1 %v12598_v11  ;;  %v7428_v42 = vadd.f32 %v16215_v20, %v7389_v60  ;;  %v7462_v44 = vmax.f32 %v7430_v14, 0.0  ;;  %v12606_v4 = vld [vmem:[%s17315_s9 + $0x20] sm:$0xff]  }
 0x79a   : > { %v16377_v49 = vpack.c.bf16 %v7457_v62, %v7456_v32  ;;  %v12053_v57 = vpop.f32.mrf.mxu1  ;;  %v16382_v38 = vsel %vm13148_vm2, %v7645_v15, 0  ;;  %v7647_v61 = vor.u32 %v7646_v51, %v7518_v12  ;;  %11366 = vmatpush3.bf16.msra.mxu0 %v12602_v37  ;;  %v12607_v32 = vld [vmem:[%s17315_s9 + $0xa0] sm:$0xff]   ;;  %v11175_v54 = vadd.f32 %v11174_v26, %v11173_v6  ;;  %v17490_v37 = vld [vmem:[#allocation46_spill] sm:$0xff]  ;;  %v17491_v26 = vld [vmem:[#allocation44_spill] sm:$0xff] }
 0x79b   : > { %v11176_v25 = vpop.f32.mrf.mxu0  ;;  %v7431_v2 = vadd.f32 %v16215_v20, %v7392_v28  ;;  %v7390_v3 = vadd.f32 %v7302_v33, %v16231_v0  ;;  %v7323_v5 = vadd.f32 %v12053_v57, %v16292_v31  ;;  %7986 = vmatmul.mubr.bf16.gmra.mxu1 %v16372_v58  ;;  %12087 = vmatprep.mubr.bf16.mxu0 %v16382_v38  ;;  %v7460_v60 = vmax.f32 %v7428_v42, 0.0 }
 0x79c   : > { %7993 = vmatprep.mubr.bf16.mxu1 %v16309_v40  ;;  %v16403_v16 = vsel %vm13148_vm2, %v7647_v61, 0  ;;  %v7314_v43 = vpop.f32.mrf.mxu1  ;;  %v7516_v53 = vor.u32 %v7514_v50, %v7513_v10  ;;  %v7528_v0 = vshll.u32 %v16377_v49, 16  ;;  %12120 = vmatpush3.bf16.msra.mxu1 %v12598_v11  ;;  %v7525_v11 = vshrl.u32 %v16377_v49, 16  ;;  %v12608_v61 = vld [vmem:[%s17315_s9 + $0x58] sm:$0xff]  }
 0x79d   : > { %v7463_v31 = vmax.f32 %v7431_v2, 0.0  ;;  %v11177_v47 = vpop.f32.mrf.mxu0  ;;  %v7429_v24 = vadd.f32 %v16215_v20, %v7390_v3  ;;  %v7395_v14 = vadd.f32 %v7323_v5, %v17490_v37  ;;  %12088 = vmatmul.mubr.bf16.gmra.mxu0 %v16403_v16  ;;  %v7315_v6 = vadd.f32 %v16283_v41, %v7314_v43  ;;  %11367 = vmatprep.subr.bf16.mxu0 %v12603_v13  ;;  %v17492_v3 = vld [vmem:[#allocation45_spill] sm:$0xff] }
 0x79e   : > { %v16413_v50 = vadd.f32 %v11177_v47, %v11176_v25  ;;  %v12054_v9 = vpop.f32.mrf.mxu1  ;;  %v7648_v62 = vrot.slane %v7528_v0, 1  ;;  %11368 = vmatpush3.bf16.msra.mxu0 %v12604_v1  ;;  %12121 = vmatprep.subr.bf16.mxu1 %v12607_v32  ;;  %v7535_v42 = vshll.u32 %v16359_v35, 16  ;;  %v7520_v57 = vrot.slane %v7518_v12, 7 }
 0x79f   : > { %v16421_v41 = vpack.c.bf16 %v7463_v31, %v7462_v44  ;;  %v7461_v15 = vmax.f32 %v7429_v24, 0.0  ;;  %v11179_v51 = vpop.f32.mrf.mxu0  ;;  %v7434_v10 = vadd.f32 %v16215_v20, %v7395_v14  ;;  %v7393_v36 = vadd.f32 %v7315_v6, %v17491_v26  ;;  %11369 = vmatprep.subr.bf16.mxu0 %v12605_v63  ;;  %v12610_v6 = vld [vmem:[%s17315_s9 + $0x50] sm:$0xff]  }
 0x7a0   : > { %v7326_v28 = vadd.f32 %v12054_v9, %v16307_v48  ;;  %v7317_v33 = vpop.f32.mrf.mxu1  ;;  %v7649_v13 = vor.u32 %v7648_v62, %v7525_v11  ;;  %12122 = vmatpush3.bf16.msra.mxu1 %v12607_v32  ;;  %v16440_v2 = vsel %vm13231_vm6, 0, %v7516_v53  ;;  %v7532_v63 = vshrl.u32 %v16359_v35, 16  ;;  %v12617_v53 = vld [vmem:[%s17315_s9 + $0x90] sm:$0xff]  }
 0x7a1   : > { %v16434_v1 = vpack.c.bf16 %v7461_v15, %v7460_v60  ;;  %v11180_v44 = vpop.f32.mrf.mxu0  ;;  %v7432_v25 = vadd.f32 %v16215_v20, %v7393_v36  ;;  %v7318_v48 = vadd.f32 %v16285_v56, %v7317_v33  ;;  %12123 = vmatprep.subr.bf16.mxu1 %v12616_v55  ;;  %v7650_v43 = vrot.slane %v7535_v42, 1  ;;  %v12609_v56 = vld [vmem:[%s17315_s9 + $0x18] sm:$0xff]  }
 0x7a2   : > { %v7396_v5 = vadd.f32 %v7326_v28, %v17492_v3  ;;  %v12057_v12 = vpop.f32.mrf.mxu1  ;;  %v16445_v32 = vsel %vm13148_vm2, %v7649_v13, 0  ;;  %11370 = vmatpush3.bf16.msra.mxu0 %v12606_v4  ;;  %v7466_v31 = vmax.f32 %v7434_v10, 0.0  ;;  %v16456_v47 = vadd.f32 %v11180_v44, %v11179_v51  ;;  %v17493_v10 = vld [vmem:[#allocation47_spill] sm:$0xff] }
 0x7a3   : > { %v11182_v24 = vpop.f32.mrf.mxu0  ;;  %v7394_v37 = vadd.f32 %v7318_v48, %v16238_v30  ;;  %v7339_v14 = vadd.f32 %v12057_v12, %v11175_v54  ;;  %7994 = vmatmul.mubr.bf16.gmra.mxu1 %v16440_v2  ;;  %12091 = vmatprep.mubr.bf16.mxu0 %v16445_v32  ;;  %v7651_v9 = vor.u32 %v7650_v43, %v7532_v63  ;;  %v7542_v54 = vshll.u32 %v16434_v1, 16  ;;  %v17494_v48 = vld [vmem:[#allocation34_spill] sm:$0xff] }
 0x7a4   : > { %v7435_v60 = vadd.f32 %v16215_v20, %v7396_v5  ;;  %8001 = vmatprep.mubr.bf16.mxu1 %v16305_v59  ;;  %v7330_v62 = vpop.f32.mrf.mxu1  ;;  %v7523_v30 = vor.u32 %v7521_v46, %v7520_v57  ;;  %11371 = vmatprep.subr.bf16.mxu0 %v12608_v61  ;;  %v7464_v4 = vmax.f32 %v7432_v25, 0.0  ;;  %v7539_v46 = vshrl.u32 %v16434_v1, 16  ;;  %v12611_v61 = vld [vmem:[%s17315_s9 + $0x10] sm:$0xff]  }
 0x7a5   : > { %v11183_v15 = vpop.f32.mrf.mxu0  ;;  %v7433_v51 = vadd.f32 %v16215_v20, %v7394_v37  ;;  %v7399_v26 = vadd.f32 %v7339_v14, %v17493_v10  ;;  %v7331_v36 = vadd.f32 %v16332_v19, %v7330_v62  ;;  %12124 = vmatpush3.bf16.msra.mxu1 %v12616_v55  ;;  %v16476_v33 = vsel %vm13148_vm2, %v7651_v9, 0  ;;  %v12618_v19 = vld [vmem:[%s17315_s9 + $0x88] sm:$0xff]  }
 0x7a6   : > { %v7467_v28 = vmax.f32 %v7435_v60, 0.0  ;;  %v12058_v13 = vpop.f32.mrf.mxu1  ;;  %v7652_v57 = vrot.slane %v7542_v54, 1  ;;  %11372 = vmatpush3.bf16.msra.mxu0 %v12609_v56  ;;  %12125 = vmatprep.subr.bf16.mxu1 %v12617_v53  ;;  %v16495_v56 = vsel %vm13231_vm6, 0, %v7523_v30  ;;  %v7549_v14 = vshll.u32 %v16421_v41, 16  ;;  %v12612_v60 = vld [vmem:[%s17315_s9 + $0x48] sm:$0xff]  }
 0x7a7   : > { %v7465_v55 = vmax.f32 %v7433_v51, 0.0  ;;  %v11185_v44 = vpop.f32.mrf.mxu0  ;;  %v7438_v25 = vadd.f32 %v16215_v20, %v7399_v26  ;;  %12092 = vmatmul.mubr.bf16.gmra.mxu0 %v16476_v33  ;;  %v7397_v3 = vadd.f32 %v7331_v36, %v17494_v48  ;;  %v7342_v5 = vadd.f32 %v12058_v13, %v16413_v50  ;;  %11373 = vmatprep.subr.bf16.mxu0 %v12610_v6  ;;  %v17495_v6 = vld [vmem:[#allocation35_spill] sm:$0xff] }
 0x7a8   : > { %v16491_v12 = vpack.c.bf16 %v7467_v28, %v7466_v31  ;;  %v7333_v43 = vpop.f32.mrf.mxu1  ;;  %v7653_v37 = vor.u32 %v7652_v57, %v7539_v46  ;;  %v7546_v30 = vshrl.u32 %v16421_v41, 16  ;;  %v12613_v28 = vld [vmem:[%s17315_s9 + $0x8] sm:$0xff]   ;;  %v11184_v13 = vadd.f32 %v11183_v15, %v11182_v24 }
 0x7a9   : > { %v16503_v9 = vpack.c.bf16 %v7465_v55, %v7464_v4  ;;  %v11186_v50 = vpop.f32.mrf.mxu0  ;;  %v16506_v31 = vadd.f32 %v16215_v20, %v7397_v3  ;;  %v7400_v62 = vadd.f32 %v7342_v5, %v17495_v6  ;;  %12126 = vmatpush3.bf16.msra.mxu1 %v12617_v53  ;;  %v7334_v10 = vadd.f32 %v16366_v7, %v7333_v43  ;;  %v12619_v53 = vld [vmem:[%s17315_s9 + $0x80] sm:$0xff]  }
 0x7aa   : > { %v11187_v51 = vadd.f32 %v11186_v50, %v11185_v44  ;;  %v12061_v26 = vpop.f32.mrf.mxu1  ;;  %v16513_v36 = vsel %vm13148_vm2, %v7653_v37, 0  ;;  %v7654_v4 = vrot.slane %v7549_v14, 1  ;;  %11374 = vmatpush3.bf16.msra.mxu0 %v12611_v61  ;;  %12127 = vmatprep.subr.bf16.mxu1 %v12618_v19  ;;  %v7470_v7 = vmax.f32 %v7438_v25, 0.0  ;;  %v12614_v44 = vld [vmem:[%s17315_s9 + $0x40] sm:$0xff]  }
 0x7ab   : > { %v11188_v57 = vpop.f32.mrf.mxu0  ;;  %v7439_v55 = vadd.f32 %v16215_v20, %v7400_v62  ;;  %8002 = vmatmul.mubr.bf16.gmra.mxu1 %v16495_v56  ;;  %12095 = vmatprep.mubr.bf16.mxu0 %v16513_v36  ;;  %v7527_v61 = vrot.slane %v7525_v11, 7  ;;  %v7398_v48 = vadd.f32 %v7334_v10, %v16247_v27  ;;  %v7556_v25 = vshll.u32 %v16503_v9, 16  ;;  %v17496_v62 = vld [vmem:[#allocation24_spill] sm:$0xff] }
 0x7ac   : > { %v7355_v3 = vadd.f32 %v12061_v26, %v11187_v51  ;;  %8009 = vmatprep.mubr.bf16.mxu1 %v16377_v49  ;;  %v7655_v24 = vor.u32 %v7654_v4, %v7546_v30  ;;  %v7346_v15 = vpop.f32.mrf.mxu1  ;;  %11375 = vmatprep.subr.bf16.mxu0 %v12612_v60  ;;  %v7468_v5 = vmax.f32 %v16506_v31, 0.0  ;;  %v12615_v31 = vld [vmem:[%s17315_s9] sm:$0xff]   ;;  %v17497_v26 = vld [vmem:[#allocation25_spill] sm:$0xff] }
 0x7ad   : > { %v7471_v43 = vmax.f32 %v7439_v55, 0.0  ;;  %v11189_v11 = vpop.f32.mrf.mxu0  ;;  %v7347_v37 = vadd.f32 %v16456_v47, %v7346_v15  ;;  %v7530_v50 = vor.u32 %v7528_v0, %v7527_v61  ;;  %12128 = vmatpush3.bf16.msra.mxu1 %v12618_v19  ;;  %v7437_v6 = vadd.f32 %v16215_v20, %v7398_v48  ;;  %v12620_v0 = vld [vmem:[%s17315_s9 + $0x1f8] sm:$0xff]  }
 0x7ae   : > { %v11190_v27 = vadd.f32 %v11189_v11, %v11188_v57  ;;  %v7403_v51 = vadd.f32 %v7355_v3, %v17496_v62  ;;  %v16544_v10 = vsel %vm13148_vm2, %v7655_v24, 0  ;;  %v12062_v60 = vpop.f32.mrf.mxu1  ;;  %11376 = vmatpush3.bf16.msra.mxu0 %v12613_v28  ;;  %12129 = vmatprep.subr.bf16.mxu1 %v12619_v53  ;;  %v7553_v57 = vshrl.u32 %v16503_v9, 16  ;;  %v16562_v55 = vld [vmem:[%s17315_s9 + $0x238] sm:$0xff]  }
 0x7af   : > { %v16552_v47 = vpack.c.bf16 %v7471_v43, %v7470_v7  ;;  %v11191_v19 = vpop.f32.mrf.mxu0  ;;  %12096 = vmatmul.mubr.bf16.gmra.mxu0 %v16544_v10  ;;  %v7401_v4 = vadd.f32 %v7347_v37, %v17497_v26  ;;  %v7656_v28 = vrot.slane %v7556_v25, 1  ;;  %11377 = vmatprep.subr.bf16.mxu0 %v12614_v44  ;;  %v7469_v61 = vmax.f32 %v7437_v6, 0.0  ;;  %v17498_v6 = vld [vmem:[#allocation27_spill] sm:$0xff] }
 0x7b0   : > { %v7442_v7 = vadd.f32 %v16215_v20, %v7403_v51  ;;  %v7358_v48 = vadd.f32 %v12062_v60, %v11190_v27  ;;  %v7349_v3 = vpop.f32.mrf.mxu1  ;;  %v17358_v24 = vshll.u32 %v16491_v12, 16  ;;  %v7534_v44 = vrot.slane %v7532_v63, 7 }
 0x7b1   : > { %v11192_v15 = vpop.f32.mrf.mxu0  ;;  %v7440_v43 = vadd.f32 %v16215_v20, %v7401_v4  ;;  %v7350_v11 = vadd.f32 %v11184_v13, %v7349_v3  ;;  %v7657_v37 = vor.u32 %v7656_v28, %v7553_v57  ;;  %12130 = vmatpush3.bf16.msra.mxu1 %v12619_v53  ;;  %v16571_v62 = vpack.c.bf16 %v7469_v61, %v7468_v5 }
 0x7b2   : > { %v7404_v26 = vadd.f32 %v7358_v48, %v17498_v6  ;;  %v12065_v51 = vpop.f32.mrf.mxu1  ;;  %v16576_v27 = vsel %vm13231_vm6, 0, %v7530_v50  ;;  %v17360_v60 = vshrl.u32 %v16491_v12, 16  ;;  %11378 = vmatpush3.bf16.msra.mxu0 %v12615_v31  ;;  %11499 = vmatprep.subr.bf16.mxu1 %v12620_v0  ;;  %v11193_v13 = vadd.f32 %v11192_v15, %v11191_v19 }
 0x7b3   : > { %v11194_v4 = vpop.f32.mrf.mxu0  ;;  %v7402_v28 = vadd.f32 %v7350_v11, %v16260_v8  ;;  %8010 = vmatmul.mubr.bf16.gmra.mxu1 %v16576_v27  ;;  %v16583_v63 = vsel %vm13148_vm2, %v7657_v37, 0  ;;  %v7658_v53 = vrot.slane %v17358_v24, 1  ;;  %12163 = vmatprep.subr.bf16.mxu0 %v16562_v55  ;;  %v7474_v5 = vmax.f32 %v7442_v7, 0.0 }
 0x7b4   : > { %v7472_v50 = vmax.f32 %v7440_v43, 0.0  ;;  %v7443_v31 = vadd.f32 %v16215_v20, %v7404_v26  ;;  %12099 = vmatprep.mubr.bf16.mxu0 %v16583_v63  ;;  %8017 = vmatprep.mubr.bf16.mxu1 %v16359_v35  ;;  %v7362_v8 = vpop.f32.mrf.mxu1  ;;  %v17359_v0 = vshll.u32 %v16571_v62, 16  ;;  %v7537_v7 = vor.u32 %v7535_v42, %v7534_v44  ;;  %v17499_v42 = vld [vmem:[#allocation48_spill] sm:$0xff]  ;;  %v17500_v44 = vld [vmem:[#allocation43_spill] sm:$0xff] }
 0x7b5   : > { %v11195_v19 = vpop.f32.mrf.mxu0  ;;  %v7441_v61 = vadd.f32 %v16215_v20, %v7402_v28  ;;  %v7659_v48 = vor.u32 %v7658_v53, %v17360_v60  ;;  %v7363_v3 = vadd.f32 %v11193_v13, %v7362_v8  ;;  %v7567_v37 = vshrl.u32 %v16571_v62, 16 }
 0x7b6   : > { %v7475_v15 = vmax.f32 %v7443_v31, 0.0  ;;  %v11196_v43 = vadd.f32 %v11195_v19, %v11194_v4  ;;  %v12066_v11 = vpop.f32.mrf.mxu1  ;;  %v7660_v6 = vrot.slane %v17359_v0, 1  ;;  %v17361_v13 = vshll.u32 %v16552_v47, 16 }
 0x7b7   : > { %v7473_v26 = vmax.f32 %v7441_v61, 0.0  ;;  %v11197_v24 = vpop.f32.mrf.mxu0  ;;  %v16602_v28 = vsel %vm13148_vm2, %v7659_v48, 0  ;;  %v7405_v53 = vadd.f32 %v7363_v3, %v16190_v18  ;;  %v6851_v4 = vadd.f32 %v17500_v44, %v17499_v42 }
 0x7b8   : > { %v16606_v8 = vpack.c.bf16 %v7475_v15, %v7474_v5  ;;  %12100 = vmatmul.mubr.bf16.gmra.mxu0 %v16602_v28  ;;  %v7365_v31 = vpop.f32.mrf.mxu1  ;;  %v7661_v19 = vor.u32 %v7660_v6, %v7567_v37  ;;  %v7574_v61 = vshrl.u32 %v16552_v47, 16  ;;  %v7662_v18 = vrot.slane %v17361_v13, 1 }
 0x7b9   : > { %v16614_v0 = vpack.c.bf16 %v7473_v26, %v7472_v50  ;;  %v11198_v48 = vpop.f32.mrf.mxu0  ;;  %v7366_v60 = vadd.f32 %v11196_v43, %v7365_v31  ;;  %v7541_v5 = vrot.slane %v7539_v46, 7  ;;  %v16622_v15 = vsel %vm13231_vm6, 0, %v7537_v7 }
 0x7ba   : > { %v11199_v3 = vadd.f32 %v11198_v48, %v11197_v24  ;;  %v16626_v6 = vsel %vm13148_vm2, %v7661_v19, 0  ;;  %v7444_v50 = vadd.f32 %v16215_v20, %v7405_v53  ;;  %v7663_v46 = vor.u32 %v7662_v18, %v7574_v61 }
 0x7bb   : > { %v11200_v26 = vpop.f32.mrf.mxu0  ;;  %v7406_v42 = vadd.f32 %v7366_v60, %v6851_v4  ;;  %8018 = vmatmul.mubr.bf16.gmra.mxu1 %v16622_v15  ;;  %12103 = vmatprep.mubr.bf16.mxu0 %v16626_v6  ;;  %v7584_v7 = vshll.u32 %v16614_v0, 16  ;;  %v7591_v43 = vshll.u32 %v16606_v8, 16  ;;  %v7544_v60 = vor.u32 %v7542_v54, %v7541_v5 }
 0x7bc   : > { %v7371_v24 = vadd.f32 %v12065_v51, %v11199_v3  ;;  %8025 = vmatprep.mubr.bf16.mxu1 %v16434_v1  ;;  %v7581_v19 = vshrl.u32 %v16614_v0, 16  ;;  %v7476_v48 = vmax.f32 %v7444_v50, 0.0  ;;  %v16645_v3 = vsel %vm13148_vm2, %v7663_v46, 0 }
 0x7bd   : > { %v11201_v44 = vpop.f32.mrf.mxu0  ;;  %v7445_v31 = vadd.f32 %v16215_v20, %v7406_v42  ;;  %v7664_v51 = vrot.slane %v7584_v7, 1  ;;  %v7666_v42 = vrot.slane %v7591_v43, 1  ;;  %v7588_v5 = vshrl.u32 %v16606_v8, 16 }
 0x7be   : > { %v7407_v53 = vadd.f32 %v7371_v24, %v16204_v23  ;;  %v11202_v4 = vadd.f32 %v11201_v44, %v11200_v26  ;;  %v7548_v50 = vrot.slane %v7546_v30, 7  ;;  %v16661_v24 = vsel %vm13231_vm6, 0, %v7544_v60 }
 0x7bf   : > { %v7477_v18 = vmax.f32 %v7445_v31, 0.0  ;;  %v7665_v23 = vor.u32 %v7664_v51, %v7581_v19  ;;  %v7667_v44 = vor.u32 %v7666_v42, %v7588_v5 }
 0x7c0   : > { %v7374_v13 = vadd.f32 %v12066_v11, %v11202_v4  ;;  %12104 = vmatmul.mubr.bf16.gmra.mxu0 %v16645_v3  ;;  %v7446_v26 = vadd.f32 %v16215_v20, %v7407_v53  ;;  %v7551_v4 = vor.u32 %v7549_v14, %v7548_v50 }
 0x7c1   : > { %v16652_v54 = vpack.c.bf16 %v7477_v18, %v7476_v48  ;;  %v16665_v11 = vsel %vm13148_vm2, %v7665_v23, 0  ;;  %v16681_v51 = vsel %vm13148_vm2, %v7667_v44, 0  ;;  %v7555_v23 = vrot.slane %v7553_v57, 7 }
 0x7c2   : > { %v7408_v46 = vadd.f32 %v7374_v13, %v16212_v21  ;;  %12107 = vmatprep.mubr.bf16.mxu0 %v16665_v11  ;;  %v7478_v60 = vmax.f32 %v7446_v26, 0.0  ;;  %v16694_v42 = vsel %vm13231_vm6, 0, %v7551_v4  ;;  %v12627_v4 = vld [vmem:[%s17315_s9 + $0x230] sm:$0xff]  }
 0x7c3   : > { %8026 = vmatmul.mubr.bf16.gmra.mxu1 %v16661_v24  ;;  %v7598_v30 = vshll.u32 %v16652_v54, 16  ;;  %v7595_v21 = vshrl.u32 %v16652_v54, 16  ;;  %v7558_v44 = vor.u32 %v7556_v25, %v7555_v23  ;;  %v17503_v25 = vshll.u32 %v16491_v12, 16 }
 0x7c4   : > { %v7447_v31 = vadd.f32 %v16215_v20, %v7408_v46  ;;  %8033 = vmatprep.mubr.bf16.mxu1 %v16421_v41 }
 0x7c5   : > { %v7668_v13 = vrot.slane %v7598_v30, 1  ;;  %v16716_v57 = vsel %vm13231_vm6, 0, %v7558_v44 }
 0x7c6   : > { %v7479_v53 = vmax.f32 %v7447_v31, 0.0 }
 0x7c7   : > { %v7669_v48 = vor.u32 %v7668_v13, %v7595_v21  ;;  %v17501_v13 = vmov 0  }
 0x7c8   : > { %v16685_v20 = vpack.c.bf16 %v7479_v53, %v7478_v60  ;;  %12108 = vmatmul.mubr.bf16.gmra.mxu0 %v16681_v51  ;;  %v17502_v60 = vshrl.u32 %v16491_v12, 16 }
 0x7c9   : > { %v16690_v18 = vsel %vm13148_vm2, %v7669_v48, 0  ;;  %v17504_v48 = vld [vmem:[#allocation23_spill] sm:$0xff] }
 0x7ca   : > { %12111 = vmatprep.mubr.bf16.mxu0 %v16690_v18  ;;  %v7605_v14 = vshll.u32 %v16685_v20, 16  ;;  %v7602_v50 = vshrl.u32 %v16685_v20, 16  ;;  %v7562_v53 = vrot.slane %v17502_v60, 7  ;;  %v7576_v60 = vrot.slane %v7574_v61, 7 }
 0x7cb   : > { %8034 = vmatmul.mubr.bf16.gmra.mxu1 %v16694_v42 }
 0x7cc   : > { %8041 = vmatprep.mubr.bf16.mxu1 %v16503_v9  ;;  %v7670_v26 = vrot.slane %v7605_v14, 1  ;;  %v7565_v17 = vor.u32 %v17503_v25, %v7562_v53  ;;  %v12638_v53 = vld [vmem:[%s17315_s9 + $0x218] sm:$0xff]  }
 0x7ce   : > { %v7671_v46 = vor.u32 %v7670_v26, %v7602_v50  ;;  %v16732_v23 = vsel %vm13231_vm6, 0, %v7565_v17  ;;  %v7569_v26 = vrot.slane %v7567_v37, 7  ;;  %v12635_v37 = vld [vmem:[%s17315_s9 + $0x220] sm:$0xff]   ;;  %v12639_v17 = vld [vmem:[%s17315_s9 + $0x210] sm:$0xff]  }
 0x7d0   : > { %v16711_v31 = vsel %vm13148_vm2, %v7671_v46, 0  ;;  %v12632_v46 = vld [vmem:[%s17315_s9 + $0x228] sm:$0xff]  }
 0x7d1   : > { %12112 = vmatmul.mubr.bf16.gmra.mxu0 %v16711_v31 }
 0x7d2   : > { %8443 = vmatprep.mubr.bf16.mxu0 %v17501_v13 }
 0x7d3   : > { %8042 = vmatmul.mubr.bf16.gmra.mxu1 %v16716_v57 }
 0x7d4   : > { %8049 = vmatprep.mubr.bf16.mxu1 %v16491_v12 }
 0x7d9   : > { %8444 = vmatmul.mubr.bf16.vlgmr.msra.gmra.mxu0 %v17504_v48 }
 0x7da   : > { %8451 = vmatprep.mubr.bf16.mxu0 %v16287_v45  ;;  %12164 = vmatpush3.bf16.msra.mxu0 %v16562_v55  ;;  %v17505_v45 = vshll.u32 %v16571_v62, 16 }
 0x7db   : > { %8050 = vmatmul.mubr.bf16.gmra.mxu1 %v16732_v23  ;;  %12165 = vmatprep.subr.bf16.mxu0 %v12627_v4 }
 0x7dc   : > { %8057 = vmatprep.mubr.bf16.mxu1 %v16571_v62  ;;  %v7572_v44 = vor.u32 %v17505_v45, %v7569_v26  ;;  %v12642_v26 = vld [vmem:[%s17315_s9 + $0x208] sm:$0xff]   ;;  %v12643_v45 = vld [vmem:[%s17315_s9 + $0x200] sm:$0xff]  }
 0x7de   : > { %12166 = vmatpush3.bf16.msra.mxu0 %v12627_v4  ;;  %v16751_v55 = vsel %vm13231_vm6, 0, %v7572_v44  ;;  %v7583_v4 = vrot.slane %v7581_v19, 7  ;;  %v7590_v44 = vrot.slane %v7588_v5, 7  ;;  %v7597_v5 = vrot.slane %v7595_v21, 7 }
 0x7df   : > { %12167 = vmatprep.subr.bf16.mxu0 %v12632_v46 }
 0x7e1   : > { %8452 = vmatmul.mubr.bf16.gmra.mxu0 %v16319_v34  ;;  %v17506_v34 = vshll.u32 %v16552_v47, 16 }
 0x7e2   : > { %8459 = vmatprep.mubr.bf16.mxu0 %v16272_v22  ;;  %12168 = vmatpush3.bf16.msra.mxu0 %v12632_v46  ;;  %v7586_v46 = vor.u32 %v7584_v7, %v7583_v4  ;;  %v7593_v7 = vor.u32 %v7591_v43, %v7590_v44  ;;  %v12629_v4 = vld [vmem:[%s17315_s9 + $0x1a0] sm:$0xff]   ;;  %v12634_v44 = vld [vmem:[%s17315_s9 + $0x190] sm:$0xff]  }
 0x7e3   : > { %8058 = vmatmul.mubr.bf16.gmra.mxu1 %v16751_v55  ;;  %12169 = vmatprep.subr.bf16.mxu0 %v12635_v37  ;;  %v7579_v25 = vor.u32 %v17506_v34, %v7576_v60  ;;  %v7600_v60 = vor.u32 %v7598_v30, %v7597_v5  ;;  %v17507_v34 = vld [vmem:[#allocation21_spill] sm:$0xff]  ;;  %v12637_v5 = vld [vmem:[%s17315_s9 + $0x188] sm:$0xff]  }
 0x7e4   : > { %8065 = vmatprep.mubr.bf16.mxu1 %v16552_v47  ;;  %v16787_v19 = vsel %vm13231_vm6, 0, %v7586_v46  ;;  %v12631_v46 = vld [vmem:[%s17315_s9 + $0x198] sm:$0xff]  }
 0x7e5   : > { %v16769_v61 = vsel %vm13231_vm6, 0, %v7579_v25  ;;  %v16811_v43 = vsel %vm13231_vm6, 0, %v7600_v60  ;;  %v12625_v25 = vld [vmem:[%s17315_s9 + $0x1e8] sm:$0xff]   ;;  %v12640_v60 = vld [vmem:[%s17315_s9 + $0x1c0] sm:$0xff]  }
 0x7e6   : > { %12170 = vmatpush3.bf16.msra.mxu0 %v12635_v37  ;;  %v16799_v37 = vsel %vm13231_vm6, 0, %v7593_v7  ;;  %v12636_v7 = vld [vmem:[%s17315_s9 + $0x1c8] sm:$0xff]  }
 0x7e7   : > { %12171 = vmatprep.subr.bf16.mxu0 %v12638_v53 }
 0x7e9   : > { %8460 = vmatmul.mubr.bf16.gmra.mxu0 %v16372_v58 }
 0x7ea   : > { %8467 = vmatprep.mubr.bf16.mxu0 %v16309_v40  ;;  %12172 = vmatpush3.bf16.msra.mxu0 %v12638_v53  ;;  %v7604_v53 = vrot.slane %v7602_v50, 7  ;;  %v12621_v50 = vld [vmem:[%s17315_s9 + $0x1b8] sm:$0xff]  }
 0x7eb   : > { %8066 = vmatmul.mubr.bf16.gmra.mxu1 %v16769_v61  ;;  %12173 = vmatprep.subr.bf16.mxu0 %v12639_v17 }
 0x7ec   : > { %8073 = vmatprep.mubr.bf16.mxu1 %v16614_v0  ;;  %v7607_v21 = vor.u32 %v7605_v14, %v7604_v53  ;;  %v12623_v14 = vld [vmem:[%s17315_s9 + $0x1f0] sm:$0xff]   ;;  %v12641_v53 = vld [vmem:[%s17315_s9 + $0x180] sm:$0xff]  }
 0x7ee   : > { %12174 = vmatpush3.bf16.msra.mxu0 %v12639_v17  ;;  %v16823_v30 = vsel %vm13231_vm6, 0, %v7607_v21  ;;  %v12626_v17 = vld [vmem:[%s17315_s9 + $0x1a8] sm:$0xff]  }
 0x7ef   : > { %12175 = vmatprep.subr.bf16.mxu0 %v12642_v26 }
 0x7f1   : > { %8468 = vmatmul.mubr.bf16.gmra.mxu0 %v16440_v2 }
 0x7f2   : > { %8475 = vmatprep.mubr.bf16.mxu0 %v16305_v59  ;;  %12176 = vmatpush3.bf16.msra.mxu0 %v12642_v26  ;;  %v12630_v26 = vld [vmem:[%s17315_s9 + $0x1d8] sm:$0xff]  }
 0x7f3   : > { %8074 = vmatmul.mubr.bf16.gmra.mxu1 %v16787_v19  ;;  %12177 = vmatprep.subr.bf16.mxu0 %v12643_v45 }
 0x7f4   : > { %8081 = vmatprep.mubr.bf16.mxu1 %v16606_v8 }
 0x7f6   : > { %12178 = vmatpush3.bf16.msra.mxu0 %v12643_v45  ;;  %v12633_v45 = vld [vmem:[%s17315_s9 + $0x1d0] sm:$0xff]  }
 0x7f9   : > { %8476 = vmatmul.mubr.bf16.gmra.mxu0 %v16495_v56 }
 0x7fa   : > { %8483 = vmatprep.mubr.bf16.mxu0 %v16377_v49 }
 0x7fb   : > { %8082 = vmatmul.mubr.bf16.gmra.mxu1 %v16799_v37 }
 0x7fc   : > { %8089 = vmatprep.mubr.bf16.mxu1 %v16652_v54 }
 0x801   : > { %8484 = vmatmul.mubr.bf16.gmra.mxu0 %v16576_v27 }
 0x802   : > { %8491 = vmatprep.mubr.bf16.mxu0 %v16359_v35 }
 0x803   : > { %8090 = vmatmul.mubr.bf16.gmra.mxu1 %v16811_v43 }
 0x804   : > { %8097 = vmatprep.mubr.bf16.mxu1 %v16685_v20 }
 0x809   : > { %8492 = vmatmul.mubr.bf16.gmra.mxu0 %v16622_v15 }
 0x80a   : > { %8499 = vmatprep.mubr.bf16.mxu0 %v16434_v1 }
 0x80b   : > { %8098 = vmatmul.mubr.bf16.gmra.mxu1 %v16823_v30 }
 0x80c   : > { %12131 = vmatprep.mubr.bf16.mxu1 %v17507_v34 }
 0x811   : > { %8500 = vmatmul.mubr.bf16.gmra.mxu0 %v16661_v24 }
 0x812   : > { %8507 = vmatprep.mubr.bf16.mxu0 %v16421_v41 }
 0x813   : > { %12132 = vmatmul.mubr.bf16.vlgmr.msra.gmra.mxu1 %v16323_v29  ;;  %v12628_v29 = vld [vmem:[%s17315_s9 + $0x1e0] sm:$0xff]  }
 0x814   : > { %11500 = vmatpush3.bf16.msra.mxu1 %v12621_v50  ;;  %12135 = vmatprep.mubr.bf16.mxu1 %v16327_v52 }
 0x815   : > { %11501 = vmatprep.subr.bf16.mxu1 %v12623_v14 }
 0x818   : > { %11502 = vmatpush3.bf16.msra.mxu1 %v12624_v39 }
 0x819   : > { %8508 = vmatmul.mubr.bf16.gmra.mxu0 %v16694_v42  ;;  %11503 = vmatprep.subr.bf16.mxu1 %v12625_v25 }
 0x81a   : > { %8515 = vmatprep.mubr.bf16.mxu0 %v16503_v9 }
 0x81b   : > { %12136 = vmatmul.mubr.bf16.gmra.mxu1 %v16382_v38 }
 0x81c   : > { %12139 = vmatprep.mubr.bf16.mxu1 %v16403_v16  ;;  %11504 = vmatpush3.bf16.msra.mxu1 %v12626_v17 }
 0x81d   : > { %11505 = vmatprep.subr.bf16.mxu1 %v12628_v29 }
 0x820   : > { %11506 = vmatpush3.bf16.msra.mxu1 %v12629_v4 }
 0x821   : > { %8516 = vmatmul.mubr.bf16.gmra.mxu0 %v16716_v57  ;;  %11507 = vmatprep.subr.bf16.mxu1 %v12630_v26 }
 0x822   : > { %8523 = vmatprep.mubr.bf16.mxu0 %v16491_v12 }
 0x823   : > { %12140 = vmatmul.mubr.bf16.gmra.mxu1 %v16445_v32 }
 0x824   : > { %12143 = vmatprep.mubr.bf16.mxu1 %v16476_v33  ;;  %11508 = vmatpush3.bf16.msra.mxu1 %v12631_v46 }
 0x825   : > { %11509 = vmatprep.subr.bf16.mxu1 %v12633_v45 }
 0x828   : > { %11510 = vmatpush3.bf16.msra.mxu1 %v12634_v44 }
 0x829   : > { %8524 = vmatmul.mubr.bf16.gmra.mxu0 %v16732_v23  ;;  %11511 = vmatprep.subr.bf16.mxu1 %v12636_v7 }
 0x82a   : > { %8531 = vmatprep.mubr.bf16.mxu0 %v16571_v62 }
 0x82b   : > { %12144 = vmatmul.mubr.bf16.gmra.mxu1 %v16513_v36 }
 0x82c   : > { %12147 = vmatprep.mubr.bf16.mxu1 %v16544_v10  ;;  %11512 = vmatpush3.bf16.msra.mxu1 %v12637_v5 }
 0x82d   : > { %11513 = vmatprep.subr.bf16.mxu1 %v12640_v60 }
 0x830   : > { %11514 = vmatpush3.bf16.msra.mxu1 %v12641_v53 }
 0x831   : > { %8532 = vmatmul.mubr.bf16.gmra.mxu0 %v16751_v55 }
 0x832   : > { %8539 = vmatprep.mubr.bf16.mxu0 %v16552_v47 }
 0x833   : > { %12148 = vmatmul.mubr.bf16.gmra.mxu1 %v16583_v63 }
 0x834   : > { %12151 = vmatprep.mubr.bf16.mxu1 %v16602_v28 }
 0x839   : > { %8540 = vmatmul.mubr.bf16.gmra.mxu0 %v16769_v61 }
 0x83a   : > { %8547 = vmatprep.mubr.bf16.mxu0 %v16614_v0 }
 0x83b   : > { %12152 = vmatmul.mubr.bf16.gmra.mxu1 %v16626_v6 }
 0x83c   : > { %12155 = vmatprep.mubr.bf16.mxu1 %v16645_v3 }
 0x841   : > { %8548 = vmatmul.mubr.bf16.gmra.mxu0 %v16787_v19 }
 0x842   : > { %8555 = vmatprep.mubr.bf16.mxu0 %v16606_v8 }
 0x843   : > { %12156 = vmatmul.mubr.bf16.gmra.mxu1 %v16665_v11 }
 0x844   : > { %12159 = vmatprep.mubr.bf16.mxu1 %v16681_v51 }
 0x849   : > { %8556 = vmatmul.mubr.bf16.gmra.mxu0 %v16799_v37 }
 0x84a   : > { %8563 = vmatprep.mubr.bf16.mxu0 %v16652_v54 }
 0x84b   : > { %12160 = vmatmul.mubr.bf16.gmra.mxu1 %v16690_v18 }
 0x84c   : > { %8958 = vmatprep.mubr.bf16.mxu1 %v16272_v22 }
 0x851   : > { %8564 = vmatmul.mubr.bf16.gmra.mxu0 %v16811_v43 }
 0x852   : > { %12179 = vmatprep.mubr.bf16.mxu0 %v16327_v52 }
 0x853   : > { %v11243_v21 = vpop.f32.mrf.mxu1  ;;  %8959 = vmatmul.mubr.bf16.vlgmr.msra.gmra.mxu1 %v16372_v58 }
 0x854   : > { %8966 = vmatprep.mubr.bf16.mxu1 %v16309_v40 }
 0x855   : > { %v12085_v50 = vpop.f32.mrf.mxu0  ;;  %v11244_v14 = vpop.f32.mrf.mxu1 }
 0x856   : > { %v11245_v39 = vadd.f32 %v11244_v14, %v11243_v21 }
 0x857   : > { %v8140_v25 = vpop.f32.mrf.mxu0  ;;  %v11246_v17 = vpop.f32.mrf.mxu1 }
 0x858   : > { %v16908_v29 = vadd.f32 %v11245_v39, %v8140_v25 }
 0x859   : > { %12180 = vmatmul.mubr.bf16.vlgmr.msra.gmra.mxu0 %v16382_v38  ;;  %v12086_v4 = vpop.f32.mrf.mxu0  ;;  %v11247_v22 = vpop.f32.mrf.mxu1 }
 0x85a   : > { %12183 = vmatprep.mubr.bf16.mxu0 %v16403_v16  ;;  %v11248_v26 = vadd.f32 %v11247_v22, %v11246_v17 }
 0x85b   : > { %v8143_v52 = vpop.f32.mrf.mxu0  ;;  %v11249_v46 = vpop.f32.mrf.mxu1  ;;  %8967 = vmatmul.mubr.bf16.gmra.mxu1 %v16440_v2 }
 0x85c   : > { %v16913_v58 = vadd.f32 %v11248_v26, %v8143_v52  ;;  %8974 = vmatprep.mubr.bf16.mxu1 %v16305_v59 }
 0x85d   : > { %v12089_v40 = vpop.f32.mrf.mxu0  ;;  %v11250_v45 = vpop.f32.mrf.mxu1 }
 0x85e   : > { %v11251_v44 = vadd.f32 %v11250_v45, %v11249_v46 }
 0x85f   : > { %v8156_v7 = vpop.f32.mrf.mxu0  ;;  %v11252_v5 = vpop.f32.mrf.mxu1 }
 0x860   : > { %v16916_v60 = vadd.f32 %v12085_v50, %v11251_v44 }
 0x861   : > { %12184 = vmatmul.mubr.bf16.gmra.mxu0 %v16445_v32  ;;  %v12090_v38 = vpop.f32.mrf.mxu0  ;;  %v11253_v16 = vpop.f32.mrf.mxu1 }
 0x862   : > { %12187 = vmatprep.mubr.bf16.mxu0 %v16476_v33  ;;  %v11254_v53 = vadd.f32 %v11253_v16, %v11252_v5 }
 0x863   : > { %v8159_v21 = vpop.f32.mrf.mxu0  ;;  %v11255_v2 = vpop.f32.mrf.mxu1  ;;  %8975 = vmatmul.mubr.bf16.gmra.mxu1 %v16495_v56 }
 0x864   : > { %v16921_v14 = vadd.f32 %v12086_v4, %v11254_v53  ;;  %8982 = vmatprep.mubr.bf16.mxu1 %v16377_v49 }
 0x865   : > { %v11256_v59 = vpop.f32.mrf.mxu1 }
 0x866   : > { %v11257_v39 = vadd.f32 %v11256_v59, %v11255_v2 }
 0x867   : > { %v12093_v25 = vpop.f32.mrf.mxu0  ;;  %v11258_v50 = vpop.f32.mrf.mxu1 }
 0x868   : > { %v16924_v17 = vadd.f32 %v11257_v39, %v8156_v7 }
 0x869   : > { %12188 = vmatmul.mubr.bf16.gmra.mxu0 %v16513_v36  ;;  %v8172_v32 = vpop.f32.mrf.mxu0  ;;  %v11259_v22 = vpop.f32.mrf.mxu1 }
 0x86a   : > { %12191 = vmatprep.mubr.bf16.mxu0 %v16544_v10  ;;  %v11260_v33 = vadd.f32 %v11259_v22, %v11258_v50 }
 0x86b   : > { %v12094_v26 = vpop.f32.mrf.mxu0  ;;  %v11261_v52 = vpop.f32.mrf.mxu1  ;;  %8983 = vmatmul.mubr.bf16.gmra.mxu1 %v16576_v27 }
 0x86c   : > { %v16929_v56 = vadd.f32 %v11260_v33, %v8159_v21  ;;  %8990 = vmatprep.mubr.bf16.mxu1 %v16359_v35 }
 0x86d   : > { %v8175_v49 = vpop.f32.mrf.mxu0  ;;  %v11262_v4 = vpop.f32.mrf.mxu1 }
 0x86e   : > { %v11263_v46 = vadd.f32 %v11262_v4, %v11261_v52 }
 0x86f   : > { %v16932_v45 = vpop.f32.mrf.mxu0  ;;  %v11264_v44 = vpop.f32.mrf.mxu1 }
 0x870   : > { %v16934_v36 = vadd.f32 %v12089_v40, %v11263_v46 }
 0x871   : > { %12192 = vmatmul.mubr.bf16.gmra.mxu0 %v16583_v63  ;;  %v8188_v10 = vpop.f32.mrf.mxu0  ;;  %v11265_v7 = vpop.f32.mrf.mxu1 }
 0x872   : > { %12195 = vmatprep.mubr.bf16.mxu0 %v16602_v28  ;;  %v11266_v5 = vadd.f32 %v11265_v7, %v11264_v44 }
 0x873   : > { %v16938_v27 = vpop.f32.mrf.mxu0  ;;  %v11267_v16 = vpop.f32.mrf.mxu1  ;;  %8991 = vmatmul.mubr.bf16.gmra.mxu1 %v16622_v15 }
 0x874   : > { %v16941_v35 = vadd.f32 %v12090_v38, %v11266_v5  ;;  %8998 = vmatprep.mubr.bf16.mxu1 %v16434_v1 }
 0x875   : > { %v8191_v53 = vpop.f32.mrf.mxu0  ;;  %v11268_v21 = vpop.f32.mrf.mxu1 }
 0x876   : > { %v11269_v40 = vadd.f32 %v11268_v21, %v11267_v16 }
 0x877   : > { %v11270_v2 = vpop.f32.mrf.mxu1 }
 0x878   : > { %v16944_v59 = vpop.f32.mrf.mxu0  ;;  %v16946_v63 = vadd.f32 %v11269_v40, %v8172_v32 }
 0x879   : > { %12196 = vmatmul.mubr.bf16.gmra.mxu0 %v16626_v6  ;;  %v11271_v28 = vpop.f32.mrf.mxu1 }
 0x87a   : > { %v8204_v39 = vpop.f32.mrf.mxu0  ;;  %12199 = vmatprep.mubr.bf16.mxu0 %v16645_v3  ;;  %v11272_v50 = vadd.f32 %v11271_v28, %v11270_v2 }
 0x87b   : > { %v11273_v15 = vpop.f32.mrf.mxu1  ;;  %8999 = vmatmul.mubr.bf16.gmra.mxu1 %v16661_v24 }
 0x87c   : > { %v16951_v38 = vpop.f32.mrf.mxu0  ;;  %v16953_v1 = vadd.f32 %v11272_v50, %v8175_v49  ;;  %9006 = vmatprep.mubr.bf16.mxu1 %v16421_v41 }
 0x87d   : > { %v11274_v22 = vpop.f32.mrf.mxu1 }
 0x87e   : > { %v8207_v33 = vpop.f32.mrf.mxu0  ;;  %v11275_v32 = vadd.f32 %v11274_v22, %v11273_v15 }
 0x87f   : > { %v11276_v52 = vpop.f32.mrf.mxu1 }
 0x880   : > { %v16956_v4 = vpop.f32.mrf.mxu0  ;;  %v16958_v6 = vadd.f32 %v12093_v25, %v11275_v32 }
 0x881   : > { %12200 = vmatmul.mubr.bf16.gmra.mxu0 %v16665_v11  ;;  %v11277_v3 = vpop.f32.mrf.mxu1 }
 0x882   : > { %v16961_v46 = vpop.f32.mrf.mxu0  ;;  %12203 = vmatprep.mubr.bf16.mxu0 %v16681_v51  ;;  %v11278_v24 = vadd.f32 %v11277_v3, %v11276_v52 }
 0x883   : > { %v11279_v49 = vpop.f32.mrf.mxu1  ;;  %9007 = vmatmul.mubr.bf16.gmra.mxu1 %v16694_v42 }
 0x884   : > { %v16965_v41 = vpop.f32.mrf.mxu0  ;;  %v16967_v44 = vadd.f32 %v12094_v26, %v11278_v24  ;;  %9014 = vmatprep.mubr.bf16.mxu1 %v16503_v9 }
 0x885   : > { %v11280_v7 = vpop.f32.mrf.mxu1 }
 0x886   : > { %v16970_v25 = vpop.f32.mrf.mxu0  ;;  %v11281_v5 = vadd.f32 %v11280_v7, %v11279_v49 }
 0x887   : > { %v11282_v11 = vpop.f32.mrf.mxu1 }
 0x888   : > { %v16972_v16 = vpop.f32.mrf.mxu0  ;;  %v16974_v21 = vadd.f32 %v11281_v5, %v8188_v10 }
 0x889   : > { %12204 = vmatmul.mubr.bf16.gmra.mxu0 %v16690_v18  ;;  %v11283_v51 = vpop.f32.mrf.mxu1 }
 0x88a   : > { %v16977_v40 = vpop.f32.mrf.mxu0  ;;  %12207 = vmatprep.mubr.bf16.mxu0 %v16711_v31  ;;  %v11284_v42 = vadd.f32 %v11283_v51, %v11282_v11 }
 0x88b   : > { %v11285_v26 = vpop.f32.mrf.mxu1  ;;  %9015 = vmatmul.mubr.bf16.gmra.mxu1 %v16716_v57 }
 0x88c   : > { %v16981_v9 = vpop.f32.mrf.mxu0  ;;  %v16983_v2 = vadd.f32 %v11284_v42, %v8191_v53  ;;  %9022 = vmatprep.mubr.bf16.mxu1 %v16491_v12 }
 0x88d   : > { %v11286_v28 = vpop.f32.mrf.mxu1 }
 0x88e   : > { %v16986_v10 = vpop.f32.mrf.mxu0  ;;  %v11287_v50 = vadd.f32 %v11286_v28, %v11285_v26 }
 0x88f   : > { %v11288_v18 = vpop.f32.mrf.mxu1 }
 0x890   : > { %v16989_v15 = vadd.f32 %v16932_v45, %v11287_v50 }
 0x891   : > { %v16991_v22 = vpop.f32.mrf.mxu0  ;;  %v11289_v31 = vpop.f32.mrf.mxu1  ;;  %12208 = vmatmul.mubr.bf16.gmra.mxu0 %v17507_v34 }
 0x892   : > { %v11290_v57 = vadd.f32 %v11289_v31, %v11288_v18 }
 0x893   : > { %v16994_v32 = vpop.f32.mrf.mxu0  ;;  %v11291_v53 = vpop.f32.mrf.mxu1  ;;  %9023 = vmatmul.mubr.bf16.gmra.mxu1 %v16732_v23 }
 0x894   : > { %v16998_v12 = vadd.f32 %v16938_v27, %v11290_v57  ;;  %9030 = vmatprep.mubr.bf16.mxu1 %v16571_v62 }
 0x895   : > { %v17001_v52 = vpop.f32.mrf.mxu0  ;;  %v11292_v45 = vpop.f32.mrf.mxu1 }
 0x896   : > { %v11293_v3 = vadd.f32 %v11292_v45, %v11291_v53 }
 0x897   : > { %v17003_v24 = vpop.f32.mrf.mxu0  ;;  %v11294_v49 = vpop.f32.mrf.mxu1 }
 0x898   : > { %v17005_v7 = vadd.f32 %v11293_v3, %v8204_v39 }
 0x899   : > { %v11379_v34 = vpop.f32.mrf.mxu0  ;;  %v11295_v5 = vpop.f32.mrf.mxu1 }
 0x89a   : > { %v11296_v11 = vadd.f32 %v11295_v5, %v11294_v49 }
 0x89b   : > { %v11380_v51 = vpop.f32.mrf.mxu0  ;;  %v11297_v42 = vpop.f32.mrf.mxu1  ;;  %9031 = vmatmul.mubr.bf16.gmra.mxu1 %v16751_v55 }
 0x89c   : > { %v11381_v23 = vadd.f32 %v11380_v51, %v11379_v34  ;;  %v17008_v27 = vadd.f32 %v11296_v11, %v8207_v33  ;;  %9038 = vmatprep.mubr.bf16.mxu1 %v16552_v47 }
 0x89d   : > { %v11382_v62 = vpop.f32.mrf.mxu0  ;;  %v11298_v26 = vpop.f32.mrf.mxu1 }
 0x89e   : > { %v11299_v28 = vadd.f32 %v11298_v26, %v11297_v42  ;;  %v17012_v50 = vadd.f32 %v11381_v23, %v16908_v29 }
 0x89f   : > { %v11383_v39 = vpop.f32.mrf.mxu0  ;;  %v11300_v18 = vpop.f32.mrf.mxu1 }
 0x8a0   : > { %v11384_v31 = vadd.f32 %v11383_v39, %v11382_v62  ;;  %v17015_v57 = vadd.f32 %v16944_v59, %v11299_v28 }
 0x8a1   : > { %v11385_v53 = vpop.f32.mrf.mxu0  ;;  %v11301_v45 = vpop.f32.mrf.mxu1 }
 0x8a2   : > { %v11302_v55 = vadd.f32 %v11301_v45, %v11300_v18  ;;  %v17018_v33 = vadd.f32 %v11384_v31, %v16913_v58 }
 0x8a3   : > { %v11386_v3 = vpop.f32.mrf.mxu0  ;;  %v11303_v47 = vpop.f32.mrf.mxu1  ;;  %9039 = vmatmul.mubr.bf16.gmra.mxu1 %v16769_v61 }
 0x8a4   : > { %v11387_v49 = vadd.f32 %v11386_v3, %v11385_v53  ;;  %v17022_v29 = vadd.f32 %v16951_v38, %v11302_v55  ;;  %9046 = vmatprep.mubr.bf16.mxu1 %v16614_v0 }
 0x8a5   : > { %v11388_v34 = vpop.f32.mrf.mxu0  ;;  %v11304_v5 = vpop.f32.mrf.mxu1 }
 0x8a6   : > { %v11305_v59 = vadd.f32 %v11304_v5, %v11303_v47  ;;  %v17026_v11 = vadd.f32 %v11387_v49, %v16916_v60 }
 0x8a7   : > { %v11389_v51 = vpop.f32.mrf.mxu0  ;;  %v11306_v42 = vpop.f32.mrf.mxu1 }
 0x8a8   : > { %v11390_v58 = vadd.f32 %v11389_v51, %v11388_v34  ;;  %v17029_v23 = vadd.f32 %v11305_v59, %v16961_v46 }
 0x8a9   : > { %v11391_v62 = vpop.f32.mrf.mxu0  ;;  %v11307_v61 = vpop.f32.mrf.mxu1 }
 0x8aa   : > { %v11308_v26 = vadd.f32 %v11307_v61, %v11306_v42  ;;  %v17032_v38 = vadd.f32 %v11390_v58, %v16921_v14 }
 0x8ab   : > { %v11392_v28 = vpop.f32.mrf.mxu0  ;;  %v11309_v0 = vpop.f32.mrf.mxu1  ;;  %9047 = vmatmul.mubr.bf16.gmra.mxu1 %v16787_v19 }
 0x8ac   : > { %v11393_v39 = vadd.f32 %v11392_v28, %v11391_v62  ;;  %v17036_v60 = vadd.f32 %v11308_v26, %v16970_v25  ;;  %9054 = vmatprep.mubr.bf16.mxu1 %v16606_v8 }
 0x8ad   : > { %v11394_v18 = vpop.f32.mrf.mxu0  ;;  %v11310_v31 = vpop.f32.mrf.mxu1 }
 0x8ae   : > { %v11311_v46 = vadd.f32 %v11310_v31, %v11309_v0  ;;  %v17040_v53 = vadd.f32 %v11393_v39, %v16924_v17 }
 0x8af   : > { %v11395_v45 = vpop.f32.mrf.mxu0  ;;  %v11312_v55 = vpop.f32.mrf.mxu1 }
 0x8b0   : > { %v11396_v14 = vadd.f32 %v11395_v45, %v11394_v18  ;;  %v17043_v3 = vadd.f32 %v16956_v4, %v11311_v46 }
 0x8b1   : > { %v11397_v47 = vpop.f32.mrf.mxu0  ;;  %v11313_v19 = vpop.f32.mrf.mxu1 }
 0x8b2   : > { %v11314_v49 = vadd.f32 %v11313_v19, %v11312_v55  ;;  %v17046_v25 = vadd.f32 %v11396_v14, %v16929_v56 }
 0x8b3   : > { %v11398_v34 = vpop.f32.mrf.mxu0  ;;  %v11315_v8 = vpop.f32.mrf.mxu1  ;;  %9055 = vmatmul.mubr.bf16.gmra.mxu1 %v16799_v37 }
 0x8b4   : > { %v11399_v5 = vadd.f32 %v11398_v34, %v11397_v47  ;;  %v17050_v17 = vadd.f32 %v16965_v41, %v11314_v49  ;;  %9062 = vmatprep.mubr.bf16.mxu1 %v16652_v54 }
 0x8b5   : > { %v11400_v59 = vpop.f32.mrf.mxu0  ;;  %v11316_v51 = vpop.f32.mrf.mxu1 }
 0x8b6   : > { %v11317_v4 = vadd.f32 %v11316_v51, %v11315_v8  ;;  %v17054_v42 = vadd.f32 %v11399_v5, %v16934_v36 }
 0x8b7   : > { %v11401_v58 = vpop.f32.mrf.mxu0  ;;  %v11318_v62 = vpop.f32.mrf.mxu1 }
 0x8b8   : > { %v11402_v56 = vadd.f32 %v11401_v58, %v11400_v59  ;;  %v17057_v61 = vadd.f32 %v11317_v4, %v16977_v40 }
 0x8b9   : > { %v11403_v26 = vpop.f32.mrf.mxu0  ;;  %v11319_v37 = vpop.f32.mrf.mxu1 }
 0x8ba   : > { %v11320_v28 = vadd.f32 %v11319_v37, %v11318_v62  ;;  %v17060_v41 = vadd.f32 %v11402_v56, %v16941_v35 }
 0x8bb   : > { %v11404_v0 = vpop.f32.mrf.mxu0  ;;  %v11321_v54 = vpop.f32.mrf.mxu1  ;;  %9063 = vmatmul.mubr.bf16.gmra.mxu1 %v16811_v43 }
 0x8bc   : > { %v11405_v39 = vadd.f32 %v11404_v0, %v11403_v26  ;;  %v17064_v36 = vadd.f32 %v11320_v28, %v16986_v10  ;;  %9070 = vmatprep.mubr.bf16.mxu1 %v16685_v20 }
 0x8bd   : > { %v11406_v18 = vpop.f32.mrf.mxu0  ;;  %v11322_v31 = vpop.f32.mrf.mxu1 }
 0x8be   : > { %v11323_v40 = vadd.f32 %v11322_v31, %v11321_v54  ;;  %v17068_v46 = vadd.f32 %v11405_v39, %v16946_v63 }
 0x8bf   : > { %v11407_v45 = vpop.f32.mrf.mxu0  ;;  %v11324_v55 = vpop.f32.mrf.mxu1 }
 0x8c0   : > { %v11408_v35 = vadd.f32 %v11407_v45, %v11406_v18  ;;  %v17071_v14 = vadd.f32 %v16972_v16, %v11323_v40 }
 0x8c1   : > { %v11409_v47 = vpop.f32.mrf.mxu0  ;;  %v11325_v43 = vpop.f32.mrf.mxu1 }
 0x8c2   : > { %v11326_v19 = vadd.f32 %v11325_v43, %v11324_v55  ;;  %v17074_v10 = vadd.f32 %v11408_v35, %v16953_v1 }
 0x8c3   : > { %v11410_v49 = vpop.f32.mrf.mxu0  ;;  %v11327_v20 = vpop.f32.mrf.mxu1  ;;  %9071 = vmatmul.mubr.bf16.gmra.mxu1 %v16823_v30 }
 0x8c4   : > { %v11411_v34 = vadd.f32 %v11410_v49, %v11409_v47  ;;  %v17078_v63 = vadd.f32 %v16981_v9, %v11326_v19  ;;  %9078 = vmatprep.mubr.bf16.mxu1 %v17501_v13 }
 0x8c5   : > { %v11412_v8 = vpop.f32.mrf.mxu0  ;;  %v11328_v5 = vpop.f32.mrf.mxu1 }
 0x8c6   : > { %v11329_v16 = vadd.f32 %v11328_v5, %v11327_v20  ;;  %v8486_v59 = vadd.f32 %v11411_v34, %v16958_v6 }
 0x8c7   : > { %v11413_v51 = vpop.f32.mrf.mxu0  ;;  %v11330_v4 = vpop.f32.mrf.mxu1 }
 0x8c8   : > { %v11414_v58 = vadd.f32 %v11413_v51, %v11412_v8  ;;  %v17083_v1 = vadd.f32 %v11329_v16, %v16994_v32 }
 0x8c9   : > { %v11415_v62 = vpop.f32.mrf.mxu0  ;;  %v11331_v56 = vpop.f32.mrf.mxu1 }
 0x8ca   : > { %v11332_v30 = vadd.f32 %v11331_v56, %v11330_v4  ;;  %v8489_v26 = vadd.f32 %v11414_v58, %v16967_v44 }
 0x8cb   : > { %v11416_v9 = vpop.f32.mrf.mxu0  ;;  %v11333_v37 = vpop.f32.mrf.mxu1  ;;  %9079 = vmatmul.mubr.bf16.gmra.mxu1 %v17504_v48 }
 0x8cc   : > { %v11417_v13 = vadd.f32 %v11416_v9, %v11415_v62  ;;  %v17088_v28 = vadd.f32 %v11332_v30, %v17003_v24 }
 0x8cd   : > { %v11418_v6 = vpop.f32.mrf.mxu0  ;;  %v11334_v0 = vpop.f32.mrf.mxu1 }
 0x8ce   : > { %v11335_v54 = vadd.f32 %v11334_v0, %v11333_v37  ;;  %v17091_v39 = vadd.f32 %v11417_v13, %v16974_v21 }
 0x8cf   : > { %v11419_v32 = vpop.f32.mrf.mxu0  ;;  %v11336_v18 = vpop.f32.mrf.mxu1 }
 0x8d0   : > { %v11420_v31 = vadd.f32 %v11419_v32, %v11418_v6  ;;  %v17094_v40 = vadd.f32 %v16991_v22, %v11335_v54 }
 0x8d1   : > { %v11421_v44 = vpop.f32.mrf.mxu0  ;;  %v11337_v45 = vpop.f32.mrf.mxu1 }
 0x8d2   : > { %v11338_v55 = vadd.f32 %v11337_v45, %v11336_v18  ;;  %v17097_v48 = vadd.f32 %v11420_v31, %v16983_v2 }
 0x8d3   : > { %v11422_v24 = vpop.f32.mrf.mxu0  ;;  %v12133_v35 = vpop.f32.mrf.mxu1 }
 0x8d4   : > { %v11423_v47 = vadd.f32 %v11422_v24, %v11421_v44  ;;  %v17100_v43 = vadd.f32 %v17001_v52, %v11338_v55  ;;  %v17103_v21 = vadd.f32 %v12133_v35, %v17026_v11 }
 0x8d5   : > { %v11424_v19 = vpop.f32.mrf.mxu0  ;;  %v8606_v49 = vpop.f32.mrf.mxu1 }
 0x8d6   : > { %v17106_v22 = vadd.f32 %v8606_v49, %v17012_v50  ;;  %v8502_v20 = vadd.f32 %v11423_v47, %v16989_v15 }
 0x8d7   : > { %v11425_v34 = vpop.f32.mrf.mxu0  ;;  %v12134_v8 = vpop.f32.mrf.mxu1 }
 0x8d8   : > { %v11426_v2 = vadd.f32 %v11425_v34, %v11424_v19  ;;  %v17110_v5 = vadd.f32 %v12134_v8, %v17032_v38 }
 0x8d9   : > { %v11427_v16 = vpop.f32.mrf.mxu0  ;;  %v8609_v51 = vpop.f32.mrf.mxu1 }
 0x8da   : > { %v17113_v52 = vadd.f32 %v8609_v51, %v17018_v33  ;;  %v8505_v11 = vadd.f32 %v11426_v2, %v16998_v12 }
 0x8db   : > { %v11428_v4 = vpop.f32.mrf.mxu0  ;;  %v12137_v58 = vpop.f32.mrf.mxu1 }
 0x8dc   : > { %v11429_v62 = vadd.f32 %v11428_v4, %v11427_v16  ;;  %v17117_v50 = vadd.f32 %v12137_v58, %v17054_v42 }
 0x8dd   : > { %v11430_v15 = vpop.f32.mrf.mxu0  ;;  %v8622_v56 = vpop.f32.mrf.mxu1 }
 0x8de   : > { %v17120_v30 = vadd.f32 %v8622_v56, %v17040_v53  ;;  %v8510_v38 = vadd.f32 %v11429_v62, %v17005_v7 }
 0x8df   : > { %v11431_v9 = vpop.f32.mrf.mxu0  ;;  %v12138_v37 = vpop.f32.mrf.mxu1 }
 0x8e0   : > { %v11432_v13 = vadd.f32 %v11431_v9, %v11430_v15  ;;  %v17124_v33 = vadd.f32 %v12138_v37, %v17060_v41 }
 0x8e1   : > { %v11433_v12 = vpop.f32.mrf.mxu0  ;;  %v8625_v6 = vpop.f32.mrf.mxu1 }
 0x8e2   : > { %v17127_v0 = vadd.f32 %v8625_v6, %v17046_v25  ;;  %v8513_v42 = vadd.f32 %v11432_v13, %v17008_v27 }
 0x8e3   : > { %v11434_v54 = vpop.f32.mrf.mxu0  ;;  %v12141_v32 = vpop.f32.mrf.mxu1 }
 0x8e4   : > { %v11435_v18 = vadd.f32 %v11434_v54, %v11433_v12  ;;  %v17130_v53 = vadd.f32 %v12141_v32, %v8486_v59 }
 0x8e5   : > { %v11436_v31 = vpop.f32.mrf.mxu0  ;;  %v8638_v7 = vpop.f32.mrf.mxu1 }
 0x8e6   : > { %v17133_v44 = vadd.f32 %v8638_v7, %v17068_v46  ;;  %v8518_v41 = vadd.f32 %v11435_v18, %v17015_v57 }
 0x8e7   : > { %v11437_v45 = vpop.f32.mrf.mxu0  ;;  %v12142_v55 = vpop.f32.mrf.mxu1 }
 0x8e8   : > { %v11438_v24 = vadd.f32 %v11437_v45, %v11436_v31  ;;  %v17136_v35 = vadd.f32 %v12142_v55, %v8489_v26 }
 0x8e9   : > { %v11439_v25 = vpop.f32.mrf.mxu0  ;;  %v8641_v47 = vpop.f32.mrf.mxu1 }
 0x8ea   : > { %v17139_v27 = vadd.f32 %v8641_v47, %v17074_v10  ;;  %v8521_v59 = vadd.f32 %v11438_v24, %v17022_v29 }
 0x8eb   : > { %v11440_v19 = vpop.f32.mrf.mxu0  ;;  %v12145_v49 = vpop.f32.mrf.mxu1 }
 0x8ec   : > { %v11441_v34 = vadd.f32 %v11440_v19, %v11439_v25  ;;  %v17142_v8 = vadd.f32 %v12145_v49, %v8502_v20 }
 0x8ed   : > { %v11442_v46 = vpop.f32.mrf.mxu0  ;;  %v8654_v2 = vpop.f32.mrf.mxu1 }
 0x8ee   : > { %v17145_v57 = vadd.f32 %v8654_v2, %v17091_v39  ;;  %v8526_v26 = vadd.f32 %v11441_v34, %v17029_v23 }
 0x8ef   : > { %v11443_v16 = vpop.f32.mrf.mxu0  ;;  %v12146_v51 = vpop.f32.mrf.mxu1 }
 0x8f0   : > { %v11444_v4 = vadd.f32 %v11443_v16, %v11442_v46  ;;  %v17148_v58 = vadd.f32 %v12146_v51, %v8505_v11 }
 0x8f1   : > { %v11445_v10 = vpop.f32.mrf.mxu0  ;;  %v8657_v62 = vpop.f32.mrf.mxu1 }
 0x8f2   : > { %v17151_v29 = vadd.f32 %v8657_v62, %v17097_v48  ;;  %v8529_v20 = vadd.f32 %v11444_v4, %v17036_v60 }
 0x8f3   : > { %v11446_v15 = vpop.f32.mrf.mxu0  ;;  %v12149_v56 = vpop.f32.mrf.mxu1 }
 0x8f4   : > { %v11447_v9 = vadd.f32 %v11446_v15, %v11445_v10  ;;  %v17154_v37 = vadd.f32 %v12149_v56, %v8518_v41 }
 0x8f5   : > { %v11448_v39 = vpop.f32.mrf.mxu0  ;;  %v8670_v13 = vpop.f32.mrf.mxu1 }
 0x8f6   : > { %v17156_v23 = vadd.f32 %v8670_v13, %v8510_v38  ;;  %v8534_v12 = vadd.f32 %v11447_v9, %v17043_v3 }
 0x8f7   : > { %v11449_v11 = vpop.f32.mrf.mxu0  ;;  %v12150_v6 = vpop.f32.mrf.mxu1 }
 0x8f8   : > { %v11450_v54 = vadd.f32 %v11449_v11, %v11448_v39  ;;  %v17159_v32 = vadd.f32 %v12150_v6, %v8521_v59 }
 0x8f9   : > { %v11451_v48 = vpop.f32.mrf.mxu0  ;;  %v8673_v18 = vpop.f32.mrf.mxu1 }
 0x8fa   : > { %v17161_v31 = vadd.f32 %v8673_v18, %v8513_v42  ;;  %v8537_v60 = vadd.f32 %v11450_v54, %v17050_v17 }
 0x8fb   : > { %v11452_v7 = vpop.f32.mrf.mxu0  ;;  %v12153_v41 = vpop.f32.mrf.mxu1 }
 0x8fc   : > { %v11453_v45 = vadd.f32 %v11452_v7, %v11451_v48  ;;  %v17164_v55 = vadd.f32 %v12153_v41, %v8534_v12 }
 0x8fd   : > { %v11454_v38 = vpop.f32.mrf.mxu0  ;;  %v8686_v24 = vpop.f32.mrf.mxu1 }
 0x8fe   : > { %v17166_v25 = vadd.f32 %v8686_v24, %v8526_v26  ;;  %v8542_v3 = vadd.f32 %v11453_v45, %v17057_v61 }
 0x8ff   : > { %v11455_v47 = vpop.f32.mrf.mxu0  ;;  %v12154_v59 = vpop.f32.mrf.mxu1 }
 0x900   : > { %v11456_v19 = vadd.f32 %v11455_v47, %v11454_v38  ;;  %v17169_v49 = vadd.f32 %v12154_v59, %v8537_v60 }
 0x901   : > { %v11457_v42 = vpop.f32.mrf.mxu0  ;;  %v8689_v34 = vpop.f32.mrf.mxu1 }
 0x902   : > { %v17171_v46 = vadd.f32 %v8689_v34, %v8529_v20  ;;  %v8545_v17 = vadd.f32 %v11456_v19, %v17064_v36 }
 0x903   : > { %v11458_v2 = vpop.f32.mrf.mxu0  ;;  %v12157_v16 = vpop.f32.mrf.mxu1 }
 0x904   : > { %v11459_v51 = vadd.f32 %v11458_v2, %v11457_v42 }
 0x905   : > { %v11460_v4 = vpop.f32.mrf.mxu0  ;;  %v8702_v10 = vpop.f32.mrf.mxu1 }
 0x906   : > { %v8550_v26 = vadd.f32 %v11459_v51, %v17071_v14  ;;  %v17175_v62 = vadd.f32 %v8702_v10, %v8542_v3 }
 0x907   : > { %v11461_v61 = vpop.f32.mrf.mxu0  ;;  %v12158_v15 = vpop.f32.mrf.mxu1 }
 0x908   : > { %v11462_v56 = vadd.f32 %v11461_v61, %v11460_v4  ;;  %v17177_v9 = vadd.f32 %v12157_v16, %v8550_v26 }
 0x909   : > { %v11463_v39 = vpop.f32.mrf.mxu0  ;;  %v8705_v13 = vpop.f32.mrf.mxu1 }
 0x90a   : > { %v8553_v20 = vadd.f32 %v11462_v56, %v17078_v63  ;;  %v17180_v12 = vadd.f32 %v8705_v13, %v8545_v17 }
 0x90b   : > { %v11464_v36 = vpop.f32.mrf.mxu0  ;;  %v12161_v11 = vpop.f32.mrf.mxu1 }
 0x90c   : > { %v11465_v6 = vadd.f32 %v11464_v36, %v11463_v39  ;;  %v17182_v54 = vadd.f32 %v12158_v15, %v8553_v20 }
 0x90d   : > { %v11466_v48 = vpop.f32.mrf.mxu0  ;;  %v8718_v14 = vpop.f32.mrf.mxu1 }
 0x90e   : > { %v8558_v18 = vadd.f32 %v11465_v6, %v17083_v1 }
 0x90f   : > { %v11467_v60 = vpop.f32.mrf.mxu0  ;;  %v12162_v7 = vpop.f32.mrf.mxu1 }
 0x910   : > { %v11468_v41 = vadd.f32 %v11467_v60, %v11466_v48  ;;  %v17185_v45 = vadd.f32 %v8718_v14, %v8558_v18 }
 0x911   : > { %v11469_v38 = vpop.f32.mrf.mxu0  ;;  %v8721_v24 = vpop.f32.mrf.mxu1 }
 0x912   : > { %v8561_v63 = vadd.f32 %v11468_v41, %v17088_v28 }
 0x913   : > { %v11470_v3 = vpop.f32.mrf.mxu0  ;;  %v11515_v47 = vpop.f32.mrf.mxu1 }
 0x914   : > { %v11471_v59 = vadd.f32 %v11470_v3, %v11469_v38  ;;  %v17188_v19 = vadd.f32 %v8721_v24, %v8561_v63 }
 0x915   : > { %v11472_v42 = vpop.f32.mrf.mxu0  ;;  %v11516_v34 = vpop.f32.mrf.mxu1 }
 0x916   : > { %v8566_v17 = vadd.f32 %v11471_v59, %v17094_v40  ;;  %v11517_v4 = vadd.f32 %v11516_v34, %v11515_v47  ;;  %v17200_v40 = vld [vmem:[%s17316_s10] ss:$0 sm:$0xff] }
 0x917   : > { %v11473_v1 = vpop.f32.mrf.mxu0  ;;  %v11518_v2 = vpop.f32.mrf.mxu1 }
 0x918   : > { %v17191_v16 = vadd.f32 %v12161_v11, %v8566_v17  ;;  %v11474_v51 = vadd.f32 %v11473_v1, %v11472_v42 }
 0x919   : > { %v12181_v10 = vpop.f32.mrf.mxu0  ;;  %v11519_v26 = vpop.f32.mrf.mxu1 }
 0x91a   : > { %v8569_v28 = vadd.f32 %v11474_v51, %v17100_v43  ;;  %v11520_v13 = vadd.f32 %v11519_v26, %v11518_v2 }
 0x91b   : > { %v9121_v61 = vpop.f32.mrf.mxu0  ;;  %v11521_v15 = vpop.f32.mrf.mxu1 }
 0x91c   : > { %v17194_v56 = vadd.f32 %v12162_v7, %v8569_v28  ;;  %v9122_v39 = vadd.f32 %v11517_v4, %v9121_v61 }
 0x91d   : > { %v12182_v20 = vpop.f32.mrf.mxu0  ;;  %v11522_v36 = vpop.f32.mrf.mxu1 }
 0x91e   : > { %v9248_v11 = vadd.f32 %v9122_v39, %v17106_v22  ;;  %v11523_v6 = vadd.f32 %v11522_v36, %v11521_v15 }
 0x91f   : > { %v9124_v43 = vpop.f32.mrf.mxu0  ;;  %v11524_v48 = vpop.f32.mrf.mxu1 }
 0x920   : > { %v9287_v14 = vadd.f32 %v17200_v40, %v9248_v11  ;;  %v9125_v18 = vadd.f32 %v11520_v13, %v9124_v43  ;;  %v9130_v60 = vadd.f32 %v12181_v10, %v11523_v6 }
 0x921   : > { %v12185_v7 = vpop.f32.mrf.mxu0  ;;  %v11525_v41 = vpop.f32.mrf.mxu1 }
 0x922   : > { %9319 = vst [vmem:[%s17206_s26] sm:$0xff] %v9287_v14  ;;  %v9249_v22 = vadd.f32 %v9125_v18, %v17113_v52  ;;  %v9250_v38 = vadd.f32 %v9130_v60, %v17103_v21  ;;  %v11526_v24 = vadd.f32 %v11525_v41, %v11524_v48 }
 0x923   : > { %v9137_v63 = vpop.f32.mrf.mxu0  ;;  %v11527_v3 = vpop.f32.mrf.mxu1 }
 0x924   : > { %v9288_v47 = vadd.f32 %v17200_v40, %v9249_v22  ;;  %v9289_v59 = vadd.f32 %v17200_v40, %v9250_v38  ;;  %v9133_v42 = vadd.f32 %v12182_v20, %v11526_v24 }
 0x925   : > { %v11528_v34 = vpop.f32.mrf.mxu1  ;;  %v12186_v2 = vpop.f32.mrf.mxu0 }
 0x926   : > { %9320 = vst [vmem:[%s17206_s26 + $0x8] sm:$0xff] %v9288_v47  ;;  %9321 = vst [vmem:[%s17206_s26 + $0x10] sm:$0xff] %v9289_v59  ;;  %v9251_v17 = vadd.f32 %v9133_v42, %v17110_v5  ;;  %v11529_v1 = vadd.f32 %v11528_v34, %v11527_v3 }
 0x927   : > { %v11530_v52 = vpop.f32.mrf.mxu1  ;;  %v9140_v28 = vpop.f32.mrf.mxu0 }
 0x928   : > { %v9290_v21 = vadd.f32 %v17200_v40, %v9251_v17  ;;  %v9138_v51 = vadd.f32 %v11529_v1, %v9137_v63 }
 0x929   : > { %v11531_v4 = vpop.f32.mrf.mxu1  ;;  %v12189_v36 = vpop.f32.mrf.mxu0 }
 0x92a   : > { %9322 = vst [vmem:[%s17206_s26 + $0x18] sm:$0xff] %v9290_v21  ;;  %v9252_v10 = vadd.f32 %v9138_v51, %v17120_v30  ;;  %v11532_v26 = vadd.f32 %v11531_v4, %v11530_v52 }
 0x92b   : > { %v11533_v61 = vpop.f32.mrf.mxu1  ;;  %v9153_v18 = vpop.f32.mrf.mxu0 }
 0x92c   : > { %v9291_v15 = vadd.f32 %v17200_v40, %v9252_v10  ;;  %v9141_v39 = vadd.f32 %v11532_v26, %v9140_v28 }
 0x92d   : > { %v11534_v13 = vpop.f32.mrf.mxu1  ;;  %v12190_v63 = vpop.f32.mrf.mxu0 }
 0x92e   : > { %9323 = vst [vmem:[%s17206_s26 + $0x20] sm:$0xff] %v9291_v15  ;;  %v9253_v5 = vadd.f32 %v9141_v39, %v17127_v0  ;;  %v11535_v20 = vadd.f32 %v11534_v13, %v11533_v61 }
 0x92f   : > { %v11536_v11 = vpop.f32.mrf.mxu1  ;;  %v9156_v34 = vpop.f32.mrf.mxu0 }
 0x930   : > { %v9292_v6 = vadd.f32 %v17200_v40, %v9253_v5  ;;  %v9146_v43 = vadd.f32 %v12185_v7, %v11535_v20 }
 0x931   : > { %v11537_v48 = vpop.f32.mrf.mxu1  ;;  %v12193_v51 = vpop.f32.mrf.mxu0 }
 0x932   : > { %9324 = vst [vmem:[%s17206_s26 + $0x28] sm:$0xff] %v9292_v6  ;;  %v9254_v30 = vadd.f32 %v9146_v43, %v17117_v50  ;;  %v11538_v14 = vadd.f32 %v11537_v48, %v11536_v11 }
 0x933   : > { %v11539_v60 = vpop.f32.mrf.mxu1  ;;  %v9169_v15 = vpop.f32.mrf.mxu0 }
 0x934   : > { %v9293_v41 = vadd.f32 %v17200_v40, %v9254_v30  ;;  %v9149_v22 = vadd.f32 %v12186_v2, %v11538_v14 }
 0x935   : > { %v11540_v38 = vpop.f32.mrf.mxu1  ;;  %v12194_v6 = vpop.f32.mrf.mxu0 }
 0x936   : > { %9325 = vst [vmem:[%s17206_s26 + $0x30] sm:$0xff] %v9293_v41  ;;  %v9255_v0 = vadd.f32 %v9149_v22, %v17124_v33  ;;  %v11541_v24 = vadd.f32 %v11540_v38, %v11539_v60 }
 0x937   : > { %v11542_v3 = vpop.f32.mrf.mxu1 }
 0x938   : > { %v9294_v7 = vadd.f32 %v17200_v40, %v9255_v0  ;;  %v9154_v47 = vadd.f32 %v11541_v24, %v9153_v18  ;;  %v9172_v18 = vpop.f32.mrf.mxu0 }
 0x939   : > { %v11543_v59 = vpop.f32.mrf.mxu1 }
 0x93a   : > { %9326 = vst [vmem:[%s17206_s26 + $0x38] sm:$0xff] %v9294_v7  ;;  %v9256_v50 = vadd.f32 %v9154_v47, %v17133_v44  ;;  %v11544_v42 = vadd.f32 %v11543_v59, %v11542_v3  ;;  %v12197_v24 = vpop.f32.mrf.mxu0 }
 0x93b   : > { %v11545_v17 = vpop.f32.mrf.mxu1 }
 0x93c   : > { %v9295_v1 = vadd.f32 %v17200_v40, %v9256_v50  ;;  %v9157_v2 = vadd.f32 %v11544_v42, %v9156_v34  ;;  %v9185_v50 = vpop.f32.mrf.mxu0 }
 0x93d   : > { %v11546_v52 = vpop.f32.mrf.mxu1 }
 0x93e   : > { %9327 = vst [vmem:[%s17206_s26 + $0x40] sm:$0xff] %v9295_v1  ;;  %v9257_v33 = vadd.f32 %v9157_v2, %v17139_v27  ;;  %v11547_v21 = vadd.f32 %v11546_v52, %v11545_v17  ;;  %v12198_v52 = vpop.f32.mrf.mxu0 }
 0x93f   : > { %v11548_v4 = vpop.f32.mrf.mxu1 }
 0x940   : > { %v9296_v10 = vadd.f32 %v17200_v40, %v9257_v33  ;;  %v9162_v26 = vadd.f32 %v12189_v36, %v11547_v21 }
 0x941   : > { %v11549_v28 = vpop.f32.mrf.mxu1 }
 0x942   : > { %9328 = vst [vmem:[%s17206_s26 + $0x48] sm:$0xff] %v9296_v10  ;;  %v9258_v44 = vadd.f32 %v9162_v26, %v17130_v53  ;;  %v11550_v61 = vadd.f32 %v11549_v28, %v11548_v4  ;;  %v9188_v26 = vpop.f32.mrf.mxu0 }
 0x943   : > { %v11551_v39 = vpop.f32.mrf.mxu1 }
 0x944   : > { %v9297_v13 = vadd.f32 %v17200_v40, %v9258_v44  ;;  %v9165_v5 = vadd.f32 %v12190_v63, %v11550_v61 }
 0x945   : > { %v11552_v20 = vpop.f32.mrf.mxu1 }
 0x946   : > { %9329 = vst [vmem:[%s17206_s26 + $0x50] sm:$0xff] %v9297_v13  ;;  %v9259_v27 = vadd.f32 %v9165_v5, %v17136_v35  ;;  %v11553_v11 = vadd.f32 %v11552_v20, %v11551_v39  ;;  %v12201_v13 = vpop.f32.mrf.mxu0 }
 0x947   : > { %v11554_v43 = vpop.f32.mrf.mxu1 }
 0x948   : > { %v9298_v36 = vadd.f32 %v17200_v40, %v9259_v27  ;;  %v9170_v48 = vadd.f32 %v11553_v11, %v9169_v15 }
 0x949   : > { %v11555_v30 = vpop.f32.mrf.mxu1 }
 0x94a   : > { %9330 = vst [vmem:[%s17206_s26 + $0x58] sm:$0xff] %v9298_v36  ;;  %v9260_v53 = vadd.f32 %v9170_v48, %v17145_v57  ;;  %v11556_v14 = vadd.f32 %v11555_v30, %v11554_v43  ;;  %v9201_v43 = vpop.f32.mrf.mxu0 }
 0x94b   : > { %v11557_v60 = vpop.f32.mrf.mxu1 }
 0x94c   : > { %v9299_v41 = vadd.f32 %v17200_v40, %v9260_v53  ;;  %v9173_v22 = vadd.f32 %v11556_v14, %v9172_v18  ;;  %v12202_v18 = vpop.f32.mrf.mxu0 }
 0x94d   : > { %v11558_v38 = vpop.f32.mrf.mxu1 }
 0x94e   : > { %9331 = vst [vmem:[%s17206_s26 + $0x60] sm:$0xff] %v9299_v41  ;;  %v9261_v35 = vadd.f32 %v9173_v22, %v17151_v29  ;;  %v11559_v0 = vadd.f32 %v11558_v38, %v11557_v60 }
 0x94f   : > { %v11560_v63 = vpop.f32.mrf.mxu1 }
 0x950   : > { %v9300_v3 = vadd.f32 %v17200_v40, %v9261_v35  ;;  %v9178_v7 = vadd.f32 %v12193_v51, %v11559_v0  ;;  %v9204_v0 = vpop.f32.mrf.mxu0 }
 0x951   : > { %v11561_v47 = vpop.f32.mrf.mxu1 }
 0x952   : > { %9332 = vst [vmem:[%s17206_s26 + $0x68] sm:$0xff] %v9300_v3  ;;  %v9262_v57 = vadd.f32 %v9178_v7, %v17142_v8  ;;  %v11562_v59 = vadd.f32 %v11561_v47, %v11560_v63 }
 0x953   : > { %v11563_v42 = vpop.f32.mrf.mxu1 }
 0x954   : > { %v9301_v34 = vadd.f32 %v17200_v40, %v9262_v57  ;;  %v9181_v17 = vadd.f32 %v12194_v6, %v11562_v59  ;;  %v12205_v57 = vpop.f32.mrf.mxu0 }
 0x955   : > { %v11564_v1 = vpop.f32.mrf.mxu1 }
 0x956   : > { %9333 = vst [vmem:[%s17206_s26 + $0x70] sm:$0xff] %v9301_v34  ;;  %v9263_v29 = vadd.f32 %v9181_v17, %v17148_v58  ;;  %v11565_v2 = vadd.f32 %v11564_v1, %v11563_v42  ;;  %v9217_v1 = vpop.f32.mrf.mxu0 }
 0x957   : > { %v11566_v33 = vpop.f32.mrf.mxu1 }
 0x958   : > { %v9302_v21 = vadd.f32 %v17200_v40, %v9263_v29  ;;  %v9186_v51 = vadd.f32 %v11565_v2, %v9185_v50 }
 0x959   : > { %v11567_v4 = vpop.f32.mrf.mxu1 }
 0x95a   : > { %9334 = vst [vmem:[%s17206_s26 + $0x78] sm:$0xff] %v9302_v21  ;;  %v9264_v8 = vadd.f32 %v9186_v51, %v17156_v23  ;;  %v11568_v10 = vadd.f32 %v11567_v4, %v11566_v33  ;;  %v12206_v51 = vpop.f32.mrf.mxu0 }
 0x95b   : > { %v11569_v28 = vpop.f32.mrf.mxu1 }
 0x95c   : > { %v9303_v44 = vadd.f32 %v17200_v40, %v9264_v8  ;;  %v9189_v61 = vadd.f32 %v11568_v10, %v9188_v26 }
 0x95d   : > { %v11570_v15 = vpop.f32.mrf.mxu1 }
 0x95e   : > { %9335 = vst [vmem:[%s17206_s26 + $0x80] sm:$0xff] %v9303_v44  ;;  %v9265_v58 = vadd.f32 %v9189_v61, %v17161_v31  ;;  %v11571_v39 = vadd.f32 %v11570_v15, %v11569_v28  ;;  %v9220_v44 = vpop.f32.mrf.mxu0 }
 0x95f   : > { %v11572_v5 = vpop.f32.mrf.mxu1 }
 0x960   : > { %v9304_v20 = vadd.f32 %v17200_v40, %v9265_v58  ;;  %v9194_v27 = vadd.f32 %v12197_v24, %v11571_v39 }
 0x961   : > { %v11573_v11 = vpop.f32.mrf.mxu1 }
 0x962   : > { %9336 = vst [vmem:[%s17206_s26 + $0x88] sm:$0xff] %v9304_v20  ;;  %v9266_v23 = vadd.f32 %v9194_v27, %v17154_v37  ;;  %v11574_v6 = vadd.f32 %v11573_v11, %v11572_v5 }
 0x963   : > { %v11575_v36 = vpop.f32.mrf.mxu1 }
 0x964   : > { %v9305_v48 = vadd.f32 %v17200_v40, %v9266_v23  ;;  %v9197_v30 = vadd.f32 %v12198_v52, %v11574_v6 }
 0x965   : > { %v11576_v53 = vpop.f32.mrf.mxu1 }
 0x966   : > { %9337 = vst [vmem:[%s17206_s26 + $0x90] sm:$0xff] %v9305_v48  ;;  %v9267_v31 = vadd.f32 %v9197_v30, %v17159_v32  ;;  %v11577_v14 = vadd.f32 %v11576_v53, %v11575_v36 }
 0x967   : > { %v11578_v60 = vpop.f32.mrf.mxu1 }
 0x968   : > { %v9306_v41 = vadd.f32 %v17200_v40, %v9267_v31  ;;  %v9202_v22 = vadd.f32 %v11577_v14, %v9201_v43 }
 0x969   : > { %v11579_v38 = vpop.f32.mrf.mxu1 }
 0x96a   : > { %9338 = vst [vmem:[%s17206_s26 + $0x98] sm:$0xff] %v9306_v41  ;;  %v9268_v37 = vadd.f32 %v9202_v22, %v17166_v25  ;;  %v11580_v35 = vadd.f32 %v11579_v38, %v11578_v60 }
 0x96b   : > { %v11581_v24 = vpop.f32.mrf.mxu1 }
 0x96c   : > { %v9307_v63 = vadd.f32 %v17200_v40, %v9268_v37  ;;  %v9205_v3 = vadd.f32 %v11580_v35, %v9204_v0 }
 0x96d   : > { %v11582_v7 = vpop.f32.mrf.mxu1 }
 0x96e   : > { %9339 = vst [vmem:[%s17206_s26 + $0xa0] sm:$0xff] %v9307_v63  ;;  %v9269_v32 = vadd.f32 %v9205_v3, %v17171_v46  ;;  %v11583_v47 = vadd.f32 %v11582_v7, %v11581_v24 }
 0x96f   : > { %v11584_v59 = vpop.f32.mrf.mxu1 }
 0x970   : > { %v9308_v50 = vadd.f32 %v17200_v40, %v9269_v32  ;;  %v9210_v42 = vadd.f32 %v12201_v13, %v11583_v47 }
 0x971   : > { %v11585_v34 = vpop.f32.mrf.mxu1 }
 0x972   : > { %9340 = vst [vmem:[%s17206_s26 + $0xa8] sm:$0xff] %v9308_v50  ;;  %v9270_v25 = vadd.f32 %v9210_v42, %v17164_v55  ;;  %v11586_v17 = vadd.f32 %v11585_v34, %v11584_v59 }
 0x973   : > { %v11587_v29 = vpop.f32.mrf.mxu1 }
 0x974   : > { %v9309_v2 = vadd.f32 %v17200_v40, %v9270_v25  ;;  %v9213_v52 = vadd.f32 %v12202_v18, %v11586_v17 }
 0x975   : > { %v11588_v33 = vpop.f32.mrf.mxu1 }
 0x976   : > { %9341 = vst [vmem:[%s17206_s26 + $0xb0] sm:$0xff] %v9309_v2  ;;  %v9271_v46 = vadd.f32 %v9213_v52, %v17169_v49  ;;  %v11589_v21 = vadd.f32 %v11588_v33, %v11587_v29  ;;  %v12209_v49 = vpop.f32.mrf.mxu0 }
 0x977   : > { %v11590_v4 = vpop.f32.mrf.mxu1 }
 0x978   : > { %v9310_v8 = vadd.f32 %v17200_v40, %v9271_v46  ;;  %v9218_v10 = vadd.f32 %v11589_v21, %v9217_v1 }
 0x979   : > { %v11591_v26 = vpop.f32.mrf.mxu1 }
 0x97a   : > { %9342 = vst [vmem:[%s17206_s26 + $0xb8] sm:$0xff] %v9310_v8  ;;  %v9272_v55 = vadd.f32 %v9218_v10, %v17175_v62  ;;  %v11592_v28 = vadd.f32 %v11591_v26, %v11590_v4  ;;  %v9233_v62 = vpop.f32.mrf.mxu0 }
 0x97b   : > { %v11593_v61 = vpop.f32.mrf.mxu1 }
 0x97c   : > { %v9311_v15 = vadd.f32 %v17200_v40, %v9272_v55  ;;  %v9221_v58 = vadd.f32 %v11592_v28, %v9220_v44  ;;  %v12210_v31 = vpop.f32.mrf.mxu0 }
 0x97d   : > { %v11594_v39 = vpop.f32.mrf.mxu1 }
 0x97e   : > { %9343 = vst [vmem:[%s17206_s26 + $0xc0] sm:$0xff] %v9311_v15  ;;  %v9273_v13 = vadd.f32 %v9221_v58, %v17180_v12  ;;  %v11595_v5 = vadd.f32 %v11594_v39, %v11593_v61  ;;  %v9236_v38 = vpop.f32.mrf.mxu0 }
 0x97f   : > { %v11596_v20 = vpop.f32.mrf.mxu1 }
 0x980   : > { %v9312_v27 = vadd.f32 %v17200_v40, %v9273_v13  ;;  %v9226_v11 = vadd.f32 %v12205_v57, %v11595_v5 }
 0x981   : > { %v11597_v23 = vpop.f32.mrf.mxu1 }
 0x982   : > { %9344 = vst [vmem:[%s17206_s26 + $0xc8] sm:$0xff] %v9312_v27  ;;  %v9274_v6 = vadd.f32 %v9226_v11, %v17177_v9  ;;  %v11598_v43 = vadd.f32 %v11597_v23, %v11596_v20 }
 0x983   : > { %v11599_v36 = vpop.f32.mrf.mxu1 }
 0x984   : > { %v9313_v48 = vadd.f32 %v17200_v40, %v9274_v6  ;;  %v9229_v30 = vadd.f32 %v12206_v51, %v11598_v43 }
 0x985   : > { %v11600_v53 = vpop.f32.mrf.mxu1 }
 0x986   : > { %9345 = vst [vmem:[%s17206_s26 + $0xd0] sm:$0xff] %v9313_v48  ;;  %v9275_v12 = vadd.f32 %v9229_v30, %v17182_v54  ;;  %v11601_v14 = vadd.f32 %v11600_v53, %v11599_v36 }
 0x987   : > { %v11602_v18 = vpop.f32.mrf.mxu1 }
 0x988   : > { %v9314_v60 = vadd.f32 %v17200_v40, %v9275_v12  ;;  %v9234_v41 = vadd.f32 %v11601_v14, %v9233_v62 }
 0x989   : > { %v11603_v22 = vpop.f32.mrf.mxu1 }
 0x98a   : > { %9346 = vst [vmem:[%s17206_s26 + $0xd8] sm:$0xff] %v9314_v60  ;;  %v9276_v9 = vadd.f32 %v9234_v41, %v17185_v45  ;;  %v11604_v37 = vadd.f32 %v11603_v22, %v11602_v18 }
 0x98b   : > { %v11605_v35 = vpop.f32.mrf.mxu1 }
 0x98c   : > { %v9315_v0 = vadd.f32 %v17200_v40, %v9276_v9  ;;  %v9237_v24 = vadd.f32 %v11604_v37, %v9236_v38 }
 0x98d   : > { %v11606_v63 = vpop.f32.mrf.mxu1 }
 0x98e   : > { %9347 = vst [vmem:[%s17206_s26 + $0xe0] sm:$0xff] %v9315_v0  ;;  %v9277_v54 = vadd.f32 %v9237_v24, %v17188_v19  ;;  %v11607_v3 = vadd.f32 %v11606_v63, %v11605_v35 }
 0x98f   : > { %v11608_v7 = vpop.f32.mrf.mxu1 }
 0x990   : > { %v9316_v32 = vadd.f32 %v17200_v40, %v9277_v54  ;;  %v9242_v47 = vadd.f32 %v12209_v49, %v11607_v3 }
 0x991   : > { %v11609_v57 = vpop.f32.mrf.mxu1 }
 0x992   : > { %9348 = vst [vmem:[%s17206_s26 + $0xe8] sm:$0xff] %v9316_v32  ;;  %v9278_v45 = vadd.f32 %v9242_v47, %v17191_v16  ;;  %v11610_v59 = vadd.f32 %v11609_v57, %v11608_v7 }
 0x994   : > { %v9317_v50 = vadd.f32 %v17200_v40, %v9278_v45  ;;  %v9245_v42 = vadd.f32 %v12210_v31, %v11610_v59 }
 0x996   : > { %9349 = vst [vmem:[%s17206_s26 + $0xf0] sm:$0xff] %v9317_v50  ;;  %v9279_v34 = vadd.f32 %v9245_v42, %v17194_v56 }
 0x998   : > { %v9318_v25 = vadd.f32 %v17200_v40, %v9279_v34 }
 0x99a   : > { %9350 = vst [vmem:[%s17206_s26 + $0xf8] sm:$0xff] %v9318_v25 }
 0x99b PF: > { %s26_s17 = sadd.s32 1, %s12879_s17  }
 0x99c   : > { %p23_p2 = scmp.ge.s32.totalorder %s26_s17, 4  }
 0x99e   :  { %25 = sbr.rel (!%p23_p2) target bundleno = 5 (0x5), region = 137 }
 0x9a3   :  { %9372 = vsyncpa [#allocation3], 1 }
 0x9a4   :  { %9374 = vsyncpa [#allocation3 + $0x1], 1 }
 0x9a5   :  { %9375 = vsyncpa [#allocation5], 1 }
 0x9a6   :  { %9376 = vsyncpa [#allocation8], 1 }
 0x9a7   :  { %9377 = vsyncpa [#allocation11], 1 }
 0x9a8   :  { %9378 = vsyncpa [#allocation14], 1 }

</bundles_post_ra>
